<compile_context>
chip_gen: v7x
topology: tpu7x:2x2x1
jax: 0.10.0
libtpu: 0.0.40
codegen_flags: <defaults>
</compile_context>

<pallas_src>
import functools

import jax
import jax.numpy as jnp
from jax.experimental import pallas as pl
from jax.experimental.pallas import tpu as pltpu


def _pad8(n):
    return ((n + 7) // 8) * 8


# ----------------------------------------------------------------------------
# Fused DEETSA post-encoder kernel
# ----------------------------------------------------------------------------
def _fused_deetsa_kernel(
        # packed activations
        text_acts_ref, img_acts_ref,
        # packed MHA params: sim + text attentions (text_dim), image attention
        t_wqkv, t_bqkv, t_wo, t_bo,
        i_wqkv, i_bqkv, i_wo, i_bo,
        # packed gate / classifier weights and biases
        w_tt, w_th, w_hh, w_ii, w_ih, w_hc, w_co,
        b_t, b_h, b_i, b_c, b_o,
        # output (lane-dense, padded num_classes)
        out_ref,
        *, num_heads, lq, lk, nc, ni, off_i2t, off_caps, off_imgs,
        batch_per_step):
    f32 = jnp.float32

    def mm(x, w):
        return jnp.dot(x, w, preferred_element_type=f32)

    def sig(x):
        # exact sigmoid via tanh (EUP slot), numerically stable
        return 0.5 * (jnp.tanh(0.5 * x) + 1.0)

    def mha_pooled(xq, xkv, wqkv, bqkv, wo, bo, a, e, hd):
        """Mean over query rows of MHA(xq, xkv, xkv) -> (1, e).

        Per-head weights are pre-reshaped ((e, hd)/(hd, e)) so there is no
        lane-axis slicing and no head concat; the softmax-prob mean over the
        query axis is taken before P@V and the output projection (linear in
        the query axis, so it commutes exactly)."""
        scale = 1.0 / float(hd) ** 0.5
        acc = jnp.zeros((1, e), f32)
        for h in range(num_heads):                       # static unrolled heads
            iq = (a * 3 + 0) * num_heads + h
            ik = (a * 3 + 1) * num_heads + h
            iv = (a * 3 + 2) * num_heads + h
            qh = (mm(xq, wqkv[iq]) + bqkv[iq]) * scale   # (Lq, hd)
            kh = mm(xkv, wqkv[ik]) + bqkv[ik]            # (Lk, hd)
            vh = mm(xkv, wqkv[iv]) + bqkv[iv]            # (Lk, hd)
            s = jax.lax.dot_general(qh, kh, (((1,), (1,)), ((), ())),
                                    preferred_element_type=f32)   # (Lq, Lk)
            s = s - jnp.max(s, axis=-1, keepdims=True)
            es = jnp.exp(s)
            p = es / jnp.sum(es, axis=-1, keepdims=True)           # exact
            p_mean = jnp.mean(p, axis=0, keepdims=True)            # (1, Lk)
            head = mm(p_mean, vh)                                  # (1, hd)
            acc = acc + mm(head, wo[a * num_heads + h])            # (1, e)
        return acc + bo[a]

    for bi in range(batch_per_step):                     # static unrolled batch
        t_act = text_acts_ref[bi]        # (rows_t, TEXT_DIM)
        i_act = img_acts_ref[bi]         # (rows_i, IMG_DIM)
        td = t_act.shape[-1]
        idim = i_act.shape[-1]
        hd_t = td // num_heads
        hd_i = idim // num_heads

        x_qcap = t_act[0:lq]                         # (LQ, TD)
        x_i2t = t_act[off_i2t:off_i2t + lk]          # (LK, TD)
        x_caps = t_act[off_caps:off_caps + nc]       # (NC, TD)
        qcap_feat = x_qcap[0:1]                      # [CLS] token, (1, TD)
        x_qimg = i_act[0:1]                          # (1, ID)
        x_imgs = i_act[off_imgs:off_imgs + ni]       # (NI, ID)

        # attention_sim (mean over query tokens folded in) / text / image
        sim_ti = mha_pooled(x_qcap, x_i2t, t_wqkv, t_bqkv, t_wo, t_bo,
                            0, td, hd_t)                           # (1, TD)
        caps_att = mha_pooled(qcap_feat, x_caps, t_wqkv, t_bqkv, t_wo, t_bo,
                              1, td, hd_t)                         # (1, TD)
        imgs_att = mha_pooled(x_qimg, x_imgs, i_wqkv, i_bqkv, i_wo, i_bo,
                              0, idim, hd_i)                       # (1, ID)

        # gated fusion head: concat-gates expressed as split matmuls
        c_w = sig(mm(qcap_feat, w_tt[0]) + mm(caps_att, w_tt[1]) + b_t[...])
        c_f = c_w * qcap_feat + (1.0 - c_w) * caps_att

        i_w = sig(mm(x_qimg, w_ii[0]) + mm(imgs_att, w_ii[1]) + b_i[...])
        i_f = i_w * x_qimg + (1.0 - i_w) * imgs_att

        cc = mm(c_f, w_th[0]) + b_h[0]                 # cc_liner
        ii = mm(i_f, w_ih[...]) + b_h[1]               # ii_liner
        ci_w = sig(mm(cc, w_hh[0]) + mm(ii, w_hh[1]) + b_h[2])
        ci = ci_w * cc + (1.0 - ci_w) * ii

        sim_f = mm(sim_ti, w_th[1]) + b_h[3]           # sim_liner
        cis_w = sig(mm(ci, w_hh[2]) + mm(sim_f, w_hh[3]) + b_h[4])
        # NOTE: reference uses `1 * ci_feature` (not cis_w * ci) — reproduce it.
        feat = ci + (1.0 - cis_w) * sim_f

        # classifier MLP (dropout = identity at eval)
        h = mm(feat, w_hc[...]) + b_c[...]
        h = jnp.where(h > 0, h, 0.01 * h)              # LeakyReLU(0.01)
        out_ref[bi] = (mm(h, w_co[...]) + b_o[...]).astype(out_ref.dtype)


# ----------------------------------------------------------------------------
# Wrapper: parameter packing + one pallas_call for the whole forward
# ----------------------------------------------------------------------------
def _pack_mha(param_sets, num_heads):
    """Pack same-embed-dim MHA param sets into flat, per-head-indexed slabs."""
    wqkv, bqkv, wo_l, bo_l = [], [], [], []
    for (wq, wk, wv, wo, bq, bk, bv, bo) in param_sets:
        e = wq.shape[0]
        hd = e // num_heads
        for w, b in ((wq, bq), (wk, bk), (wv, bv)):
            for h in range(num_heads):
                wqkv.append(w[:, h * hd:(h + 1) * hd])     # (E, hd)
                bqkv.append(b[:, h * hd:(h + 1) * hd])     # (1, hd)
        for h in range(num_heads):
            wo_l.append(wo[h * hd:(h + 1) * hd, :])        # (hd, E)
        bo_l.append(bo)                                    # (1, E)
    return (jnp.stack(wqkv), jnp.stack(bqkv), jnp.stack(wo_l), jnp.stack(bo_l))


# TODO(synk): BERT text encoder and ResNet101 image encoder are external
# pretrained models; their outputs are taken as kernel inputs here.
def deetsa_forward(qcap_hidden, img2text_hidden, caps_feats, qimg_feat,
                   imgs_feats, p_sim, p_text, p_img, gp, num_heads,
                   num_classes, batch_per_step=None):
    B, LQ, TD = qcap_hidden.shape
    LK = img2text_hidden.shape[1]
    NC = caps_feats.shape[1]
    ID = qimg_feat.shape[-1]
    NI = imgs_feats.shape[1]

    # Batch strategy: one element per grid step ("parallel") on multi-TC chips
    # (v7x, 2 TensorCores) so the batch is split across cores; fold the whole
    # batch into one grid step on single-TC chips (v5e/v6e) to avoid a serial
    # 2-step pipeline for <1 MiB of data.
    if batch_per_step is None:
        kind = ""
        try:
            kind = (getattr(jax.devices()[0], "device_kind", "") or "").lower()
        except Exception:
            pass
        multi_tc = ("v7" in kind) or ("7x" in kind)
        batch_per_step = 1 if (multi_tc and B > 1) else B
    if B % batch_per_step != 0:
        batch_per_step = 1
    grid_b = B // batch_per_step

    # --- packed activations: one text-dim slab, one image-dim slab
    #     (segments start at sublane-tile-aligned offsets)
    lq_p, lk_p = _pad8(LQ), _pad8(LK)
    off_i2t, off_caps = lq_p, lq_p + lk_p
    text_acts = jnp.concatenate(
        [jnp.pad(qcap_hidden, ((0, 0), (0, lq_p - LQ), (0, 0))),
         jnp.pad(img2text_hidden, ((0, 0), (0, lk_p - LK), (0, 0))),
         caps_feats], axis=1)                              # (B, rows_t, TD)
    off_imgs = 8
    img_acts = jnp.concatenate(
        [jnp.pad(qimg_feat.reshape(B, 1, ID), ((0, 0), (0, off_imgs - 1), (0, 0))),
         imgs_feats], axis=1)                              # (B, rows_i, ID)

    # --- packed MHA weights (per-head slabs; sim + text share text_dim)
    t_wqkv, t_bqkv, t_wo, t_bo = _pack_mha([p_sim, p_text], num_heads)
    i_wqkv, i_bqkv, i_wo, i_bo = _pack_mha([p_img], num_heads)

    # --- packed gate / classifier weights (concat-gates split into halves)
    (wc, bc, wi, bi, wcc, bcc, wii, bii, wci, bci,
     wsim, bsim, wcis, bcis, wf1, bf1, wf2, bf2) = gp
    HID = wcc.shape[1]
    CLS_HID = wf1.shape[1]
    ncls_pad = ((num_classes + 127) // 128) * 128
    w_tt = jnp.stack([wc[:TD], wc[TD:]])                   # (2, TD, TD)
    w_th = jnp.stack([wcc, wsim])                          # (2, TD, HID)
    w_hh = jnp.stack([wci[:HID], wci[HID:], wcis[:HID], wcis[HID:]])
    w_ii = jnp.stack([wi[:ID], wi[ID:]])                   # (2, ID, ID)
    w_ih = wii                                             # (ID, HID)
    w_hc = wf1                                             # (HID, CLS_HID)
    w_co = jnp.pad(wf2, ((0, 0), (0, ncls_pad - num_classes)))
    b_t = bc                                               # (1, TD)
    b_h = jnp.stack([bcc, bii, bci, bsim, bcis])           # (5, 1, HID)
    b_i = bi                                               # (1, ID)
    b_c = bf1                                              # (1, CLS_HID)
    b_o = jnp.pad(bf2, ((0, 0), (0, ncls_pad - num_classes)))

    operands = (text_acts, img_acts,
                t_wqkv, t_bqkv, t_wo, t_bo,
                i_wqkv, i_bqkv, i_wo, i_bo,
                w_tt, w_th, w_hh, w_ii, w_ih, w_hc, w_co,
                b_t, b_h, b_i, b_c, b_o)

    def batch_spec(arr):
        nrest = arr.ndim - 1
        shp = (batch_per_step,) + arr.shape[1:]
        return pl.BlockSpec(shp, lambda g, nrest=nrest: (g,) + (0,) * nrest)

    def const_spec(arr):
        n = arr.ndim
        return pl.BlockSpec(arr.shape, lambda g, n=n: (0,) * n)

    in_specs = [batch_spec(text_acts), batch_spec(img_acts)]
    in_specs += [const_spec(a) for a in operands[2:]]

    kernel = functools.partial(
        _fused_deetsa_kernel, num_heads=num_heads,
        lq=LQ, lk=LK, nc=NC, ni=NI,
        off_i2t=off_i2t, off_caps=off_caps, off_imgs=off_imgs,
        batch_per_step=batch_per_step)

    # advisory cost estimate so XLA can overlap this tiny custom call with
    # surrounding (encoder) work when embedded in a full model
    macs = B * ((LQ + 2 * LK) * TD * TD + 2 * LQ * LK * TD + LQ * TD * TD
                + (1 + 2 * NC) * TD * TD + 2 * NC * TD + TD * TD
                + (1 + 2 * NI) * ID * ID + 2 * NI * ID + ID * ID
                + 2 * TD * TD + 2 * ID * ID + TD * HID + ID * HID
                + 4 * HID * HID + TD * HID + HID * CLS_HID
                + CLS_HID * num_classes)
    bytes_accessed = sum(int(a.size) * a.dtype.itemsize for a in operands)
    bytes_accessed += B * ncls_pad * 4
    cost = pl.CostEstimate(
        flops=2 * int(macs),
        transcendentals=int(B * (num_heads * (LQ * LK + NC + NI)
                                 + 4 * HID + TD + ID)),
        bytes_accessed=int(bytes_accessed))

    out = pl.pallas_call(
        kernel,
        out_shape=jax.ShapeDtypeStruct((B, 1, ncls_pad), jnp.float32),
        grid=(grid_b,),
        in_specs=in_specs,
        out_specs=pl.BlockSpec((batch_per_step, 1, ncls_pad),
                               lambda g: (g, 0, 0)),
        compiler_params=pltpu.CompilerParams(
            dimension_semantics=("parallel",)),            # v7x: batch on 2 TCs
        cost_estimate=cost,
    )(*operands)
    return out[:, 0, :num_classes]


# ----------------------------------------------------------------------------
# Parameter construction (deterministic, synthetic; distinct keys everywhere)
# ----------------------------------------------------------------------------
def _dense(key, d_in, d_out, scale=0.05):
    kw, kb = jax.random.split(key)
    w = jax.random.normal(kw, (d_in, d_out), jnp.float32) * scale   # (in, out)
    b = jax.random.normal(kb, (1, d_out), jnp.float32) * scale
    return w, b


def mha_params(key, e, scale=0.05):
    ks = jax.random.split(key, 8)
    wq = jax.random.normal(ks[0], (e, e), jnp.float32) * scale
    wk = jax.random.normal(ks[1], (e, e), jnp.float32) * scale
    wv = jax.random.normal(ks[2], (e, e), jnp.float32) * scale
    wo = jax.random.normal(ks[3], (e, e), jnp.float32) * scale
    bq = jax.random.normal(ks[4], (1, e), jnp.float32) * scale
    bk = jax.random.normal(ks[5], (1, e), jnp.float32) * scale
    bv = jax.random.normal(ks[6], (1, e), jnp.float32) * scale
    bo = jax.random.normal(ks[7], (1, e), jnp.float32) * scale
    return (wq, wk, wv, wo, bq, bk, bv, bo)


def gate_params(key, text_dim, img_dim, hid, cls_hid, ncls):
    ks = jax.random.split(key, 9)
    wc, bc = _dense(ks[0], 2 * text_dim, text_dim)      # c_liner
    wi, bi = _dense(ks[1], 2 * img_dim, img_dim)        # i_liner
    wcc, bcc = _dense(ks[2], text_dim, hid)             # cc_liner
    wii, bii = _dense(ks[3], img_dim, hid)              # ii_liner
    wci, bci = _dense(ks[4], 2 * hid, hid)              # w_ci_liner
    wsim, bsim = _dense(ks[5], text_dim, hid)           # sim_liner
    wcis, bcis = _dense(ks[6], 2 * hid, hid)            # w_cis_liner
    wf1, bf1 = _dense(ks[7], hid, cls_hid)              # classifier[0]
    wf2, bf2 = _dense(ks[8], cls_hid, ncls)             # classifier[3]
    return (wc, bc, wi, bi, wcc, bcc, wii, bii, wci, bci,
            wsim, bsim, wcis, bcis, wf1, bf1, wf2, bf2)


# ----------------------------------------------------------------------------
# Pure-JAX reference (for numerical validation)
# ----------------------------------------------------------------------------
def _mha_ref(q, k, v, params, num_heads):
    wq, wk, wv, wo, bq, bk, bv, bo = params
    B, Lq, E = q.shape
    Lk = k.shape[1]
    hd = E // num_heads
    qq = (q @ wq + bq).reshape(B, Lq, num_heads, hd).transpose(0, 2, 1, 3)
    kk = (k @ wk + bk).reshape(B, Lk, num_heads, hd).transpose(0, 2, 1, 3)
    vv = (v @ wv + bv).reshape(B, Lk, num_heads, hd).transpose(0, 2, 1, 3)
    s = jnp.einsum('bhqd,bhkd->bhqk', qq, kk) / jnp.sqrt(float(hd))
    p = jax.nn.softmax(s, axis=-1)
    o = jnp.einsum('bhqk,bhkd->bhqd', p, vv)
    o = o.transpose(0, 2, 1, 3).reshape(B, Lq, E)
    return o @ wo + bo


def _forward_ref(qcap_hidden, img2text_hidden, caps_feats, qimg_feat,
                 imgs_feats, p_sim, p_text, p_img, gp, num_heads):
    (wc, bc, wi, bi, wcc, bcc, wii, bii, wci, bci,
     wsim, bsim, wcis, bcis, wf1, bf1, wf2, bf2) = gp
    qcap = qcap_hidden[:, 0, :]
    sim_ti = jnp.mean(_mha_ref(qcap_hidden, img2text_hidden, img2text_hidden,
                               p_sim, num_heads), axis=1)
    caps = _mha_ref(qcap[:, None, :], caps_feats, caps_feats,
                    p_text, num_heads)[:, 0, :]
    imgs = _mha_ref(qimg_feat[:, None, :], imgs_feats, imgs_feats,
                    p_img, num_heads)[:, 0, :]
    sig = jax.nn.sigmoid
    c_w = sig(jnp.concatenate([qcap, caps], -1) @ wc + bc)
    c_f = c_w * qcap + (1 - c_w) * caps
    i_w = sig(jnp.concatenate([qimg_feat, imgs], -1) @ wi + bi)
    i_f = i_w * qimg_feat + (1 - i_w) * imgs
    cc = c_f @ wcc + bcc
    ii = i_f @ wii + bii
    ci_w = sig(jnp.concatenate([cc, ii], -1) @ wci + bci)
    ci = ci_w * cc + (1 - ci_w) * ii
    sim_f = sim_ti @ wsim + bsim
    cis_w = sig(jnp.concatenate([ci, sim_f], -1) @ wcis + bcis)
    feat = ci + (1 - cis_w) * sim_f
    h = feat @ wf1 + bf1
    h = jnp.where(h > 0, h, 0.01 * h)
    return h @ wf2 + bf2


# ----------------------------------------------------------------------------
if __name__ == "__main__":
    B = 2
    LQ, LK = 8, 8            # token lengths of qCap / img_to_text BERT outputs
    N_CAPS, N_IMGS = 4, 4    # max_captions_num, max_images_num
    TEXT_DIM, IMG_DIM = 32, 64
    HID, CLS_HID, NCLS = 32, 64, 3
    HEADS = 4

    key = jax.random.PRNGKey(0)
    ks = jax.random.split(key, 10)

    # Surrogate encoder outputs (stand-ins for BERT / ResNet101 features).
    qcap_hidden = jax.random.normal(ks[0], (B, LQ, TEXT_DIM), jnp.float32)
    img2text_hidden = jax.random.normal(ks[1], (B, LK, TEXT_DIM), jnp.float32)
    caps_feats = jax.random.normal(ks[2], (B, N_CAPS, TEXT_DIM), jnp.float32)
    qimg_feat = jax.random.normal(ks[3], (B, IMG_DIM), jnp.float32)
    imgs_feats = jax.random.normal(ks[4], (B, N_IMGS, IMG_DIM), jnp.float32)

    p_sim = mha_params(ks[5], TEXT_DIM)
    p_text = mha_params(ks[6], TEXT_DIM)
    p_img = mha_params(ks[7], IMG_DIM)
    gp = gate_params(ks[8], TEXT_DIM, IMG_DIM, HID, CLS_HID, NCLS)

    logits = deetsa_forward(qcap_hidden, img2text_hidden, caps_feats,
                            qimg_feat, imgs_feats, p_sim, p_text, p_img, gp,
                            HEADS, NCLS)
    logits = jax.block_until_ready(logits)

    ref = _forward_ref(qcap_hidden, img2text_hidden, caps_feats, qimg_feat,
                       imgs_feats, p_sim, p_text, p_img, gp, HEADS)

    assert logits.shape == (B, NCLS), logits.shape
    assert jnp.allclose(logits, ref, rtol=2e-3, atol=2e-3), (logits, ref)
    print("KERNEL_OK")
</pallas_src>

<mosaic_0001>
module attributes {stable_mosaic.version = 11 : i64} {
  func.func @_fused_deetsa_kernel(%arg0: i32, %arg1: memref<2x20x32xf32, #tpu.memory_space<vmem>>, %arg2: memref<2x12x64xf32, #tpu.memory_space<vmem>>, %arg3: memref<24x32x8xf32, #tpu.memory_space<vmem>>, %arg4: memref<24x1x8xf32, #tpu.memory_space<vmem>>, %arg5: memref<8x8x32xf32, #tpu.memory_space<vmem>>, %arg6: memref<2x1x32xf32, #tpu.memory_space<vmem>>, %arg7: memref<12x64x16xf32, #tpu.memory_space<vmem>>, %arg8: memref<12x1x16xf32, #tpu.memory_space<vmem>>, %arg9: memref<4x16x64xf32, #tpu.memory_space<vmem>>, %arg10: memref<1x1x64xf32, #tpu.memory_space<vmem>>, %arg11: memref<2x32x32xf32, #tpu.memory_space<vmem>>, %arg12: memref<2x32x32xf32, #tpu.memory_space<vmem>>, %arg13: memref<4x32x32xf32, #tpu.memory_space<vmem>>, %arg14: memref<2x64x64xf32, #tpu.memory_space<vmem>>, %arg15: memref<64x32xf32, #tpu.memory_space<vmem>>, %arg16: memref<32x64xf32, #tpu.memory_space<vmem>>, %arg17: memref<64x128xf32, #tpu.memory_space<vmem>>, %arg18: memref<1x32xf32, #tpu.memory_space<vmem>>, %arg19: memref<5x1x32xf32, #tpu.memory_space<vmem>>, %arg20: memref<1x64xf32, #tpu.memory_space<vmem>>, %arg21: memref<1x64xf32, #tpu.memory_space<vmem>>, %arg22: memref<1x128xf32, #tpu.memory_space<vmem>>, %arg23: memref<2x1x128xf32, #tpu.memory_space<vmem>>) attributes {dimension_semantics = [#tpu.dimension_semantics<parallel>], iteration_bounds = array<i64: 1>, scalar_prefetch = 0 : i64, scratch_operands = 0 : i64, tpu.core_type = #tpu.core_type<tc>, window_params = [{transform_indices = @transform_0, window_bounds = array<i64: 2, 20, 32>}, {transform_indices = @transform_1, window_bounds = array<i64: 2, 12, 64>}, {pipeline_mode = #tpu.pipeline_mode<synchronous>, transform_indices = @transform_2, window_bounds = array<i64: 24, 32, 8>}, {pipeline_mode = #tpu.pipeline_mode<synchronous>, transform_indices = @transform_3, window_bounds = array<i64: 24, 1, 8>}, {pipeline_mode = #tpu.pipeline_mode<synchronous>, transform_indices = @transform_4, window_bounds = array<i64: 8, 8, 32>}, {pipeline_mode = #tpu.pipeline_mode<synchronous>, transform_indices = @transform_5, window_bounds = array<i64: 2, 1, 32>}, {pipeline_mode = #tpu.pipeline_mode<synchronous>, transform_indices = @transform_6, window_bounds = array<i64: 12, 64, 16>}, {pipeline_mode = #tpu.pipeline_mode<synchronous>, transform_indices = @transform_7, window_bounds = array<i64: 12, 1, 16>}, {pipeline_mode = #tpu.pipeline_mode<synchronous>, transform_indices = @transform_8, window_bounds = array<i64: 4, 16, 64>}, {pipeline_mode = #tpu.pipeline_mode<synchronous>, transform_indices = @transform_9, window_bounds = array<i64: 1, 1, 64>}, {pipeline_mode = #tpu.pipeline_mode<synchronous>, transform_indices = @transform_10, window_bounds = array<i64: 2, 32, 32>}, {pipeline_mode = #tpu.pipeline_mode<synchronous>, transform_indices = @transform_11, window_bounds = array<i64: 2, 32, 32>}, {pipeline_mode = #tpu.pipeline_mode<synchronous>, transform_indices = @transform_12, window_bounds = array<i64: 4, 32, 32>}, {pipeline_mode = #tpu.pipeline_mode<synchronous>, transform_indices = @transform_13, window_bounds = array<i64: 2, 64, 64>}, {pipeline_mode = #tpu.pipeline_mode<synchronous>, transform_indices = @transform_14, window_bounds = array<i64: 64, 32>}, {pipeline_mode = #tpu.pipeline_mode<synchronous>, transform_indices = @transform_15, window_bounds = array<i64: 32, 64>}, {pipeline_mode = #tpu.pipeline_mode<synchronous>, transform_indices = @transform_16, window_bounds = array<i64: 64, 128>}, {pipeline_mode = #tpu.pipeline_mode<synchronous>, transform_indices = @transform_17, window_bounds = array<i64: 1, 32>}, {pipeline_mode = #tpu.pipeline_mode<synchronous>, transform_indices = @transform_18, window_bounds = array<i64: 5, 1, 32>}, {pipeline_mode = #tpu.pipeline_mode<synchronous>, transform_indices = @transform_19, window_bounds = array<i64: 1, 64>}, {pipeline_mode = #tpu.pipeline_mode<synchronous>, transform_indices = @transform_20, window_bounds = array<i64: 1, 64>}, {pipeline_mode = #tpu.pipeline_mode<synchronous>, transform_indices = @transform_21, window_bounds = array<i64: 1, 128>}, {transform_indices = @transform_22, window_bounds = array<i64: 2, 1, 128>}]} {
    %c0 = arith.constant 0 : index
    %c0_0 = arith.constant 0 : index
    %c0_1 = arith.constant 0 : index
    %0 = vector.load %arg1[%c0, %c0_0, %c0_1] : memref<2x20x32xf32, #tpu.memory_space<vmem>>, vector<1x20x32xf32>
    %1 = vector.shape_cast %0 : vector<1x20x32xf32> to vector<20x32xf32>
    %c0_2 = arith.constant 0 : index
    %c0_3 = arith.constant 0 : index
    %c0_4 = arith.constant 0 : index
    %2 = vector.load %arg2[%c0_2, %c0_3, %c0_4] : memref<2x12x64xf32, #tpu.memory_space<vmem>>, vector<1x12x64xf32>
    %3 = vector.shape_cast %2 : vector<1x12x64xf32> to vector<12x64xf32>
    %4 = vector.extract_strided_slice %1 {offsets = [0, 0], sizes = [8, 32], strides = [1, 1]} : vector<20x32xf32> to vector<8x32xf32>
    %5 = vector.extract_strided_slice %1 {offsets = [8, 0], sizes = [8, 32], strides = [1, 1]} : vector<20x32xf32> to vector<8x32xf32>
    %6 = vector.extract_strided_slice %1 {offsets = [16, 0], sizes = [4, 32], strides = [1, 1]} : vector<20x32xf32> to vector<4x32xf32>
    %7 = vector.extract_strided_slice %4 {offsets = [0, 0], sizes = [1, 32], strides = [1, 1]} : vector<8x32xf32> to vector<1x32xf32>
    %8 = vector.extract_strided_slice %3 {offsets = [0, 0], sizes = [1, 64], strides = [1, 1]} : vector<12x64xf32> to vector<1x64xf32>
    %9 = vector.extract_strided_slice %3 {offsets = [8, 0], sizes = [4, 64], strides = [1, 1]} : vector<12x64xf32> to vector<4x64xf32>
    %cst = arith.constant 0.000000e+00 : f32
    %10 = vector.broadcast %cst : f32 to vector<1x32xf32>
    %c0_5 = arith.constant 0 : index
    %c0_6 = arith.constant 0 : index
    %c0_7 = arith.constant 0 : index
    %11 = vector.load %arg3[%c0_5, %c0_6, %c0_7] : memref<24x32x8xf32, #tpu.memory_space<vmem>>, vector<1x32x8xf32>
    %12 = vector.shape_cast %11 : vector<1x32x8xf32> to vector<32x8xf32>
    %cst_8 = arith.constant dense<0.000000e+00> : vector<8x8xf32>
    %13 = tpu.matmul %4, %12, %cst_8 {dimension_numbers = #tpu.dot_dimension_numbers<[1], [0], [0], [1], [0, 0, 1, 1], [], []>} : vector<8x32xf32>, vector<32x8xf32>, vector<8x8xf32> -> vector<8x8xf32>
    %c0_9 = arith.constant 0 : index
    %c0_10 = arith.constant 0 : index
    %c0_11 = arith.constant 0 : index
    %14 = vector.load %arg4[%c0_9, %c0_10, %c0_11] : memref<24x1x8xf32, #tpu.memory_space<vmem>>, vector<1x1x8xf32>
    %15 = vector.shape_cast %14 : vector<1x1x8xf32> to vector<1x8xf32>
    %16 = vector.broadcast %15 : vector<1x8xf32> to vector<8x8xf32>
    %17 = arith.addf %13, %16 : vector<8x8xf32>
    %cst_12 = arith.constant 0.353553385 : f32
    %18 = vector.broadcast %cst_12 : f32 to vector<8x8xf32>
    %19 = arith.mulf %17, %18 : vector<8x8xf32>
    %c4 = arith.constant 4 : index
    %c0_13 = arith.constant 0 : index
    %c0_14 = arith.constant 0 : index
    %20 = vector.load %arg3[%c4, %c0_13, %c0_14] : memref<24x32x8xf32, #tpu.memory_space<vmem>>, vector<1x32x8xf32>
    %21 = vector.shape_cast %20 : vector<1x32x8xf32> to vector<32x8xf32>
    %cst_15 = arith.constant dense<0.000000e+00> : vector<8x8xf32>
    %22 = tpu.matmul %5, %21, %cst_15 {dimension_numbers = #tpu.dot_dimension_numbers<[1], [0], [0], [1], [0, 0, 1, 1], [], []>} : vector<8x32xf32>, vector<32x8xf32>, vector<8x8xf32> -> vector<8x8xf32>
    %c4_16 = arith.constant 4 : index
    %c0_17 = arith.constant 0 : index
    %c0_18 = arith.constant 0 : index
    %23 = vector.load %arg4[%c4_16, %c0_17, %c0_18] : memref<24x1x8xf32, #tpu.memory_space<vmem>>, vector<1x1x8xf32>
    %24 = vector.shape_cast %23 : vector<1x1x8xf32> to vector<1x8xf32>
    %25 = vector.broadcast %24 : vector<1x8xf32> to vector<8x8xf32>
    %26 = arith.addf %22, %25 : vector<8x8xf32>
    %c8 = arith.constant 8 : index
    %c0_19 = arith.constant 0 : index
    %c0_20 = arith.constant 0 : index
    %27 = vector.load %arg3[%c8, %c0_19, %c0_20] : memref<24x32x8xf32, #tpu.memory_space<vmem>>, vector<1x32x8xf32>
    %28 = vector.shape_cast %27 : vector<1x32x8xf32> to vector<32x8xf32>
    %cst_21 = arith.constant dense<0.000000e+00> : vector<8x8xf32>
    %29 = tpu.matmul %5, %28, %cst_21 {dimension_numbers = #tpu.dot_dimension_numbers<[1], [0], [0], [1], [0, 0, 1, 1], [], []>} : vector<8x32xf32>, vector<32x8xf32>, vector<8x8xf32> -> vector<8x8xf32>
    %c8_22 = arith.constant 8 : index
    %c0_23 = arith.constant 0 : index
    %c0_24 = arith.constant 0 : index
    %30 = vector.load %arg4[%c8_22, %c0_23, %c0_24] : memref<24x1x8xf32, #tpu.memory_space<vmem>>, vector<1x1x8xf32>
    %31 = vector.shape_cast %30 : vector<1x1x8xf32> to vector<1x8xf32>
    %32 = vector.broadcast %31 : vector<1x8xf32> to vector<8x8xf32>
    %33 = arith.addf %29, %32 : vector<8x8xf32>
    %cst_25 = arith.constant dense<0.000000e+00> : vector<8x8xf32>
    %34 = tpu.matmul %19, %26, %cst_25 {dimension_numbers = #tpu.dot_dimension_numbers<[1], [1], [0], [0], [0, 0, 1, 0], [], []>} : vector<8x8xf32>, vector<8x8xf32>, vector<8x8xf32> -> vector<8x8xf32>
    %cst_26 = arith.constant dense<0xFF800000> : vector<8xf32>
    %35 = vector.multi_reduction <maximumf>, %34, %cst_26 [1] : vector<8x8xf32> to vector<8xf32>
    %36 = vector.shape_cast %35 : vector<8xf32> to vector<8x1xf32>
    %37 = vector.broadcast %36 : vector<8x1xf32> to vector<8x8xf32>
    %38 = arith.subf %34, %37 : vector<8x8xf32>
    %39 = math.exp %38 : vector<8x8xf32>
    %cst_27 = arith.constant dense<0.000000e+00> : vector<8xf32>
    %40 = vector.multi_reduction <add>, %39, %cst_27 [1] : vector<8x8xf32> to vector<8xf32>
    %41 = vector.shape_cast %40 : vector<8xf32> to vector<8x1xf32>
    %42 = vector.broadcast %41 : vector<8x1xf32> to vector<8x8xf32>
    %43 = arith.divf %39, %42 : vector<8x8xf32>
    %cst_28 = arith.constant dense<0.000000e+00> : vector<8xf32>
    %44 = vector.multi_reduction <add>, %43, %cst_28 [0] : vector<8x8xf32> to vector<8xf32>
    %45 = vector.shape_cast %44 : vector<8xf32> to vector<1x8xf32>
    %cst_29 = arith.constant 8.000000e+00 : f32
    %46 = vector.broadcast %cst_29 : f32 to vector<1x8xf32>
    %47 = arith.divf %45, %46 : vector<1x8xf32>
    %cst_30 = arith.constant dense<0.000000e+00> : vector<1x8xf32>
    %48 = tpu.matmul %47, %33, %cst_30 {dimension_numbers = #tpu.dot_dimension_numbers<[1], [0], [0], [1], [0, 0, 1, 1], [], []>} : vector<1x8xf32>, vector<8x8xf32>, vector<1x8xf32> -> vector<1x8xf32>
    %c0_31 = arith.constant 0 : index
    %c0_32 = arith.constant 0 : index
    %c0_33 = arith.constant 0 : index
    %49 = vector.load %arg5[%c0_31, %c0_32, %c0_33] : memref<8x8x32xf32, #tpu.memory_space<vmem>>, vector<1x8x32xf32>
    %50 = vector.shape_cast %49 : vector<1x8x32xf32> to vector<8x32xf32>
    %cst_34 = arith.constant dense<0.000000e+00> : vector<1x32xf32>
    %51 = tpu.matmul %48, %50, %cst_34 {dimension_numbers = #tpu.dot_dimension_numbers<[1], [0], [0], [1], [0, 0, 1, 1], [], []>} : vector<1x8xf32>, vector<8x32xf32>, vector<1x32xf32> -> vector<1x32xf32>
    %52 = arith.addf %10, %51 : vector<1x32xf32>
    %c1 = arith.constant 1 : index
    %c0_35 = arith.constant 0 : index
    %c0_36 = arith.constant 0 : index
    %53 = vector.load %arg3[%c1, %c0_35, %c0_36] : memref<24x32x8xf32, #tpu.memory_space<vmem>>, vector<1x32x8xf32>
    %54 = vector.shape_cast %53 : vector<1x32x8xf32> to vector<32x8xf32>
    %cst_37 = arith.constant dense<0.000000e+00> : vector<8x8xf32>
    %55 = tpu.matmul %4, %54, %cst_37 {dimension_numbers = #tpu.dot_dimension_numbers<[1], [0], [0], [1], [0, 0, 1, 1], [], []>} : vector<8x32xf32>, vector<32x8xf32>, vector<8x8xf32> -> vector<8x8xf32>
    %c1_38 = arith.constant 1 : index
    %c0_39 = arith.constant 0 : index
    %c0_40 = arith.constant 0 : index
    %56 = vector.load %arg4[%c1_38, %c0_39, %c0_40] : memref<24x1x8xf32, #tpu.memory_space<vmem>>, vector<1x1x8xf32>
    %57 = vector.shape_cast %56 : vector<1x1x8xf32> to vector<1x8xf32>
    %58 = vector.broadcast %57 : vector<1x8xf32> to vector<8x8xf32>
    %59 = arith.addf %55, %58 : vector<8x8xf32>
    %cst_41 = arith.constant 0.353553385 : f32
    %60 = vector.broadcast %cst_41 : f32 to vector<8x8xf32>
    %61 = arith.mulf %59, %60 : vector<8x8xf32>
    %c5 = arith.constant 5 : index
    %c0_42 = arith.constant 0 : index
    %c0_43 = arith.constant 0 : index
    %62 = vector.load %arg3[%c5, %c0_42, %c0_43] : memref<24x32x8xf32, #tpu.memory_space<vmem>>, vector<1x32x8xf32>
    %63 = vector.shape_cast %62 : vector<1x32x8xf32> to vector<32x8xf32>
    %cst_44 = arith.constant dense<0.000000e+00> : vector<8x8xf32>
    %64 = tpu.matmul %5, %63, %cst_44 {dimension_numbers = #tpu.dot_dimension_numbers<[1], [0], [0], [1], [0, 0, 1, 1], [], []>} : vector<8x32xf32>, vector<32x8xf32>, vector<8x8xf32> -> vector<8x8xf32>
    %c5_45 = arith.constant 5 : index
    %c0_46 = arith.constant 0 : index
    %c0_47 = arith.constant 0 : index
    %65 = vector.load %arg4[%c5_45, %c0_46, %c0_47] : memref<24x1x8xf32, #tpu.memory_space<vmem>>, vector<1x1x8xf32>
    %66 = vector.shape_cast %65 : vector<1x1x8xf32> to vector<1x8xf32>
    %67 = vector.broadcast %66 : vector<1x8xf32> to vector<8x8xf32>
    %68 = arith.addf %64, %67 : vector<8x8xf32>
    %c9 = arith.constant 9 : index
    %c0_48 = arith.constant 0 : index
    %c0_49 = arith.constant 0 : index
    %69 = vector.load %arg3[%c9, %c0_48, %c0_49] : memref<24x32x8xf32, #tpu.memory_space<vmem>>, vector<1x32x8xf32>
    %70 = vector.shape_cast %69 : vector<1x32x8xf32> to vector<32x8xf32>
    %cst_50 = arith.constant dense<0.000000e+00> : vector<8x8xf32>
    %71 = tpu.matmul %5, %70, %cst_50 {dimension_numbers = #tpu.dot_dimension_numbers<[1], [0], [0], [1], [0, 0, 1, 1], [], []>} : vector<8x32xf32>, vector<32x8xf32>, vector<8x8xf32> -> vector<8x8xf32>
    %c9_51 = arith.constant 9 : index
    %c0_52 = arith.constant 0 : index
    %c0_53 = arith.constant 0 : index
    %72 = vector.load %arg4[%c9_51, %c0_52, %c0_53] : memref<24x1x8xf32, #tpu.memory_space<vmem>>, vector<1x1x8xf32>
    %73 = vector.shape_cast %72 : vector<1x1x8xf32> to vector<1x8xf32>
    %74 = vector.broadcast %73 : vector<1x8xf32> to vector<8x8xf32>
    %75 = arith.addf %71, %74 : vector<8x8xf32>
    %cst_54 = arith.constant dense<0.000000e+00> : vector<8x8xf32>
    %76 = tpu.matmul %61, %68, %cst_54 {dimension_numbers = #tpu.dot_dimension_numbers<[1], [1], [0], [0], [0, 0, 1, 0], [], []>} : vector<8x8xf32>, vector<8x8xf32>, vector<8x8xf32> -> vector<8x8xf32>
    %cst_55 = arith.constant dense<0xFF800000> : vector<8xf32>
    %77 = vector.multi_reduction <maximumf>, %76, %cst_55 [1] : vector<8x8xf32> to vector<8xf32>
    %78 = vector.shape_cast %77 : vector<8xf32> to vector<8x1xf32>
    %79 = vector.broadcast %78 : vector<8x1xf32> to vector<8x8xf32>
    %80 = arith.subf %76, %79 : vector<8x8xf32>
    %81 = math.exp %80 : vector<8x8xf32>
    %cst_56 = arith.constant dense<0.000000e+00> : vector<8xf32>
    %82 = vector.multi_reduction <add>, %81, %cst_56 [1] : vector<8x8xf32> to vector<8xf32>
    %83 = vector.shape_cast %82 : vector<8xf32> to vector<8x1xf32>
    %84 = vector.broadcast %83 : vector<8x1xf32> to vector<8x8xf32>
    %85 = arith.divf %81, %84 : vector<8x8xf32>
    %cst_57 = arith.constant dense<0.000000e+00> : vector<8xf32>
    %86 = vector.multi_reduction <add>, %85, %cst_57 [0] : vector<8x8xf32> to vector<8xf32>
    %87 = vector.shape_cast %86 : vector<8xf32> to vector<1x8xf32>
    %cst_58 = arith.constant 8.000000e+00 : f32
    %88 = vector.broadcast %cst_58 : f32 to vector<1x8xf32>
    %89 = arith.divf %87, %88 : vector<1x8xf32>
    %cst_59 = arith.constant dense<0.000000e+00> : vector<1x8xf32>
    %90 = tpu.matmul %89, %75, %cst_59 {dimension_numbers = #tpu.dot_dimension_numbers<[1], [0], [0], [1], [0, 0, 1, 1], [], []>} : vector<1x8xf32>, vector<8x8xf32>, vector<1x8xf32> -> vector<1x8xf32>
    %c1_60 = arith.constant 1 : index
    %c0_61 = arith.constant 0 : index
    %c0_62 = arith.constant 0 : index
    %91 = vector.load %arg5[%c1_60, %c0_61, %c0_62] : memref<8x8x32xf32, #tpu.memory_space<vmem>>, vector<1x8x32xf32>
    %92 = vector.shape_cast %91 : vector<1x8x32xf32> to vector<8x32xf32>
    %cst_63 = arith.constant dense<0.000000e+00> : vector<1x32xf32>
    %93 = tpu.matmul %90, %92, %cst_63 {dimension_numbers = #tpu.dot_dimension_numbers<[1], [0], [0], [1], [0, 0, 1, 1], [], []>} : vector<1x8xf32>, vector<8x32xf32>, vector<1x32xf32> -> vector<1x32xf32>
    %94 = arith.addf %52, %93 : vector<1x32xf32>
    %c2 = arith.constant 2 : index
    %c0_64 = arith.constant 0 : index
    %c0_65 = arith.constant 0 : index
    %95 = vector.load %arg3[%c2, %c0_64, %c0_65] : memref<24x32x8xf32, #tpu.memory_space<vmem>>, vector<1x32x8xf32>
    %96 = vector.shape_cast %95 : vector<1x32x8xf32> to vector<32x8xf32>
    %cst_66 = arith.constant dense<0.000000e+00> : vector<8x8xf32>
    %97 = tpu.matmul %4, %96, %cst_66 {dimension_numbers = #tpu.dot_dimension_numbers<[1], [0], [0], [1], [0, 0, 1, 1], [], []>} : vector<8x32xf32>, vector<32x8xf32>, vector<8x8xf32> -> vector<8x8xf32>
    %c2_67 = arith.constant 2 : index
    %c0_68 = arith.constant 0 : index
    %c0_69 = arith.constant 0 : index
    %98 = vector.load %arg4[%c2_67, %c0_68, %c0_69] : memref<24x1x8xf32, #tpu.memory_space<vmem>>, vector<1x1x8xf32>
    %99 = vector.shape_cast %98 : vector<1x1x8xf32> to vector<1x8xf32>
    %100 = vector.broadcast %99 : vector<1x8xf32> to vector<8x8xf32>
    %101 = arith.addf %97, %100 : vector<8x8xf32>
    %cst_70 = arith.constant 0.353553385 : f32
    %102 = vector.broadcast %cst_70 : f32 to vector<8x8xf32>
    %103 = arith.mulf %101, %102 : vector<8x8xf32>
    %c6 = arith.constant 6 : index
    %c0_71 = arith.constant 0 : index
    %c0_72 = arith.constant 0 : index
    %104 = vector.load %arg3[%c6, %c0_71, %c0_72] : memref<24x32x8xf32, #tpu.memory_space<vmem>>, vector<1x32x8xf32>
    %105 = vector.shape_cast %104 : vector<1x32x8xf32> to vector<32x8xf32>
    %cst_73 = arith.constant dense<0.000000e+00> : vector<8x8xf32>
    %106 = tpu.matmul %5, %105, %cst_73 {dimension_numbers = #tpu.dot_dimension_numbers<[1], [0], [0], [1], [0, 0, 1, 1], [], []>} : vector<8x32xf32>, vector<32x8xf32>, vector<8x8xf32> -> vector<8x8xf32>
    %c6_74 = arith.constant 6 : index
    %c0_75 = arith.constant 0 : index
    %c0_76 = arith.constant 0 : index
    %107 = vector.load %arg4[%c6_74, %c0_75, %c0_76] : memref<24x1x8xf32, #tpu.memory_space<vmem>>, vector<1x1x8xf32>
    %108 = vector.shape_cast %107 : vector<1x1x8xf32> to vector<1x8xf32>
    %109 = vector.broadcast %108 : vector<1x8xf32> to vector<8x8xf32>
    %110 = arith.addf %106, %109 : vector<8x8xf32>
    %c10 = arith.constant 10 : index
    %c0_77 = arith.constant 0 : index
    %c0_78 = arith.constant 0 : index
    %111 = vector.load %arg3[%c10, %c0_77, %c0_78] : memref<24x32x8xf32, #tpu.memory_space<vmem>>, vector<1x32x8xf32>
    %112 = vector.shape_cast %111 : vector<1x32x8xf32> to vector<32x8xf32>
    %cst_79 = arith.constant dense<0.000000e+00> : vector<8x8xf32>
    %113 = tpu.matmul %5, %112, %cst_79 {dimension_numbers = #tpu.dot_dimension_numbers<[1], [0], [0], [1], [0, 0, 1, 1], [], []>} : vector<8x32xf32>, vector<32x8xf32>, vector<8x8xf32> -> vector<8x8xf32>
    %c10_80 = arith.constant 10 : index
    %c0_81 = arith.constant 0 : index
    %c0_82 = arith.constant 0 : index
    %114 = vector.load %arg4[%c10_80, %c0_81, %c0_82] : memref<24x1x8xf32, #tpu.memory_space<vmem>>, vector<1x1x8xf32>
    %115 = vector.shape_cast %114 : vector<1x1x8xf32> to vector<1x8xf32>
    %116 = vector.broadcast %115 : vector<1x8xf32> to vector<8x8xf32>
    %117 = arith.addf %113, %116 : vector<8x8xf32>
    %cst_83 = arith.constant dense<0.000000e+00> : vector<8x8xf32>
    %118 = tpu.matmul %103, %110, %cst_83 {dimension_numbers = #tpu.dot_dimension_numbers<[1], [1], [0], [0], [0, 0, 1, 0], [], []>} : vector<8x8xf32>, vector<8x8xf32>, vector<8x8xf32> -> vector<8x8xf32>
    %cst_84 = arith.constant dense<0xFF800000> : vector<8xf32>
    %119 = vector.multi_reduction <maximumf>, %118, %cst_84 [1] : vector<8x8xf32> to vector<8xf32>
    %120 = vector.shape_cast %119 : vector<8xf32> to vector<8x1xf32>
    %121 = vector.broadcast %120 : vector<8x1xf32> to vector<8x8xf32>
    %122 = arith.subf %118, %121 : vector<8x8xf32>
    %123 = math.exp %122 : vector<8x8xf32>
    %cst_85 = arith.constant dense<0.000000e+00> : vector<8xf32>
    %124 = vector.multi_reduction <add>, %123, %cst_85 [1] : vector<8x8xf32> to vector<8xf32>
    %125 = vector.shape_cast %124 : vector<8xf32> to vector<8x1xf32>
    %126 = vector.broadcast %125 : vector<8x1xf32> to vector<8x8xf32>
    %127 = arith.divf %123, %126 : vector<8x8xf32>
    %cst_86 = arith.constant dense<0.000000e+00> : vector<8xf32>
    %128 = vector.multi_reduction <add>, %127, %cst_86 [0] : vector<8x8xf32> to vector<8xf32>
    %129 = vector.shape_cast %128 : vector<8xf32> to vector<1x8xf32>
    %cst_87 = arith.constant 8.000000e+00 : f32
    %130 = vector.broadcast %cst_87 : f32 to vector<1x8xf32>
    %131 = arith.divf %129, %130 : vector<1x8xf32>
    %cst_88 = arith.constant dense<0.000000e+00> : vector<1x8xf32>
    %132 = tpu.matmul %131, %117, %cst_88 {dimension_numbers = #tpu.dot_dimension_numbers<[1], [0], [0], [1], [0, 0, 1, 1], [], []>} : vector<1x8xf32>, vector<8x8xf32>, vector<1x8xf32> -> vector<1x8xf32>
    %c2_89 = arith.constant 2 : index
    %c0_90 = arith.constant 0 : index
    %c0_91 = arith.constant 0 : index
    %133 = vector.load %arg5[%c2_89, %c0_90, %c0_91] : memref<8x8x32xf32, #tpu.memory_space<vmem>>, vector<1x8x32xf32>
    %134 = vector.shape_cast %133 : vector<1x8x32xf32> to vector<8x32xf32>
    %cst_92 = arith.constant dense<0.000000e+00> : vector<1x32xf32>
    %135 = tpu.matmul %132, %134, %cst_92 {dimension_numbers = #tpu.dot_dimension_numbers<[1], [0], [0], [1], [0, 0, 1, 1], [], []>} : vector<1x8xf32>, vector<8x32xf32>, vector<1x32xf32> -> vector<1x32xf32>
    %136 = arith.addf %94, %135 : vector<1x32xf32>
    %c3 = arith.constant 3 : index
    %c0_93 = arith.constant 0 : index
    %c0_94 = arith.constant 0 : index
    %137 = vector.load %arg3[%c3, %c0_93, %c0_94] : memref<24x32x8xf32, #tpu.memory_space<vmem>>, vector<1x32x8xf32>
    %138 = vector.shape_cast %137 : vector<1x32x8xf32> to vector<32x8xf32>
    %cst_95 = arith.constant dense<0.000000e+00> : vector<8x8xf32>
    %139 = tpu.matmul %4, %138, %cst_95 {dimension_numbers = #tpu.dot_dimension_numbers<[1], [0], [0], [1], [0, 0, 1, 1], [], []>} : vector<8x32xf32>, vector<32x8xf32>, vector<8x8xf32> -> vector<8x8xf32>
    %c3_96 = arith.constant 3 : index
    %c0_97 = arith.constant 0 : index
    %c0_98 = arith.constant 0 : index
    %140 = vector.load %arg4[%c3_96, %c0_97, %c0_98] : memref<24x1x8xf32, #tpu.memory_space<vmem>>, vector<1x1x8xf32>
    %141 = vector.shape_cast %140 : vector<1x1x8xf32> to vector<1x8xf32>
    %142 = vector.broadcast %141 : vector<1x8xf32> to vector<8x8xf32>
    %143 = arith.addf %139, %142 : vector<8x8xf32>
    %cst_99 = arith.constant 0.353553385 : f32
    %144 = vector.broadcast %cst_99 : f32 to vector<8x8xf32>
    %145 = arith.mulf %143, %144 : vector<8x8xf32>
    %c7 = arith.constant 7 : index
    %c0_100 = arith.constant 0 : index
    %c0_101 = arith.constant 0 : index
    %146 = vector.load %arg3[%c7, %c0_100, %c0_101] : memref<24x32x8xf32, #tpu.memory_space<vmem>>, vector<1x32x8xf32>
    %147 = vector.shape_cast %146 : vector<1x32x8xf32> to vector<32x8xf32>
    %cst_102 = arith.constant dense<0.000000e+00> : vector<8x8xf32>
    %148 = tpu.matmul %5, %147, %cst_102 {dimension_numbers = #tpu.dot_dimension_numbers<[1], [0], [0], [1], [0, 0, 1, 1], [], []>} : vector<8x32xf32>, vector<32x8xf32>, vector<8x8xf32> -> vector<8x8xf32>
    %c7_103 = arith.constant 7 : index
    %c0_104 = arith.constant 0 : index
    %c0_105 = arith.constant 0 : index
    %149 = vector.load %arg4[%c7_103, %c0_104, %c0_105] : memref<24x1x8xf32, #tpu.memory_space<vmem>>, vector<1x1x8xf32>
    %150 = vector.shape_cast %149 : vector<1x1x8xf32> to vector<1x8xf32>
    %151 = vector.broadcast %150 : vector<1x8xf32> to vector<8x8xf32>
    %152 = arith.addf %148, %151 : vector<8x8xf32>
    %c11 = arith.constant 11 : index
    %c0_106 = arith.constant 0 : index
    %c0_107 = arith.constant 0 : index
    %153 = vector.load %arg3[%c11, %c0_106, %c0_107] : memref<24x32x8xf32, #tpu.memory_space<vmem>>, vector<1x32x8xf32>
    %154 = vector.shape_cast %153 : vector<1x32x8xf32> to vector<32x8xf32>
    %cst_108 = arith.constant dense<0.000000e+00> : vector<8x8xf32>
    %155 = tpu.matmul %5, %154, %cst_108 {dimension_numbers = #tpu.dot_dimension_numbers<[1], [0], [0], [1], [0, 0, 1, 1], [], []>} : vector<8x32xf32>, vector<32x8xf32>, vector<8x8xf32> -> vector<8x8xf32>
    %c11_109 = arith.constant 11 : index
    %c0_110 = arith.constant 0 : index
    %c0_111 = arith.constant 0 : index
    %156 = vector.load %arg4[%c11_109, %c0_110, %c0_111] : memref<24x1x8xf32, #tpu.memory_space<vmem>>, vector<1x1x8xf32>
    %157 = vector.shape_cast %156 : vector<1x1x8xf32> to vector<1x8xf32>
    %158 = vector.broadcast %157 : vector<1x8xf32> to vector<8x8xf32>
    %159 = arith.addf %155, %158 : vector<8x8xf32>
    %cst_112 = arith.constant dense<0.000000e+00> : vector<8x8xf32>
    %160 = tpu.matmul %145, %152, %cst_112 {dimension_numbers = #tpu.dot_dimension_numbers<[1], [1], [0], [0], [0, 0, 1, 0], [], []>} : vector<8x8xf32>, vector<8x8xf32>, vector<8x8xf32> -> vector<8x8xf32>
    %cst_113 = arith.constant dense<0xFF800000> : vector<8xf32>
    %161 = vector.multi_reduction <maximumf>, %160, %cst_113 [1] : vector<8x8xf32> to vector<8xf32>
    %162 = vector.shape_cast %161 : vector<8xf32> to vector<8x1xf32>
    %163 = vector.broadcast %162 : vector<8x1xf32> to vector<8x8xf32>
    %164 = arith.subf %160, %163 : vector<8x8xf32>
    %165 = math.exp %164 : vector<8x8xf32>
    %cst_114 = arith.constant dense<0.000000e+00> : vector<8xf32>
    %166 = vector.multi_reduction <add>, %165, %cst_114 [1] : vector<8x8xf32> to vector<8xf32>
    %167 = vector.shape_cast %166 : vector<8xf32> to vector<8x1xf32>
    %168 = vector.broadcast %167 : vector<8x1xf32> to vector<8x8xf32>
    %169 = arith.divf %165, %168 : vector<8x8xf32>
    %cst_115 = arith.constant dense<0.000000e+00> : vector<8xf32>
    %170 = vector.multi_reduction <add>, %169, %cst_115 [0] : vector<8x8xf32> to vector<8xf32>
    %171 = vector.shape_cast %170 : vector<8xf32> to vector<1x8xf32>
    %cst_116 = arith.constant 8.000000e+00 : f32
    %172 = vector.broadcast %cst_116 : f32 to vector<1x8xf32>
    %173 = arith.divf %171, %172 : vector<1x8xf32>
    %cst_117 = arith.constant dense<0.000000e+00> : vector<1x8xf32>
    %174 = tpu.matmul %173, %159, %cst_117 {dimension_numbers = #tpu.dot_dimension_numbers<[1], [0], [0], [1], [0, 0, 1, 1], [], []>} : vector<1x8xf32>, vector<8x8xf32>, vector<1x8xf32> -> vector<1x8xf32>
    %c3_118 = arith.constant 3 : index
    %c0_119 = arith.constant 0 : index
    %c0_120 = arith.constant 0 : index
    %175 = vector.load %arg5[%c3_118, %c0_119, %c0_120] : memref<8x8x32xf32, #tpu.memory_space<vmem>>, vector<1x8x32xf32>
    %176 = vector.shape_cast %175 : vector<1x8x32xf32> to vector<8x32xf32>
    %cst_121 = arith.constant dense<0.000000e+00> : vector<1x32xf32>
    %177 = tpu.matmul %174, %176, %cst_121 {dimension_numbers = #tpu.dot_dimension_numbers<[1], [0], [0], [1], [0, 0, 1, 1], [], []>} : vector<1x8xf32>, vector<8x32xf32>, vector<1x32xf32> -> vector<1x32xf32>
    %178 = arith.addf %136, %177 : vector<1x32xf32>
    %c0_122 = arith.constant 0 : index
    %c0_123 = arith.constant 0 : index
    %c0_124 = arith.constant 0 : index
    %179 = vector.load %arg6[%c0_122, %c0_123, %c0_124] : memref<2x1x32xf32, #tpu.memory_space<vmem>>, vector<1x1x32xf32>
    %180 = vector.shape_cast %179 : vector<1x1x32xf32> to vector<1x32xf32>
    %181 = arith.addf %178, %180 : vector<1x32xf32>
    %cst_125 = arith.constant 0.000000e+00 : f32
    %182 = vector.broadcast %cst_125 : f32 to vector<1x32xf32>
    %c12 = arith.constant 12 : index
    %c0_126 = arith.constant 0 : index
    %c0_127 = arith.constant 0 : index
    %183 = vector.load %arg3[%c12, %c0_126, %c0_127] : memref<24x32x8xf32, #tpu.memory_space<vmem>>, vector<1x32x8xf32>
    %184 = vector.shape_cast %183 : vector<1x32x8xf32> to vector<32x8xf32>
    %cst_128 = arith.constant dense<0.000000e+00> : vector<1x8xf32>
    %185 = tpu.matmul %7, %184, %cst_128 {dimension_numbers = #tpu.dot_dimension_numbers<[1], [0], [0], [1], [0, 0, 1, 1], [], []>} : vector<1x32xf32>, vector<32x8xf32>, vector<1x8xf32> -> vector<1x8xf32>
    %c12_129 = arith.constant 12 : index
    %c0_130 = arith.constant 0 : index
    %c0_131 = arith.constant 0 : index
    %186 = vector.load %arg4[%c12_129, %c0_130, %c0_131] : memref<24x1x8xf32, #tpu.memory_space<vmem>>, vector<1x1x8xf32>
    %187 = vector.shape_cast %186 : vector<1x1x8xf32> to vector<1x8xf32>
    %188 = arith.addf %185, %187 : vector<1x8xf32>
    %cst_132 = arith.constant 0.353553385 : f32
    %189 = vector.broadcast %cst_132 : f32 to vector<1x8xf32>
    %190 = arith.mulf %188, %189 : vector<1x8xf32>
    %c16 = arith.constant 16 : index
    %c0_133 = arith.constant 0 : index
    %c0_134 = arith.constant 0 : index
    %191 = vector.load %arg3[%c16, %c0_133, %c0_134] : memref<24x32x8xf32, #tpu.memory_space<vmem>>, vector<1x32x8xf32>
    %192 = vector.shape_cast %191 : vector<1x32x8xf32> to vector<32x8xf32>
    %cst_135 = arith.constant dense<0.000000e+00> : vector<4x8xf32>
    %193 = tpu.matmul %6, %192, %cst_135 {dimension_numbers = #tpu.dot_dimension_numbers<[1], [0], [0], [1], [0, 0, 1, 1], [], []>} : vector<4x32xf32>, vector<32x8xf32>, vector<4x8xf32> -> vector<4x8xf32>
    %c16_136 = arith.constant 16 : index
    %c0_137 = arith.constant 0 : index
    %c0_138 = arith.constant 0 : index
    %194 = vector.load %arg4[%c16_136, %c0_137, %c0_138] : memref<24x1x8xf32, #tpu.memory_space<vmem>>, vector<1x1x8xf32>
    %195 = vector.shape_cast %194 : vector<1x1x8xf32> to vector<1x8xf32>
    %196 = vector.broadcast %195 : vector<1x8xf32> to vector<4x8xf32>
    %197 = arith.addf %193, %196 : vector<4x8xf32>
    %c20 = arith.constant 20 : index
    %c0_139 = arith.constant 0 : index
    %c0_140 = arith.constant 0 : index
    %198 = vector.load %arg3[%c20, %c0_139, %c0_140] : memref<24x32x8xf32, #tpu.memory_space<vmem>>, vector<1x32x8xf32>
    %199 = vector.shape_cast %198 : vector<1x32x8xf32> to vector<32x8xf32>
    %cst_141 = arith.constant dense<0.000000e+00> : vector<4x8xf32>
    %200 = tpu.matmul %6, %199, %cst_141 {dimension_numbers = #tpu.dot_dimension_numbers<[1], [0], [0], [1], [0, 0, 1, 1], [], []>} : vector<4x32xf32>, vector<32x8xf32>, vector<4x8xf32> -> vector<4x8xf32>
    %c20_142 = arith.constant 20 : index
    %c0_143 = arith.constant 0 : index
    %c0_144 = arith.constant 0 : index
    %201 = vector.load %arg4[%c20_142, %c0_143, %c0_144] : memref<24x1x8xf32, #tpu.memory_space<vmem>>, vector<1x1x8xf32>
    %202 = vector.shape_cast %201 : vector<1x1x8xf32> to vector<1x8xf32>
    %203 = vector.broadcast %202 : vector<1x8xf32> to vector<4x8xf32>
    %204 = arith.addf %200, %203 : vector<4x8xf32>
    %cst_145 = arith.constant dense<0.000000e+00> : vector<1x4xf32>
    %205 = tpu.matmul %190, %197, %cst_145 {dimension_numbers = #tpu.dot_dimension_numbers<[1], [1], [0], [0], [0, 0, 1, 0], [], []>} : vector<1x8xf32>, vector<4x8xf32>, vector<1x4xf32> -> vector<1x4xf32>
    %cst_146 = arith.constant dense<0xFF800000> : vector<1xf32>
    %206 = vector.multi_reduction <maximumf>, %205, %cst_146 [1] : vector<1x4xf32> to vector<1xf32>
    %207 = vector.shape_cast %206 : vector<1xf32> to vector<1x1xf32>
    %208 = vector.broadcast %207 : vector<1x1xf32> to vector<1x4xf32>
    %209 = arith.subf %205, %208 : vector<1x4xf32>
    %210 = math.exp %209 : vector<1x4xf32>
    %cst_147 = arith.constant dense<0.000000e+00> : vector<1xf32>
    %211 = vector.multi_reduction <add>, %210, %cst_147 [1] : vector<1x4xf32> to vector<1xf32>
    %212 = vector.shape_cast %211 : vector<1xf32> to vector<1x1xf32>
    %213 = vector.broadcast %212 : vector<1x1xf32> to vector<1x4xf32>
    %214 = arith.divf %210, %213 : vector<1x4xf32>
    %cst_148 = arith.constant dense<0.000000e+00> : vector<4xf32>
    %215 = vector.multi_reduction <add>, %214, %cst_148 [0] : vector<1x4xf32> to vector<4xf32>
    %216 = vector.shape_cast %215 : vector<4xf32> to vector<1x4xf32>
    %cst_149 = arith.constant 1.000000e+00 : f32
    %217 = vector.broadcast %cst_149 : f32 to vector<1x4xf32>
    %218 = arith.divf %216, %217 : vector<1x4xf32>
    %cst_150 = arith.constant dense<0.000000e+00> : vector<1x8xf32>
    %219 = tpu.matmul %218, %204, %cst_150 {dimension_numbers = #tpu.dot_dimension_numbers<[1], [0], [0], [1], [0, 0, 1, 1], [], []>} : vector<1x4xf32>, vector<4x8xf32>, vector<1x8xf32> -> vector<1x8xf32>
    %c4_151 = arith.constant 4 : index
    %c0_152 = arith.constant 0 : index
    %c0_153 = arith.constant 0 : index
    %220 = vector.load %arg5[%c4_151, %c0_152, %c0_153] : memref<8x8x32xf32, #tpu.memory_space<vmem>>, vector<1x8x32xf32>
    %221 = vector.shape_cast %220 : vector<1x8x32xf32> to vector<8x32xf32>
    %cst_154 = arith.constant dense<0.000000e+00> : vector<1x32xf32>
    %222 = tpu.matmul %219, %221, %cst_154 {dimension_numbers = #tpu.dot_dimension_numbers<[1], [0], [0], [1], [0, 0, 1, 1], [], []>} : vector<1x8xf32>, vector<8x32xf32>, vector<1x32xf32> -> vector<1x32xf32>
    %223 = arith.addf %182, %222 : vector<1x32xf32>
    %c13 = arith.constant 13 : index
    %c0_155 = arith.constant 0 : index
    %c0_156 = arith.constant 0 : index
    %224 = vector.load %arg3[%c13, %c0_155, %c0_156] : memref<24x32x8xf32, #tpu.memory_space<vmem>>, vector<1x32x8xf32>
    %225 = vector.shape_cast %224 : vector<1x32x8xf32> to vector<32x8xf32>
    %cst_157 = arith.constant dense<0.000000e+00> : vector<1x8xf32>
    %226 = tpu.matmul %7, %225, %cst_157 {dimension_numbers = #tpu.dot_dimension_numbers<[1], [0], [0], [1], [0, 0, 1, 1], [], []>} : vector<1x32xf32>, vector<32x8xf32>, vector<1x8xf32> -> vector<1x8xf32>
    %c13_158 = arith.constant 13 : index
    %c0_159 = arith.constant 0 : index
    %c0_160 = arith.constant 0 : index
    %227 = vector.load %arg4[%c13_158, %c0_159, %c0_160] : memref<24x1x8xf32, #tpu.memory_space<vmem>>, vector<1x1x8xf32>
    %228 = vector.shape_cast %227 : vector<1x1x8xf32> to vector<1x8xf32>
    %229 = arith.addf %226, %228 : vector<1x8xf32>
    %cst_161 = arith.constant 0.353553385 : f32
    %230 = vector.broadcast %cst_161 : f32 to vector<1x8xf32>
    %231 = arith.mulf %229, %230 : vector<1x8xf32>
    %c17 = arith.constant 17 : index
    %c0_162 = arith.constant 0 : index
    %c0_163 = arith.constant 0 : index
    %232 = vector.load %arg3[%c17, %c0_162, %c0_163] : memref<24x32x8xf32, #tpu.memory_space<vmem>>, vector<1x32x8xf32>
    %233 = vector.shape_cast %232 : vector<1x32x8xf32> to vector<32x8xf32>
    %cst_164 = arith.constant dense<0.000000e+00> : vector<4x8xf32>
    %234 = tpu.matmul %6, %233, %cst_164 {dimension_numbers = #tpu.dot_dimension_numbers<[1], [0], [0], [1], [0, 0, 1, 1], [], []>} : vector<4x32xf32>, vector<32x8xf32>, vector<4x8xf32> -> vector<4x8xf32>
    %c17_165 = arith.constant 17 : index
    %c0_166 = arith.constant 0 : index
    %c0_167 = arith.constant 0 : index
    %235 = vector.load %arg4[%c17_165, %c0_166, %c0_167] : memref<24x1x8xf32, #tpu.memory_space<vmem>>, vector<1x1x8xf32>
    %236 = vector.shape_cast %235 : vector<1x1x8xf32> to vector<1x8xf32>
    %237 = vector.broadcast %236 : vector<1x8xf32> to vector<4x8xf32>
    %238 = arith.addf %234, %237 : vector<4x8xf32>
    %c21 = arith.constant 21 : index
    %c0_168 = arith.constant 0 : index
    %c0_169 = arith.constant 0 : index
    %239 = vector.load %arg3[%c21, %c0_168, %c0_169] : memref<24x32x8xf32, #tpu.memory_space<vmem>>, vector<1x32x8xf32>
    %240 = vector.shape_cast %239 : vector<1x32x8xf32> to vector<32x8xf32>
    %cst_170 = arith.constant dense<0.000000e+00> : vector<4x8xf32>
    %241 = tpu.matmul %6, %240, %cst_170 {dimension_numbers = #tpu.dot_dimension_numbers<[1], [0], [0], [1], [0, 0, 1, 1], [], []>} : vector<4x32xf32>, vector<32x8xf32>, vector<4x8xf32> -> vector<4x8xf32>
    %c21_171 = arith.constant 21 : index
    %c0_172 = arith.constant 0 : index
    %c0_173 = arith.constant 0 : index
    %242 = vector.load %arg4[%c21_171, %c0_172, %c0_173] : memref<24x1x8xf32, #tpu.memory_space<vmem>>, vector<1x1x8xf32>
    %243 = vector.shape_cast %242 : vector<1x1x8xf32> to vector<1x8xf32>
    %244 = vector.broadcast %243 : vector<1x8xf32> to vector<4x8xf32>
    %245 = arith.addf %241, %244 : vector<4x8xf32>
    %cst_174 = arith.constant dense<0.000000e+00> : vector<1x4xf32>
    %246 = tpu.matmul %231, %238, %cst_174 {dimension_numbers = #tpu.dot_dimension_numbers<[1], [1], [0], [0], [0, 0, 1, 0], [], []>} : vector<1x8xf32>, vector<4x8xf32>, vector<1x4xf32> -> vector<1x4xf32>
    %cst_175 = arith.constant dense<0xFF800000> : vector<1xf32>
    %247 = vector.multi_reduction <maximumf>, %246, %cst_175 [1] : vector<1x4xf32> to vector<1xf32>
    %248 = vector.shape_cast %247 : vector<1xf32> to vector<1x1xf32>
    %249 = vector.broadcast %248 : vector<1x1xf32> to vector<1x4xf32>
    %250 = arith.subf %246, %249 : vector<1x4xf32>
    %251 = math.exp %250 : vector<1x4xf32>
    %cst_176 = arith.constant dense<0.000000e+00> : vector<1xf32>
    %252 = vector.multi_reduction <add>, %251, %cst_176 [1] : vector<1x4xf32> to vector<1xf32>
    %253 = vector.shape_cast %252 : vector<1xf32> to vector<1x1xf32>
    %254 = vector.broadcast %253 : vector<1x1xf32> to vector<1x4xf32>
    %255 = arith.divf %251, %254 : vector<1x4xf32>
    %cst_177 = arith.constant dense<0.000000e+00> : vector<4xf32>
    %256 = vector.multi_reduction <add>, %255, %cst_177 [0] : vector<1x4xf32> to vector<4xf32>
    %257 = vector.shape_cast %256 : vector<4xf32> to vector<1x4xf32>
    %cst_178 = arith.constant 1.000000e+00 : f32
    %258 = vector.broadcast %cst_178 : f32 to vector<1x4xf32>
    %259 = arith.divf %257, %258 : vector<1x4xf32>
    %cst_179 = arith.constant dense<0.000000e+00> : vector<1x8xf32>
    %260 = tpu.matmul %259, %245, %cst_179 {dimension_numbers = #tpu.dot_dimension_numbers<[1], [0], [0], [1], [0, 0, 1, 1], [], []>} : vector<1x4xf32>, vector<4x8xf32>, vector<1x8xf32> -> vector<1x8xf32>
    %c5_180 = arith.constant 5 : index
    %c0_181 = arith.constant 0 : index
    %c0_182 = arith.constant 0 : index
    %261 = vector.load %arg5[%c5_180, %c0_181, %c0_182] : memref<8x8x32xf32, #tpu.memory_space<vmem>>, vector<1x8x32xf32>
    %262 = vector.shape_cast %261 : vector<1x8x32xf32> to vector<8x32xf32>
    %cst_183 = arith.constant dense<0.000000e+00> : vector<1x32xf32>
    %263 = tpu.matmul %260, %262, %cst_183 {dimension_numbers = #tpu.dot_dimension_numbers<[1], [0], [0], [1], [0, 0, 1, 1], [], []>} : vector<1x8xf32>, vector<8x32xf32>, vector<1x32xf32> -> vector<1x32xf32>
    %264 = arith.addf %223, %263 : vector<1x32xf32>
    %c14 = arith.constant 14 : index
    %c0_184 = arith.constant 0 : index
    %c0_185 = arith.constant 0 : index
    %265 = vector.load %arg3[%c14, %c0_184, %c0_185] : memref<24x32x8xf32, #tpu.memory_space<vmem>>, vector<1x32x8xf32>
    %266 = vector.shape_cast %265 : vector<1x32x8xf32> to vector<32x8xf32>
    %cst_186 = arith.constant dense<0.000000e+00> : vector<1x8xf32>
    %267 = tpu.matmul %7, %266, %cst_186 {dimension_numbers = #tpu.dot_dimension_numbers<[1], [0], [0], [1], [0, 0, 1, 1], [], []>} : vector<1x32xf32>, vector<32x8xf32>, vector<1x8xf32> -> vector<1x8xf32>
    %c14_187 = arith.constant 14 : index
    %c0_188 = arith.constant 0 : index
    %c0_189 = arith.constant 0 : index
    %268 = vector.load %arg4[%c14_187, %c0_188, %c0_189] : memref<24x1x8xf32, #tpu.memory_space<vmem>>, vector<1x1x8xf32>
    %269 = vector.shape_cast %268 : vector<1x1x8xf32> to vector<1x8xf32>
    %270 = arith.addf %267, %269 : vector<1x8xf32>
    %cst_190 = arith.constant 0.353553385 : f32
    %271 = vector.broadcast %cst_190 : f32 to vector<1x8xf32>
    %272 = arith.mulf %270, %271 : vector<1x8xf32>
    %c18 = arith.constant 18 : index
    %c0_191 = arith.constant 0 : index
    %c0_192 = arith.constant 0 : index
    %273 = vector.load %arg3[%c18, %c0_191, %c0_192] : memref<24x32x8xf32, #tpu.memory_space<vmem>>, vector<1x32x8xf32>
    %274 = vector.shape_cast %273 : vector<1x32x8xf32> to vector<32x8xf32>
    %cst_193 = arith.constant dense<0.000000e+00> : vector<4x8xf32>
    %275 = tpu.matmul %6, %274, %cst_193 {dimension_numbers = #tpu.dot_dimension_numbers<[1], [0], [0], [1], [0, 0, 1, 1], [], []>} : vector<4x32xf32>, vector<32x8xf32>, vector<4x8xf32> -> vector<4x8xf32>
    %c18_194 = arith.constant 18 : index
    %c0_195 = arith.constant 0 : index
    %c0_196 = arith.constant 0 : index
    %276 = vector.load %arg4[%c18_194, %c0_195, %c0_196] : memref<24x1x8xf32, #tpu.memory_space<vmem>>, vector<1x1x8xf32>
    %277 = vector.shape_cast %276 : vector<1x1x8xf32> to vector<1x8xf32>
    %278 = vector.broadcast %277 : vector<1x8xf32> to vector<4x8xf32>
    %279 = arith.addf %275, %278 : vector<4x8xf32>
    %c22 = arith.constant 22 : index
    %c0_197 = arith.constant 0 : index
    %c0_198 = arith.constant 0 : index
    %280 = vector.load %arg3[%c22, %c0_197, %c0_198] : memref<24x32x8xf32, #tpu.memory_space<vmem>>, vector<1x32x8xf32>
    %281 = vector.shape_cast %280 : vector<1x32x8xf32> to vector<32x8xf32>
    %cst_199 = arith.constant dense<0.000000e+00> : vector<4x8xf32>
    %282 = tpu.matmul %6, %281, %cst_199 {dimension_numbers = #tpu.dot_dimension_numbers<[1], [0], [0], [1], [0, 0, 1, 1], [], []>} : vector<4x32xf32>, vector<32x8xf32>, vector<4x8xf32> -> vector<4x8xf32>
    %c22_200 = arith.constant 22 : index
    %c0_201 = arith.constant 0 : index
    %c0_202 = arith.constant 0 : index
    %283 = vector.load %arg4[%c22_200, %c0_201, %c0_202] : memref<24x1x8xf32, #tpu.memory_space<vmem>>, vector<1x1x8xf32>
    %284 = vector.shape_cast %283 : vector<1x1x8xf32> to vector<1x8xf32>
    %285 = vector.broadcast %284 : vector<1x8xf32> to vector<4x8xf32>
    %286 = arith.addf %282, %285 : vector<4x8xf32>
    %cst_203 = arith.constant dense<0.000000e+00> : vector<1x4xf32>
    %287 = tpu.matmul %272, %279, %cst_203 {dimension_numbers = #tpu.dot_dimension_numbers<[1], [1], [0], [0], [0, 0, 1, 0], [], []>} : vector<1x8xf32>, vector<4x8xf32>, vector<1x4xf32> -> vector<1x4xf32>
    %cst_204 = arith.constant dense<0xFF800000> : vector<1xf32>
    %288 = vector.multi_reduction <maximumf>, %287, %cst_204 [1] : vector<1x4xf32> to vector<1xf32>
    %289 = vector.shape_cast %288 : vector<1xf32> to vector<1x1xf32>
    %290 = vector.broadcast %289 : vector<1x1xf32> to vector<1x4xf32>
    %291 = arith.subf %287, %290 : vector<1x4xf32>
    %292 = math.exp %291 : vector<1x4xf32>
    %cst_205 = arith.constant dense<0.000000e+00> : vector<1xf32>
    %293 = vector.multi_reduction <add>, %292, %cst_205 [1] : vector<1x4xf32> to vector<1xf32>
    %294 = vector.shape_cast %293 : vector<1xf32> to vector<1x1xf32>
    %295 = vector.broadcast %294 : vector<1x1xf32> to vector<1x4xf32>
    %296 = arith.divf %292, %295 : vector<1x4xf32>
    %cst_206 = arith.constant dense<0.000000e+00> : vector<4xf32>
    %297 = vector.multi_reduction <add>, %296, %cst_206 [0] : vector<1x4xf32> to vector<4xf32>
    %298 = vector.shape_cast %297 : vector<4xf32> to vector<1x4xf32>
    %cst_207 = arith.constant 1.000000e+00 : f32
    %299 = vector.broadcast %cst_207 : f32 to vector<1x4xf32>
    %300 = arith.divf %298, %299 : vector<1x4xf32>
    %cst_208 = arith.constant dense<0.000000e+00> : vector<1x8xf32>
    %301 = tpu.matmul %300, %286, %cst_208 {dimension_numbers = #tpu.dot_dimension_numbers<[1], [0], [0], [1], [0, 0, 1, 1], [], []>} : vector<1x4xf32>, vector<4x8xf32>, vector<1x8xf32> -> vector<1x8xf32>
    %c6_209 = arith.constant 6 : index
    %c0_210 = arith.constant 0 : index
    %c0_211 = arith.constant 0 : index
    %302 = vector.load %arg5[%c6_209, %c0_210, %c0_211] : memref<8x8x32xf32, #tpu.memory_space<vmem>>, vector<1x8x32xf32>
    %303 = vector.shape_cast %302 : vector<1x8x32xf32> to vector<8x32xf32>
    %cst_212 = arith.constant dense<0.000000e+00> : vector<1x32xf32>
    %304 = tpu.matmul %301, %303, %cst_212 {dimension_numbers = #tpu.dot_dimension_numbers<[1], [0], [0], [1], [0, 0, 1, 1], [], []>} : vector<1x8xf32>, vector<8x32xf32>, vector<1x32xf32> -> vector<1x32xf32>
    %305 = arith.addf %264, %304 : vector<1x32xf32>
    %c15 = arith.constant 15 : index
    %c0_213 = arith.constant 0 : index
    %c0_214 = arith.constant 0 : index
    %306 = vector.load %arg3[%c15, %c0_213, %c0_214] : memref<24x32x8xf32, #tpu.memory_space<vmem>>, vector<1x32x8xf32>
    %307 = vector.shape_cast %306 : vector<1x32x8xf32> to vector<32x8xf32>
    %cst_215 = arith.constant dense<0.000000e+00> : vector<1x8xf32>
    %308 = tpu.matmul %7, %307, %cst_215 {dimension_numbers = #tpu.dot_dimension_numbers<[1], [0], [0], [1], [0, 0, 1, 1], [], []>} : vector<1x32xf32>, vector<32x8xf32>, vector<1x8xf32> -> vector<1x8xf32>
    %c15_216 = arith.constant 15 : index
    %c0_217 = arith.constant 0 : index
    %c0_218 = arith.constant 0 : index
    %309 = vector.load %arg4[%c15_216, %c0_217, %c0_218] : memref<24x1x8xf32, #tpu.memory_space<vmem>>, vector<1x1x8xf32>
    %310 = vector.shape_cast %309 : vector<1x1x8xf32> to vector<1x8xf32>
    %311 = arith.addf %308, %310 : vector<1x8xf32>
    %cst_219 = arith.constant 0.353553385 : f32
    %312 = vector.broadcast %cst_219 : f32 to vector<1x8xf32>
    %313 = arith.mulf %311, %312 : vector<1x8xf32>
    %c19 = arith.constant 19 : index
    %c0_220 = arith.constant 0 : index
    %c0_221 = arith.constant 0 : index
    %314 = vector.load %arg3[%c19, %c0_220, %c0_221] : memref<24x32x8xf32, #tpu.memory_space<vmem>>, vector<1x32x8xf32>
    %315 = vector.shape_cast %314 : vector<1x32x8xf32> to vector<32x8xf32>
    %cst_222 = arith.constant dense<0.000000e+00> : vector<4x8xf32>
    %316 = tpu.matmul %6, %315, %cst_222 {dimension_numbers = #tpu.dot_dimension_numbers<[1], [0], [0], [1], [0, 0, 1, 1], [], []>} : vector<4x32xf32>, vector<32x8xf32>, vector<4x8xf32> -> vector<4x8xf32>
    %c19_223 = arith.constant 19 : index
    %c0_224 = arith.constant 0 : index
    %c0_225 = arith.constant 0 : index
    %317 = vector.load %arg4[%c19_223, %c0_224, %c0_225] : memref<24x1x8xf32, #tpu.memory_space<vmem>>, vector<1x1x8xf32>
    %318 = vector.shape_cast %317 : vector<1x1x8xf32> to vector<1x8xf32>
    %319 = vector.broadcast %318 : vector<1x8xf32> to vector<4x8xf32>
    %320 = arith.addf %316, %319 : vector<4x8xf32>
    %c23 = arith.constant 23 : index
    %c0_226 = arith.constant 0 : index
    %c0_227 = arith.constant 0 : index
    %321 = vector.load %arg3[%c23, %c0_226, %c0_227] : memref<24x32x8xf32, #tpu.memory_space<vmem>>, vector<1x32x8xf32>
    %322 = vector.shape_cast %321 : vector<1x32x8xf32> to vector<32x8xf32>
    %cst_228 = arith.constant dense<0.000000e+00> : vector<4x8xf32>
    %323 = tpu.matmul %6, %322, %cst_228 {dimension_numbers = #tpu.dot_dimension_numbers<[1], [0], [0], [1], [0, 0, 1, 1], [], []>} : vector<4x32xf32>, vector<32x8xf32>, vector<4x8xf32> -> vector<4x8xf32>
    %c23_229 = arith.constant 23 : index
    %c0_230 = arith.constant 0 : index
    %c0_231 = arith.constant 0 : index
    %324 = vector.load %arg4[%c23_229, %c0_230, %c0_231] : memref<24x1x8xf32, #tpu.memory_space<vmem>>, vector<1x1x8xf32>
    %325 = vector.shape_cast %324 : vector<1x1x8xf32> to vector<1x8xf32>
    %326 = vector.broadcast %325 : vector<1x8xf32> to vector<4x8xf32>
    %327 = arith.addf %323, %326 : vector<4x8xf32>
    %cst_232 = arith.constant dense<0.000000e+00> : vector<1x4xf32>
    %328 = tpu.matmul %313, %320, %cst_232 {dimension_numbers = #tpu.dot_dimension_numbers<[1], [1], [0], [0], [0, 0, 1, 0], [], []>} : vector<1x8xf32>, vector<4x8xf32>, vector<1x4xf32> -> vector<1x4xf32>
    %cst_233 = arith.constant dense<0xFF800000> : vector<1xf32>
    %329 = vector.multi_reduction <maximumf>, %328, %cst_233 [1] : vector<1x4xf32> to vector<1xf32>
    %330 = vector.shape_cast %329 : vector<1xf32> to vector<1x1xf32>
    %331 = vector.broadcast %330 : vector<1x1xf32> to vector<1x4xf32>
    %332 = arith.subf %328, %331 : vector<1x4xf32>
    %333 = math.exp %332 : vector<1x4xf32>
    %cst_234 = arith.constant dense<0.000000e+00> : vector<1xf32>
    %334 = vector.multi_reduction <add>, %333, %cst_234 [1] : vector<1x4xf32> to vector<1xf32>
    %335 = vector.shape_cast %334 : vector<1xf32> to vector<1x1xf32>
    %336 = vector.broadcast %335 : vector<1x1xf32> to vector<1x4xf32>
    %337 = arith.divf %333, %336 : vector<1x4xf32>
    %cst_235 = arith.constant dense<0.000000e+00> : vector<4xf32>
    %338 = vector.multi_reduction <add>, %337, %cst_235 [0] : vector<1x4xf32> to vector<4xf32>
    %339 = vector.shape_cast %338 : vector<4xf32> to vector<1x4xf32>
    %cst_236 = arith.constant 1.000000e+00 : f32
    %340 = vector.broadcast %cst_236 : f32 to vector<1x4xf32>
    %341 = arith.divf %339, %340 : vector<1x4xf32>
    %cst_237 = arith.constant dense<0.000000e+00> : vector<1x8xf32>
    %342 = tpu.matmul %341, %327, %cst_237 {dimension_numbers = #tpu.dot_dimension_numbers<[1], [0], [0], [1], [0, 0, 1, 1], [], []>} : vector<1x4xf32>, vector<4x8xf32>, vector<1x8xf32> -> vector<1x8xf32>
    %c7_238 = arith.constant 7 : index
    %c0_239 = arith.constant 0 : index
    %c0_240 = arith.constant 0 : index
    %343 = vector.load %arg5[%c7_238, %c0_239, %c0_240] : memref<8x8x32xf32, #tpu.memory_space<vmem>>, vector<1x8x32xf32>
    %344 = vector.shape_cast %343 : vector<1x8x32xf32> to vector<8x32xf32>
    %cst_241 = arith.constant dense<0.000000e+00> : vector<1x32xf32>
    %345 = tpu.matmul %342, %344, %cst_241 {dimension_numbers = #tpu.dot_dimension_numbers<[1], [0], [0], [1], [0, 0, 1, 1], [], []>} : vector<1x8xf32>, vector<8x32xf32>, vector<1x32xf32> -> vector<1x32xf32>
    %346 = arith.addf %305, %345 : vector<1x32xf32>
    %c1_242 = arith.constant 1 : index
    %c0_243 = arith.constant 0 : index
    %c0_244 = arith.constant 0 : index
    %347 = vector.load %arg6[%c1_242, %c0_243, %c0_244] : memref<2x1x32xf32, #tpu.memory_space<vmem>>, vector<1x1x32xf32>
    %348 = vector.shape_cast %347 : vector<1x1x32xf32> to vector<1x32xf32>
    %349 = arith.addf %346, %348 : vector<1x32xf32>
    %cst_245 = arith.constant 0.000000e+00 : f32
    %350 = vector.broadcast %cst_245 : f32 to vector<1x64xf32>
    %c0_246 = arith.constant 0 : index
    %c0_247 = arith.constant 0 : index
    %c0_248 = arith.constant 0 : index
    %351 = vector.load %arg7[%c0_246, %c0_247, %c0_248] : memref<12x64x16xf32, #tpu.memory_space<vmem>>, vector<1x64x16xf32>
    %352 = vector.shape_cast %351 : vector<1x64x16xf32> to vector<64x16xf32>
    %cst_249 = arith.constant dense<0.000000e+00> : vector<1x16xf32>
    %353 = tpu.matmul %8, %352, %cst_249 {dimension_numbers = #tpu.dot_dimension_numbers<[1], [0], [0], [1], [0, 0, 1, 1], [], []>} : vector<1x64xf32>, vector<64x16xf32>, vector<1x16xf32> -> vector<1x16xf32>
    %c0_250 = arith.constant 0 : index
    %c0_251 = arith.constant 0 : index
    %c0_252 = arith.constant 0 : index
    %354 = vector.load %arg8[%c0_250, %c0_251, %c0_252] : memref<12x1x16xf32, #tpu.memory_space<vmem>>, vector<1x1x16xf32>
    %355 = vector.shape_cast %354 : vector<1x1x16xf32> to vector<1x16xf32>
    %356 = arith.addf %353, %355 : vector<1x16xf32>
    %cst_253 = arith.constant 2.500000e-01 : f32
    %357 = vector.broadcast %cst_253 : f32 to vector<1x16xf32>
    %358 = arith.mulf %356, %357 : vector<1x16xf32>
    %c4_254 = arith.constant 4 : index
    %c0_255 = arith.constant 0 : index
    %c0_256 = arith.constant 0 : index
    %359 = vector.load %arg7[%c4_254, %c0_255, %c0_256] : memref<12x64x16xf32, #tpu.memory_space<vmem>>, vector<1x64x16xf32>
    %360 = vector.shape_cast %359 : vector<1x64x16xf32> to vector<64x16xf32>
    %cst_257 = arith.constant dense<0.000000e+00> : vector<4x16xf32>
    %361 = tpu.matmul %9, %360, %cst_257 {dimension_numbers = #tpu.dot_dimension_numbers<[1], [0], [0], [1], [0, 0, 1, 1], [], []>} : vector<4x64xf32>, vector<64x16xf32>, vector<4x16xf32> -> vector<4x16xf32>
    %c4_258 = arith.constant 4 : index
    %c0_259 = arith.constant 0 : index
    %c0_260 = arith.constant 0 : index
    %362 = vector.load %arg8[%c4_258, %c0_259, %c0_260] : memref<12x1x16xf32, #tpu.memory_space<vmem>>, vector<1x1x16xf32>
    %363 = vector.shape_cast %362 : vector<1x1x16xf32> to vector<1x16xf32>
    %364 = vector.broadcast %363 : vector<1x16xf32> to vector<4x16xf32>
    %365 = arith.addf %361, %364 : vector<4x16xf32>
    %c8_261 = arith.constant 8 : index
    %c0_262 = arith.constant 0 : index
    %c0_263 = arith.constant 0 : index
    %366 = vector.load %arg7[%c8_261, %c0_262, %c0_263] : memref<12x64x16xf32, #tpu.memory_space<vmem>>, vector<1x64x16xf32>
    %367 = vector.shape_cast %366 : vector<1x64x16xf32> to vector<64x16xf32>
    %cst_264 = arith.constant dense<0.000000e+00> : vector<4x16xf32>
    %368 = tpu.matmul %9, %367, %cst_264 {dimension_numbers = #tpu.dot_dimension_numbers<[1], [0], [0], [1], [0, 0, 1, 1], [], []>} : vector<4x64xf32>, vector<64x16xf32>, vector<4x16xf32> -> vector<4x16xf32>
    %c8_265 = arith.constant 8 : index
    %c0_266 = arith.constant 0 : index
    %c0_267 = arith.constant 0 : index
    %369 = vector.load %arg8[%c8_265, %c0_266, %c0_267] : memref<12x1x16xf32, #tpu.memory_space<vmem>>, vector<1x1x16xf32>
    %370 = vector.shape_cast %369 : vector<1x1x16xf32> to vector<1x16xf32>
    %371 = vector.broadcast %370 : vector<1x16xf32> to vector<4x16xf32>
    %372 = arith.addf %368, %371 : vector<4x16xf32>
    %cst_268 = arith.constant dense<0.000000e+00> : vector<1x4xf32>
    %373 = tpu.matmul %358, %365, %cst_268 {dimension_numbers = #tpu.dot_dimension_numbers<[1], [1], [0], [0], [0, 0, 1, 0], [], []>} : vector<1x16xf32>, vector<4x16xf32>, vector<1x4xf32> -> vector<1x4xf32>
    %cst_269 = arith.constant dense<0xFF800000> : vector<1xf32>
    %374 = vector.multi_reduction <maximumf>, %373, %cst_269 [1] : vector<1x4xf32> to vector<1xf32>
    %375 = vector.shape_cast %374 : vector<1xf32> to vector<1x1xf32>
    %376 = vector.broadcast %375 : vector<1x1xf32> to vector<1x4xf32>
    %377 = arith.subf %373, %376 : vector<1x4xf32>
    %378 = math.exp %377 : vector<1x4xf32>
    %cst_270 = arith.constant dense<0.000000e+00> : vector<1xf32>
    %379 = vector.multi_reduction <add>, %378, %cst_270 [1] : vector<1x4xf32> to vector<1xf32>
    %380 = vector.shape_cast %379 : vector<1xf32> to vector<1x1xf32>
    %381 = vector.broadcast %380 : vector<1x1xf32> to vector<1x4xf32>
    %382 = arith.divf %378, %381 : vector<1x4xf32>
    %cst_271 = arith.constant dense<0.000000e+00> : vector<4xf32>
    %383 = vector.multi_reduction <add>, %382, %cst_271 [0] : vector<1x4xf32> to vector<4xf32>
    %384 = vector.shape_cast %383 : vector<4xf32> to vector<1x4xf32>
    %cst_272 = arith.constant 1.000000e+00 : f32
    %385 = vector.broadcast %cst_272 : f32 to vector<1x4xf32>
    %386 = arith.divf %384, %385 : vector<1x4xf32>
    %cst_273 = arith.constant dense<0.000000e+00> : vector<1x16xf32>
    %387 = tpu.matmul %386, %372, %cst_273 {dimension_numbers = #tpu.dot_dimension_numbers<[1], [0], [0], [1], [0, 0, 1, 1], [], []>} : vector<1x4xf32>, vector<4x16xf32>, vector<1x16xf32> -> vector<1x16xf32>
    %c0_274 = arith.constant 0 : index
    %c0_275 = arith.constant 0 : index
    %c0_276 = arith.constant 0 : index
    %388 = vector.load %arg9[%c0_274, %c0_275, %c0_276] : memref<4x16x64xf32, #tpu.memory_space<vmem>>, vector<1x16x64xf32>
    %389 = vector.shape_cast %388 : vector<1x16x64xf32> to vector<16x64xf32>
    %cst_277 = arith.constant dense<0.000000e+00> : vector<1x64xf32>
    %390 = tpu.matmul %387, %389, %cst_277 {dimension_numbers = #tpu.dot_dimension_numbers<[1], [0], [0], [1], [0, 0, 1, 1], [], []>} : vector<1x16xf32>, vector<16x64xf32>, vector<1x64xf32> -> vector<1x64xf32>
    %391 = arith.addf %350, %390 : vector<1x64xf32>
    %c1_278 = arith.constant 1 : index
    %c0_279 = arith.constant 0 : index
    %c0_280 = arith.constant 0 : index
    %392 = vector.load %arg7[%c1_278, %c0_279, %c0_280] : memref<12x64x16xf32, #tpu.memory_space<vmem>>, vector<1x64x16xf32>
    %393 = vector.shape_cast %392 : vector<1x64x16xf32> to vector<64x16xf32>
    %cst_281 = arith.constant dense<0.000000e+00> : vector<1x16xf32>
    %394 = tpu.matmul %8, %393, %cst_281 {dimension_numbers = #tpu.dot_dimension_numbers<[1], [0], [0], [1], [0, 0, 1, 1], [], []>} : vector<1x64xf32>, vector<64x16xf32>, vector<1x16xf32> -> vector<1x16xf32>
    %c1_282 = arith.constant 1 : index
    %c0_283 = arith.constant 0 : index
    %c0_284 = arith.constant 0 : index
    %395 = vector.load %arg8[%c1_282, %c0_283, %c0_284] : memref<12x1x16xf32, #tpu.memory_space<vmem>>, vector<1x1x16xf32>
    %396 = vector.shape_cast %395 : vector<1x1x16xf32> to vector<1x16xf32>
    %397 = arith.addf %394, %396 : vector<1x16xf32>
    %cst_285 = arith.constant 2.500000e-01 : f32
    %398 = vector.broadcast %cst_285 : f32 to vector<1x16xf32>
    %399 = arith.mulf %397, %398 : vector<1x16xf32>
    %c5_286 = arith.constant 5 : index
    %c0_287 = arith.constant 0 : index
    %c0_288 = arith.constant 0 : index
    %400 = vector.load %arg7[%c5_286, %c0_287, %c0_288] : memref<12x64x16xf32, #tpu.memory_space<vmem>>, vector<1x64x16xf32>
    %401 = vector.shape_cast %400 : vector<1x64x16xf32> to vector<64x16xf32>
    %cst_289 = arith.constant dense<0.000000e+00> : vector<4x16xf32>
    %402 = tpu.matmul %9, %401, %cst_289 {dimension_numbers = #tpu.dot_dimension_numbers<[1], [0], [0], [1], [0, 0, 1, 1], [], []>} : vector<4x64xf32>, vector<64x16xf32>, vector<4x16xf32> -> vector<4x16xf32>
    %c5_290 = arith.constant 5 : index
    %c0_291 = arith.constant 0 : index
    %c0_292 = arith.constant 0 : index
    %403 = vector.load %arg8[%c5_290, %c0_291, %c0_292] : memref<12x1x16xf32, #tpu.memory_space<vmem>>, vector<1x1x16xf32>
    %404 = vector.shape_cast %403 : vector<1x1x16xf32> to vector<1x16xf32>
    %405 = vector.broadcast %404 : vector<1x16xf32> to vector<4x16xf32>
    %406 = arith.addf %402, %405 : vector<4x16xf32>
    %c9_293 = arith.constant 9 : index
    %c0_294 = arith.constant 0 : index
    %c0_295 = arith.constant 0 : index
    %407 = vector.load %arg7[%c9_293, %c0_294, %c0_295] : memref<12x64x16xf32, #tpu.memory_space<vmem>>, vector<1x64x16xf32>
    %408 = vector.shape_cast %407 : vector<1x64x16xf32> to vector<64x16xf32>
    %cst_296 = arith.constant dense<0.000000e+00> : vector<4x16xf32>
    %409 = tpu.matmul %9, %408, %cst_296 {dimension_numbers = #tpu.dot_dimension_numbers<[1], [0], [0], [1], [0, 0, 1, 1], [], []>} : vector<4x64xf32>, vector<64x16xf32>, vector<4x16xf32> -> vector<4x16xf32>
    %c9_297 = arith.constant 9 : index
    %c0_298 = arith.constant 0 : index
    %c0_299 = arith.constant 0 : index
    %410 = vector.load %arg8[%c9_297, %c0_298, %c0_299] : memref<12x1x16xf32, #tpu.memory_space<vmem>>, vector<1x1x16xf32>
    %411 = vector.shape_cast %410 : vector<1x1x16xf32> to vector<1x16xf32>
    %412 = vector.broadcast %411 : vector<1x16xf32> to vector<4x16xf32>
    %413 = arith.addf %409, %412 : vector<4x16xf32>
    %cst_300 = arith.constant dense<0.000000e+00> : vector<1x4xf32>
    %414 = tpu.matmul %399, %406, %cst_300 {dimension_numbers = #tpu.dot_dimension_numbers<[1], [1], [0], [0], [0, 0, 1, 0], [], []>} : vector<1x16xf32>, vector<4x16xf32>, vector<1x4xf32> -> vector<1x4xf32>
    %cst_301 = arith.constant dense<0xFF800000> : vector<1xf32>
    %415 = vector.multi_reduction <maximumf>, %414, %cst_301 [1] : vector<1x4xf32> to vector<1xf32>
    %416 = vector.shape_cast %415 : vector<1xf32> to vector<1x1xf32>
    %417 = vector.broadcast %416 : vector<1x1xf32> to vector<1x4xf32>
    %418 = arith.subf %414, %417 : vector<1x4xf32>
    %419 = math.exp %418 : vector<1x4xf32>
    %cst_302 = arith.constant dense<0.000000e+00> : vector<1xf32>
    %420 = vector.multi_reduction <add>, %419, %cst_302 [1] : vector<1x4xf32> to vector<1xf32>
    %421 = vector.shape_cast %420 : vector<1xf32> to vector<1x1xf32>
    %422 = vector.broadcast %421 : vector<1x1xf32> to vector<1x4xf32>
    %423 = arith.divf %419, %422 : vector<1x4xf32>
    %cst_303 = arith.constant dense<0.000000e+00> : vector<4xf32>
    %424 = vector.multi_reduction <add>, %423, %cst_303 [0] : vector<1x4xf32> to vector<4xf32>
    %425 = vector.shape_cast %424 : vector<4xf32> to vector<1x4xf32>
    %cst_304 = arith.constant 1.000000e+00 : f32
    %426 = vector.broadcast %cst_304 : f32 to vector<1x4xf32>
    %427 = arith.divf %425, %426 : vector<1x4xf32>
    %cst_305 = arith.constant dense<0.000000e+00> : vector<1x16xf32>
    %428 = tpu.matmul %427, %413, %cst_305 {dimension_numbers = #tpu.dot_dimension_numbers<[1], [0], [0], [1], [0, 0, 1, 1], [], []>} : vector<1x4xf32>, vector<4x16xf32>, vector<1x16xf32> -> vector<1x16xf32>
    %c1_306 = arith.constant 1 : index
    %c0_307 = arith.constant 0 : index
    %c0_308 = arith.constant 0 : index
    %429 = vector.load %arg9[%c1_306, %c0_307, %c0_308] : memref<4x16x64xf32, #tpu.memory_space<vmem>>, vector<1x16x64xf32>
    %430 = vector.shape_cast %429 : vector<1x16x64xf32> to vector<16x64xf32>
    %cst_309 = arith.constant dense<0.000000e+00> : vector<1x64xf32>
    %431 = tpu.matmul %428, %430, %cst_309 {dimension_numbers = #tpu.dot_dimension_numbers<[1], [0], [0], [1], [0, 0, 1, 1], [], []>} : vector<1x16xf32>, vector<16x64xf32>, vector<1x64xf32> -> vector<1x64xf32>
    %432 = arith.addf %391, %431 : vector<1x64xf32>
    %c2_310 = arith.constant 2 : index
    %c0_311 = arith.constant 0 : index
    %c0_312 = arith.constant 0 : index
    %433 = vector.load %arg7[%c2_310, %c0_311, %c0_312] : memref<12x64x16xf32, #tpu.memory_space<vmem>>, vector<1x64x16xf32>
    %434 = vector.shape_cast %433 : vector<1x64x16xf32> to vector<64x16xf32>
    %cst_313 = arith.constant dense<0.000000e+00> : vector<1x16xf32>
    %435 = tpu.matmul %8, %434, %cst_313 {dimension_numbers = #tpu.dot_dimension_numbers<[1], [0], [0], [1], [0, 0, 1, 1], [], []>} : vector<1x64xf32>, vector<64x16xf32>, vector<1x16xf32> -> vector<1x16xf32>
    %c2_314 = arith.constant 2 : index
    %c0_315 = arith.constant 0 : index
    %c0_316 = arith.constant 0 : index
    %436 = vector.load %arg8[%c2_314, %c0_315, %c0_316] : memref<12x1x16xf32, #tpu.memory_space<vmem>>, vector<1x1x16xf32>
    %437 = vector.shape_cast %436 : vector<1x1x16xf32> to vector<1x16xf32>
    %438 = arith.addf %435, %437 : vector<1x16xf32>
    %cst_317 = arith.constant 2.500000e-01 : f32
    %439 = vector.broadcast %cst_317 : f32 to vector<1x16xf32>
    %440 = arith.mulf %438, %439 : vector<1x16xf32>
    %c6_318 = arith.constant 6 : index
    %c0_319 = arith.constant 0 : index
    %c0_320 = arith.constant 0 : index
    %441 = vector.load %arg7[%c6_318, %c0_319, %c0_320] : memref<12x64x16xf32, #tpu.memory_space<vmem>>, vector<1x64x16xf32>
    %442 = vector.shape_cast %441 : vector<1x64x16xf32> to vector<64x16xf32>
    %cst_321 = arith.constant dense<0.000000e+00> : vector<4x16xf32>
    %443 = tpu.matmul %9, %442, %cst_321 {dimension_numbers = #tpu.dot_dimension_numbers<[1], [0], [0], [1], [0, 0, 1, 1], [], []>} : vector<4x64xf32>, vector<64x16xf32>, vector<4x16xf32> -> vector<4x16xf32>
    %c6_322 = arith.constant 6 : index
    %c0_323 = arith.constant 0 : index
    %c0_324 = arith.constant 0 : index
    %444 = vector.load %arg8[%c6_322, %c0_323, %c0_324] : memref<12x1x16xf32, #tpu.memory_space<vmem>>, vector<1x1x16xf32>
    %445 = vector.shape_cast %444 : vector<1x1x16xf32> to vector<1x16xf32>
    %446 = vector.broadcast %445 : vector<1x16xf32> to vector<4x16xf32>
    %447 = arith.addf %443, %446 : vector<4x16xf32>
    %c10_325 = arith.constant 10 : index
    %c0_326 = arith.constant 0 : index
    %c0_327 = arith.constant 0 : index
    %448 = vector.load %arg7[%c10_325, %c0_326, %c0_327] : memref<12x64x16xf32, #tpu.memory_space<vmem>>, vector<1x64x16xf32>
    %449 = vector.shape_cast %448 : vector<1x64x16xf32> to vector<64x16xf32>
    %cst_328 = arith.constant dense<0.000000e+00> : vector<4x16xf32>
    %450 = tpu.matmul %9, %449, %cst_328 {dimension_numbers = #tpu.dot_dimension_numbers<[1], [0], [0], [1], [0, 0, 1, 1], [], []>} : vector<4x64xf32>, vector<64x16xf32>, vector<4x16xf32> -> vector<4x16xf32>
    %c10_329 = arith.constant 10 : index
    %c0_330 = arith.constant 0 : index
    %c0_331 = arith.constant 0 : index
    %451 = vector.load %arg8[%c10_329, %c0_330, %c0_331] : memref<12x1x16xf32, #tpu.memory_space<vmem>>, vector<1x1x16xf32>
    %452 = vector.shape_cast %451 : vector<1x1x16xf32> to vector<1x16xf32>
    %453 = vector.broadcast %452 : vector<1x16xf32> to vector<4x16xf32>
    %454 = arith.addf %450, %453 : vector<4x16xf32>
    %cst_332 = arith.constant dense<0.000000e+00> : vector<1x4xf32>
    %455 = tpu.matmul %440, %447, %cst_332 {dimension_numbers = #tpu.dot_dimension_numbers<[1], [1], [0], [0], [0, 0, 1, 0], [], []>} : vector<1x16xf32>, vector<4x16xf32>, vector<1x4xf32> -> vector<1x4xf32>
    %cst_333 = arith.constant dense<0xFF800000> : vector<1xf32>
    %456 = vector.multi_reduction <maximumf>, %455, %cst_333 [1] : vector<1x4xf32> to vector<1xf32>
    %457 = vector.shape_cast %456 : vector<1xf32> to vector<1x1xf32>
    %458 = vector.broadcast %457 : vector<1x1xf32> to vector<1x4xf32>
    %459 = arith.subf %455, %458 : vector<1x4xf32>
    %460 = math.exp %459 : vector<1x4xf32>
    %cst_334 = arith.constant dense<0.000000e+00> : vector<1xf32>
    %461 = vector.multi_reduction <add>, %460, %cst_334 [1] : vector<1x4xf32> to vector<1xf32>
    %462 = vector.shape_cast %461 : vector<1xf32> to vector<1x1xf32>
    %463 = vector.broadcast %462 : vector<1x1xf32> to vector<1x4xf32>
    %464 = arith.divf %460, %463 : vector<1x4xf32>
    %cst_335 = arith.constant dense<0.000000e+00> : vector<4xf32>
    %465 = vector.multi_reduction <add>, %464, %cst_335 [0] : vector<1x4xf32> to vector<4xf32>
    %466 = vector.shape_cast %465 : vector<4xf32> to vector<1x4xf32>
    %cst_336 = arith.constant 1.000000e+00 : f32
    %467 = vector.broadcast %cst_336 : f32 to vector<1x4xf32>
    %468 = arith.divf %466, %467 : vector<1x4xf32>
    %cst_337 = arith.constant dense<0.000000e+00> : vector<1x16xf32>
    %469 = tpu.matmul %468, %454, %cst_337 {dimension_numbers = #tpu.dot_dimension_numbers<[1], [0], [0], [1], [0, 0, 1, 1], [], []>} : vector<1x4xf32>, vector<4x16xf32>, vector<1x16xf32> -> vector<1x16xf32>
    %c2_338 = arith.constant 2 : index
    %c0_339 = arith.constant 0 : index
    %c0_340 = arith.constant 0 : index
    %470 = vector.load %arg9[%c2_338, %c0_339, %c0_340] : memref<4x16x64xf32, #tpu.memory_space<vmem>>, vector<1x16x64xf32>
    %471 = vector.shape_cast %470 : vector<1x16x64xf32> to vector<16x64xf32>
    %cst_341 = arith.constant dense<0.000000e+00> : vector<1x64xf32>
    %472 = tpu.matmul %469, %471, %cst_341 {dimension_numbers = #tpu.dot_dimension_numbers<[1], [0], [0], [1], [0, 0, 1, 1], [], []>} : vector<1x16xf32>, vector<16x64xf32>, vector<1x64xf32> -> vector<1x64xf32>
    %473 = arith.addf %432, %472 : vector<1x64xf32>
    %c3_342 = arith.constant 3 : index
    %c0_343 = arith.constant 0 : index
    %c0_344 = arith.constant 0 : index
    %474 = vector.load %arg7[%c3_342, %c0_343, %c0_344] : memref<12x64x16xf32, #tpu.memory_space<vmem>>, vector<1x64x16xf32>
    %475 = vector.shape_cast %474 : vector<1x64x16xf32> to vector<64x16xf32>
    %cst_345 = arith.constant dense<0.000000e+00> : vector<1x16xf32>
    %476 = tpu.matmul %8, %475, %cst_345 {dimension_numbers = #tpu.dot_dimension_numbers<[1], [0], [0], [1], [0, 0, 1, 1], [], []>} : vector<1x64xf32>, vector<64x16xf32>, vector<1x16xf32> -> vector<1x16xf32>
    %c3_346 = arith.constant 3 : index
    %c0_347 = arith.constant 0 : index
    %c0_348 = arith.constant 0 : index
    %477 = vector.load %arg8[%c3_346, %c0_347, %c0_348] : memref<12x1x16xf32, #tpu.memory_space<vmem>>, vector<1x1x16xf32>
    %478 = vector.shape_cast %477 : vector<1x1x16xf32> to vector<1x16xf32>
    %479 = arith.addf %476, %478 : vector<1x16xf32>
    %cst_349 = arith.constant 2.500000e-01 : f32
    %480 = vector.broadcast %cst_349 : f32 to vector<1x16xf32>
    %481 = arith.mulf %479, %480 : vector<1x16xf32>
    %c7_350 = arith.constant 7 : index
    %c0_351 = arith.constant 0 : index
    %c0_352 = arith.constant 0 : index
    %482 = vector.load %arg7[%c7_350, %c0_351, %c0_352] : memref<12x64x16xf32, #tpu.memory_space<vmem>>, vector<1x64x16xf32>
    %483 = vector.shape_cast %482 : vector<1x64x16xf32> to vector<64x16xf32>
    %cst_353 = arith.constant dense<0.000000e+00> : vector<4x16xf32>
    %484 = tpu.matmul %9, %483, %cst_353 {dimension_numbers = #tpu.dot_dimension_numbers<[1], [0], [0], [1], [0, 0, 1, 1], [], []>} : vector<4x64xf32>, vector<64x16xf32>, vector<4x16xf32> -> vector<4x16xf32>
    %c7_354 = arith.constant 7 : index
    %c0_355 = arith.constant 0 : index
    %c0_356 = arith.constant 0 : index
    %485 = vector.load %arg8[%c7_354, %c0_355, %c0_356] : memref<12x1x16xf32, #tpu.memory_space<vmem>>, vector<1x1x16xf32>
    %486 = vector.shape_cast %485 : vector<1x1x16xf32> to vector<1x16xf32>
    %487 = vector.broadcast %486 : vector<1x16xf32> to vector<4x16xf32>
    %488 = arith.addf %484, %487 : vector<4x16xf32>
    %c11_357 = arith.constant 11 : index
    %c0_358 = arith.constant 0 : index
    %c0_359 = arith.constant 0 : index
    %489 = vector.load %arg7[%c11_357, %c0_358, %c0_359] : memref<12x64x16xf32, #tpu.memory_space<vmem>>, vector<1x64x16xf32>
    %490 = vector.shape_cast %489 : vector<1x64x16xf32> to vector<64x16xf32>
    %cst_360 = arith.constant dense<0.000000e+00> : vector<4x16xf32>
    %491 = tpu.matmul %9, %490, %cst_360 {dimension_numbers = #tpu.dot_dimension_numbers<[1], [0], [0], [1], [0, 0, 1, 1], [], []>} : vector<4x64xf32>, vector<64x16xf32>, vector<4x16xf32> -> vector<4x16xf32>
    %c11_361 = arith.constant 11 : index
    %c0_362 = arith.constant 0 : index
    %c0_363 = arith.constant 0 : index
    %492 = vector.load %arg8[%c11_361, %c0_362, %c0_363] : memref<12x1x16xf32, #tpu.memory_space<vmem>>, vector<1x1x16xf32>
    %493 = vector.shape_cast %492 : vector<1x1x16xf32> to vector<1x16xf32>
    %494 = vector.broadcast %493 : vector<1x16xf32> to vector<4x16xf32>
    %495 = arith.addf %491, %494 : vector<4x16xf32>
    %cst_364 = arith.constant dense<0.000000e+00> : vector<1x4xf32>
    %496 = tpu.matmul %481, %488, %cst_364 {dimension_numbers = #tpu.dot_dimension_numbers<[1], [1], [0], [0], [0, 0, 1, 0], [], []>} : vector<1x16xf32>, vector<4x16xf32>, vector<1x4xf32> -> vector<1x4xf32>
    %cst_365 = arith.constant dense<0xFF800000> : vector<1xf32>
    %497 = vector.multi_reduction <maximumf>, %496, %cst_365 [1] : vector<1x4xf32> to vector<1xf32>
    %498 = vector.shape_cast %497 : vector<1xf32> to vector<1x1xf32>
    %499 = vector.broadcast %498 : vector<1x1xf32> to vector<1x4xf32>
    %500 = arith.subf %496, %499 : vector<1x4xf32>
    %501 = math.exp %500 : vector<1x4xf32>
    %cst_366 = arith.constant dense<0.000000e+00> : vector<1xf32>
    %502 = vector.multi_reduction <add>, %501, %cst_366 [1] : vector<1x4xf32> to vector<1xf32>
    %503 = vector.shape_cast %502 : vector<1xf32> to vector<1x1xf32>
    %504 = vector.broadcast %503 : vector<1x1xf32> to vector<1x4xf32>
    %505 = arith.divf %501, %504 : vector<1x4xf32>
    %cst_367 = arith.constant dense<0.000000e+00> : vector<4xf32>
    %506 = vector.multi_reduction <add>, %505, %cst_367 [0] : vector<1x4xf32> to vector<4xf32>
    %507 = vector.shape_cast %506 : vector<4xf32> to vector<1x4xf32>
    %cst_368 = arith.constant 1.000000e+00 : f32
    %508 = vector.broadcast %cst_368 : f32 to vector<1x4xf32>
    %509 = arith.divf %507, %508 : vector<1x4xf32>
    %cst_369 = arith.constant dense<0.000000e+00> : vector<1x16xf32>
    %510 = tpu.matmul %509, %495, %cst_369 {dimension_numbers = #tpu.dot_dimension_numbers<[1], [0], [0], [1], [0, 0, 1, 1], [], []>} : vector<1x4xf32>, vector<4x16xf32>, vector<1x16xf32> -> vector<1x16xf32>
    %c3_370 = arith.constant 3 : index
    %c0_371 = arith.constant 0 : index
    %c0_372 = arith.constant 0 : index
    %511 = vector.load %arg9[%c3_370, %c0_371, %c0_372] : memref<4x16x64xf32, #tpu.memory_space<vmem>>, vector<1x16x64xf32>
    %512 = vector.shape_cast %511 : vector<1x16x64xf32> to vector<16x64xf32>
    %cst_373 = arith.constant dense<0.000000e+00> : vector<1x64xf32>
    %513 = tpu.matmul %510, %512, %cst_373 {dimension_numbers = #tpu.dot_dimension_numbers<[1], [0], [0], [1], [0, 0, 1, 1], [], []>} : vector<1x16xf32>, vector<16x64xf32>, vector<1x64xf32> -> vector<1x64xf32>
    %514 = arith.addf %473, %513 : vector<1x64xf32>
    %c0_374 = arith.constant 0 : index
    %c0_375 = arith.constant 0 : index
    %c0_376 = arith.constant 0 : index
    %515 = vector.load %arg10[%c0_374, %c0_375, %c0_376] : memref<1x1x64xf32, #tpu.memory_space<vmem>>, vector<1x1x64xf32>
    %516 = vector.shape_cast %515 : vector<1x1x64xf32> to vector<1x64xf32>
    %517 = arith.addf %514, %516 : vector<1x64xf32>
    %c0_377 = arith.constant 0 : index
    %c0_378 = arith.constant 0 : index
    %c0_379 = arith.constant 0 : index
    %518 = vector.load %arg11[%c0_377, %c0_378, %c0_379] : memref<2x32x32xf32, #tpu.memory_space<vmem>>, vector<1x32x32xf32>
    %519 = vector.shape_cast %518 : vector<1x32x32xf32> to vector<32x32xf32>
    %cst_380 = arith.constant dense<0.000000e+00> : vector<1x32xf32>
    %520 = tpu.matmul %7, %519, %cst_380 {dimension_numbers = #tpu.dot_dimension_numbers<[1], [0], [0], [1], [0, 0, 1, 1], [], []>} : vector<1x32xf32>, vector<32x32xf32>, vector<1x32xf32> -> vector<1x32xf32>
    %c1_381 = arith.constant 1 : index
    %c0_382 = arith.constant 0 : index
    %c0_383 = arith.constant 0 : index
    %521 = vector.load %arg11[%c1_381, %c0_382, %c0_383] : memref<2x32x32xf32, #tpu.memory_space<vmem>>, vector<1x32x32xf32>
    %522 = vector.shape_cast %521 : vector<1x32x32xf32> to vector<32x32xf32>
    %cst_384 = arith.constant dense<0.000000e+00> : vector<1x32xf32>
    %523 = tpu.matmul %349, %522, %cst_384 {dimension_numbers = #tpu.dot_dimension_numbers<[1], [0], [0], [1], [0, 0, 1, 1], [], []>} : vector<1x32xf32>, vector<32x32xf32>, vector<1x32xf32> -> vector<1x32xf32>
    %524 = arith.addf %520, %523 : vector<1x32xf32>
    %c0_385 = arith.constant 0 : index
    %c0_386 = arith.constant 0 : index
    %525 = vector.load %arg18[%c0_385, %c0_386] : memref<1x32xf32, #tpu.memory_space<vmem>>, vector<1x32xf32>
    %526 = arith.addf %524, %525 : vector<1x32xf32>
    %cst_387 = arith.constant 5.000000e-01 : f32
    %527 = vector.broadcast %cst_387 : f32 to vector<1x32xf32>
    %528 = arith.mulf %527, %526 : vector<1x32xf32>
    %529 = math.tanh %528 : vector<1x32xf32>
    %cst_388 = arith.constant 1.000000e+00 : f32
    %530 = vector.broadcast %cst_388 : f32 to vector<1x32xf32>
    %531 = arith.addf %529, %530 : vector<1x32xf32>
    %cst_389 = arith.constant 5.000000e-01 : f32
    %532 = vector.broadcast %cst_389 : f32 to vector<1x32xf32>
    %533 = arith.mulf %532, %531 : vector<1x32xf32>
    %534 = arith.mulf %533, %7 : vector<1x32xf32>
    %cst_390 = arith.constant 1.000000e+00 : f32
    %535 = vector.broadcast %cst_390 : f32 to vector<1x32xf32>
    %536 = arith.subf %535, %533 : vector<1x32xf32>
    %537 = arith.mulf %536, %349 : vector<1x32xf32>
    %538 = arith.addf %534, %537 : vector<1x32xf32>
    %c0_391 = arith.constant 0 : index
    %c0_392 = arith.constant 0 : index
    %c0_393 = arith.constant 0 : index
    %539 = vector.load %arg14[%c0_391, %c0_392, %c0_393] : memref<2x64x64xf32, #tpu.memory_space<vmem>>, vector<1x64x64xf32>
    %540 = vector.shape_cast %539 : vector<1x64x64xf32> to vector<64x64xf32>
    %cst_394 = arith.constant dense<0.000000e+00> : vector<1x64xf32>
    %541 = tpu.matmul %8, %540, %cst_394 {dimension_numbers = #tpu.dot_dimension_numbers<[1], [0], [0], [1], [0, 0, 1, 1], [], []>} : vector<1x64xf32>, vector<64x64xf32>, vector<1x64xf32> -> vector<1x64xf32>
    %c1_395 = arith.constant 1 : index
    %c0_396 = arith.constant 0 : index
    %c0_397 = arith.constant 0 : index
    %542 = vector.load %arg14[%c1_395, %c0_396, %c0_397] : memref<2x64x64xf32, #tpu.memory_space<vmem>>, vector<1x64x64xf32>
    %543 = vector.shape_cast %542 : vector<1x64x64xf32> to vector<64x64xf32>
    %cst_398 = arith.constant dense<0.000000e+00> : vector<1x64xf32>
    %544 = tpu.matmul %517, %543, %cst_398 {dimension_numbers = #tpu.dot_dimension_numbers<[1], [0], [0], [1], [0, 0, 1, 1], [], []>} : vector<1x64xf32>, vector<64x64xf32>, vector<1x64xf32> -> vector<1x64xf32>
    %545 = arith.addf %541, %544 : vector<1x64xf32>
    %c0_399 = arith.constant 0 : index
    %c0_400 = arith.constant 0 : index
    %546 = vector.load %arg20[%c0_399, %c0_400] : memref<1x64xf32, #tpu.memory_space<vmem>>, vector<1x64xf32>
    %547 = arith.addf %545, %546 : vector<1x64xf32>
    %cst_401 = arith.constant 5.000000e-01 : f32
    %548 = vector.broadcast %cst_401 : f32 to vector<1x64xf32>
    %549 = arith.mulf %548, %547 : vector<1x64xf32>
    %550 = math.tanh %549 : vector<1x64xf32>
    %cst_402 = arith.constant 1.000000e+00 : f32
    %551 = vector.broadcast %cst_402 : f32 to vector<1x64xf32>
    %552 = arith.addf %550, %551 : vector<1x64xf32>
    %cst_403 = arith.constant 5.000000e-01 : f32
    %553 = vector.broadcast %cst_403 : f32 to vector<1x64xf32>
    %554 = arith.mulf %553, %552 : vector<1x64xf32>
    %555 = arith.mulf %554, %8 : vector<1x64xf32>
    %cst_404 = arith.constant 1.000000e+00 : f32
    %556 = vector.broadcast %cst_404 : f32 to vector<1x64xf32>
    %557 = arith.subf %556, %554 : vector<1x64xf32>
    %558 = arith.mulf %557, %517 : vector<1x64xf32>
    %559 = arith.addf %555, %558 : vector<1x64xf32>
    %c0_405 = arith.constant 0 : index
    %c0_406 = arith.constant 0 : index
    %c0_407 = arith.constant 0 : index
    %560 = vector.load %arg12[%c0_405, %c0_406, %c0_407] : memref<2x32x32xf32, #tpu.memory_space<vmem>>, vector<1x32x32xf32>
    %561 = vector.shape_cast %560 : vector<1x32x32xf32> to vector<32x32xf32>
    %cst_408 = arith.constant dense<0.000000e+00> : vector<1x32xf32>
    %562 = tpu.matmul %538, %561, %cst_408 {dimension_numbers = #tpu.dot_dimension_numbers<[1], [0], [0], [1], [0, 0, 1, 1], [], []>} : vector<1x32xf32>, vector<32x32xf32>, vector<1x32xf32> -> vector<1x32xf32>
    %c0_409 = arith.constant 0 : index
    %c0_410 = arith.constant 0 : index
    %c0_411 = arith.constant 0 : index
    %563 = vector.load %arg19[%c0_409, %c0_410, %c0_411] : memref<5x1x32xf32, #tpu.memory_space<vmem>>, vector<1x1x32xf32>
    %564 = vector.shape_cast %563 : vector<1x1x32xf32> to vector<1x32xf32>
    %565 = arith.addf %562, %564 : vector<1x32xf32>
    %c0_412 = arith.constant 0 : index
    %c0_413 = arith.constant 0 : index
    %566 = vector.load %arg15[%c0_412, %c0_413] : memref<64x32xf32, #tpu.memory_space<vmem>>, vector<64x32xf32>
    %cst_414 = arith.constant dense<0.000000e+00> : vector<1x32xf32>
    %567 = tpu.matmul %559, %566, %cst_414 {dimension_numbers = #tpu.dot_dimension_numbers<[1], [0], [0], [1], [0, 0, 1, 1], [], []>} : vector<1x64xf32>, vector<64x32xf32>, vector<1x32xf32> -> vector<1x32xf32>
    %c1_415 = arith.constant 1 : index
    %c0_416 = arith.constant 0 : index
    %c0_417 = arith.constant 0 : index
    %568 = vector.load %arg19[%c1_415, %c0_416, %c0_417] : memref<5x1x32xf32, #tpu.memory_space<vmem>>, vector<1x1x32xf32>
    %569 = vector.shape_cast %568 : vector<1x1x32xf32> to vector<1x32xf32>
    %570 = arith.addf %567, %569 : vector<1x32xf32>
    %c0_418 = arith.constant 0 : index
    %c0_419 = arith.constant 0 : index
    %c0_420 = arith.constant 0 : index
    %571 = vector.load %arg13[%c0_418, %c0_419, %c0_420] : memref<4x32x32xf32, #tpu.memory_space<vmem>>, vector<1x32x32xf32>
    %572 = vector.shape_cast %571 : vector<1x32x32xf32> to vector<32x32xf32>
    %cst_421 = arith.constant dense<0.000000e+00> : vector<1x32xf32>
    %573 = tpu.matmul %565, %572, %cst_421 {dimension_numbers = #tpu.dot_dimension_numbers<[1], [0], [0], [1], [0, 0, 1, 1], [], []>} : vector<1x32xf32>, vector<32x32xf32>, vector<1x32xf32> -> vector<1x32xf32>
    %c1_422 = arith.constant 1 : index
    %c0_423 = arith.constant 0 : index
    %c0_424 = arith.constant 0 : index
    %574 = vector.load %arg13[%c1_422, %c0_423, %c0_424] : memref<4x32x32xf32, #tpu.memory_space<vmem>>, vector<1x32x32xf32>
    %575 = vector.shape_cast %574 : vector<1x32x32xf32> to vector<32x32xf32>
    %cst_425 = arith.constant dense<0.000000e+00> : vector<1x32xf32>
    %576 = tpu.matmul %570, %575, %cst_425 {dimension_numbers = #tpu.dot_dimension_numbers<[1], [0], [0], [1], [0, 0, 1, 1], [], []>} : vector<1x32xf32>, vector<32x32xf32>, vector<1x32xf32> -> vector<1x32xf32>
    %577 = arith.addf %573, %576 : vector<1x32xf32>
    %c2_426 = arith.constant 2 : index
    %c0_427 = arith.constant 0 : index
    %c0_428 = arith.constant 0 : index
    %578 = vector.load %arg19[%c2_426, %c0_427, %c0_428] : memref<5x1x32xf32, #tpu.memory_space<vmem>>, vector<1x1x32xf32>
    %579 = vector.shape_cast %578 : vector<1x1x32xf32> to vector<1x32xf32>
    %580 = arith.addf %577, %579 : vector<1x32xf32>
    %cst_429 = arith.constant 5.000000e-01 : f32
    %581 = vector.broadcast %cst_429 : f32 to vector<1x32xf32>
    %582 = arith.mulf %581, %580 : vector<1x32xf32>
    %583 = math.tanh %582 : vector<1x32xf32>
    %cst_430 = arith.constant 1.000000e+00 : f32
    %584 = vector.broadcast %cst_430 : f32 to vector<1x32xf32>
    %585 = arith.addf %583, %584 : vector<1x32xf32>
    %cst_431 = arith.constant 5.000000e-01 : f32
    %586 = vector.broadcast %cst_431 : f32 to vector<1x32xf32>
    %587 = arith.mulf %586, %585 : vector<1x32xf32>
    %588 = arith.mulf %587, %565 : vector<1x32xf32>
    %cst_432 = arith.constant 1.000000e+00 : f32
    %589 = vector.broadcast %cst_432 : f32 to vector<1x32xf32>
    %590 = arith.subf %589, %587 : vector<1x32xf32>
    %591 = arith.mulf %590, %570 : vector<1x32xf32>
    %592 = arith.addf %588, %591 : vector<1x32xf32>
    %c1_433 = arith.constant 1 : index
    %c0_434 = arith.constant 0 : index
    %c0_435 = arith.constant 0 : index
    %593 = vector.load %arg12[%c1_433, %c0_434, %c0_435] : memref<2x32x32xf32, #tpu.memory_space<vmem>>, vector<1x32x32xf32>
    %594 = vector.shape_cast %593 : vector<1x32x32xf32> to vector<32x32xf32>
    %cst_436 = arith.constant dense<0.000000e+00> : vector<1x32xf32>
    %595 = tpu.matmul %181, %594, %cst_436 {dimension_numbers = #tpu.dot_dimension_numbers<[1], [0], [0], [1], [0, 0, 1, 1], [], []>} : vector<1x32xf32>, vector<32x32xf32>, vector<1x32xf32> -> vector<1x32xf32>
    %c3_437 = arith.constant 3 : index
    %c0_438 = arith.constant 0 : index
    %c0_439 = arith.constant 0 : index
    %596 = vector.load %arg19[%c3_437, %c0_438, %c0_439] : memref<5x1x32xf32, #tpu.memory_space<vmem>>, vector<1x1x32xf32>
    %597 = vector.shape_cast %596 : vector<1x1x32xf32> to vector<1x32xf32>
    %598 = arith.addf %595, %597 : vector<1x32xf32>
    %c2_440 = arith.constant 2 : index
    %c0_441 = arith.constant 0 : index
    %c0_442 = arith.constant 0 : index
    %599 = vector.load %arg13[%c2_440, %c0_441, %c0_442] : memref<4x32x32xf32, #tpu.memory_space<vmem>>, vector<1x32x32xf32>
    %600 = vector.shape_cast %599 : vector<1x32x32xf32> to vector<32x32xf32>
    %cst_443 = arith.constant dense<0.000000e+00> : vector<1x32xf32>
    %601 = tpu.matmul %592, %600, %cst_443 {dimension_numbers = #tpu.dot_dimension_numbers<[1], [0], [0], [1], [0, 0, 1, 1], [], []>} : vector<1x32xf32>, vector<32x32xf32>, vector<1x32xf32> -> vector<1x32xf32>
    %c3_444 = arith.constant 3 : index
    %c0_445 = arith.constant 0 : index
    %c0_446 = arith.constant 0 : index
    %602 = vector.load %arg13[%c3_444, %c0_445, %c0_446] : memref<4x32x32xf32, #tpu.memory_space<vmem>>, vector<1x32x32xf32>
    %603 = vector.shape_cast %602 : vector<1x32x32xf32> to vector<32x32xf32>
    %cst_447 = arith.constant dense<0.000000e+00> : vector<1x32xf32>
    %604 = tpu.matmul %598, %603, %cst_447 {dimension_numbers = #tpu.dot_dimension_numbers<[1], [0], [0], [1], [0, 0, 1, 1], [], []>} : vector<1x32xf32>, vector<32x32xf32>, vector<1x32xf32> -> vector<1x32xf32>
    %605 = arith.addf %601, %604 : vector<1x32xf32>
    %c4_448 = arith.constant 4 : index
    %c0_449 = arith.constant 0 : index
    %c0_450 = arith.constant 0 : index
    %606 = vector.load %arg19[%c4_448, %c0_449, %c0_450] : memref<5x1x32xf32, #tpu.memory_space<vmem>>, vector<1x1x32xf32>
    %607 = vector.shape_cast %606 : vector<1x1x32xf32> to vector<1x32xf32>
    %608 = arith.addf %605, %607 : vector<1x32xf32>
    %cst_451 = arith.constant 5.000000e-01 : f32
    %609 = vector.broadcast %cst_451 : f32 to vector<1x32xf32>
    %610 = arith.mulf %609, %608 : vector<1x32xf32>
    %611 = math.tanh %610 : vector<1x32xf32>
    %cst_452 = arith.constant 1.000000e+00 : f32
    %612 = vector.broadcast %cst_452 : f32 to vector<1x32xf32>
    %613 = arith.addf %611, %612 : vector<1x32xf32>
    %cst_453 = arith.constant 5.000000e-01 : f32
    %614 = vector.broadcast %cst_453 : f32 to vector<1x32xf32>
    %615 = arith.mulf %614, %613 : vector<1x32xf32>
    %cst_454 = arith.constant 1.000000e+00 : f32
    %616 = vector.broadcast %cst_454 : f32 to vector<1x32xf32>
    %617 = arith.subf %616, %615 : vector<1x32xf32>
    %618 = arith.mulf %617, %598 : vector<1x32xf32>
    %619 = arith.addf %592, %618 : vector<1x32xf32>
    %c0_455 = arith.constant 0 : index
    %c0_456 = arith.constant 0 : index
    %620 = vector.load %arg16[%c0_455, %c0_456] : memref<32x64xf32, #tpu.memory_space<vmem>>, vector<32x64xf32>
    %cst_457 = arith.constant dense<0.000000e+00> : vector<1x64xf32>
    %621 = tpu.matmul %619, %620, %cst_457 {dimension_numbers = #tpu.dot_dimension_numbers<[1], [0], [0], [1], [0, 0, 1, 1], [], []>} : vector<1x32xf32>, vector<32x64xf32>, vector<1x64xf32> -> vector<1x64xf32>
    %c0_458 = arith.constant 0 : index
    %c0_459 = arith.constant 0 : index
    %622 = vector.load %arg21[%c0_458, %c0_459] : memref<1x64xf32, #tpu.memory_space<vmem>>, vector<1x64xf32>
    %623 = arith.addf %621, %622 : vector<1x64xf32>
    %cst_460 = arith.constant 0.000000e+00 : f32
    %624 = vector.broadcast %cst_460 : f32 to vector<1x64xf32>
    %625 = arith.cmpf ogt, %623, %624 : vector<1x64xf32>
    %cst_461 = arith.constant 0.00999999977 : f32
    %626 = vector.broadcast %cst_461 : f32 to vector<1x64xf32>
    %627 = arith.mulf %626, %623 : vector<1x64xf32>
    %628 = arith.select %625, %623, %627 : vector<1x64xi1>, vector<1x64xf32>
    %c0_462 = arith.constant 0 : index
    %c0_463 = arith.constant 0 : index
    %629 = vector.load %arg17[%c0_462, %c0_463] : memref<64x128xf32, #tpu.memory_space<vmem>>, vector<64x128xf32>
    %cst_464 = arith.constant dense<0.000000e+00> : vector<1x128xf32>
    %630 = tpu.matmul %628, %629, %cst_464 {dimension_numbers = #tpu.dot_dimension_numbers<[1], [0], [0], [1], [0, 0, 1, 1], [], []>} : vector<1x64xf32>, vector<64x128xf32>, vector<1x128xf32> -> vector<1x128xf32>
    %c0_465 = arith.constant 0 : index
    %c0_466 = arith.constant 0 : index
    %631 = vector.load %arg22[%c0_465, %c0_466] : memref<1x128xf32, #tpu.memory_space<vmem>>, vector<1x128xf32>
    %632 = arith.addf %630, %631 : vector<1x128xf32>
    %c0_467 = arith.constant 0 : index
    %c0_468 = arith.constant 0 : index
    %c0_469 = arith.constant 0 : index
    %633 = vector.load %arg23[%c0_467, %c0_468, %c0_469] : memref<2x1x128xf32, #tpu.memory_space<vmem>>, vector<1x1x128xf32>
    %634 = vector.shape_cast %633 : vector<1x1x128xf32> to vector<1x128xf32>
    %635 = vector.shape_cast %632 : vector<1x128xf32> to vector<1x1x128xf32>
    tpu.vector_store %arg23[%c0_467, %c0_468, %c0_469], %635 {strides = array<i32>} : memref<2x1x128xf32, #tpu.memory_space<vmem>>, vector<1x1x128xf32>,
    %c1_470 = arith.constant 1 : index
    %c0_471 = arith.constant 0 : index
    %c0_472 = arith.constant 0 : index
    %636 = vector.load %arg1[%c1_470, %c0_471, %c0_472] : memref<2x20x32xf32, #tpu.memory_space<vmem>>, vector<1x20x32xf32>
    %637 = vector.shape_cast %636 : vector<1x20x32xf32> to vector<20x32xf32>
    %c1_473 = arith.constant 1 : index
    %c0_474 = arith.constant 0 : index
    %c0_475 = arith.constant 0 : index
    %638 = vector.load %arg2[%c1_473, %c0_474, %c0_475] : memref<2x12x64xf32, #tpu.memory_space<vmem>>, vector<1x12x64xf32>
    %639 = vector.shape_cast %638 : vector<1x12x64xf32> to vector<12x64xf32>
    %640 = vector.extract_strided_slice %637 {offsets = [0, 0], sizes = [8, 32], strides = [1, 1]} : vector<20x32xf32> to vector<8x32xf32>
    %641 = vector.extract_strided_slice %637 {offsets = [8, 0], sizes = [8, 32], strides = [1, 1]} : vector<20x32xf32> to vector<8x32xf32>
    %642 = vector.extract_strided_slice %637 {offsets = [16, 0], sizes = [4, 32], strides = [1, 1]} : vector<20x32xf32> to vector<4x32xf32>
    %643 = vector.extract_strided_slice %640 {offsets = [0, 0], sizes = [1, 32], strides = [1, 1]} : vector<8x32xf32> to vector<1x32xf32>
    %644 = vector.extract_strided_slice %639 {offsets = [0, 0], sizes = [1, 64], strides = [1, 1]} : vector<12x64xf32> to vector<1x64xf32>
    %645 = vector.extract_strided_slice %639 {offsets = [8, 0], sizes = [4, 64], strides = [1, 1]} : vector<12x64xf32> to vector<4x64xf32>
    %cst_476 = arith.constant 0.000000e+00 : f32
    %646 = vector.broadcast %cst_476 : f32 to vector<1x32xf32>
    %c0_477 = arith.constant 0 : index
    %c0_478 = arith.constant 0 : index
    %c0_479 = arith.constant 0 : index
    %647 = vector.load %arg3[%c0_477, %c0_478, %c0_479] : memref<24x32x8xf32, #tpu.memory_space<vmem>>, vector<1x32x8xf32>
    %648 = vector.shape_cast %647 : vector<1x32x8xf32> to vector<32x8xf32>
    %cst_480 = arith.constant dense<0.000000e+00> : vector<8x8xf32>
    %649 = tpu.matmul %640, %648, %cst_480 {dimension_numbers = #tpu.dot_dimension_numbers<[1], [0], [0], [1], [0, 0, 1, 1], [], []>} : vector<8x32xf32>, vector<32x8xf32>, vector<8x8xf32> -> vector<8x8xf32>
    %c0_481 = arith.constant 0 : index
    %c0_482 = arith.constant 0 : index
    %c0_483 = arith.constant 0 : index
    %650 = vector.load %arg4[%c0_481, %c0_482, %c0_483] : memref<24x1x8xf32, #tpu.memory_space<vmem>>, vector<1x1x8xf32>
    %651 = vector.shape_cast %650 : vector<1x1x8xf32> to vector<1x8xf32>
    %652 = vector.broadcast %651 : vector<1x8xf32> to vector<8x8xf32>
    %653 = arith.addf %649, %652 : vector<8x8xf32>
    %cst_484 = arith.constant 0.353553385 : f32
    %654 = vector.broadcast %cst_484 : f32 to vector<8x8xf32>
    %655 = arith.mulf %653, %654 : vector<8x8xf32>
    %c4_485 = arith.constant 4 : index
    %c0_486 = arith.constant 0 : index
    %c0_487 = arith.constant 0 : index
    %656 = vector.load %arg3[%c4_485, %c0_486, %c0_487] : memref<24x32x8xf32, #tpu.memory_space<vmem>>, vector<1x32x8xf32>
    %657 = vector.shape_cast %656 : vector<1x32x8xf32> to vector<32x8xf32>
    %cst_488 = arith.constant dense<0.000000e+00> : vector<8x8xf32>
    %658 = tpu.matmul %641, %657, %cst_488 {dimension_numbers = #tpu.dot_dimension_numbers<[1], [0], [0], [1], [0, 0, 1, 1], [], []>} : vector<8x32xf32>, vector<32x8xf32>, vector<8x8xf32> -> vector<8x8xf32>
    %c4_489 = arith.constant 4 : index
    %c0_490 = arith.constant 0 : index
    %c0_491 = arith.constant 0 : index
    %659 = vector.load %arg4[%c4_489, %c0_490, %c0_491] : memref<24x1x8xf32, #tpu.memory_space<vmem>>, vector<1x1x8xf32>
    %660 = vector.shape_cast %659 : vector<1x1x8xf32> to vector<1x8xf32>
    %661 = vector.broadcast %660 : vector<1x8xf32> to vector<8x8xf32>
    %662 = arith.addf %658, %661 : vector<8x8xf32>
    %c8_492 = arith.constant 8 : index
    %c0_493 = arith.constant 0 : index
    %c0_494 = arith.constant 0 : index
    %663 = vector.load %arg3[%c8_492, %c0_493, %c0_494] : memref<24x32x8xf32, #tpu.memory_space<vmem>>, vector<1x32x8xf32>
    %664 = vector.shape_cast %663 : vector<1x32x8xf32> to vector<32x8xf32>
    %cst_495 = arith.constant dense<0.000000e+00> : vector<8x8xf32>
    %665 = tpu.matmul %641, %664, %cst_495 {dimension_numbers = #tpu.dot_dimension_numbers<[1], [0], [0], [1], [0, 0, 1, 1], [], []>} : vector<8x32xf32>, vector<32x8xf32>, vector<8x8xf32> -> vector<8x8xf32>
    %c8_496 = arith.constant 8 : index
    %c0_497 = arith.constant 0 : index
    %c0_498 = arith.constant 0 : index
    %666 = vector.load %arg4[%c8_496, %c0_497, %c0_498] : memref<24x1x8xf32, #tpu.memory_space<vmem>>, vector<1x1x8xf32>
    %667 = vector.shape_cast %666 : vector<1x1x8xf32> to vector<1x8xf32>
    %668 = vector.broadcast %667 : vector<1x8xf32> to vector<8x8xf32>
    %669 = arith.addf %665, %668 : vector<8x8xf32>
    %cst_499 = arith.constant dense<0.000000e+00> : vector<8x8xf32>
    %670 = tpu.matmul %655, %662, %cst_499 {dimension_numbers = #tpu.dot_dimension_numbers<[1], [1], [0], [0], [0, 0, 1, 0], [], []>} : vector<8x8xf32>, vector<8x8xf32>, vector<8x8xf32> -> vector<8x8xf32>
    %cst_500 = arith.constant dense<0xFF800000> : vector<8xf32>
    %671 = vector.multi_reduction <maximumf>, %670, %cst_500 [1] : vector<8x8xf32> to vector<8xf32>
    %672 = vector.shape_cast %671 : vector<8xf32> to vector<8x1xf32>
    %673 = vector.broadcast %672 : vector<8x1xf32> to vector<8x8xf32>
    %674 = arith.subf %670, %673 : vector<8x8xf32>
    %675 = math.exp %674 : vector<8x8xf32>
    %cst_501 = arith.constant dense<0.000000e+00> : vector<8xf32>
    %676 = vector.multi_reduction <add>, %675, %cst_501 [1] : vector<8x8xf32> to vector<8xf32>
    %677 = vector.shape_cast %676 : vector<8xf32> to vector<8x1xf32>
    %678 = vector.broadcast %677 : vector<8x1xf32> to vector<8x8xf32>
    %679 = arith.divf %675, %678 : vector<8x8xf32>
    %cst_502 = arith.constant dense<0.000000e+00> : vector<8xf32>
    %680 = vector.multi_reduction <add>, %679, %cst_502 [0] : vector<8x8xf32> to vector<8xf32>
    %681 = vector.shape_cast %680 : vector<8xf32> to vector<1x8xf32>
    %cst_503 = arith.constant 8.000000e+00 : f32
    %682 = vector.broadcast %cst_503 : f32 to vector<1x8xf32>
    %683 = arith.divf %681, %682 : vector<1x8xf32>
    %cst_504 = arith.constant dense<0.000000e+00> : vector<1x8xf32>
    %684 = tpu.matmul %683, %669, %cst_504 {dimension_numbers = #tpu.dot_dimension_numbers<[1], [0], [0], [1], [0, 0, 1, 1], [], []>} : vector<1x8xf32>, vector<8x8xf32>, vector<1x8xf32> -> vector<1x8xf32>
    %c0_505 = arith.constant 0 : index
    %c0_506 = arith.constant 0 : index
    %c0_507 = arith.constant 0 : index
    %685 = vector.load %arg5[%c0_505, %c0_506, %c0_507] : memref<8x8x32xf32, #tpu.memory_space<vmem>>, vector<1x8x32xf32>
    %686 = vector.shape_cast %685 : vector<1x8x32xf32> to vector<8x32xf32>
    %cst_508 = arith.constant dense<0.000000e+00> : vector<1x32xf32>
    %687 = tpu.matmul %684, %686, %cst_508 {dimension_numbers = #tpu.dot_dimension_numbers<[1], [0], [0], [1], [0, 0, 1, 1], [], []>} : vector<1x8xf32>, vector<8x32xf32>, vector<1x32xf32> -> vector<1x32xf32>
    %688 = arith.addf %646, %687 : vector<1x32xf32>
    %c1_509 = arith.constant 1 : index
    %c0_510 = arith.constant 0 : index
    %c0_511 = arith.constant 0 : index
    %689 = vector.load %arg3[%c1_509, %c0_510, %c0_511] : memref<24x32x8xf32, #tpu.memory_space<vmem>>, vector<1x32x8xf32>
    %690 = vector.shape_cast %689 : vector<1x32x8xf32> to vector<32x8xf32>
    %cst_512 = arith.constant dense<0.000000e+00> : vector<8x8xf32>
    %691 = tpu.matmul %640, %690, %cst_512 {dimension_numbers = #tpu.dot_dimension_numbers<[1], [0], [0], [1], [0, 0, 1, 1], [], []>} : vector<8x32xf32>, vector<32x8xf32>, vector<8x8xf32> -> vector<8x8xf32>
    %c1_513 = arith.constant 1 : index
    %c0_514 = arith.constant 0 : index
    %c0_515 = arith.constant 0 : index
    %692 = vector.load %arg4[%c1_513, %c0_514, %c0_515] : memref<24x1x8xf32, #tpu.memory_space<vmem>>, vector<1x1x8xf32>
    %693 = vector.shape_cast %692 : vector<1x1x8xf32> to vector<1x8xf32>
    %694 = vector.broadcast %693 : vector<1x8xf32> to vector<8x8xf32>
    %695 = arith.addf %691, %694 : vector<8x8xf32>
    %cst_516 = arith.constant 0.353553385 : f32
    %696 = vector.broadcast %cst_516 : f32 to vector<8x8xf32>
    %697 = arith.mulf %695, %696 : vector<8x8xf32>
    %c5_517 = arith.constant 5 : index
    %c0_518 = arith.constant 0 : index
    %c0_519 = arith.constant 0 : index
    %698 = vector.load %arg3[%c5_517, %c0_518, %c0_519] : memref<24x32x8xf32, #tpu.memory_space<vmem>>, vector<1x32x8xf32>
    %699 = vector.shape_cast %698 : vector<1x32x8xf32> to vector<32x8xf32>
    %cst_520 = arith.constant dense<0.000000e+00> : vector<8x8xf32>
    %700 = tpu.matmul %641, %699, %cst_520 {dimension_numbers = #tpu.dot_dimension_numbers<[1], [0], [0], [1], [0, 0, 1, 1], [], []>} : vector<8x32xf32>, vector<32x8xf32>, vector<8x8xf32> -> vector<8x8xf32>
    %c5_521 = arith.constant 5 : index
    %c0_522 = arith.constant 0 : index
    %c0_523 = arith.constant 0 : index
    %701 = vector.load %arg4[%c5_521, %c0_522, %c0_523] : memref<24x1x8xf32, #tpu.memory_space<vmem>>, vector<1x1x8xf32>
    %702 = vector.shape_cast %701 : vector<1x1x8xf32> to vector<1x8xf32>
    %703 = vector.broadcast %702 : vector<1x8xf32> to vector<8x8xf32>
    %704 = arith.addf %700, %703 : vector<8x8xf32>
    %c9_524 = arith.constant 9 : index
    %c0_525 = arith.constant 0 : index
    %c0_526 = arith.constant 0 : index
    %705 = vector.load %arg3[%c9_524, %c0_525, %c0_526] : memref<24x32x8xf32, #tpu.memory_space<vmem>>, vector<1x32x8xf32>
    %706 = vector.shape_cast %705 : vector<1x32x8xf32> to vector<32x8xf32>
    %cst_527 = arith.constant dense<0.000000e+00> : vector<8x8xf32>
    %707 = tpu.matmul %641, %706, %cst_527 {dimension_numbers = #tpu.dot_dimension_numbers<[1], [0], [0], [1], [0, 0, 1, 1], [], []>} : vector<8x32xf32>, vector<32x8xf32>, vector<8x8xf32> -> vector<8x8xf32>
    %c9_528 = arith.constant 9 : index
    %c0_529 = arith.constant 0 : index
    %c0_530 = arith.constant 0 : index
    %708 = vector.load %arg4[%c9_528, %c0_529, %c0_530] : memref<24x1x8xf32, #tpu.memory_space<vmem>>, vector<1x1x8xf32>
    %709 = vector.shape_cast %708 : vector<1x1x8xf32> to vector<1x8xf32>
    %710 = vector.broadcast %709 : vector<1x8xf32> to vector<8x8xf32>
    %711 = arith.addf %707, %710 : vector<8x8xf32>
    %cst_531 = arith.constant dense<0.000000e+00> : vector<8x8xf32>
    %712 = tpu.matmul %697, %704, %cst_531 {dimension_numbers = #tpu.dot_dimension_numbers<[1], [1], [0], [0], [0, 0, 1, 0], [], []>} : vector<8x8xf32>, vector<8x8xf32>, vector<8x8xf32> -> vector<8x8xf32>
    %cst_532 = arith.constant dense<0xFF800000> : vector<8xf32>
    %713 = vector.multi_reduction <maximumf>, %712, %cst_532 [1] : vector<8x8xf32> to vector<8xf32>
    %714 = vector.shape_cast %713 : vector<8xf32> to vector<8x1xf32>
    %715 = vector.broadcast %714 : vector<8x1xf32> to vector<8x8xf32>
    %716 = arith.subf %712, %715 : vector<8x8xf32>
    %717 = math.exp %716 : vector<8x8xf32>
    %cst_533 = arith.constant dense<0.000000e+00> : vector<8xf32>
    %718 = vector.multi_reduction <add>, %717, %cst_533 [1] : vector<8x8xf32> to vector<8xf32>
    %719 = vector.shape_cast %718 : vector<8xf32> to vector<8x1xf32>
    %720 = vector.broadcast %719 : vector<8x1xf32> to vector<8x8xf32>
    %721 = arith.divf %717, %720 : vector<8x8xf32>
    %cst_534 = arith.constant dense<0.000000e+00> : vector<8xf32>
    %722 = vector.multi_reduction <add>, %721, %cst_534 [0] : vector<8x8xf32> to vector<8xf32>
    %723 = vector.shape_cast %722 : vector<8xf32> to vector<1x8xf32>
    %cst_535 = arith.constant 8.000000e+00 : f32
    %724 = vector.broadcast %cst_535 : f32 to vector<1x8xf32>
    %725 = arith.divf %723, %724 : vector<1x8xf32>
    %cst_536 = arith.constant dense<0.000000e+00> : vector<1x8xf32>
    %726 = tpu.matmul %725, %711, %cst_536 {dimension_numbers = #tpu.dot_dimension_numbers<[1], [0], [0], [1], [0, 0, 1, 1], [], []>} : vector<1x8xf32>, vector<8x8xf32>, vector<1x8xf32> -> vector<1x8xf32>
    %c1_537 = arith.constant 1 : index
    %c0_538 = arith.constant 0 : index
    %c0_539 = arith.constant 0 : index
    %727 = vector.load %arg5[%c1_537, %c0_538, %c0_539] : memref<8x8x32xf32, #tpu.memory_space<vmem>>, vector<1x8x32xf32>
    %728 = vector.shape_cast %727 : vector<1x8x32xf32> to vector<8x32xf32>
    %cst_540 = arith.constant dense<0.000000e+00> : vector<1x32xf32>
    %729 = tpu.matmul %726, %728, %cst_540 {dimension_numbers = #tpu.dot_dimension_numbers<[1], [0], [0], [1], [0, 0, 1, 1], [], []>} : vector<1x8xf32>, vector<8x32xf32>, vector<1x32xf32> -> vector<1x32xf32>
    %730 = arith.addf %688, %729 : vector<1x32xf32>
    %c2_541 = arith.constant 2 : index
    %c0_542 = arith.constant 0 : index
    %c0_543 = arith.constant 0 : index
    %731 = vector.load %arg3[%c2_541, %c0_542, %c0_543] : memref<24x32x8xf32, #tpu.memory_space<vmem>>, vector<1x32x8xf32>
    %732 = vector.shape_cast %731 : vector<1x32x8xf32> to vector<32x8xf32>
    %cst_544 = arith.constant dense<0.000000e+00> : vector<8x8xf32>
    %733 = tpu.matmul %640, %732, %cst_544 {dimension_numbers = #tpu.dot_dimension_numbers<[1], [0], [0], [1], [0, 0, 1, 1], [], []>} : vector<8x32xf32>, vector<32x8xf32>, vector<8x8xf32> -> vector<8x8xf32>
    %c2_545 = arith.constant 2 : index
    %c0_546 = arith.constant 0 : index
    %c0_547 = arith.constant 0 : index
    %734 = vector.load %arg4[%c2_545, %c0_546, %c0_547] : memref<24x1x8xf32, #tpu.memory_space<vmem>>, vector<1x1x8xf32>
    %735 = vector.shape_cast %734 : vector<1x1x8xf32> to vector<1x8xf32>
    %736 = vector.broadcast %735 : vector<1x8xf32> to vector<8x8xf32>
    %737 = arith.addf %733, %736 : vector<8x8xf32>
    %cst_548 = arith.constant 0.353553385 : f32
    %738 = vector.broadcast %cst_548 : f32 to vector<8x8xf32>
    %739 = arith.mulf %737, %738 : vector<8x8xf32>
    %c6_549 = arith.constant 6 : index
    %c0_550 = arith.constant 0 : index
    %c0_551 = arith.constant 0 : index
    %740 = vector.load %arg3[%c6_549, %c0_550, %c0_551] : memref<24x32x8xf32, #tpu.memory_space<vmem>>, vector<1x32x8xf32>
    %741 = vector.shape_cast %740 : vector<1x32x8xf32> to vector<32x8xf32>
    %cst_552 = arith.constant dense<0.000000e+00> : vector<8x8xf32>
    %742 = tpu.matmul %641, %741, %cst_552 {dimension_numbers = #tpu.dot_dimension_numbers<[1], [0], [0], [1], [0, 0, 1, 1], [], []>} : vector<8x32xf32>, vector<32x8xf32>, vector<8x8xf32> -> vector<8x8xf32>
    %c6_553 = arith.constant 6 : index
    %c0_554 = arith.constant 0 : index
    %c0_555 = arith.constant 0 : index
    %743 = vector.load %arg4[%c6_553, %c0_554, %c0_555] : memref<24x1x8xf32, #tpu.memory_space<vmem>>, vector<1x1x8xf32>
    %744 = vector.shape_cast %743 : vector<1x1x8xf32> to vector<1x8xf32>
    %745 = vector.broadcast %744 : vector<1x8xf32> to vector<8x8xf32>
    %746 = arith.addf %742, %745 : vector<8x8xf32>
    %c10_556 = arith.constant 10 : index
    %c0_557 = arith.constant 0 : index
    %c0_558 = arith.constant 0 : index
    %747 = vector.load %arg3[%c10_556, %c0_557, %c0_558] : memref<24x32x8xf32, #tpu.memory_space<vmem>>, vector<1x32x8xf32>
    %748 = vector.shape_cast %747 : vector<1x32x8xf32> to vector<32x8xf32>
    %cst_559 = arith.constant dense<0.000000e+00> : vector<8x8xf32>
    %749 = tpu.matmul %641, %748, %cst_559 {dimension_numbers = #tpu.dot_dimension_numbers<[1], [0], [0], [1], [0, 0, 1, 1], [], []>} : vector<8x32xf32>, vector<32x8xf32>, vector<8x8xf32> -> vector<8x8xf32>
    %c10_560 = arith.constant 10 : index
    %c0_561 = arith.constant 0 : index
    %c0_562 = arith.constant 0 : index
    %750 = vector.load %arg4[%c10_560, %c0_561, %c0_562] : memref<24x1x8xf32, #tpu.memory_space<vmem>>, vector<1x1x8xf32>
    %751 = vector.shape_cast %750 : vector<1x1x8xf32> to vector<1x8xf32>
    %752 = vector.broadcast %751 : vector<1x8xf32> to vector<8x8xf32>
    %753 = arith.addf %749, %752 : vector<8x8xf32>
    %cst_563 = arith.constant dense<0.000000e+00> : vector<8x8xf32>
    %754 = tpu.matmul %739, %746, %cst_563 {dimension_numbers = #tpu.dot_dimension_numbers<[1], [1], [0], [0], [0, 0, 1, 0], [], []>} : vector<8x8xf32>, vector<8x8xf32>, vector<8x8xf32> -> vector<8x8xf32>
    %cst_564 = arith.constant dense<0xFF800000> : vector<8xf32>
    %755 = vector.multi_reduction <maximumf>, %754, %cst_564 [1] : vector<8x8xf32> to vector<8xf32>
    %756 = vector.shape_cast %755 : vector<8xf32> to vector<8x1xf32>
    %757 = vector.broadcast %756 : vector<8x1xf32> to vector<8x8xf32>
    %758 = arith.subf %754, %757 : vector<8x8xf32>
    %759 = math.exp %758 : vector<8x8xf32>
    %cst_565 = arith.constant dense<0.000000e+00> : vector<8xf32>
    %760 = vector.multi_reduction <add>, %759, %cst_565 [1] : vector<8x8xf32> to vector<8xf32>
    %761 = vector.shape_cast %760 : vector<8xf32> to vector<8x1xf32>
    %762 = vector.broadcast %761 : vector<8x1xf32> to vector<8x8xf32>
    %763 = arith.divf %759, %762 : vector<8x8xf32>
    %cst_566 = arith.constant dense<0.000000e+00> : vector<8xf32>
    %764 = vector.multi_reduction <add>, %763, %cst_566 [0] : vector<8x8xf32> to vector<8xf32>
    %765 = vector.shape_cast %764 : vector<8xf32> to vector<1x8xf32>
    %cst_567 = arith.constant 8.000000e+00 : f32
    %766 = vector.broadcast %cst_567 : f32 to vector<1x8xf32>
    %767 = arith.divf %765, %766 : vector<1x8xf32>
    %cst_568 = arith.constant dense<0.000000e+00> : vector<1x8xf32>
    %768 = tpu.matmul %767, %753, %cst_568 {dimension_numbers = #tpu.dot_dimension_numbers<[1], [0], [0], [1], [0, 0, 1, 1], [], []>} : vector<1x8xf32>, vector<8x8xf32>, vector<1x8xf32> -> vector<1x8xf32>
    %c2_569 = arith.constant 2 : index
    %c0_570 = arith.constant 0 : index
    %c0_571 = arith.constant 0 : index
    %769 = vector.load %arg5[%c2_569, %c0_570, %c0_571] : memref<8x8x32xf32, #tpu.memory_space<vmem>>, vector<1x8x32xf32>
    %770 = vector.shape_cast %769 : vector<1x8x32xf32> to vector<8x32xf32>
    %cst_572 = arith.constant dense<0.000000e+00> : vector<1x32xf32>
    %771 = tpu.matmul %768, %770, %cst_572 {dimension_numbers = #tpu.dot_dimension_numbers<[1], [0], [0], [1], [0, 0, 1, 1], [], []>} : vector<1x8xf32>, vector<8x32xf32>, vector<1x32xf32> -> vector<1x32xf32>
    %772 = arith.addf %730, %771 : vector<1x32xf32>
    %c3_573 = arith.constant 3 : index
    %c0_574 = arith.constant 0 : index
    %c0_575 = arith.constant 0 : index
    %773 = vector.load %arg3[%c3_573, %c0_574, %c0_575] : memref<24x32x8xf32, #tpu.memory_space<vmem>>, vector<1x32x8xf32>
    %774 = vector.shape_cast %773 : vector<1x32x8xf32> to vector<32x8xf32>
    %cst_576 = arith.constant dense<0.000000e+00> : vector<8x8xf32>
    %775 = tpu.matmul %640, %774, %cst_576 {dimension_numbers = #tpu.dot_dimension_numbers<[1], [0], [0], [1], [0, 0, 1, 1], [], []>} : vector<8x32xf32>, vector<32x8xf32>, vector<8x8xf32> -> vector<8x8xf32>
    %c3_577 = arith.constant 3 : index
    %c0_578 = arith.constant 0 : index
    %c0_579 = arith.constant 0 : index
    %776 = vector.load %arg4[%c3_577, %c0_578, %c0_579] : memref<24x1x8xf32, #tpu.memory_space<vmem>>, vector<1x1x8xf32>
    %777 = vector.shape_cast %776 : vector<1x1x8xf32> to vector<1x8xf32>
    %778 = vector.broadcast %777 : vector<1x8xf32> to vector<8x8xf32>
    %779 = arith.addf %775, %778 : vector<8x8xf32>
    %cst_580 = arith.constant 0.353553385 : f32
    %780 = vector.broadcast %cst_580 : f32 to vector<8x8xf32>
    %781 = arith.mulf %779, %780 : vector<8x8xf32>
    %c7_581 = arith.constant 7 : index
    %c0_582 = arith.constant 0 : index
    %c0_583 = arith.constant 0 : index
    %782 = vector.load %arg3[%c7_581, %c0_582, %c0_583] : memref<24x32x8xf32, #tpu.memory_space<vmem>>, vector<1x32x8xf32>
    %783 = vector.shape_cast %782 : vector<1x32x8xf32> to vector<32x8xf32>
    %cst_584 = arith.constant dense<0.000000e+00> : vector<8x8xf32>
    %784 = tpu.matmul %641, %783, %cst_584 {dimension_numbers = #tpu.dot_dimension_numbers<[1], [0], [0], [1], [0, 0, 1, 1], [], []>} : vector<8x32xf32>, vector<32x8xf32>, vector<8x8xf32> -> vector<8x8xf32>
    %c7_585 = arith.constant 7 : index
    %c0_586 = arith.constant 0 : index
    %c0_587 = arith.constant 0 : index
    %785 = vector.load %arg4[%c7_585, %c0_586, %c0_587] : memref<24x1x8xf32, #tpu.memory_space<vmem>>, vector<1x1x8xf32>
    %786 = vector.shape_cast %785 : vector<1x1x8xf32> to vector<1x8xf32>
    %787 = vector.broadcast %786 : vector<1x8xf32> to vector<8x8xf32>
    %788 = arith.addf %784, %787 : vector<8x8xf32>
    %c11_588 = arith.constant 11 : index
    %c0_589 = arith.constant 0 : index
    %c0_590 = arith.constant 0 : index
    %789 = vector.load %arg3[%c11_588, %c0_589, %c0_590] : memref<24x32x8xf32, #tpu.memory_space<vmem>>, vector<1x32x8xf32>
    %790 = vector.shape_cast %789 : vector<1x32x8xf32> to vector<32x8xf32>
    %cst_591 = arith.constant dense<0.000000e+00> : vector<8x8xf32>
    %791 = tpu.matmul %641, %790, %cst_591 {dimension_numbers = #tpu.dot_dimension_numbers<[1], [0], [0], [1], [0, 0, 1, 1], [], []>} : vector<8x32xf32>, vector<32x8xf32>, vector<8x8xf32> -> vector<8x8xf32>
    %c11_592 = arith.constant 11 : index
    %c0_593 = arith.constant 0 : index
    %c0_594 = arith.constant 0 : index
    %792 = vector.load %arg4[%c11_592, %c0_593, %c0_594] : memref<24x1x8xf32, #tpu.memory_space<vmem>>, vector<1x1x8xf32>
    %793 = vector.shape_cast %792 : vector<1x1x8xf32> to vector<1x8xf32>
    %794 = vector.broadcast %793 : vector<1x8xf32> to vector<8x8xf32>
    %795 = arith.addf %791, %794 : vector<8x8xf32>
    %cst_595 = arith.constant dense<0.000000e+00> : vector<8x8xf32>
    %796 = tpu.matmul %781, %788, %cst_595 {dimension_numbers = #tpu.dot_dimension_numbers<[1], [1], [0], [0], [0, 0, 1, 0], [], []>} : vector<8x8xf32>, vector<8x8xf32>, vector<8x8xf32> -> vector<8x8xf32>
    %cst_596 = arith.constant dense<0xFF800000> : vector<8xf32>
    %797 = vector.multi_reduction <maximumf>, %796, %cst_596 [1] : vector<8x8xf32> to vector<8xf32>
    %798 = vector.shape_cast %797 : vector<8xf32> to vector<8x1xf32>
    %799 = vector.broadcast %798 : vector<8x1xf32> to vector<8x8xf32>
    %800 = arith.subf %796, %799 : vector<8x8xf32>
    %801 = math.exp %800 : vector<8x8xf32>
    %cst_597 = arith.constant dense<0.000000e+00> : vector<8xf32>
    %802 = vector.multi_reduction <add>, %801, %cst_597 [1] : vector<8x8xf32> to vector<8xf32>
    %803 = vector.shape_cast %802 : vector<8xf32> to vector<8x1xf32>
    %804 = vector.broadcast %803 : vector<8x1xf32> to vector<8x8xf32>
    %805 = arith.divf %801, %804 : vector<8x8xf32>
    %cst_598 = arith.constant dense<0.000000e+00> : vector<8xf32>
    %806 = vector.multi_reduction <add>, %805, %cst_598 [0] : vector<8x8xf32> to vector<8xf32>
    %807 = vector.shape_cast %806 : vector<8xf32> to vector<1x8xf32>
    %cst_599 = arith.constant 8.000000e+00 : f32
    %808 = vector.broadcast %cst_599 : f32 to vector<1x8xf32>
    %809 = arith.divf %807, %808 : vector<1x8xf32>
    %cst_600 = arith.constant dense<0.000000e+00> : vector<1x8xf32>
    %810 = tpu.matmul %809, %795, %cst_600 {dimension_numbers = #tpu.dot_dimension_numbers<[1], [0], [0], [1], [0, 0, 1, 1], [], []>} : vector<1x8xf32>, vector<8x8xf32>, vector<1x8xf32> -> vector<1x8xf32>
    %c3_601 = arith.constant 3 : index
    %c0_602 = arith.constant 0 : index
    %c0_603 = arith.constant 0 : index
    %811 = vector.load %arg5[%c3_601, %c0_602, %c0_603] : memref<8x8x32xf32, #tpu.memory_space<vmem>>, vector<1x8x32xf32>
    %812 = vector.shape_cast %811 : vector<1x8x32xf32> to vector<8x32xf32>
    %cst_604 = arith.constant dense<0.000000e+00> : vector<1x32xf32>
    %813 = tpu.matmul %810, %812, %cst_604 {dimension_numbers = #tpu.dot_dimension_numbers<[1], [0], [0], [1], [0, 0, 1, 1], [], []>} : vector<1x8xf32>, vector<8x32xf32>, vector<1x32xf32> -> vector<1x32xf32>
    %814 = arith.addf %772, %813 : vector<1x32xf32>
    %c0_605 = arith.constant 0 : index
    %c0_606 = arith.constant 0 : index
    %c0_607 = arith.constant 0 : index
    %815 = vector.load %arg6[%c0_605, %c0_606, %c0_607] : memref<2x1x32xf32, #tpu.memory_space<vmem>>, vector<1x1x32xf32>
    %816 = vector.shape_cast %815 : vector<1x1x32xf32> to vector<1x32xf32>
    %817 = arith.addf %814, %816 : vector<1x32xf32>
    %cst_608 = arith.constant 0.000000e+00 : f32
    %818 = vector.broadcast %cst_608 : f32 to vector<1x32xf32>
    %c12_609 = arith.constant 12 : index
    %c0_610 = arith.constant 0 : index
    %c0_611 = arith.constant 0 : index
    %819 = vector.load %arg3[%c12_609, %c0_610, %c0_611] : memref<24x32x8xf32, #tpu.memory_space<vmem>>, vector<1x32x8xf32>
    %820 = vector.shape_cast %819 : vector<1x32x8xf32> to vector<32x8xf32>
    %cst_612 = arith.constant dense<0.000000e+00> : vector<1x8xf32>
    %821 = tpu.matmul %643, %820, %cst_612 {dimension_numbers = #tpu.dot_dimension_numbers<[1], [0], [0], [1], [0, 0, 1, 1], [], []>} : vector<1x32xf32>, vector<32x8xf32>, vector<1x8xf32> -> vector<1x8xf32>
    %c12_613 = arith.constant 12 : index
    %c0_614 = arith.constant 0 : index
    %c0_615 = arith.constant 0 : index
    %822 = vector.load %arg4[%c12_613, %c0_614, %c0_615] : memref<24x1x8xf32, #tpu.memory_space<vmem>>, vector<1x1x8xf32>
    %823 = vector.shape_cast %822 : vector<1x1x8xf32> to vector<1x8xf32>
    %824 = arith.addf %821, %823 : vector<1x8xf32>
    %cst_616 = arith.constant 0.353553385 : f32
    %825 = vector.broadcast %cst_616 : f32 to vector<1x8xf32>
    %826 = arith.mulf %824, %825 : vector<1x8xf32>
    %c16_617 = arith.constant 16 : index
    %c0_618 = arith.constant 0 : index
    %c0_619 = arith.constant 0 : index
    %827 = vector.load %arg3[%c16_617, %c0_618, %c0_619] : memref<24x32x8xf32, #tpu.memory_space<vmem>>, vector<1x32x8xf32>
    %828 = vector.shape_cast %827 : vector<1x32x8xf32> to vector<32x8xf32>
    %cst_620 = arith.constant dense<0.000000e+00> : vector<4x8xf32>
    %829 = tpu.matmul %642, %828, %cst_620 {dimension_numbers = #tpu.dot_dimension_numbers<[1], [0], [0], [1], [0, 0, 1, 1], [], []>} : vector<4x32xf32>, vector<32x8xf32>, vector<4x8xf32> -> vector<4x8xf32>
    %c16_621 = arith.constant 16 : index
    %c0_622 = arith.constant 0 : index
    %c0_623 = arith.constant 0 : index
    %830 = vector.load %arg4[%c16_621, %c0_622, %c0_623] : memref<24x1x8xf32, #tpu.memory_space<vmem>>, vector<1x1x8xf32>
    %831 = vector.shape_cast %830 : vector<1x1x8xf32> to vector<1x8xf32>
    %832 = vector.broadcast %831 : vector<1x8xf32> to vector<4x8xf32>
    %833 = arith.addf %829, %832 : vector<4x8xf32>
    %c20_624 = arith.constant 20 : index
    %c0_625 = arith.constant 0 : index
    %c0_626 = arith.constant 0 : index
    %834 = vector.load %arg3[%c20_624, %c0_625, %c0_626] : memref<24x32x8xf32, #tpu.memory_space<vmem>>, vector<1x32x8xf32>
    %835 = vector.shape_cast %834 : vector<1x32x8xf32> to vector<32x8xf32>
    %cst_627 = arith.constant dense<0.000000e+00> : vector<4x8xf32>
    %836 = tpu.matmul %642, %835, %cst_627 {dimension_numbers = #tpu.dot_dimension_numbers<[1], [0], [0], [1], [0, 0, 1, 1], [], []>} : vector<4x32xf32>, vector<32x8xf32>, vector<4x8xf32> -> vector<4x8xf32>
    %c20_628 = arith.constant 20 : index
    %c0_629 = arith.constant 0 : index
    %c0_630 = arith.constant 0 : index
    %837 = vector.load %arg4[%c20_628, %c0_629, %c0_630] : memref<24x1x8xf32, #tpu.memory_space<vmem>>, vector<1x1x8xf32>
    %838 = vector.shape_cast %837 : vector<1x1x8xf32> to vector<1x8xf32>
    %839 = vector.broadcast %838 : vector<1x8xf32> to vector<4x8xf32>
    %840 = arith.addf %836, %839 : vector<4x8xf32>
    %cst_631 = arith.constant dense<0.000000e+00> : vector<1x4xf32>
    %841 = tpu.matmul %826, %833, %cst_631 {dimension_numbers = #tpu.dot_dimension_numbers<[1], [1], [0], [0], [0, 0, 1, 0], [], []>} : vector<1x8xf32>, vector<4x8xf32>, vector<1x4xf32> -> vector<1x4xf32>
    %cst_632 = arith.constant dense<0xFF800000> : vector<1xf32>
    %842 = vector.multi_reduction <maximumf>, %841, %cst_632 [1] : vector<1x4xf32> to vector<1xf32>
    %843 = vector.shape_cast %842 : vector<1xf32> to vector<1x1xf32>
    %844 = vector.broadcast %843 : vector<1x1xf32> to vector<1x4xf32>
    %845 = arith.subf %841, %844 : vector<1x4xf32>
    %846 = math.exp %845 : vector<1x4xf32>
    %cst_633 = arith.constant dense<0.000000e+00> : vector<1xf32>
    %847 = vector.multi_reduction <add>, %846, %cst_633 [1] : vector<1x4xf32> to vector<1xf32>
    %848 = vector.shape_cast %847 : vector<1xf32> to vector<1x1xf32>
    %849 = vector.broadcast %848 : vector<1x1xf32> to vector<1x4xf32>
    %850 = arith.divf %846, %849 : vector<1x4xf32>
    %cst_634 = arith.constant dense<0.000000e+00> : vector<4xf32>
    %851 = vector.multi_reduction <add>, %850, %cst_634 [0] : vector<1x4xf32> to vector<4xf32>
    %852 = vector.shape_cast %851 : vector<4xf32> to vector<1x4xf32>
    %cst_635 = arith.constant 1.000000e+00 : f32
    %853 = vector.broadcast %cst_635 : f32 to vector<1x4xf32>
    %854 = arith.divf %852, %853 : vector<1x4xf32>
    %cst_636 = arith.constant dense<0.000000e+00> : vector<1x8xf32>
    %855 = tpu.matmul %854, %840, %cst_636 {dimension_numbers = #tpu.dot_dimension_numbers<[1], [0], [0], [1], [0, 0, 1, 1], [], []>} : vector<1x4xf32>, vector<4x8xf32>, vector<1x8xf32> -> vector<1x8xf32>
    %c4_637 = arith.constant 4 : index
    %c0_638 = arith.constant 0 : index
    %c0_639 = arith.constant 0 : index
    %856 = vector.load %arg5[%c4_637, %c0_638, %c0_639] : memref<8x8x32xf32, #tpu.memory_space<vmem>>, vector<1x8x32xf32>
    %857 = vector.shape_cast %856 : vector<1x8x32xf32> to vector<8x32xf32>
    %cst_640 = arith.constant dense<0.000000e+00> : vector<1x32xf32>
    %858 = tpu.matmul %855, %857, %cst_640 {dimension_numbers = #tpu.dot_dimension_numbers<[1], [0], [0], [1], [0, 0, 1, 1], [], []>} : vector<1x8xf32>, vector<8x32xf32>, vector<1x32xf32> -> vector<1x32xf32>
    %859 = arith.addf %818, %858 : vector<1x32xf32>
    %c13_641 = arith.constant 13 : index
    %c0_642 = arith.constant 0 : index
    %c0_643 = arith.constant 0 : index
    %860 = vector.load %arg3[%c13_641, %c0_642, %c0_643] : memref<24x32x8xf32, #tpu.memory_space<vmem>>, vector<1x32x8xf32>
    %861 = vector.shape_cast %860 : vector<1x32x8xf32> to vector<32x8xf32>
    %cst_644 = arith.constant dense<0.000000e+00> : vector<1x8xf32>
    %862 = tpu.matmul %643, %861, %cst_644 {dimension_numbers = #tpu.dot_dimension_numbers<[1], [0], [0], [1], [0, 0, 1, 1], [], []>} : vector<1x32xf32>, vector<32x8xf32>, vector<1x8xf32> -> vector<1x8xf32>
    %c13_645 = arith.constant 13 : index
    %c0_646 = arith.constant 0 : index
    %c0_647 = arith.constant 0 : index
    %863 = vector.load %arg4[%c13_645, %c0_646, %c0_647] : memref<24x1x8xf32, #tpu.memory_space<vmem>>, vector<1x1x8xf32>
    %864 = vector.shape_cast %863 : vector<1x1x8xf32> to vector<1x8xf32>
    %865 = arith.addf %862, %864 : vector<1x8xf32>
    %cst_648 = arith.constant 0.353553385 : f32
    %866 = vector.broadcast %cst_648 : f32 to vector<1x8xf32>
    %867 = arith.mulf %865, %866 : vector<1x8xf32>
    %c17_649 = arith.constant 17 : index
    %c0_650 = arith.constant 0 : index
    %c0_651 = arith.constant 0 : index
    %868 = vector.load %arg3[%c17_649, %c0_650, %c0_651] : memref<24x32x8xf32, #tpu.memory_space<vmem>>, vector<1x32x8xf32>
    %869 = vector.shape_cast %868 : vector<1x32x8xf32> to vector<32x8xf32>
    %cst_652 = arith.constant dense<0.000000e+00> : vector<4x8xf32>
    %870 = tpu.matmul %642, %869, %cst_652 {dimension_numbers = #tpu.dot_dimension_numbers<[1], [0], [0], [1], [0, 0, 1, 1], [], []>} : vector<4x32xf32>, vector<32x8xf32>, vector<4x8xf32> -> vector<4x8xf32>
    %c17_653 = arith.constant 17 : index
    %c0_654 = arith.constant 0 : index
    %c0_655 = arith.constant 0 : index
    %871 = vector.load %arg4[%c17_653, %c0_654, %c0_655] : memref<24x1x8xf32, #tpu.memory_space<vmem>>, vector<1x1x8xf32>
    %872 = vector.shape_cast %871 : vector<1x1x8xf32> to vector<1x8xf32>
    %873 = vector.broadcast %872 : vector<1x8xf32> to vector<4x8xf32>
    %874 = arith.addf %870, %873 : vector<4x8xf32>
    %c21_656 = arith.constant 21 : index
    %c0_657 = arith.constant 0 : index
    %c0_658 = arith.constant 0 : index
    %875 = vector.load %arg3[%c21_656, %c0_657, %c0_658] : memref<24x32x8xf32, #tpu.memory_space<vmem>>, vector<1x32x8xf32>
    %876 = vector.shape_cast %875 : vector<1x32x8xf32> to vector<32x8xf32>
    %cst_659 = arith.constant dense<0.000000e+00> : vector<4x8xf32>
    %877 = tpu.matmul %642, %876, %cst_659 {dimension_numbers = #tpu.dot_dimension_numbers<[1], [0], [0], [1], [0, 0, 1, 1], [], []>} : vector<4x32xf32>, vector<32x8xf32>, vector<4x8xf32> -> vector<4x8xf32>
    %c21_660 = arith.constant 21 : index
    %c0_661 = arith.constant 0 : index
    %c0_662 = arith.constant 0 : index
    %878 = vector.load %arg4[%c21_660, %c0_661, %c0_662] : memref<24x1x8xf32, #tpu.memory_space<vmem>>, vector<1x1x8xf32>
    %879 = vector.shape_cast %878 : vector<1x1x8xf32> to vector<1x8xf32>
    %880 = vector.broadcast %879 : vector<1x8xf32> to vector<4x8xf32>
    %881 = arith.addf %877, %880 : vector<4x8xf32>
    %cst_663 = arith.constant dense<0.000000e+00> : vector<1x4xf32>
    %882 = tpu.matmul %867, %874, %cst_663 {dimension_numbers = #tpu.dot_dimension_numbers<[1], [1], [0], [0], [0, 0, 1, 0], [], []>} : vector<1x8xf32>, vector<4x8xf32>, vector<1x4xf32> -> vector<1x4xf32>
    %cst_664 = arith.constant dense<0xFF800000> : vector<1xf32>
    %883 = vector.multi_reduction <maximumf>, %882, %cst_664 [1] : vector<1x4xf32> to vector<1xf32>
    %884 = vector.shape_cast %883 : vector<1xf32> to vector<1x1xf32>
    %885 = vector.broadcast %884 : vector<1x1xf32> to vector<1x4xf32>
    %886 = arith.subf %882, %885 : vector<1x4xf32>
    %887 = math.exp %886 : vector<1x4xf32>
    %cst_665 = arith.constant dense<0.000000e+00> : vector<1xf32>
    %888 = vector.multi_reduction <add>, %887, %cst_665 [1] : vector<1x4xf32> to vector<1xf32>
    %889 = vector.shape_cast %888 : vector<1xf32> to vector<1x1xf32>
    %890 = vector.broadcast %889 : vector<1x1xf32> to vector<1x4xf32>
    %891 = arith.divf %887, %890 : vector<1x4xf32>
    %cst_666 = arith.constant dense<0.000000e+00> : vector<4xf32>
    %892 = vector.multi_reduction <add>, %891, %cst_666 [0] : vector<1x4xf32> to vector<4xf32>
    %893 = vector.shape_cast %892 : vector<4xf32> to vector<1x4xf32>
    %cst_667 = arith.constant 1.000000e+00 : f32
    %894 = vector.broadcast %cst_667 : f32 to vector<1x4xf32>
    %895 = arith.divf %893, %894 : vector<1x4xf32>
    %cst_668 = arith.constant dense<0.000000e+00> : vector<1x8xf32>
    %896 = tpu.matmul %895, %881, %cst_668 {dimension_numbers = #tpu.dot_dimension_numbers<[1], [0], [0], [1], [0, 0, 1, 1], [], []>} : vector<1x4xf32>, vector<4x8xf32>, vector<1x8xf32> -> vector<1x8xf32>
    %c5_669 = arith.constant 5 : index
    %c0_670 = arith.constant 0 : index
    %c0_671 = arith.constant 0 : index
    %897 = vector.load %arg5[%c5_669, %c0_670, %c0_671] : memref<8x8x32xf32, #tpu.memory_space<vmem>>, vector<1x8x32xf32>
    %898 = vector.shape_cast %897 : vector<1x8x32xf32> to vector<8x32xf32>
    %cst_672 = arith.constant dense<0.000000e+00> : vector<1x32xf32>
    %899 = tpu.matmul %896, %898, %cst_672 {dimension_numbers = #tpu.dot_dimension_numbers<[1], [0], [0], [1], [0, 0, 1, 1], [], []>} : vector<1x8xf32>, vector<8x32xf32>, vector<1x32xf32> -> vector<1x32xf32>
    %900 = arith.addf %859, %899 : vector<1x32xf32>
    %c14_673 = arith.constant 14 : index
    %c0_674 = arith.constant 0 : index
    %c0_675 = arith.constant 0 : index
    %901 = vector.load %arg3[%c14_673, %c0_674, %c0_675] : memref<24x32x8xf32, #tpu.memory_space<vmem>>, vector<1x32x8xf32>
    %902 = vector.shape_cast %901 : vector<1x32x8xf32> to vector<32x8xf32>
    %cst_676 = arith.constant dense<0.000000e+00> : vector<1x8xf32>
    %903 = tpu.matmul %643, %902, %cst_676 {dimension_numbers = #tpu.dot_dimension_numbers<[1], [0], [0], [1], [0, 0, 1, 1], [], []>} : vector<1x32xf32>, vector<32x8xf32>, vector<1x8xf32> -> vector<1x8xf32>
    %c14_677 = arith.constant 14 : index
    %c0_678 = arith.constant 0 : index
    %c0_679 = arith.constant 0 : index
    %904 = vector.load %arg4[%c14_677, %c0_678, %c0_679] : memref<24x1x8xf32, #tpu.memory_space<vmem>>, vector<1x1x8xf32>
    %905 = vector.shape_cast %904 : vector<1x1x8xf32> to vector<1x8xf32>
    %906 = arith.addf %903, %905 : vector<1x8xf32>
    %cst_680 = arith.constant 0.353553385 : f32
    %907 = vector.broadcast %cst_680 : f32 to vector<1x8xf32>
    %908 = arith.mulf %906, %907 : vector<1x8xf32>
    %c18_681 = arith.constant 18 : index
    %c0_682 = arith.constant 0 : index
    %c0_683 = arith.constant 0 : index
    %909 = vector.load %arg3[%c18_681, %c0_682, %c0_683] : memref<24x32x8xf32, #tpu.memory_space<vmem>>, vector<1x32x8xf32>
    %910 = vector.shape_cast %909 : vector<1x32x8xf32> to vector<32x8xf32>
    %cst_684 = arith.constant dense<0.000000e+00> : vector<4x8xf32>
    %911 = tpu.matmul %642, %910, %cst_684 {dimension_numbers = #tpu.dot_dimension_numbers<[1], [0], [0], [1], [0, 0, 1, 1], [], []>} : vector<4x32xf32>, vector<32x8xf32>, vector<4x8xf32> -> vector<4x8xf32>
    %c18_685 = arith.constant 18 : index
    %c0_686 = arith.constant 0 : index
    %c0_687 = arith.constant 0 : index
    %912 = vector.load %arg4[%c18_685, %c0_686, %c0_687] : memref<24x1x8xf32, #tpu.memory_space<vmem>>, vector<1x1x8xf32>
    %913 = vector.shape_cast %912 : vector<1x1x8xf32> to vector<1x8xf32>
    %914 = vector.broadcast %913 : vector<1x8xf32> to vector<4x8xf32>
    %915 = arith.addf %911, %914 : vector<4x8xf32>
    %c22_688 = arith.constant 22 : index
    %c0_689 = arith.constant 0 : index
    %c0_690 = arith.constant 0 : index
    %916 = vector.load %arg3[%c22_688, %c0_689, %c0_690] : memref<24x32x8xf32, #tpu.memory_space<vmem>>, vector<1x32x8xf32>
    %917 = vector.shape_cast %916 : vector<1x32x8xf32> to vector<32x8xf32>
    %cst_691 = arith.constant dense<0.000000e+00> : vector<4x8xf32>
    %918 = tpu.matmul %642, %917, %cst_691 {dimension_numbers = #tpu.dot_dimension_numbers<[1], [0], [0], [1], [0, 0, 1, 1], [], []>} : vector<4x32xf32>, vector<32x8xf32>, vector<4x8xf32> -> vector<4x8xf32>
    %c22_692 = arith.constant 22 : index
    %c0_693 = arith.constant 0 : index
    %c0_694 = arith.constant 0 : index
    %919 = vector.load %arg4[%c22_692, %c0_693, %c0_694] : memref<24x1x8xf32, #tpu.memory_space<vmem>>, vector<1x1x8xf32>
    %920 = vector.shape_cast %919 : vector<1x1x8xf32> to vector<1x8xf32>
    %921 = vector.broadcast %920 : vector<1x8xf32> to vector<4x8xf32>
    %922 = arith.addf %918, %921 : vector<4x8xf32>
    %cst_695 = arith.constant dense<0.000000e+00> : vector<1x4xf32>
    %923 = tpu.matmul %908, %915, %cst_695 {dimension_numbers = #tpu.dot_dimension_numbers<[1], [1], [0], [0], [0, 0, 1, 0], [], []>} : vector<1x8xf32>, vector<4x8xf32>, vector<1x4xf32> -> vector<1x4xf32>
    %cst_696 = arith.constant dense<0xFF800000> : vector<1xf32>
    %924 = vector.multi_reduction <maximumf>, %923, %cst_696 [1] : vector<1x4xf32> to vector<1xf32>
    %925 = vector.shape_cast %924 : vector<1xf32> to vector<1x1xf32>
    %926 = vector.broadcast %925 : vector<1x1xf32> to vector<1x4xf32>
    %927 = arith.subf %923, %926 : vector<1x4xf32>
    %928 = math.exp %927 : vector<1x4xf32>
    %cst_697 = arith.constant dense<0.000000e+00> : vector<1xf32>
    %929 = vector.multi_reduction <add>, %928, %cst_697 [1] : vector<1x4xf32> to vector<1xf32>
    %930 = vector.shape_cast %929 : vector<1xf32> to vector<1x1xf32>
    %931 = vector.broadcast %930 : vector<1x1xf32> to vector<1x4xf32>
    %932 = arith.divf %928, %931 : vector<1x4xf32>
    %cst_698 = arith.constant dense<0.000000e+00> : vector<4xf32>
    %933 = vector.multi_reduction <add>, %932, %cst_698 [0] : vector<1x4xf32> to vector<4xf32>
    %934 = vector.shape_cast %933 : vector<4xf32> to vector<1x4xf32>
    %cst_699 = arith.constant 1.000000e+00 : f32
    %935 = vector.broadcast %cst_699 : f32 to vector<1x4xf32>
    %936 = arith.divf %934, %935 : vector<1x4xf32>
    %cst_700 = arith.constant dense<0.000000e+00> : vector<1x8xf32>
    %937 = tpu.matmul %936, %922, %cst_700 {dimension_numbers = #tpu.dot_dimension_numbers<[1], [0], [0], [1], [0, 0, 1, 1], [], []>} : vector<1x4xf32>, vector<4x8xf32>, vector<1x8xf32> -> vector<1x8xf32>
    %c6_701 = arith.constant 6 : index
    %c0_702 = arith.constant 0 : index
    %c0_703 = arith.constant 0 : index
    %938 = vector.load %arg5[%c6_701, %c0_702, %c0_703] : memref<8x8x32xf32, #tpu.memory_space<vmem>>, vector<1x8x32xf32>
    %939 = vector.shape_cast %938 : vector<1x8x32xf32> to vector<8x32xf32>
    %cst_704 = arith.constant dense<0.000000e+00> : vector<1x32xf32>
    %940 = tpu.matmul %937, %939, %cst_704 {dimension_numbers = #tpu.dot_dimension_numbers<[1], [0], [0], [1], [0, 0, 1, 1], [], []>} : vector<1x8xf32>, vector<8x32xf32>, vector<1x32xf32> -> vector<1x32xf32>
    %941 = arith.addf %900, %940 : vector<1x32xf32>
    %c15_705 = arith.constant 15 : index
    %c0_706 = arith.constant 0 : index
    %c0_707 = arith.constant 0 : index
    %942 = vector.load %arg3[%c15_705, %c0_706, %c0_707] : memref<24x32x8xf32, #tpu.memory_space<vmem>>, vector<1x32x8xf32>
    %943 = vector.shape_cast %942 : vector<1x32x8xf32> to vector<32x8xf32>
    %cst_708 = arith.constant dense<0.000000e+00> : vector<1x8xf32>
    %944 = tpu.matmul %643, %943, %cst_708 {dimension_numbers = #tpu.dot_dimension_numbers<[1], [0], [0], [1], [0, 0, 1, 1], [], []>} : vector<1x32xf32>, vector<32x8xf32>, vector<1x8xf32> -> vector<1x8xf32>
    %c15_709 = arith.constant 15 : index
    %c0_710 = arith.constant 0 : index
    %c0_711 = arith.constant 0 : index
    %945 = vector.load %arg4[%c15_709, %c0_710, %c0_711] : memref<24x1x8xf32, #tpu.memory_space<vmem>>, vector<1x1x8xf32>
    %946 = vector.shape_cast %945 : vector<1x1x8xf32> to vector<1x8xf32>
    %947 = arith.addf %944, %946 : vector<1x8xf32>
    %cst_712 = arith.constant 0.353553385 : f32
    %948 = vector.broadcast %cst_712 : f32 to vector<1x8xf32>
    %949 = arith.mulf %947, %948 : vector<1x8xf32>
    %c19_713 = arith.constant 19 : index
    %c0_714 = arith.constant 0 : index
    %c0_715 = arith.constant 0 : index
    %950 = vector.load %arg3[%c19_713, %c0_714, %c0_715] : memref<24x32x8xf32, #tpu.memory_space<vmem>>, vector<1x32x8xf32>
    %951 = vector.shape_cast %950 : vector<1x32x8xf32> to vector<32x8xf32>
    %cst_716 = arith.constant dense<0.000000e+00> : vector<4x8xf32>
    %952 = tpu.matmul %642, %951, %cst_716 {dimension_numbers = #tpu.dot_dimension_numbers<[1], [0], [0], [1], [0, 0, 1, 1], [], []>} : vector<4x32xf32>, vector<32x8xf32>, vector<4x8xf32> -> vector<4x8xf32>
    %c19_717 = arith.constant 19 : index
    %c0_718 = arith.constant 0 : index
    %c0_719 = arith.constant 0 : index
    %953 = vector.load %arg4[%c19_717, %c0_718, %c0_719] : memref<24x1x8xf32, #tpu.memory_space<vmem>>, vector<1x1x8xf32>
    %954 = vector.shape_cast %953 : vector<1x1x8xf32> to vector<1x8xf32>
    %955 = vector.broadcast %954 : vector<1x8xf32> to vector<4x8xf32>
    %956 = arith.addf %952, %955 : vector<4x8xf32>
    %c23_720 = arith.constant 23 : index
    %c0_721 = arith.constant 0 : index
    %c0_722 = arith.constant 0 : index
    %957 = vector.load %arg3[%c23_720, %c0_721, %c0_722] : memref<24x32x8xf32, #tpu.memory_space<vmem>>, vector<1x32x8xf32>
    %958 = vector.shape_cast %957 : vector<1x32x8xf32> to vector<32x8xf32>
    %cst_723 = arith.constant dense<0.000000e+00> : vector<4x8xf32>
    %959 = tpu.matmul %642, %958, %cst_723 {dimension_numbers = #tpu.dot_dimension_numbers<[1], [0], [0], [1], [0, 0, 1, 1], [], []>} : vector<4x32xf32>, vector<32x8xf32>, vector<4x8xf32> -> vector<4x8xf32>
    %c23_724 = arith.constant 23 : index
    %c0_725 = arith.constant 0 : index
    %c0_726 = arith.constant 0 : index
    %960 = vector.load %arg4[%c23_724, %c0_725, %c0_726] : memref<24x1x8xf32, #tpu.memory_space<vmem>>, vector<1x1x8xf32>
    %961 = vector.shape_cast %960 : vector<1x1x8xf32> to vector<1x8xf32>
    %962 = vector.broadcast %961 : vector<1x8xf32> to vector<4x8xf32>
    %963 = arith.addf %959, %962 : vector<4x8xf32>
    %cst_727 = arith.constant dense<0.000000e+00> : vector<1x4xf32>
    %964 = tpu.matmul %949, %956, %cst_727 {dimension_numbers = #tpu.dot_dimension_numbers<[1], [1], [0], [0], [0, 0, 1, 0], [], []>} : vector<1x8xf32>, vector<4x8xf32>, vector<1x4xf32> -> vector<1x4xf32>
    %cst_728 = arith.constant dense<0xFF800000> : vector<1xf32>
    %965 = vector.multi_reduction <maximumf>, %964, %cst_728 [1] : vector<1x4xf32> to vector<1xf32>
    %966 = vector.shape_cast %965 : vector<1xf32> to vector<1x1xf32>
    %967 = vector.broadcast %966 : vector<1x1xf32> to vector<1x4xf32>
    %968 = arith.subf %964, %967 : vector<1x4xf32>
    %969 = math.exp %968 : vector<1x4xf32>
    %cst_729 = arith.constant dense<0.000000e+00> : vector<1xf32>
    %970 = vector.multi_reduction <add>, %969, %cst_729 [1] : vector<1x4xf32> to vector<1xf32>
    %971 = vector.shape_cast %970 : vector<1xf32> to vector<1x1xf32>
    %972 = vector.broadcast %971 : vector<1x1xf32> to vector<1x4xf32>
    %973 = arith.divf %969, %972 : vector<1x4xf32>
    %cst_730 = arith.constant dense<0.000000e+00> : vector<4xf32>
    %974 = vector.multi_reduction <add>, %973, %cst_730 [0] : vector<1x4xf32> to vector<4xf32>
    %975 = vector.shape_cast %974 : vector<4xf32> to vector<1x4xf32>
    %cst_731 = arith.constant 1.000000e+00 : f32
    %976 = vector.broadcast %cst_731 : f32 to vector<1x4xf32>
    %977 = arith.divf %975, %976 : vector<1x4xf32>
    %cst_732 = arith.constant dense<0.000000e+00> : vector<1x8xf32>
    %978 = tpu.matmul %977, %963, %cst_732 {dimension_numbers = #tpu.dot_dimension_numbers<[1], [0], [0], [1], [0, 0, 1, 1], [], []>} : vector<1x4xf32>, vector<4x8xf32>, vector<1x8xf32> -> vector<1x8xf32>
    %c7_733 = arith.constant 7 : index
    %c0_734 = arith.constant 0 : index
    %c0_735 = arith.constant 0 : index
    %979 = vector.load %arg5[%c7_733, %c0_734, %c0_735] : memref<8x8x32xf32, #tpu.memory_space<vmem>>, vector<1x8x32xf32>
    %980 = vector.shape_cast %979 : vector<1x8x32xf32> to vector<8x32xf32>
    %cst_736 = arith.constant dense<0.000000e+00> : vector<1x32xf32>
    %981 = tpu.matmul %978, %980, %cst_736 {dimension_numbers = #tpu.dot_dimension_numbers<[1], [0], [0], [1], [0, 0, 1, 1], [], []>} : vector<1x8xf32>, vector<8x32xf32>, vector<1x32xf32> -> vector<1x32xf32>
    %982 = arith.addf %941, %981 : vector<1x32xf32>
    %c1_737 = arith.constant 1 : index
    %c0_738 = arith.constant 0 : index
    %c0_739 = arith.constant 0 : index
    %983 = vector.load %arg6[%c1_737, %c0_738, %c0_739] : memref<2x1x32xf32, #tpu.memory_space<vmem>>, vector<1x1x32xf32>
    %984 = vector.shape_cast %983 : vector<1x1x32xf32> to vector<1x32xf32>
    %985 = arith.addf %982, %984 : vector<1x32xf32>
    %cst_740 = arith.constant 0.000000e+00 : f32
    %986 = vector.broadcast %cst_740 : f32 to vector<1x64xf32>
    %c0_741 = arith.constant 0 : index
    %c0_742 = arith.constant 0 : index
    %c0_743 = arith.constant 0 : index
    %987 = vector.load %arg7[%c0_741, %c0_742, %c0_743] : memref<12x64x16xf32, #tpu.memory_space<vmem>>, vector<1x64x16xf32>
    %988 = vector.shape_cast %987 : vector<1x64x16xf32> to vector<64x16xf32>
    %cst_744 = arith.constant dense<0.000000e+00> : vector<1x16xf32>
    %989 = tpu.matmul %644, %988, %cst_744 {dimension_numbers = #tpu.dot_dimension_numbers<[1], [0], [0], [1], [0, 0, 1, 1], [], []>} : vector<1x64xf32>, vector<64x16xf32>, vector<1x16xf32> -> vector<1x16xf32>
    %c0_745 = arith.constant 0 : index
    %c0_746 = arith.constant 0 : index
    %c0_747 = arith.constant 0 : index
    %990 = vector.load %arg8[%c0_745, %c0_746, %c0_747] : memref<12x1x16xf32, #tpu.memory_space<vmem>>, vector<1x1x16xf32>
    %991 = vector.shape_cast %990 : vector<1x1x16xf32> to vector<1x16xf32>
    %992 = arith.addf %989, %991 : vector<1x16xf32>
    %cst_748 = arith.constant 2.500000e-01 : f32
    %993 = vector.broadcast %cst_748 : f32 to vector<1x16xf32>
    %994 = arith.mulf %992, %993 : vector<1x16xf32>
    %c4_749 = arith.constant 4 : index
    %c0_750 = arith.constant 0 : index
    %c0_751 = arith.constant 0 : index
    %995 = vector.load %arg7[%c4_749, %c0_750, %c0_751] : memref<12x64x16xf32, #tpu.memory_space<vmem>>, vector<1x64x16xf32>
    %996 = vector.shape_cast %995 : vector<1x64x16xf32> to vector<64x16xf32>
    %cst_752 = arith.constant dense<0.000000e+00> : vector<4x16xf32>
    %997 = tpu.matmul %645, %996, %cst_752 {dimension_numbers = #tpu.dot_dimension_numbers<[1], [0], [0], [1], [0, 0, 1, 1], [], []>} : vector<4x64xf32>, vector<64x16xf32>, vector<4x16xf32> -> vector<4x16xf32>
    %c4_753 = arith.constant 4 : index
    %c0_754 = arith.constant 0 : index
    %c0_755 = arith.constant 0 : index
    %998 = vector.load %arg8[%c4_753, %c0_754, %c0_755] : memref<12x1x16xf32, #tpu.memory_space<vmem>>, vector<1x1x16xf32>
    %999 = vector.shape_cast %998 : vector<1x1x16xf32> to vector<1x16xf32>
    %1000 = vector.broadcast %999 : vector<1x16xf32> to vector<4x16xf32>
    %1001 = arith.addf %997, %1000 : vector<4x16xf32>
    %c8_756 = arith.constant 8 : index
    %c0_757 = arith.constant 0 : index
    %c0_758 = arith.constant 0 : index
    %1002 = vector.load %arg7[%c8_756, %c0_757, %c0_758] : memref<12x64x16xf32, #tpu.memory_space<vmem>>, vector<1x64x16xf32>
    %1003 = vector.shape_cast %1002 : vector<1x64x16xf32> to vector<64x16xf32>
    %cst_759 = arith.constant dense<0.000000e+00> : vector<4x16xf32>
    %1004 = tpu.matmul %645, %1003, %cst_759 {dimension_numbers = #tpu.dot_dimension_numbers<[1], [0], [0], [1], [0, 0, 1, 1], [], []>} : vector<4x64xf32>, vector<64x16xf32>, vector<4x16xf32> -> vector<4x16xf32>
    %c8_760 = arith.constant 8 : index
    %c0_761 = arith.constant 0 : index
    %c0_762 = arith.constant 0 : index
    %1005 = vector.load %arg8[%c8_760, %c0_761, %c0_762] : memref<12x1x16xf32, #tpu.memory_space<vmem>>, vector<1x1x16xf32>
    %1006 = vector.shape_cast %1005 : vector<1x1x16xf32> to vector<1x16xf32>
    %1007 = vector.broadcast %1006 : vector<1x16xf32> to vector<4x16xf32>
    %1008 = arith.addf %1004, %1007 : vector<4x16xf32>
    %cst_763 = arith.constant dense<0.000000e+00> : vector<1x4xf32>
    %1009 = tpu.matmul %994, %1001, %cst_763 {dimension_numbers = #tpu.dot_dimension_numbers<[1], [1], [0], [0], [0, 0, 1, 0], [], []>} : vector<1x16xf32>, vector<4x16xf32>, vector<1x4xf32> -> vector<1x4xf32>
    %cst_764 = arith.constant dense<0xFF800000> : vector<1xf32>
    %1010 = vector.multi_reduction <maximumf>, %1009, %cst_764 [1] : vector<1x4xf32> to vector<1xf32>
    %1011 = vector.shape_cast %1010 : vector<1xf32> to vector<1x1xf32>
    %1012 = vector.broadcast %1011 : vector<1x1xf32> to vector<1x4xf32>
    %1013 = arith.subf %1009, %1012 : vector<1x4xf32>
    %1014 = math.exp %1013 : vector<1x4xf32>
    %cst_765 = arith.constant dense<0.000000e+00> : vector<1xf32>
    %1015 = vector.multi_reduction <add>, %1014, %cst_765 [1] : vector<1x4xf32> to vector<1xf32>
    %1016 = vector.shape_cast %1015 : vector<1xf32> to vector<1x1xf32>
    %1017 = vector.broadcast %1016 : vector<1x1xf32> to vector<1x4xf32>
    %1018 = arith.divf %1014, %1017 : vector<1x4xf32>
    %cst_766 = arith.constant dense<0.000000e+00> : vector<4xf32>
    %1019 = vector.multi_reduction <add>, %1018, %cst_766 [0] : vector<1x4xf32> to vector<4xf32>
    %1020 = vector.shape_cast %1019 : vector<4xf32> to vector<1x4xf32>
    %cst_767 = arith.constant 1.000000e+00 : f32
    %1021 = vector.broadcast %cst_767 : f32 to vector<1x4xf32>
    %1022 = arith.divf %1020, %1021 : vector<1x4xf32>
    %cst_768 = arith.constant dense<0.000000e+00> : vector<1x16xf32>
    %1023 = tpu.matmul %1022, %1008, %cst_768 {dimension_numbers = #tpu.dot_dimension_numbers<[1], [0], [0], [1], [0, 0, 1, 1], [], []>} : vector<1x4xf32>, vector<4x16xf32>, vector<1x16xf32> -> vector<1x16xf32>
    %c0_769 = arith.constant 0 : index
    %c0_770 = arith.constant 0 : index
    %c0_771 = arith.constant 0 : index
    %1024 = vector.load %arg9[%c0_769, %c0_770, %c0_771] : memref<4x16x64xf32, #tpu.memory_space<vmem>>, vector<1x16x64xf32>
    %1025 = vector.shape_cast %1024 : vector<1x16x64xf32> to vector<16x64xf32>
    %cst_772 = arith.constant dense<0.000000e+00> : vector<1x64xf32>
    %1026 = tpu.matmul %1023, %1025, %cst_772 {dimension_numbers = #tpu.dot_dimension_numbers<[1], [0], [0], [1], [0, 0, 1, 1], [], []>} : vector<1x16xf32>, vector<16x64xf32>, vector<1x64xf32> -> vector<1x64xf32>
    %1027 = arith.addf %986, %1026 : vector<1x64xf32>
    %c1_773 = arith.constant 1 : index
    %c0_774 = arith.constant 0 : index
    %c0_775 = arith.constant 0 : index
    %1028 = vector.load %arg7[%c1_773, %c0_774, %c0_775] : memref<12x64x16xf32, #tpu.memory_space<vmem>>, vector<1x64x16xf32>
    %1029 = vector.shape_cast %1028 : vector<1x64x16xf32> to vector<64x16xf32>
    %cst_776 = arith.constant dense<0.000000e+00> : vector<1x16xf32>
    %1030 = tpu.matmul %644, %1029, %cst_776 {dimension_numbers = #tpu.dot_dimension_numbers<[1], [0], [0], [1], [0, 0, 1, 1], [], []>} : vector<1x64xf32>, vector<64x16xf32>, vector<1x16xf32> -> vector<1x16xf32>
    %c1_777 = arith.constant 1 : index
    %c0_778 = arith.constant 0 : index
    %c0_779 = arith.constant 0 : index
    %1031 = vector.load %arg8[%c1_777, %c0_778, %c0_779] : memref<12x1x16xf32, #tpu.memory_space<vmem>>, vector<1x1x16xf32>
    %1032 = vector.shape_cast %1031 : vector<1x1x16xf32> to vector<1x16xf32>
    %1033 = arith.addf %1030, %1032 : vector<1x16xf32>
    %cst_780 = arith.constant 2.500000e-01 : f32
    %1034 = vector.broadcast %cst_780 : f32 to vector<1x16xf32>
    %1035 = arith.mulf %1033, %1034 : vector<1x16xf32>
    %c5_781 = arith.constant 5 : index
    %c0_782 = arith.constant 0 : index
    %c0_783 = arith.constant 0 : index
    %1036 = vector.load %arg7[%c5_781, %c0_782, %c0_783] : memref<12x64x16xf32, #tpu.memory_space<vmem>>, vector<1x64x16xf32>
    %1037 = vector.shape_cast %1036 : vector<1x64x16xf32> to vector<64x16xf32>
    %cst_784 = arith.constant dense<0.000000e+00> : vector<4x16xf32>
    %1038 = tpu.matmul %645, %1037, %cst_784 {dimension_numbers = #tpu.dot_dimension_numbers<[1], [0], [0], [1], [0, 0, 1, 1], [], []>} : vector<4x64xf32>, vector<64x16xf32>, vector<4x16xf32> -> vector<4x16xf32>
    %c5_785 = arith.constant 5 : index
    %c0_786 = arith.constant 0 : index
    %c0_787 = arith.constant 0 : index
    %1039 = vector.load %arg8[%c5_785, %c0_786, %c0_787] : memref<12x1x16xf32, #tpu.memory_space<vmem>>, vector<1x1x16xf32>
    %1040 = vector.shape_cast %1039 : vector<1x1x16xf32> to vector<1x16xf32>
    %1041 = vector.broadcast %1040 : vector<1x16xf32> to vector<4x16xf32>
    %1042 = arith.addf %1038, %1041 : vector<4x16xf32>
    %c9_788 = arith.constant 9 : index
    %c0_789 = arith.constant 0 : index
    %c0_790 = arith.constant 0 : index
    %1043 = vector.load %arg7[%c9_788, %c0_789, %c0_790] : memref<12x64x16xf32, #tpu.memory_space<vmem>>, vector<1x64x16xf32>
    %1044 = vector.shape_cast %1043 : vector<1x64x16xf32> to vector<64x16xf32>
    %cst_791 = arith.constant dense<0.000000e+00> : vector<4x16xf32>
    %1045 = tpu.matmul %645, %1044, %cst_791 {dimension_numbers = #tpu.dot_dimension_numbers<[1], [0], [0], [1], [0, 0, 1, 1], [], []>} : vector<4x64xf32>, vector<64x16xf32>, vector<4x16xf32> -> vector<4x16xf32>
    %c9_792 = arith.constant 9 : index
    %c0_793 = arith.constant 0 : index
    %c0_794 = arith.constant 0 : index
    %1046 = vector.load %arg8[%c9_792, %c0_793, %c0_794] : memref<12x1x16xf32, #tpu.memory_space<vmem>>, vector<1x1x16xf32>
    %1047 = vector.shape_cast %1046 : vector<1x1x16xf32> to vector<1x16xf32>
    %1048 = vector.broadcast %1047 : vector<1x16xf32> to vector<4x16xf32>
    %1049 = arith.addf %1045, %1048 : vector<4x16xf32>
    %cst_795 = arith.constant dense<0.000000e+00> : vector<1x4xf32>
    %1050 = tpu.matmul %1035, %1042, %cst_795 {dimension_numbers = #tpu.dot_dimension_numbers<[1], [1], [0], [0], [0, 0, 1, 0], [], []>} : vector<1x16xf32>, vector<4x16xf32>, vector<1x4xf32> -> vector<1x4xf32>
    %cst_796 = arith.constant dense<0xFF800000> : vector<1xf32>
    %1051 = vector.multi_reduction <maximumf>, %1050, %cst_796 [1] : vector<1x4xf32> to vector<1xf32>
    %1052 = vector.shape_cast %1051 : vector<1xf32> to vector<1x1xf32>
    %1053 = vector.broadcast %1052 : vector<1x1xf32> to vector<1x4xf32>
    %1054 = arith.subf %1050, %1053 : vector<1x4xf32>
    %1055 = math.exp %1054 : vector<1x4xf32>
    %cst_797 = arith.constant dense<0.000000e+00> : vector<1xf32>
    %1056 = vector.multi_reduction <add>, %1055, %cst_797 [1] : vector<1x4xf32> to vector<1xf32>
    %1057 = vector.shape_cast %1056 : vector<1xf32> to vector<1x1xf32>
    %1058 = vector.broadcast %1057 : vector<1x1xf32> to vector<1x4xf32>
    %1059 = arith.divf %1055, %1058 : vector<1x4xf32>
    %cst_798 = arith.constant dense<0.000000e+00> : vector<4xf32>
    %1060 = vector.multi_reduction <add>, %1059, %cst_798 [0] : vector<1x4xf32> to vector<4xf32>
    %1061 = vector.shape_cast %1060 : vector<4xf32> to vector<1x4xf32>
    %cst_799 = arith.constant 1.000000e+00 : f32
    %1062 = vector.broadcast %cst_799 : f32 to vector<1x4xf32>
    %1063 = arith.divf %1061, %1062 : vector<1x4xf32>
    %cst_800 = arith.constant dense<0.000000e+00> : vector<1x16xf32>
    %1064 = tpu.matmul %1063, %1049, %cst_800 {dimension_numbers = #tpu.dot_dimension_numbers<[1], [0], [0], [1], [0, 0, 1, 1], [], []>} : vector<1x4xf32>, vector<4x16xf32>, vector<1x16xf32> -> vector<1x16xf32>
    %c1_801 = arith.constant 1 : index
    %c0_802 = arith.constant 0 : index
    %c0_803 = arith.constant 0 : index
    %1065 = vector.load %arg9[%c1_801, %c0_802, %c0_803] : memref<4x16x64xf32, #tpu.memory_space<vmem>>, vector<1x16x64xf32>
    %1066 = vector.shape_cast %1065 : vector<1x16x64xf32> to vector<16x64xf32>
    %cst_804 = arith.constant dense<0.000000e+00> : vector<1x64xf32>
    %1067 = tpu.matmul %1064, %1066, %cst_804 {dimension_numbers = #tpu.dot_dimension_numbers<[1], [0], [0], [1], [0, 0, 1, 1], [], []>} : vector<1x16xf32>, vector<16x64xf32>, vector<1x64xf32> -> vector<1x64xf32>
    %1068 = arith.addf %1027, %1067 : vector<1x64xf32>
    %c2_805 = arith.constant 2 : index
    %c0_806 = arith.constant 0 : index
    %c0_807 = arith.constant 0 : index
    %1069 = vector.load %arg7[%c2_805, %c0_806, %c0_807] : memref<12x64x16xf32, #tpu.memory_space<vmem>>, vector<1x64x16xf32>
    %1070 = vector.shape_cast %1069 : vector<1x64x16xf32> to vector<64x16xf32>
    %cst_808 = arith.constant dense<0.000000e+00> : vector<1x16xf32>
    %1071 = tpu.matmul %644, %1070, %cst_808 {dimension_numbers = #tpu.dot_dimension_numbers<[1], [0], [0], [1], [0, 0, 1, 1], [], []>} : vector<1x64xf32>, vector<64x16xf32>, vector<1x16xf32> -> vector<1x16xf32>
    %c2_809 = arith.constant 2 : index
    %c0_810 = arith.constant 0 : index
    %c0_811 = arith.constant 0 : index
    %1072 = vector.load %arg8[%c2_809, %c0_810, %c0_811] : memref<12x1x16xf32, #tpu.memory_space<vmem>>, vector<1x1x16xf32>
    %1073 = vector.shape_cast %1072 : vector<1x1x16xf32> to vector<1x16xf32>
    %1074 = arith.addf %1071, %1073 : vector<1x16xf32>
    %cst_812 = arith.constant 2.500000e-01 : f32
    %1075 = vector.broadcast %cst_812 : f32 to vector<1x16xf32>
    %1076 = arith.mulf %1074, %1075 : vector<1x16xf32>
    %c6_813 = arith.constant 6 : index
    %c0_814 = arith.constant 0 : index
    %c0_815 = arith.constant 0 : index
    %1077 = vector.load %arg7[%c6_813, %c0_814, %c0_815] : memref<12x64x16xf32, #tpu.memory_space<vmem>>, vector<1x64x16xf32>
    %1078 = vector.shape_cast %1077 : vector<1x64x16xf32> to vector<64x16xf32>
    %cst_816 = arith.constant dense<0.000000e+00> : vector<4x16xf32>
    %1079 = tpu.matmul %645, %1078, %cst_816 {dimension_numbers = #tpu.dot_dimension_numbers<[1], [0], [0], [1], [0, 0, 1, 1], [], []>} : vector<4x64xf32>, vector<64x16xf32>, vector<4x16xf32> -> vector<4x16xf32>
    %c6_817 = arith.constant 6 : index
    %c0_818 = arith.constant 0 : index
    %c0_819 = arith.constant 0 : index
    %1080 = vector.load %arg8[%c6_817, %c0_818, %c0_819] : memref<12x1x16xf32, #tpu.memory_space<vmem>>, vector<1x1x16xf32>
    %1081 = vector.shape_cast %1080 : vector<1x1x16xf32> to vector<1x16xf32>
    %1082 = vector.broadcast %1081 : vector<1x16xf32> to vector<4x16xf32>
    %1083 = arith.addf %1079, %1082 : vector<4x16xf32>
    %c10_820 = arith.constant 10 : index
    %c0_821 = arith.constant 0 : index
    %c0_822 = arith.constant 0 : index
    %1084 = vector.load %arg7[%c10_820, %c0_821, %c0_822] : memref<12x64x16xf32, #tpu.memory_space<vmem>>, vector<1x64x16xf32>
    %1085 = vector.shape_cast %1084 : vector<1x64x16xf32> to vector<64x16xf32>
    %cst_823 = arith.constant dense<0.000000e+00> : vector<4x16xf32>
    %1086 = tpu.matmul %645, %1085, %cst_823 {dimension_numbers = #tpu.dot_dimension_numbers<[1], [0], [0], [1], [0, 0, 1, 1], [], []>} : vector<4x64xf32>, vector<64x16xf32>, vector<4x16xf32> -> vector<4x16xf32>
    %c10_824 = arith.constant 10 : index
    %c0_825 = arith.constant 0 : index
    %c0_826 = arith.constant 0 : index
    %1087 = vector.load %arg8[%c10_824, %c0_825, %c0_826] : memref<12x1x16xf32, #tpu.memory_space<vmem>>, vector<1x1x16xf32>
    %1088 = vector.shape_cast %1087 : vector<1x1x16xf32> to vector<1x16xf32>
    %1089 = vector.broadcast %1088 : vector<1x16xf32> to vector<4x16xf32>
    %1090 = arith.addf %1086, %1089 : vector<4x16xf32>
    %cst_827 = arith.constant dense<0.000000e+00> : vector<1x4xf32>
    %1091 = tpu.matmul %1076, %1083, %cst_827 {dimension_numbers = #tpu.dot_dimension_numbers<[1], [1], [0], [0], [0, 0, 1, 0], [], []>} : vector<1x16xf32>, vector<4x16xf32>, vector<1x4xf32> -> vector<1x4xf32>
    %cst_828 = arith.constant dense<0xFF800000> : vector<1xf32>
    %1092 = vector.multi_reduction <maximumf>, %1091, %cst_828 [1] : vector<1x4xf32> to vector<1xf32>
    %1093 = vector.shape_cast %1092 : vector<1xf32> to vector<1x1xf32>
    %1094 = vector.broadcast %1093 : vector<1x1xf32> to vector<1x4xf32>
    %1095 = arith.subf %1091, %1094 : vector<1x4xf32>
    %1096 = math.exp %1095 : vector<1x4xf32>
    %cst_829 = arith.constant dense<0.000000e+00> : vector<1xf32>
    %1097 = vector.multi_reduction <add>, %1096, %cst_829 [1] : vector<1x4xf32> to vector<1xf32>
    %1098 = vector.shape_cast %1097 : vector<1xf32> to vector<1x1xf32>
    %1099 = vector.broadcast %1098 : vector<1x1xf32> to vector<1x4xf32>
    %1100 = arith.divf %1096, %1099 : vector<1x4xf32>
    %cst_830 = arith.constant dense<0.000000e+00> : vector<4xf32>
    %1101 = vector.multi_reduction <add>, %1100, %cst_830 [0] : vector<1x4xf32> to vector<4xf32>
    %1102 = vector.shape_cast %1101 : vector<4xf32> to vector<1x4xf32>
    %cst_831 = arith.constant 1.000000e+00 : f32
    %1103 = vector.broadcast %cst_831 : f32 to vector<1x4xf32>
    %1104 = arith.divf %1102, %1103 : vector<1x4xf32>
    %cst_832 = arith.constant dense<0.000000e+00> : vector<1x16xf32>
    %1105 = tpu.matmul %1104, %1090, %cst_832 {dimension_numbers = #tpu.dot_dimension_numbers<[1], [0], [0], [1], [0, 0, 1, 1], [], []>} : vector<1x4xf32>, vector<4x16xf32>, vector<1x16xf32> -> vector<1x16xf32>
    %c2_833 = arith.constant 2 : index
    %c0_834 = arith.constant 0 : index
    %c0_835 = arith.constant 0 : index
    %1106 = vector.load %arg9[%c2_833, %c0_834, %c0_835] : memref<4x16x64xf32, #tpu.memory_space<vmem>>, vector<1x16x64xf32>
    %1107 = vector.shape_cast %1106 : vector<1x16x64xf32> to vector<16x64xf32>
    %cst_836 = arith.constant dense<0.000000e+00> : vector<1x64xf32>
    %1108 = tpu.matmul %1105, %1107, %cst_836 {dimension_numbers = #tpu.dot_dimension_numbers<[1], [0], [0], [1], [0, 0, 1, 1], [], []>} : vector<1x16xf32>, vector<16x64xf32>, vector<1x64xf32> -> vector<1x64xf32>
    %1109 = arith.addf %1068, %1108 : vector<1x64xf32>
    %c3_837 = arith.constant 3 : index
    %c0_838 = arith.constant 0 : index
    %c0_839 = arith.constant 0 : index
    %1110 = vector.load %arg7[%c3_837, %c0_838, %c0_839] : memref<12x64x16xf32, #tpu.memory_space<vmem>>, vector<1x64x16xf32>
    %1111 = vector.shape_cast %1110 : vector<1x64x16xf32> to vector<64x16xf32>
    %cst_840 = arith.constant dense<0.000000e+00> : vector<1x16xf32>
    %1112 = tpu.matmul %644, %1111, %cst_840 {dimension_numbers = #tpu.dot_dimension_numbers<[1], [0], [0], [1], [0, 0, 1, 1], [], []>} : vector<1x64xf32>, vector<64x16xf32>, vector<1x16xf32> -> vector<1x16xf32>
    %c3_841 = arith.constant 3 : index
    %c0_842 = arith.constant 0 : index
    %c0_843 = arith.constant 0 : index
    %1113 = vector.load %arg8[%c3_841, %c0_842, %c0_843] : memref<12x1x16xf32, #tpu.memory_space<vmem>>, vector<1x1x16xf32>
    %1114 = vector.shape_cast %1113 : vector<1x1x16xf32> to vector<1x16xf32>
    %1115 = arith.addf %1112, %1114 : vector<1x16xf32>
    %cst_844 = arith.constant 2.500000e-01 : f32
    %1116 = vector.broadcast %cst_844 : f32 to vector<1x16xf32>
    %1117 = arith.mulf %1115, %1116 : vector<1x16xf32>
    %c7_845 = arith.constant 7 : index
    %c0_846 = arith.constant 0 : index
    %c0_847 = arith.constant 0 : index
    %1118 = vector.load %arg7[%c7_845, %c0_846, %c0_847] : memref<12x64x16xf32, #tpu.memory_space<vmem>>, vector<1x64x16xf32>
    %1119 = vector.shape_cast %1118 : vector<1x64x16xf32> to vector<64x16xf32>
    %cst_848 = arith.constant dense<0.000000e+00> : vector<4x16xf32>
    %1120 = tpu.matmul %645, %1119, %cst_848 {dimension_numbers = #tpu.dot_dimension_numbers<[1], [0], [0], [1], [0, 0, 1, 1], [], []>} : vector<4x64xf32>, vector<64x16xf32>, vector<4x16xf32> -> vector<4x16xf32>
    %c7_849 = arith.constant 7 : index
    %c0_850 = arith.constant 0 : index
    %c0_851 = arith.constant 0 : index
    %1121 = vector.load %arg8[%c7_849, %c0_850, %c0_851] : memref<12x1x16xf32, #tpu.memory_space<vmem>>, vector<1x1x16xf32>
    %1122 = vector.shape_cast %1121 : vector<1x1x16xf32> to vector<1x16xf32>
    %1123 = vector.broadcast %1122 : vector<1x16xf32> to vector<4x16xf32>
    %1124 = arith.addf %1120, %1123 : vector<4x16xf32>
    %c11_852 = arith.constant 11 : index
    %c0_853 = arith.constant 0 : index
    %c0_854 = arith.constant 0 : index
    %1125 = vector.load %arg7[%c11_852, %c0_853, %c0_854] : memref<12x64x16xf32, #tpu.memory_space<vmem>>, vector<1x64x16xf32>
    %1126 = vector.shape_cast %1125 : vector<1x64x16xf32> to vector<64x16xf32>
    %cst_855 = arith.constant dense<0.000000e+00> : vector<4x16xf32>
    %1127 = tpu.matmul %645, %1126, %cst_855 {dimension_numbers = #tpu.dot_dimension_numbers<[1], [0], [0], [1], [0, 0, 1, 1], [], []>} : vector<4x64xf32>, vector<64x16xf32>, vector<4x16xf32> -> vector<4x16xf32>
    %c11_856 = arith.constant 11 : index
    %c0_857 = arith.constant 0 : index
    %c0_858 = arith.constant 0 : index
    %1128 = vector.load %arg8[%c11_856, %c0_857, %c0_858] : memref<12x1x16xf32, #tpu.memory_space<vmem>>, vector<1x1x16xf32>
    %1129 = vector.shape_cast %1128 : vector<1x1x16xf32> to vector<1x16xf32>
    %1130 = vector.broadcast %1129 : vector<1x16xf32> to vector<4x16xf32>
    %1131 = arith.addf %1127, %1130 : vector<4x16xf32>
    %cst_859 = arith.constant dense<0.000000e+00> : vector<1x4xf32>
    %1132 = tpu.matmul %1117, %1124, %cst_859 {dimension_numbers = #tpu.dot_dimension_numbers<[1], [1], [0], [0], [0, 0, 1, 0], [], []>} : vector<1x16xf32>, vector<4x16xf32>, vector<1x4xf32> -> vector<1x4xf32>
    %cst_860 = arith.constant dense<0xFF800000> : vector<1xf32>
    %1133 = vector.multi_reduction <maximumf>, %1132, %cst_860 [1] : vector<1x4xf32> to vector<1xf32>
    %1134 = vector.shape_cast %1133 : vector<1xf32> to vector<1x1xf32>
    %1135 = vector.broadcast %1134 : vector<1x1xf32> to vector<1x4xf32>
    %1136 = arith.subf %1132, %1135 : vector<1x4xf32>
    %1137 = math.exp %1136 : vector<1x4xf32>
    %cst_861 = arith.constant dense<0.000000e+00> : vector<1xf32>
    %1138 = vector.multi_reduction <add>, %1137, %cst_861 [1] : vector<1x4xf32> to vector<1xf32>
    %1139 = vector.shape_cast %1138 : vector<1xf32> to vector<1x1xf32>
    %1140 = vector.broadcast %1139 : vector<1x1xf32> to vector<1x4xf32>
    %1141 = arith.divf %1137, %1140 : vector<1x4xf32>
    %cst_862 = arith.constant dense<0.000000e+00> : vector<4xf32>
    %1142 = vector.multi_reduction <add>, %1141, %cst_862 [0] : vector<1x4xf32> to vector<4xf32>
    %1143 = vector.shape_cast %1142 : vector<4xf32> to vector<1x4xf32>
    %cst_863 = arith.constant 1.000000e+00 : f32
    %1144 = vector.broadcast %cst_863 : f32 to vector<1x4xf32>
    %1145 = arith.divf %1143, %1144 : vector<1x4xf32>
    %cst_864 = arith.constant dense<0.000000e+00> : vector<1x16xf32>
    %1146 = tpu.matmul %1145, %1131, %cst_864 {dimension_numbers = #tpu.dot_dimension_numbers<[1], [0], [0], [1], [0, 0, 1, 1], [], []>} : vector<1x4xf32>, vector<4x16xf32>, vector<1x16xf32> -> vector<1x16xf32>
    %c3_865 = arith.constant 3 : index
    %c0_866 = arith.constant 0 : index
    %c0_867 = arith.constant 0 : index
    %1147 = vector.load %arg9[%c3_865, %c0_866, %c0_867] : memref<4x16x64xf32, #tpu.memory_space<vmem>>, vector<1x16x64xf32>
    %1148 = vector.shape_cast %1147 : vector<1x16x64xf32> to vector<16x64xf32>
    %cst_868 = arith.constant dense<0.000000e+00> : vector<1x64xf32>
    %1149 = tpu.matmul %1146, %1148, %cst_868 {dimension_numbers = #tpu.dot_dimension_numbers<[1], [0], [0], [1], [0, 0, 1, 1], [], []>} : vector<1x16xf32>, vector<16x64xf32>, vector<1x64xf32> -> vector<1x64xf32>
    %1150 = arith.addf %1109, %1149 : vector<1x64xf32>
    %c0_869 = arith.constant 0 : index
    %c0_870 = arith.constant 0 : index
    %c0_871 = arith.constant 0 : index
    %1151 = vector.load %arg10[%c0_869, %c0_870, %c0_871] : memref<1x1x64xf32, #tpu.memory_space<vmem>>, vector<1x1x64xf32>
    %1152 = vector.shape_cast %1151 : vector<1x1x64xf32> to vector<1x64xf32>
    %1153 = arith.addf %1150, %1152 : vector<1x64xf32>
    %c0_872 = arith.constant 0 : index
    %c0_873 = arith.constant 0 : index
    %c0_874 = arith.constant 0 : index
    %1154 = vector.load %arg11[%c0_872, %c0_873, %c0_874] : memref<2x32x32xf32, #tpu.memory_space<vmem>>, vector<1x32x32xf32>
    %1155 = vector.shape_cast %1154 : vector<1x32x32xf32> to vector<32x32xf32>
    %cst_875 = arith.constant dense<0.000000e+00> : vector<1x32xf32>
    %1156 = tpu.matmul %643, %1155, %cst_875 {dimension_numbers = #tpu.dot_dimension_numbers<[1], [0], [0], [1], [0, 0, 1, 1], [], []>} : vector<1x32xf32>, vector<32x32xf32>, vector<1x32xf32> -> vector<1x32xf32>
    %c1_876 = arith.constant 1 : index
    %c0_877 = arith.constant 0 : index
    %c0_878 = arith.constant 0 : index
    %1157 = vector.load %arg11[%c1_876, %c0_877, %c0_878] : memref<2x32x32xf32, #tpu.memory_space<vmem>>, vector<1x32x32xf32>
    %1158 = vector.shape_cast %1157 : vector<1x32x32xf32> to vector<32x32xf32>
    %cst_879 = arith.constant dense<0.000000e+00> : vector<1x32xf32>
    %1159 = tpu.matmul %985, %1158, %cst_879 {dimension_numbers = #tpu.dot_dimension_numbers<[1], [0], [0], [1], [0, 0, 1, 1], [], []>} : vector<1x32xf32>, vector<32x32xf32>, vector<1x32xf32> -> vector<1x32xf32>
    %1160 = arith.addf %1156, %1159 : vector<1x32xf32>
    %c0_880 = arith.constant 0 : index
    %c0_881 = arith.constant 0 : index
    %1161 = vector.load %arg18[%c0_880, %c0_881] : memref<1x32xf32, #tpu.memory_space<vmem>>, vector<1x32xf32>
    %1162 = arith.addf %1160, %1161 : vector<1x32xf32>
    %cst_882 = arith.constant 5.000000e-01 : f32
    %1163 = vector.broadcast %cst_882 : f32 to vector<1x32xf32>
    %1164 = arith.mulf %1163, %1162 : vector<1x32xf32>
    %1165 = math.tanh %1164 : vector<1x32xf32>
    %cst_883 = arith.constant 1.000000e+00 : f32
    %1166 = vector.broadcast %cst_883 : f32 to vector<1x32xf32>
    %1167 = arith.addf %1165, %1166 : vector<1x32xf32>
    %cst_884 = arith.constant 5.000000e-01 : f32
    %1168 = vector.broadcast %cst_884 : f32 to vector<1x32xf32>
    %1169 = arith.mulf %1168, %1167 : vector<1x32xf32>
    %1170 = arith.mulf %1169, %643 : vector<1x32xf32>
    %cst_885 = arith.constant 1.000000e+00 : f32
    %1171 = vector.broadcast %cst_885 : f32 to vector<1x32xf32>
    %1172 = arith.subf %1171, %1169 : vector<1x32xf32>
    %1173 = arith.mulf %1172, %985 : vector<1x32xf32>
    %1174 = arith.addf %1170, %1173 : vector<1x32xf32>
    %c0_886 = arith.constant 0 : index
    %c0_887 = arith.constant 0 : index
    %c0_888 = arith.constant 0 : index
    %1175 = vector.load %arg14[%c0_886, %c0_887, %c0_888] : memref<2x64x64xf32, #tpu.memory_space<vmem>>, vector<1x64x64xf32>
    %1176 = vector.shape_cast %1175 : vector<1x64x64xf32> to vector<64x64xf32>
    %cst_889 = arith.constant dense<0.000000e+00> : vector<1x64xf32>
    %1177 = tpu.matmul %644, %1176, %cst_889 {dimension_numbers = #tpu.dot_dimension_numbers<[1], [0], [0], [1], [0, 0, 1, 1], [], []>} : vector<1x64xf32>, vector<64x64xf32>, vector<1x64xf32> -> vector<1x64xf32>
    %c1_890 = arith.constant 1 : index
    %c0_891 = arith.constant 0 : index
    %c0_892 = arith.constant 0 : index
    %1178 = vector.load %arg14[%c1_890, %c0_891, %c0_892] : memref<2x64x64xf32, #tpu.memory_space<vmem>>, vector<1x64x64xf32>
    %1179 = vector.shape_cast %1178 : vector<1x64x64xf32> to vector<64x64xf32>
    %cst_893 = arith.constant dense<0.000000e+00> : vector<1x64xf32>
    %1180 = tpu.matmul %1153, %1179, %cst_893 {dimension_numbers = #tpu.dot_dimension_numbers<[1], [0], [0], [1], [0, 0, 1, 1], [], []>} : vector<1x64xf32>, vector<64x64xf32>, vector<1x64xf32> -> vector<1x64xf32>
    %1181 = arith.addf %1177, %1180 : vector<1x64xf32>
    %c0_894 = arith.constant 0 : index
    %c0_895 = arith.constant 0 : index
    %1182 = vector.load %arg20[%c0_894, %c0_895] : memref<1x64xf32, #tpu.memory_space<vmem>>, vector<1x64xf32>
    %1183 = arith.addf %1181, %1182 : vector<1x64xf32>
    %cst_896 = arith.constant 5.000000e-01 : f32
    %1184 = vector.broadcast %cst_896 : f32 to vector<1x64xf32>
    %1185 = arith.mulf %1184, %1183 : vector<1x64xf32>
    %1186 = math.tanh %1185 : vector<1x64xf32>
    %cst_897 = arith.constant 1.000000e+00 : f32
    %1187 = vector.broadcast %cst_897 : f32 to vector<1x64xf32>
    %1188 = arith.addf %1186, %1187 : vector<1x64xf32>
    %cst_898 = arith.constant 5.000000e-01 : f32
    %1189 = vector.broadcast %cst_898 : f32 to vector<1x64xf32>
    %1190 = arith.mulf %1189, %1188 : vector<1x64xf32>
    %1191 = arith.mulf %1190, %644 : vector<1x64xf32>
    %cst_899 = arith.constant 1.000000e+00 : f32
    %1192 = vector.broadcast %cst_899 : f32 to vector<1x64xf32>
    %1193 = arith.subf %1192, %1190 : vector<1x64xf32>
    %1194 = arith.mulf %1193, %1153 : vector<1x64xf32>
    %1195 = arith.addf %1191, %1194 : vector<1x64xf32>
    %c0_900 = arith.constant 0 : index
    %c0_901 = arith.constant 0 : index
    %c0_902 = arith.constant 0 : index
    %1196 = vector.load %arg12[%c0_900, %c0_901, %c0_902] : memref<2x32x32xf32, #tpu.memory_space<vmem>>, vector<1x32x32xf32>
    %1197 = vector.shape_cast %1196 : vector<1x32x32xf32> to vector<32x32xf32>
    %cst_903 = arith.constant dense<0.000000e+00> : vector<1x32xf32>
    %1198 = tpu.matmul %1174, %1197, %cst_903 {dimension_numbers = #tpu.dot_dimension_numbers<[1], [0], [0], [1], [0, 0, 1, 1], [], []>} : vector<1x32xf32>, vector<32x32xf32>, vector<1x32xf32> -> vector<1x32xf32>
    %c0_904 = arith.constant 0 : index
    %c0_905 = arith.constant 0 : index
    %c0_906 = arith.constant 0 : index
    %1199 = vector.load %arg19[%c0_904, %c0_905, %c0_906] : memref<5x1x32xf32, #tpu.memory_space<vmem>>, vector<1x1x32xf32>
    %1200 = vector.shape_cast %1199 : vector<1x1x32xf32> to vector<1x32xf32>
    %1201 = arith.addf %1198, %1200 : vector<1x32xf32>
    %c0_907 = arith.constant 0 : index
    %c0_908 = arith.constant 0 : index
    %1202 = vector.load %arg15[%c0_907, %c0_908] : memref<64x32xf32, #tpu.memory_space<vmem>>, vector<64x32xf32>
    %cst_909 = arith.constant dense<0.000000e+00> : vector<1x32xf32>
    %1203 = tpu.matmul %1195, %1202, %cst_909 {dimension_numbers = #tpu.dot_dimension_numbers<[1], [0], [0], [1], [0, 0, 1, 1], [], []>} : vector<1x64xf32>, vector<64x32xf32>, vector<1x32xf32> -> vector<1x32xf32>
    %c1_910 = arith.constant 1 : index
    %c0_911 = arith.constant 0 : index
    %c0_912 = arith.constant 0 : index
    %1204 = vector.load %arg19[%c1_910, %c0_911, %c0_912] : memref<5x1x32xf32, #tpu.memory_space<vmem>>, vector<1x1x32xf32>
    %1205 = vector.shape_cast %1204 : vector<1x1x32xf32> to vector<1x32xf32>
    %1206 = arith.addf %1203, %1205 : vector<1x32xf32>
    %c0_913 = arith.constant 0 : index
    %c0_914 = arith.constant 0 : index
    %c0_915 = arith.constant 0 : index
    %1207 = vector.load %arg13[%c0_913, %c0_914, %c0_915] : memref<4x32x32xf32, #tpu.memory_space<vmem>>, vector<1x32x32xf32>
    %1208 = vector.shape_cast %1207 : vector<1x32x32xf32> to vector<32x32xf32>
    %cst_916 = arith.constant dense<0.000000e+00> : vector<1x32xf32>
    %1209 = tpu.matmul %1201, %1208, %cst_916 {dimension_numbers = #tpu.dot_dimension_numbers<[1], [0], [0], [1], [0, 0, 1, 1], [], []>} : vector<1x32xf32>, vector<32x32xf32>, vector<1x32xf32> -> vector<1x32xf32>
    %c1_917 = arith.constant 1 : index
    %c0_918 = arith.constant 0 : index
    %c0_919 = arith.constant 0 : index
    %1210 = vector.load %arg13[%c1_917, %c0_918, %c0_919] : memref<4x32x32xf32, #tpu.memory_space<vmem>>, vector<1x32x32xf32>
    %1211 = vector.shape_cast %1210 : vector<1x32x32xf32> to vector<32x32xf32>
    %cst_920 = arith.constant dense<0.000000e+00> : vector<1x32xf32>
    %1212 = tpu.matmul %1206, %1211, %cst_920 {dimension_numbers = #tpu.dot_dimension_numbers<[1], [0], [0], [1], [0, 0, 1, 1], [], []>} : vector<1x32xf32>, vector<32x32xf32>, vector<1x32xf32> -> vector<1x32xf32>
    %1213 = arith.addf %1209, %1212 : vector<1x32xf32>
    %c2_921 = arith.constant 2 : index
    %c0_922 = arith.constant 0 : index
    %c0_923 = arith.constant 0 : index
    %1214 = vector.load %arg19[%c2_921, %c0_922, %c0_923] : memref<5x1x32xf32, #tpu.memory_space<vmem>>, vector<1x1x32xf32>
    %1215 = vector.shape_cast %1214 : vector<1x1x32xf32> to vector<1x32xf32>
    %1216 = arith.addf %1213, %1215 : vector<1x32xf32>
    %cst_924 = arith.constant 5.000000e-01 : f32
    %1217 = vector.broadcast %cst_924 : f32 to vector<1x32xf32>
    %1218 = arith.mulf %1217, %1216 : vector<1x32xf32>
    %1219 = math.tanh %1218 : vector<1x32xf32>
    %cst_925 = arith.constant 1.000000e+00 : f32
    %1220 = vector.broadcast %cst_925 : f32 to vector<1x32xf32>
    %1221 = arith.addf %1219, %1220 : vector<1x32xf32>
    %cst_926 = arith.constant 5.000000e-01 : f32
    %1222 = vector.broadcast %cst_926 : f32 to vector<1x32xf32>
    %1223 = arith.mulf %1222, %1221 : vector<1x32xf32>
    %1224 = arith.mulf %1223, %1201 : vector<1x32xf32>
    %cst_927 = arith.constant 1.000000e+00 : f32
    %1225 = vector.broadcast %cst_927 : f32 to vector<1x32xf32>
    %1226 = arith.subf %1225, %1223 : vector<1x32xf32>
    %1227 = arith.mulf %1226, %1206 : vector<1x32xf32>
    %1228 = arith.addf %1224, %1227 : vector<1x32xf32>
    %c1_928 = arith.constant 1 : index
    %c0_929 = arith.constant 0 : index
    %c0_930 = arith.constant 0 : index
    %1229 = vector.load %arg12[%c1_928, %c0_929, %c0_930] : memref<2x32x32xf32, #tpu.memory_space<vmem>>, vector<1x32x32xf32>
    %1230 = vector.shape_cast %1229 : vector<1x32x32xf32> to vector<32x32xf32>
    %cst_931 = arith.constant dense<0.000000e+00> : vector<1x32xf32>
    %1231 = tpu.matmul %817, %1230, %cst_931 {dimension_numbers = #tpu.dot_dimension_numbers<[1], [0], [0], [1], [0, 0, 1, 1], [], []>} : vector<1x32xf32>, vector<32x32xf32>, vector<1x32xf32> -> vector<1x32xf32>
    %c3_932 = arith.constant 3 : index
    %c0_933 = arith.constant 0 : index
    %c0_934 = arith.constant 0 : index
    %1232 = vector.load %arg19[%c3_932, %c0_933, %c0_934] : memref<5x1x32xf32, #tpu.memory_space<vmem>>, vector<1x1x32xf32>
    %1233 = vector.shape_cast %1232 : vector<1x1x32xf32> to vector<1x32xf32>
    %1234 = arith.addf %1231, %1233 : vector<1x32xf32>
    %c2_935 = arith.constant 2 : index
    %c0_936 = arith.constant 0 : index
    %c0_937 = arith.constant 0 : index
    %1235 = vector.load %arg13[%c2_935, %c0_936, %c0_937] : memref<4x32x32xf32, #tpu.memory_space<vmem>>, vector<1x32x32xf32>
    %1236 = vector.shape_cast %1235 : vector<1x32x32xf32> to vector<32x32xf32>
    %cst_938 = arith.constant dense<0.000000e+00> : vector<1x32xf32>
    %1237 = tpu.matmul %1228, %1236, %cst_938 {dimension_numbers = #tpu.dot_dimension_numbers<[1], [0], [0], [1], [0, 0, 1, 1], [], []>} : vector<1x32xf32>, vector<32x32xf32>, vector<1x32xf32> -> vector<1x32xf32>
    %c3_939 = arith.constant 3 : index
    %c0_940 = arith.constant 0 : index
    %c0_941 = arith.constant 0 : index
    %1238 = vector.load %arg13[%c3_939, %c0_940, %c0_941] : memref<4x32x32xf32, #tpu.memory_space<vmem>>, vector<1x32x32xf32>
    %1239 = vector.shape_cast %1238 : vector<1x32x32xf32> to vector<32x32xf32>
    %cst_942 = arith.constant dense<0.000000e+00> : vector<1x32xf32>
    %1240 = tpu.matmul %1234, %1239, %cst_942 {dimension_numbers = #tpu.dot_dimension_numbers<[1], [0], [0], [1], [0, 0, 1, 1], [], []>} : vector<1x32xf32>, vector<32x32xf32>, vector<1x32xf32> -> vector<1x32xf32>
    %1241 = arith.addf %1237, %1240 : vector<1x32xf32>
    %c4_943 = arith.constant 4 : index
    %c0_944 = arith.constant 0 : index
    %c0_945 = arith.constant 0 : index
    %1242 = vector.load %arg19[%c4_943, %c0_944, %c0_945] : memref<5x1x32xf32, #tpu.memory_space<vmem>>, vector<1x1x32xf32>
    %1243 = vector.shape_cast %1242 : vector<1x1x32xf32> to vector<1x32xf32>
    %1244 = arith.addf %1241, %1243 : vector<1x32xf32>
    %cst_946 = arith.constant 5.000000e-01 : f32
    %1245 = vector.broadcast %cst_946 : f32 to vector<1x32xf32>
    %1246 = arith.mulf %1245, %1244 : vector<1x32xf32>
    %1247 = math.tanh %1246 : vector<1x32xf32>
    %cst_947 = arith.constant 1.000000e+00 : f32
    %1248 = vector.broadcast %cst_947 : f32 to vector<1x32xf32>
    %1249 = arith.addf %1247, %1248 : vector<1x32xf32>
    %cst_948 = arith.constant 5.000000e-01 : f32
    %1250 = vector.broadcast %cst_948 : f32 to vector<1x32xf32>
    %1251 = arith.mulf %1250, %1249 : vector<1x32xf32>
    %cst_949 = arith.constant 1.000000e+00 : f32
    %1252 = vector.broadcast %cst_949 : f32 to vector<1x32xf32>
    %1253 = arith.subf %1252, %1251 : vector<1x32xf32>
    %1254 = arith.mulf %1253, %1234 : vector<1x32xf32>
    %1255 = arith.addf %1228, %1254 : vector<1x32xf32>
    %c0_950 = arith.constant 0 : index
    %c0_951 = arith.constant 0 : index
    %1256 = vector.load %arg16[%c0_950, %c0_951] : memref<32x64xf32, #tpu.memory_space<vmem>>, vector<32x64xf32>
    %cst_952 = arith.constant dense<0.000000e+00> : vector<1x64xf32>
    %1257 = tpu.matmul %1255, %1256, %cst_952 {dimension_numbers = #tpu.dot_dimension_numbers<[1], [0], [0], [1], [0, 0, 1, 1], [], []>} : vector<1x32xf32>, vector<32x64xf32>, vector<1x64xf32> -> vector<1x64xf32>
    %c0_953 = arith.constant 0 : index
    %c0_954 = arith.constant 0 : index
    %1258 = vector.load %arg21[%c0_953, %c0_954] : memref<1x64xf32, #tpu.memory_space<vmem>>, vector<1x64xf32>
    %1259 = arith.addf %1257, %1258 : vector<1x64xf32>
    %cst_955 = arith.constant 0.000000e+00 : f32
    %1260 = vector.broadcast %cst_955 : f32 to vector<1x64xf32>
    %1261 = arith.cmpf ogt, %1259, %1260 : vector<1x64xf32>
    %cst_956 = arith.constant 0.00999999977 : f32
    %1262 = vector.broadcast %cst_956 : f32 to vector<1x64xf32>
    %1263 = arith.mulf %1262, %1259 : vector<1x64xf32>
    %1264 = arith.select %1261, %1259, %1263 : vector<1x64xi1>, vector<1x64xf32>
    %c0_957 = arith.constant 0 : index
    %c0_958 = arith.constant 0 : index
    %1265 = vector.load %arg17[%c0_957, %c0_958] : memref<64x128xf32, #tpu.memory_space<vmem>>, vector<64x128xf32>
    %cst_959 = arith.constant dense<0.000000e+00> : vector<1x128xf32>
    %1266 = tpu.matmul %1264, %1265, %cst_959 {dimension_numbers = #tpu.dot_dimension_numbers<[1], [0], [0], [1], [0, 0, 1, 1], [], []>} : vector<1x64xf32>, vector<64x128xf32>, vector<1x128xf32> -> vector<1x128xf32>
    %c0_960 = arith.constant 0 : index
    %c0_961 = arith.constant 0 : index
    %1267 = vector.load %arg22[%c0_960, %c0_961] : memref<1x128xf32, #tpu.memory_space<vmem>>, vector<1x128xf32>
    %1268 = arith.addf %1266, %1267 : vector<1x128xf32>
    %c1_962 = arith.constant 1 : index
    %c0_963 = arith.constant 0 : index
    %c0_964 = arith.constant 0 : index
    %1269 = vector.load %arg23[%c1_962, %c0_963, %c0_964] : memref<2x1x128xf32, #tpu.memory_space<vmem>>, vector<1x1x128xf32>
    %1270 = vector.shape_cast %1269 : vector<1x1x128xf32> to vector<1x128xf32>
    %1271 = vector.shape_cast %1268 : vector<1x128xf32> to vector<1x1x128xf32>
    tpu.vector_store %arg23[%c1_962, %c0_963, %c0_964], %1271 {strides = array<i32>} : memref<2x1x128xf32, #tpu.memory_space<vmem>>, vector<1x1x128xf32>,
    return
  }
  func.func @transform_0(%arg0: i32) -> (i32, i32, i32) {
    %c0_i32 = arith.constant 0 : i32
    %c0_i32_0 = arith.constant 0 : i32
    %c0_i32_1 = arith.constant 0 : i32
    return %arg0, %c0_i32, %c0_i32_0 : i32, i32, i32
  }
  func.func @transform_1(%arg0: i32) -> (i32, i32, i32) {
    %c0_i32 = arith.constant 0 : i32
    %c0_i32_0 = arith.constant 0 : i32
    %c0_i32_1 = arith.constant 0 : i32
    return %arg0, %c0_i32, %c0_i32_0 : i32, i32, i32
  }
  func.func @transform_2(%arg0: i32) -> (i32, i32, i32) {
    %c0_i32 = arith.constant 0 : i32
    %c0_i32_0 = arith.constant 0 : i32
    %c0_i32_1 = arith.constant 0 : i32
    %c0_i32_2 = arith.constant 0 : i32
    return %c0_i32, %c0_i32_0, %c0_i32_1 : i32, i32, i32
  }
  func.func @transform_3(%arg0: i32) -> (i32, i32, i32) {
    %c0_i32 = arith.constant 0 : i32
    %c0_i32_0 = arith.constant 0 : i32
    %c0_i32_1 = arith.constant 0 : i32
    %c0_i32_2 = arith.constant 0 : i32
    return %c0_i32, %c0_i32_0, %c0_i32_1 : i32, i32, i32
  }
  func.func @transform_4(%arg0: i32) -> (i32, i32, i32) {
    %c0_i32 = arith.constant 0 : i32
    %c0_i32_0 = arith.constant 0 : i32
    %c0_i32_1 = arith.constant 0 : i32
    %c0_i32_2 = arith.constant 0 : i32
    return %c0_i32, %c0_i32_0, %c0_i32_1 : i32, i32, i32
  }
  func.func @transform_5(%arg0: i32) -> (i32, i32, i32) {
    %c0_i32 = arith.constant 0 : i32
    %c0_i32_0 = arith.constant 0 : i32
    %c0_i32_1 = arith.constant 0 : i32
    %c0_i32_2 = arith.constant 0 : i32
    return %c0_i32, %c0_i32_0, %c0_i32_1 : i32, i32, i32
  }
  func.func @transform_6(%arg0: i32) -> (i32, i32, i32) {
    %c0_i32 = arith.constant 0 : i32
    %c0_i32_0 = arith.constant 0 : i32
    %c0_i32_1 = arith.constant 0 : i32
    %c0_i32_2 = arith.constant 0 : i32
    return %c0_i32, %c0_i32_0, %c0_i32_1 : i32, i32, i32
  }
  func.func @transform_7(%arg0: i32) -> (i32, i32, i32) {
    %c0_i32 = arith.constant 0 : i32
    %c0_i32_0 = arith.constant 0 : i32
    %c0_i32_1 = arith.constant 0 : i32
    %c0_i32_2 = arith.constant 0 : i32
    return %c0_i32, %c0_i32_0, %c0_i32_1 : i32, i32, i32
  }
  func.func @transform_8(%arg0: i32) -> (i32, i32, i32) {
    %c0_i32 = arith.constant 0 : i32
    %c0_i32_0 = arith.constant 0 : i32
    %c0_i32_1 = arith.constant 0 : i32
    %c0_i32_2 = arith.constant 0 : i32
    return %c0_i32, %c0_i32_0, %c0_i32_1 : i32, i32, i32
  }
  func.func @transform_9(%arg0: i32) -> (i32, i32, i32) {
    %c0_i32 = arith.constant 0 : i32
    %c0_i32_0 = arith.constant 0 : i32
    %c0_i32_1 = arith.constant 0 : i32
    %c0_i32_2 = arith.constant 0 : i32
    return %c0_i32, %c0_i32_0, %c0_i32_1 : i32, i32, i32
  }
  func.func @transform_10(%arg0: i32) -> (i32, i32, i32) {
    %c0_i32 = arith.constant 0 : i32
    %c0_i32_0 = arith.constant 0 : i32
    %c0_i32_1 = arith.constant 0 : i32
    %c0_i32_2 = arith.constant 0 : i32
    return %c0_i32, %c0_i32_0, %c0_i32_1 : i32, i32, i32
  }
  func.func @transform_11(%arg0: i32) -> (i32, i32, i32) {
    %c0_i32 = arith.constant 0 : i32
    %c0_i32_0 = arith.constant 0 : i32
    %c0_i32_1 = arith.constant 0 : i32
    %c0_i32_2 = arith.constant 0 : i32
    return %c0_i32, %c0_i32_0, %c0_i32_1 : i32, i32, i32
  }
  func.func @transform_12(%arg0: i32) -> (i32, i32, i32) {
    %c0_i32 = arith.constant 0 : i32
    %c0_i32_0 = arith.constant 0 : i32
    %c0_i32_1 = arith.constant 0 : i32
    %c0_i32_2 = arith.constant 0 : i32
    return %c0_i32, %c0_i32_0, %c0_i32_1 : i32, i32, i32
  }
  func.func @transform_13(%arg0: i32) -> (i32, i32, i32) {
    %c0_i32 = arith.constant 0 : i32
    %c0_i32_0 = arith.constant 0 : i32
    %c0_i32_1 = arith.constant 0 : i32
    %c0_i32_2 = arith.constant 0 : i32
    return %c0_i32, %c0_i32_0, %c0_i32_1 : i32, i32, i32
  }
  func.func @transform_14(%arg0: i32) -> (i32, i32) {
    %c0_i32 = arith.constant 0 : i32
    %c0_i32_0 = arith.constant 0 : i32
    %c0_i32_1 = arith.constant 0 : i32
    return %c0_i32, %c0_i32_0 : i32, i32
  }
  func.func @transform_15(%arg0: i32) -> (i32, i32) {
    %c0_i32 = arith.constant 0 : i32
    %c0_i32_0 = arith.constant 0 : i32
    %c0_i32_1 = arith.constant 0 : i32
    return %c0_i32, %c0_i32_0 : i32, i32
  }
  func.func @transform_16(%arg0: i32) -> (i32, i32) {
    %c0_i32 = arith.constant 0 : i32
    %c0_i32_0 = arith.constant 0 : i32
    %c0_i32_1 = arith.constant 0 : i32
    return %c0_i32, %c0_i32_0 : i32, i32
  }
  func.func @transform_17(%arg0: i32) -> (i32, i32) {
    %c0_i32 = arith.constant 0 : i32
    %c0_i32_0 = arith.constant 0 : i32
    %c0_i32_1 = arith.constant 0 : i32
    return %c0_i32, %c0_i32_0 : i32, i32
  }
  func.func @transform_18(%arg0: i32) -> (i32, i32, i32) {
    %c0_i32 = arith.constant 0 : i32
    %c0_i32_0 = arith.constant 0 : i32
    %c0_i32_1 = arith.constant 0 : i32
    %c0_i32_2 = arith.constant 0 : i32
    return %c0_i32, %c0_i32_0, %c0_i32_1 : i32, i32, i32
  }
  func.func @transform_19(%arg0: i32) -> (i32, i32) {
    %c0_i32 = arith.constant 0 : i32
    %c0_i32_0 = arith.constant 0 : i32
    %c0_i32_1 = arith.constant 0 : i32
    return %c0_i32, %c0_i32_0 : i32, i32
  }
  func.func @transform_20(%arg0: i32) -> (i32, i32) {
    %c0_i32 = arith.constant 0 : i32
    %c0_i32_0 = arith.constant 0 : i32
    %c0_i32_1 = arith.constant 0 : i32
    return %c0_i32, %c0_i32_0 : i32, i32
  }
  func.func @transform_21(%arg0: i32) -> (i32, i32) {
    %c0_i32 = arith.constant 0 : i32
    %c0_i32_0 = arith.constant 0 : i32
    %c0_i32_1 = arith.constant 0 : i32
    return %c0_i32, %c0_i32_0 : i32, i32
  }
  func.func @transform_22(%arg0: i32) -> (i32, i32, i32) {
    %c0_i32 = arith.constant 0 : i32
    %c0_i32_0 = arith.constant 0 : i32
    %c0_i32_1 = arith.constant 0 : i32
    return %arg0, %c0_i32, %c0_i32_0 : i32, i32, i32
  }
}

</mosaic_0001>

<bundles_post_ra>
// kernel: tpu_custom_call.1
= control target key start
LH: loop header
LB: loop body
LE: loop exit
PB: predicated region body
PF: predicated region fallthrough
CT: control target
= control target key end

     0   :  { %s21446_s0 = inlined_call_operand.vmem [shape: f32[2,20,32], index: 0, kind: input, shape index: {}]   ;;  %s21447_s1 = inlined_call_operand.vmem [shape: f32[2,12,64], index: 1, kind: input, shape index: {}]   ;;  %s21448_s2 = inlined_call_operand.vmem [shape: f32[24,32,8], index: 2, kind: input, shape index: {}]   ;;  %s21449_s3 = inlined_call_operand.vmem [shape: f32[24,1,8], index: 3, kind: input, shape index: {}]   ;;  %s21450_s4 = inlined_call_operand.vmem [shape: f32[8,8,32], index: 4, kind: input, shape index: {}]   ;;  %s21451_s5 = inlined_call_operand.vmem [shape: f32[2,1,32], index: 5, kind: input, shape index: {}]   ;;  %s21452_s6 = inlined_call_operand.vmem [shape: f32[12,64,16], index: 6, kind: input, shape index: {}]   ;;  %s21453_s7 = inlined_call_operand.vmem [shape: f32[12,1,16], index: 7, kind: input, shape index: {}]   ;;  %s21454_s8 = inlined_call_operand.vmem [shape: f32[4,16,64], index: 8, kind: input, shape index: {}]   ;;  %s21455_s9 = inlined_call_operand.vmem [shape: f32[1,1,64], index: 9, kind: input, shape index: {}]   ;;  %s21456_s10 = inlined_call_operand.vmem [shape: f32[2,32,32], index: 10, kind: input, shape index: {}]   ;;  %s21457_s11 = inlined_call_operand.vmem [shape: f32[2,32,32], index: 11, kind: input, shape index: {}]   ;;  %s21458_s12 = inlined_call_operand.vmem [shape: f32[4,32,32], index: 12, kind: input, shape index: {}]   ;;  %s21459_s13 = inlined_call_operand.vmem [shape: f32[2,64,64], index: 13, kind: input, shape index: {}]   ;;  %s21460_s14 = inlined_call_operand.vmem [shape: f32[64,32], index: 14, kind: input, shape index: {}]   ;;  %s21461_s15 = inlined_call_operand.vmem [shape: f32[32,64], index: 15, kind: input, shape index: {}]   ;;  %s21462_s16 = inlined_call_operand.vmem [shape: f32[64,128], index: 16, kind: input, shape index: {}]   ;;  %s21463_s17 = inlined_call_operand.vmem [shape: f32[1,32], index: 17, kind: input, shape index: {}]   ;;  %s21464_s18 = inlined_call_operand.vmem [shape: f32[5,1,32], index: 18, kind: input, shape index: {}]   ;;  %s21465_s19 = inlined_call_operand.vmem [shape: f32[1,64], index: 19, kind: input, shape index: {}]   ;;  %s21466_s20 = inlined_call_operand.vmem [shape: f32[1,64], index: 20, kind: input, shape index: {}]   ;;  %s21467_s21 = inlined_call_operand.vmem [shape: f32[1,128], index: 21, kind: input, shape index: {}]   ;;  %s21468_s22 = inlined_call_operand.hbm [shape: f32[2,1,128], index: 22, kind: output, shape index: {}]  }
   0x1   :  { %21478 = sst [smem:[#allocation5_spill]] %s21446_s0 }
   0x2   :  { %21479 = sst [smem:[#allocation6_spill]] %s21447_s1 }
   0x3   :  { %21480 = sst [smem:[#allocation7_spill]] %s21448_s2 }
   0x4   :  { %21481 = sst [smem:[#allocation8_spill]] %s21449_s3 }
   0x5   :  { %21482 = sst [smem:[#allocation9_spill]] %s21450_s4 }
   0x6   :  { %21483 = sst [smem:[#allocation10_spill]] %s21451_s5 }
   0x7   :  { %21484 = sst [smem:[#allocation11_spill]] %s21452_s6 }
   0x8   :  { %21485 = sst [smem:[#allocation12_spill]] %s21463_s17 }
   0x9   :  { %21486 = sst [smem:[#allocation13_spill]] %s21468_s22 }
   0xa   :  { %s21487_s29 = sld [smem:[#allocation7_spill]]  ;;  %v18201_v3 = vmov 0.0|0.0   ;;  %vm18202_vm0 = vmmov 0   ;;  %v18203_v11 = vmov 0.0  }
   0xb   :  { %17249 = vmatprep.subr.bf16.mxu0 %v18201_v3  ;;  %17255 = vmatprep.subr.bf16.mxu1 %v18201_v3 }
   0xc   :  { %15547 = vmatprep.mubr.msk.f32.mxu0 %vm18202_vm0, %v18203_v11  ;;  %15558 = vmatprep.mubr.msk.f32.mxu1 %vm18202_vm0, %v18203_v11 }
  0x10   :  { %v77_v0 = vld [vmem:[%s21487_s29] sm:$0xff]  ;;  %v78_v1 = vld [vmem:[%s21487_s29 + $0x8] sm:$0xff]  ;;  %v79_v6 = vld [vmem:[%s21487_s29 + $0x10] sm:$0xff] }
  0x11   :  { %v13980_v2 = vld [vmem:[%s21487_s29 + $0x80] sm:$0xff]  ;;  %v17250_v4 = vpack.c.bf16 %v78_v1, %v77_v0  ;;  %v13981_v5 = vld [vmem:[%s21487_s29 + $0x88] sm:$0xff]  ;;  %v80_v7 = vld [vmem:[%s21487_s29 + $0x18] sm:$0xff] }
  0x12   :  { %v17256_v8 = vpack.c.bf16 %v13981_v5, %v13980_v2  ;;  %v13982_v9 = vld [vmem:[%s21487_s29 + $0x90] sm:$0xff]  ;;  %v13983_v10 = vld [vmem:[%s21487_s29 + $0x98] sm:$0xff]  ;;  %v17253_v12 = vpack.c.bf16 %v80_v7, %v79_v6  ;;  %v13987_v14 = vld [vmem:[%s21487_s29 + $0x100] sm:$0xff] }
  0x13   :  { %17251 = vmatpush3.bf16.msra.mxu0 %v17250_v4  ;;  %v17259_v13 = vpack.c.bf16 %v13983_v10, %v13982_v9  ;;  %v13988_v15 = vld [vmem:[%s21487_s29 + $0x108] sm:$0xff] }
  0x14   :  { %17257 = vmatpush3.bf16.msra.mxu1 %v17256_v8  ;;  %17252 = vmatprep.subr.bf16.mxu0 %v18201_v3 }
  0x15   :  { %17258 = vmatprep.subr.bf16.mxu1 %v18201_v3 }
  0x16   :  { %27 = vsyncpa [#allocation3], 0  ;;  %s21488_s24 = sld [smem:[#allocation5_spill]]  ;;  %vm88_vm1 = vcmask 261120   ;;  %v17262_v17 = vpack.c.bf16 %v13988_v15, %v13987_v14  ;;  %v13989_v19 = vld [vmem:[%s21487_s29 + $0x110] sm:$0xff]  ;;  %v13990_v20 = vld [vmem:[%s21487_s29 + $0x118] sm:$0xff] }
  0x17   :  { %17254 = vmatpush3.bf16.msra.mxu0 %v17253_v12  ;;  %v17265_v21 = vpack.c.bf16 %v13990_v20, %v13989_v19  ;;  %s21489_s4 = sld [smem:[#allocation8_spill]]  ;;  %vm332_vm2 = vcmask 64512   ;;  %v13997_v43 = vld [vmem:[%s21487_s29 + $0x20] sm:$0xff]  ;;  %v13998_v44 = vld [vmem:[%s21487_s29 + $0x28] sm:$0xff]  ;;  %v13999_v46 = vld [vmem:[%s21487_s29 + $0x30] sm:$0xff]  ;;  %s21490_s0 = sld [smem:[#allocation9_spill]] }
  0x18   :  { %17260 = vmatpush3.bf16.msra.mxu1 %v17259_v13  ;;  %17261 = vmatprep.subr.bf16.mxu0 %v18201_v3  ;;  %v17268_v45 = vpack.c.bf16 %v13998_v44, %v13997_v43  ;;  %v14000_v47 = vld [vmem:[%s21487_s29 + $0x38] sm:$0xff]  ;;  %v14004_v58 = vld [vmem:[%s21487_s29 + $0xa0] sm:$0xff]  ;;  %v14005_v59 = vld [vmem:[%s21487_s29 + $0xa8] sm:$0xff]  ;;  %vm2382_vm3 = vcmask 24576   ;;  %vm2399_vm4 = vcmask 1043456   ;;  %vm2395_vm5 = vcmask 31744  }
  0x19   :  { %15577 = vmatprep.subr.mxu1 %v18203_v11  ;;  %v17271_v48 = vpack.c.bf16 %v14000_v47, %v13999_v46  ;;  %v17274_v61 = vpack.c.bf16 %v14005_v59, %v14004_v58  ;;  %v14006_v63 = vld [vmem:[%s21487_s29 + $0xb0] sm:$0xff]  ;;  %v14007_v0 = vld [vmem:[%s21487_s29 + $0xb8] sm:$0xff]  ;;  %v14011_v15 = vld [vmem:[%s21487_s29 + $0x120] sm:$0xff]  ;;  %s21491_s5 = sld [smem:[#allocation11_spill]]  ;;  %s21492_s28 = sld [smem:[#allocation6_spill]]  ;;  %vm4011_vm6 = vcmask 523264  }
  0x1a   :  { %v17277_v1 = vpack.c.bf16 %v14007_v0, %v14006_v63  ;;  %v14013_v19 = vld [vmem:[%s21487_s29 + $0x130] sm:$0xff]  ;;  %v14027_v58 = vld [vmem:[%s21487_s29 + $0x58] sm:$0xff]  ;;  %vm4263_vm7 = vcmask 130048   ;;  %s21493_s3 = sld [smem:[#allocation10_spill]]  ;;  %s21494_s22 = sld [smem:[#allocation12_spill]] }
  0x1c   :  { %v18363_v16 = vld [vmem:[%s21488_s24] sm:$0xff]  ;;  %v18368_v18 = vld [vmem:[%s21488_s24 + $0x8] sm:$0xff] }
  0x1d   :  { %15548 = vmatmul.mubr.msk.f32.vlgmr.msra.gmra.mrb[0].mxu0 %vm88_vm1, %v18363_v16  ;;  %15559 = vmatmul.mubr.msk.f32.vlgmr.msra.gmra.mrb[0].mxu1 %vm88_vm1, %v18368_v18  ;;  %v13978_v22 = vld [vmem:[%s21489_s4] ss:$0 sm:$0xff]  ;;  %v13985_v23 = vld [vmem:[%s21489_s4 + $0x4] ss:$0 sm:$0xff]  ;;  %v13992_v31 = vld [vmem:[%s21489_s4 + $0x8] ss:$0 sm:$0xff] }
  0x1e   :  { %17263 = vmatpush3.bf16.msra.mxu0 %v17262_v17  ;;  %15569 = vmatprep.mubr.msk.f32.mxu0 %vm18202_vm0, %v18203_v11  ;;  %v14002_v7 = vld [vmem:[%s21489_s4 + $0x1] ss:$0 sm:$0xff]  ;;  %v14009_v9 = vld [vmem:[%s21489_s4 + $0x5] ss:$0 sm:$0xff]  ;;  %v14012_v17 = vld [vmem:[%s21487_s29 + $0x128] sm:$0xff] }
  0x1f   :  { %17264 = vmatprep.subr.bf16.mxu0 %v18201_v3  ;;  %15579 = vmatprep.mubr.msk.f32.mxu1 %vm18202_vm0, %v18203_v11  ;;  %v17280_v20 = vpack.c.bf16 %v14012_v17, %v14011_v15  ;;  %v502_v47 = vld [vmem:[%s21490_s0] sm:$0xff]  ;;  %v14039_v15 = vld [vmem:[%s21487_s29 + $0x148] sm:$0xff]  ;;  %v14040_v17 = vld [vmem:[%s21487_s29 + $0x150] sm:$0xff] }
  0x20   :  { %v14036_v0 = vld [vmem:[%s21489_s4 + $0x6] ss:$0 sm:$0xff] }
  0x22   :  { %17266 = vmatpush3.bf16.msra.mxu0 %v17265_v21  ;;  %v14014_v21 = vld [vmem:[%s21487_s29 + $0x138] sm:$0xff] }
  0x23   :  { %15572 = vmatprep.subr.mxu0 %v18203_v11 }
  0x25   :  { %15570 = vmatmul.mubr.msk.f32.vlgmr.msra.gmra.mrb[2].mxu0 %vm88_vm1, %v18368_v18 }
  0x26   :  { %15574 = vmatprep.mubr.msk.f32.mxu0 %vm18202_vm0, %v18203_v11 }
  0xf0   :  { %v158_v24 = vpop.f32.mrb[0].mxu0  ;;  %v245_v26 = vpop.f32.mrb[0].mxu1 }
  0xf1   :  { %v159_v25 = vadd.f32 %v13978_v22, %v158_v24  ;;  %v15549_v27 = vpop.f32.mrb[1].mxu0  ;;  %v246_v28 = vadd.f32 %v13985_v23, %v245_v26  ;;  %v15560_v29 = vpop.f32.mrb[1].mxu1  ;;  %v17283_v22 = vpack.c.bf16 %v14014_v21, %v14013_v19 }
  0xf3   :  { %v162_v30 = vmul.f32 0.35355338, %v159_v25  ;;  %15573 = vmatpush3.xpose.msk.msra.mxu0 %vm332_vm2, %v246_v28 }
  0xf4   :  { %17267 = vmatprep.subr.bf16.mxu0 %v18201_v3 }
  0xf6   :  { %15575 = vmatmul.mubr.msk.f32.vlgmr.msra.gmra.mrb[4].mxu0 %vm332_vm2, %v162_v30 }
  0xf7   :  { %15590 = vmatprep.mubr.msk.f32.mxu0 %vm18202_vm0, %v18203_v11  ;;  %17269 = vmatpush3.bf16.msra.mxu0 %v17268_v45 }
  0xf8   :  { %v328_v32 = vpop.f32.mrb[2].mxu0  ;;  %17270 = vmatprep.subr.bf16.mxu0 %v18201_v3 }
  0xf9   :  { %v329_v33 = vadd.f32 %v13992_v31, %v328_v32  ;;  %v15571_v34 = vpop.f32.mrb[3].mxu0  ;;  %v14016_v31 = vld [vmem:[%s21489_s4 + $0x9] ss:$0 sm:$0xff] }
  0xfb   :  { %15578 = vmatpush3.msra.mxu1 %v329_v33  ;;  %17272 = vmatpush3.bf16.msra.mxu0 %v17271_v48  ;;  %v14031_v48 = vld [vmem:[%s21487_s29 + $0xc0] sm:$0xff] }
  0xfc   :  { %17273 = vmatprep.subr.bf16.mxu1 %v18201_v3  ;;  %17279 = vmatprep.subr.bf16.mxu0 %v18201_v3 }
  0xfe   :  { %15591 = vmatmul.mubr.msk.f32.vlgmr.msra.gmra.mrb[6].mxu0 %vm88_vm1, %v18363_v16 }
  0xff   :  { %15612 = vmatprep.mubr.msk.f32.mxu0 %vm18202_vm0, %v18203_v11  ;;  %17281 = vmatpush3.bf16.msra.mxu0 %v17280_v20  ;;  %v14041_v20 = vld [vmem:[%s21487_s29 + $0x158] sm:$0xff] }
 0x100   :  { %17282 = vmatprep.subr.bf16.mxu0 %v18201_v3  ;;  %v17301_v21 = vpack.c.bf16 %v14041_v20, %v14040_v17 }
 0x103   :  { %17284 = vmatpush3.bf16.msra.mxu0 %v17283_v22 }
 0x104   :  { %15625 = vmatprep.subr.mxu0 %v18203_v11 }
 0x106   :  { %15613 = vmatmul.mubr.msk.f32.vlgmr.msra.gmra.mrb[8].mxu0 %vm88_vm1, %v18368_v18 }
 0x107   :  { %15627 = vmatprep.mubr.msk.f32.mxu0 %vm18202_vm0, %v18203_v11 }
 0x1c9   :  { %v405_v35 = vpop.f32.mrb[4].mxu0 }
 0x1ca   :  { %v15576_v36 = vpop.f32.mrb[5].mxu0  ;;  %v409_v37 = vsel %vm332_vm2, %v405_v35, -inf }
 0x1cb   :  { %410 = vmax.xlane.f32.xlu0 %v409_v37 }
 0x1d1   :  { %v582_v2 = vpop.f32.mrb[6].mxu0 }
 0x1d2   :  { %v15592_v4 = vpop.f32.mrb[7].mxu0  ;;  %v583_v8 = vadd.f32 %v14002_v7, %v582_v2 }
 0x1d4   :  { %v586_v14 = vmul.f32 0.35355338, %v583_v8  ;;  %v14029_v8 = vld [vmem:[%s21489_s4 + $0x2] ss:$0 sm:$0xff] }
 0x1d9   :  { %v749_v32 = vpop.f32.mrb[8].mxu0 }
 0x1da   :  { %v750_v33 = vadd.f32 %v14016_v31, %v749_v32  ;;  %v15614_v34 = vpop.f32.mrb[9].mxu0 }
 0x1db   :  { %v14048_v34 = vld [vmem:[%s21490_s0 + $0x10] sm:$0xff] }
 0x258   :  { %v411_v38 = vpop.xlane.xlu0 %410 }
 0x259   :  { %v412_v39 = vsub.f32 %v405_v35, %v411_v38  ;;  %v14021_v35 = vld [vmem:[%s21490_s0 + $0x8] sm:$0xff] }
 0x25a   :  { %15626 = vmatpush3.msra.mxu0 %v14021_v35 }
 0x25b   :  { %v413_v40 = vmul.f32 1.442695, %v412_v39  ;;  %17285 = vmatprep.subr.bf16.mxu0 %v18201_v3 }
 0x25d   :  { %18059 = vpow2.f32 %v413_v40 }
 0x267   :  { %v18060_v41 = vpop.eup %18059 }
 0x268   :  { %v415_v42 = vsel %vm332_vm2, %v18060_v41, 0.0 }
 0x269   :  { %416 = vadd.xlane.f32.xlu0 %v415_v42 }
 0x2f6   :  { %v417_v49 = vpop.xlane.xlu0 %416 }
 0x2f7   :  { %18061 = vrcp.f32 %v417_v49  ;;  %v14032_v49 = vld [vmem:[%s21487_s29 + $0xc8] sm:$0xff] }
 0x301   :  { %v18062_v50 = vpop.eup %18061 }
 0x302   :  { %v419_v51 = vmul.f32 %v18062_v50, %v18060_v41  ;;  %v17292_v50 = vpack.c.bf16 %v14032_v49, %v14031_v48  ;;  %v14052_v49 = vld [vmem:[%s21487_s29 + $0x70] sm:$0xff] }
 0x304   :  { %v420_v52 = vsel %vm332_vm2, %v419_v51, 0.0  ;;  %v14033_v51 = vld [vmem:[%s21487_s29 + $0xd0] sm:$0xff] }
 0x305   :  { %v421_v53 = vrot.slane %v420_v52, 4 }
 0x307   :  { %v422_v54 = vadd.f32 %v421_v53, %v420_v52  ;;  %v14034_v52 = vld [vmem:[%s21487_s29 + $0xd8] sm:$0xff] }
 0x308   :  { %v17295_v53 = vpack.c.bf16 %v14034_v52, %v14033_v51  ;;  %v14057_v52 = vld [vmem:[%s21487_s29 + $0xe0] sm:$0xff] }
 0x309   :  { %v423_v55 = vrot.slane %v422_v54, 2 }
 0x30b   :  { %v424_v56 = vadd.f32 %v423_v55, %v422_v54  ;;  %v14024_v54 = vld [vmem:[%s21487_s29 + $0x40] sm:$0xff]  ;;  %v14025_v55 = vld [vmem:[%s21487_s29 + $0x48] sm:$0xff] }
 0x30d   :  { %v425_v57 = vrot.slane %v424_v56, 1 }
 0x30f   :  { %v426_v60 = vadd.f32 %v425_v57, %v424_v56  ;;  %v17286_v56 = vpack.c.bf16 %v14025_v55, %v14024_v54  ;;  %v14026_v57 = vld [vmem:[%s21487_s29 + $0x50] sm:$0xff] }
 0x310   :  { %v14059_v55 = vld [vmem:[%s21487_s29 + $0xf0] sm:$0xff] }
 0x311   :  { %v428_v62 = vmul.f32 0.125, %v426_v60 }
 0x313   :  { %15580 = vmatmul.mubr.msk.f32.vlgmr.msra.gmra.mrb[2].mxu1 %vm332_vm2, %v428_v62 }
 0x314   :  { %17275 = vmatpush3.bf16.msra.mxu1 %v17274_v61  ;;  %15601 = vmatprep.mubr.msk.f32.mxu1 %vm18202_vm0, %v18203_v11  ;;  %v17289_v61 = vpack.c.bf16 %v14027_v58, %v14026_v57 }
 0x315   :  { %17276 = vmatprep.subr.bf16.mxu1 %v18201_v3 }
 0x318   :  { %17278 = vmatpush3.bf16.msra.mxu1 %v17277_v1 }
 0x319   :  { %15615 = vmatprep.subr.mxu1 %v18203_v11 }
 0x31b   :  { %15602 = vmatmul.mubr.msk.f32.vlgmr.msra.gmra.mrb[4].mxu1 %vm88_vm1, %v18368_v18 }
 0x31c   :  { %15617 = vmatprep.mubr.msk.f32.mxu1 %vm18202_vm0, %v18203_v11 }
 0x3e6   :  { %v18449_v5 = vpop.f32.mrb[2].mxu1 }
 0x3e7   :  { %v15581_v6 = vpop.f32.mrb[3].mxu1 }
 0x3ee   :  { %v666_v10 = vpop.f32.mrb[4].mxu1 }
 0x3ef   :  { %v667_v12 = vadd.f32 %v14009_v9, %v666_v10  ;;  %v15603_v13 = vpop.f32.mrb[5].mxu1 }
 0x3f1   :  { %15616 = vmatpush3.xpose.msk.msra.mxu1 %vm332_vm2, %v667_v12 }
 0x3f2   :  { %15620 = vmatprep.subr.mxu1 %v18203_v11 }
 0x3f4   :  { %15618 = vmatmul.mubr.msk.f32.vlgmr.msra.gmra.mrb[6].mxu1 %vm332_vm2, %v586_v14  ;;  %v14038_v14 = vld [vmem:[%s21487_s29 + $0x140] sm:$0xff] }
 0x3f5   :  { %15622 = vmatprep.mubr.msk.f32.mxu1 %vm18202_vm0, %v18203_v11  ;;  %15621 = vmatpush3.msra.mxu1 %v750_v33  ;;  %v17298_v19 = vpack.c.bf16 %v14039_v15, %v14038_v14  ;;  %v14067_v14 = vld [vmem:[%s21487_s29 + $0x178] sm:$0xff] }
 0x3f6   :  { %15630 = vmatprep.subr.mxu1 %v18203_v11 }
 0x4c7   :  { %v825_v23 = vpop.f32.mrb[6].mxu1 }
 0x4c8   :  { %v15619_v24 = vpop.f32.mrb[7].mxu1  ;;  %v829_v25 = vsel %vm332_vm2, %v825_v23, -inf }
 0x4c9   :  { %830 = vmax.xlane.f32.xlu1 %v829_v25 }
 0x556   :  { %v831_v26 = vpop.xlane.xlu1 %830 }
 0x557   :  { %v832_v27 = vsub.f32 %v825_v23, %v831_v26 }
 0x559   :  { %v833_v28 = vmul.f32 1.442695, %v832_v27 }
 0x55b   :  { %18063 = vpow2.f32 %v833_v28 }
 0x565   :  { %v18064_v29 = vpop.eup %18063 }
 0x566   :  { %v835_v30 = vsel %vm332_vm2, %v18064_v29, 0.0 }
 0x567   :  { %836 = vadd.xlane.f32.xlu1 %v835_v30  ;;  %v14043_v30 = vld [vmem:[%s21489_s4 + $0xa] ss:$0 sm:$0xff] }
 0x5f4   :  { %v837_v36 = vpop.xlane.xlu1 %836 }
 0x5f5   :  { %18065 = vrcp.f32 %v837_v36 }
 0x5ff   :  { %v18066_v37 = vpop.eup %18065 }
 0x600   :  { %v839_v38 = vmul.f32 %v18066_v37, %v18064_v29 }
 0x602   :  { %v840_v39 = vsel %vm332_vm2, %v839_v38, 0.0 }
 0x603   :  { %v841_v40 = vrot.slane %v840_v39, 4 }
 0x605   :  { %v842_v41 = vadd.f32 %v841_v40, %v840_v39 }
 0x607   :  { %v843_v42 = vrot.slane %v842_v41, 2 }
 0x609   :  { %v844_v43 = vadd.f32 %v843_v42, %v842_v41 }
 0x60b   :  { %v845_v44 = vrot.slane %v844_v43, 1 }
 0x60d   :  { %v846_v45 = vadd.f32 %v845_v44, %v844_v43 }
 0x60f   :  { %v847_v46 = vmul.f32 0.125, %v846_v45 }
 0x611   :  { %15623 = vmatmul.mubr.msk.f32.vlgmr.msra.gmra.mrb[8].mxu1 %vm332_vm2, %v847_v46  ;;  %v14050_v46 = vld [vmem:[%s21487_s29 + $0x60] sm:$0xff] }
 0x612   :  { %15631 = vmatpush3.msra.mxu1 %v502_v47  ;;  %15632 = vmatprep.mubr.msk.f32.mxu1 %vm18202_vm0, %v18203_v11  ;;  %v14051_v47 = vld [vmem:[%s21487_s29 + $0x68] sm:$0xff] }
 0x613   :  { %17291 = vmatprep.subr.bf16.mxu1 %v18201_v3  ;;  %v17304_v48 = vpack.c.bf16 %v14051_v47, %v14050_v46  ;;  %v14082_v47 = vld [vmem:[%s21487_s29 + $0x200] sm:$0xff] }
 0x615   :  { %15633 = vmatmul.mubr.msk.f32.vlgmr.msra.gmra.mrb[10].mxu1 %vm332_vm2, %v18449_v5 }
 0x616   :  { %17293 = vmatpush3.bf16.msra.mxu1 %v17292_v50  ;;  %15654 = vmatprep.mubr.msk.f32.mxu1 %vm18202_vm0, %v18203_v11  ;;  %v14053_v50 = vld [vmem:[%s21487_s29 + $0x78] sm:$0xff] }
 0x617   :  { %17294 = vmatprep.subr.bf16.mxu1 %v18201_v3  ;;  %v17307_v51 = vpack.c.bf16 %v14053_v50, %v14052_v49  ;;  %v14084_v50 = vld [vmem:[%s21487_s29 + $0x210] sm:$0xff] }
 0x61a   :  { %17296 = vmatpush3.bf16.msra.mxu1 %v17295_v53  ;;  %v14058_v53 = vld [vmem:[%s21487_s29 + $0xe8] sm:$0xff] }
 0x61b   :  { %15668 = vmatprep.subr.mxu1 %v18203_v11  ;;  %v17310_v54 = vpack.c.bf16 %v14058_v53, %v14057_v52 }
 0x61d   :  { %15655 = vmatmul.mubr.msk.f32.vlgmr.msra.gmra.mrb[12].mxu1 %vm88_vm1, %v18368_v18 }
 0x61e   :  { %15670 = vmatprep.mubr.msk.f32.mxu1 %vm18202_vm0, %v18203_v11 }
 0x6e4   :  { %v917_v59 = vpop.f32.mrb[8].mxu1 }
 0x6e5   :  { %v15624_v60 = vpop.f32.mrb[9].mxu1  ;;  %15628 = vmatmul.mubr.msk.f32.vlgmr.msra.gmra.mrb[10].mxu0 %vm332_vm2, %v917_v59 }
 0x6e6   :  { %17287 = vmatpush3.bf16.msra.mxu0 %v17286_v56  ;;  %15643 = vmatprep.mubr.msk.f32.mxu0 %vm18202_vm0, %v18203_v11  ;;  %v14060_v56 = vld [vmem:[%s21487_s29 + $0xf8] sm:$0xff] }
 0x6e7   :  { %17288 = vmatprep.subr.bf16.mxu0 %v18201_v3  ;;  %v17313_v59 = vpack.c.bf16 %v14060_v56, %v14059_v55  ;;  %v18708_v55 = vld [vmem:[%s21488_s24 + $0x10] sm:$0xf] }
 0x6e8   :  { %v1065_v62 = vpop.f32.mrb[10].mxu1 }
 0x6e9   :  { %v15634_v63 = vpop.f32.mrb[11].mxu1 }
 0x6ea   :  { %17290 = vmatpush3.bf16.msra.mxu0 %v17289_v61 }
 0x6eb   :  { %17297 = vmatprep.subr.bf16.mxu0 %v18201_v3 }
 0x6ed   :  { %15644 = vmatmul.mubr.msk.f32.vlgmr.msra.gmra.mrb[12].mxu0 %vm88_vm1, %v18363_v16 }
 0x6ee   :  { %15665 = vmatprep.mubr.msk.f32.mxu0 %vm18202_vm0, %v18203_v11  ;;  %17299 = vmatpush3.bf16.msra.mxu0 %v17298_v19 }
 0x6ef   :  { %17300 = vmatprep.subr.bf16.mxu0 %v18201_v3 }
 0x6f0   :  { %v1232_v1 = vpop.f32.mrb[12].mxu1 }
 0x6f1   :  { %v1233_v2 = vadd.f32 %v14036_v0, %v1232_v1  ;;  %v15656_v4 = vpop.f32.mrb[13].mxu1  ;;  %v14055_v1 = vld [vmem:[%s21489_s4 + $0x3] ss:$0 sm:$0xff] }
 0x6f2   :  { %17302 = vmatpush3.bf16.msra.mxu0 %v17301_v21  ;;  %v14062_v4 = vld [vmem:[%s21489_s4 + $0x7] ss:$0 sm:$0xff] }
 0x6f3   :  { %15669 = vmatpush3.xpose.msk.msra.mxu1 %vm332_vm2, %v1233_v2  ;;  %15678 = vmatprep.subr.mxu0 %v18203_v11 }
 0x6f4   :  { %15673 = vmatprep.subr.mxu1 %v18203_v11 }
 0x6f5   :  { %15666 = vmatmul.mubr.msk.f32.vlgmr.msra.gmra.mrb[14].mxu0 %vm88_vm1, %v18368_v18 }
 0x6f6   :  { %15680 = vmatprep.mubr.msk.f32.mxu0 %vm18202_vm0, %v18203_v11  ;;  %15679 = vmatpush3.msra.mxu0 %v14048_v34 }
 0x6f7   :  { %17309 = vmatprep.subr.bf16.mxu0 %v18201_v3 }
 0x7b8   :  { %v992_v5 = vpop.f32.mrb[10].mxu0 }
 0x7b9   :  { %v18546_v6 = vadd.f32 %v1065_v62, %v992_v5  ;;  %v15629_v7 = vpop.f32.mrb[11].mxu0 }
 0x7c0   :  { %v1148_v9 = vpop.f32.mrb[12].mxu0 }
 0x7c1   :  { %v1149_v10 = vadd.f32 %v14029_v8, %v1148_v9  ;;  %v15645_v12 = vpop.f32.mrb[13].mxu0 }
 0x7c2   :  { %v14066_v12 = vld [vmem:[%s21487_s29 + $0x170] sm:$0xff] }
 0x7c3   :  { %v1152_v13 = vmul.f32 0.35355338, %v1149_v10  ;;  %v14065_v10 = vld [vmem:[%s21487_s29 + $0x168] sm:$0xff]  ;;  %v17319_v15 = vpack.c.bf16 %v14067_v14, %v14066_v12 }
 0x7c5   :  { %15671 = vmatmul.mubr.msk.f32.vlgmr.msra.gmra.mrb[14].mxu1 %vm332_vm2, %v1152_v13 }
 0x7c6   :  { %15675 = vmatprep.mubr.msk.f32.mxu1 %vm18202_vm0, %v18203_v11 }
 0x7c8   :  { %v1315_v31 = vpop.f32.mrb[14].mxu0 }
 0x7c9   :  { %v1316_v32 = vadd.f32 %v14043_v30, %v1315_v31  ;;  %v15667_v33 = vpop.f32.mrb[15].mxu0 }
 0x7cb   :  { %15674 = vmatpush3.msra.mxu1 %v1316_v32 }
 0x7cc   :  { %17303 = vmatprep.subr.bf16.mxu1 %v18201_v3 }
 0x898   :  { %v1391_v22 = vpop.f32.mrb[14].mxu1 }
 0x899   :  { %v15672_v23 = vpop.f32.mrb[15].mxu1  ;;  %v1395_v24 = vsel %vm332_vm2, %v1391_v22, -inf }
 0x89a   :  { %1396 = vmax.xlane.f32.xlu0 %v1395_v24 }
 0x927   :  { %v1397_v25 = vpop.xlane.xlu0 %1396 }
 0x928   :  { %v1398_v26 = vsub.f32 %v1391_v22, %v1397_v25 }
 0x92a   :  { %v1399_v27 = vmul.f32 1.442695, %v1398_v26 }
 0x92c   :  { %18067 = vpow2.f32 %v1399_v27 }
 0x936   :  { %v18068_v28 = vpop.eup %18067 }
 0x937   :  { %v1401_v29 = vsel %vm332_vm2, %v18068_v28, 0.0 }
 0x938   :  { %1402 = vadd.xlane.f32.xlu1 %v1401_v29  ;;  %v14074_v29 = vld [vmem:[%s21490_s0 + $0x18] sm:$0xff] }
 0x9c5   :  { %v1403_v35 = vpop.xlane.xlu1 %1402 }
 0x9c6   :  { %18069 = vrcp.f32 %v1403_v35 }
 0x9d0   :  { %v18070_v36 = vpop.eup %18069 }
 0x9d1   :  { %v1405_v37 = vmul.f32 %v18070_v36, %v18068_v28 }
 0x9d3   :  { %v1406_v38 = vsel %vm332_vm2, %v1405_v37, 0.0 }
 0x9d4   :  { %v1407_v39 = vrot.slane %v1406_v38, 4 }
 0x9d6   :  { %v1408_v40 = vadd.f32 %v1407_v39, %v1406_v38 }
 0x9d8   :  { %v1409_v41 = vrot.slane %v1408_v40, 2 }
 0x9da   :  { %v1410_v42 = vadd.f32 %v1409_v41, %v1408_v40  ;;  %v14076_v41 = vld [vmem:[%s21487_s29 + $0x180] sm:$0xff] }
 0x9dc   :  { %v1411_v43 = vrot.slane %v1410_v42, 1 }
 0x9de   :  { %v1412_v44 = vadd.f32 %v1411_v43, %v1410_v42  ;;  %v14077_v42 = vld [vmem:[%s21487_s29 + $0x188] sm:$0xff] }
 0x9df   :  { %v17322_v43 = vpack.c.bf16 %v14077_v42, %v14076_v41 }
 0x9e0   :  { %v1413_v45 = vmul.f32 0.125, %v1412_v44  ;;  %v14078_v44 = vld [vmem:[%s21487_s29 + $0x190] sm:$0xff] }
 0x9e2   :  { %15676 = vmatmul.mubr.msk.f32.vlgmr.msra.gmra.mrb[16].mxu1 %vm332_vm2, %v1413_v45  ;;  %v14079_v45 = vld [vmem:[%s21487_s29 + $0x198] sm:$0xff] }
 0x9e3   :  { %15691 = vmatprep.mubr.msk.f32.mxu1 %vm18202_vm0, %v18203_v11  ;;  %17305 = vmatpush3.bf16.msra.mxu1 %v17304_v48  ;;  %v17325_v46 = vpack.c.bf16 %v14079_v45, %v14078_v44  ;;  %v14083_v48 = vld [vmem:[%s21487_s29 + $0x208] sm:$0xff]  ;;  %v14112_v45 = vld [vmem:[%s21489_s4 + $0x11] ss:$0 sm:$0xff] }
 0x9e4   :  { %17306 = vmatprep.subr.bf16.mxu1 %v18201_v3  ;;  %v17328_v49 = vpack.c.bf16 %v14083_v48, %v14082_v47 }
 0x9e7   :  { %17308 = vmatpush3.bf16.msra.mxu1 %v17307_v51  ;;  %v14085_v51 = vld [vmem:[%s21487_s29 + $0x218] sm:$0xff] }
 0x9e8   :  { %17315 = vmatprep.subr.bf16.mxu1 %v18201_v3 }
 0x9ea   :  { %15692 = vmatmul.mubr.msk.f32.vlgmr.msra.gmra.mrb[18].mxu1 %vm88_vm1, %v18363_v16 }
 0x9eb   :  { %15713 = vmatprep.mubr.msk.f32.mxu1 %vm18202_vm0, %v18203_v11 }
 0xab5   :  { %v1483_v57 = vpop.f32.mrb[16].mxu1 }
 0xab6   :  { %v15677_v58 = vpop.f32.mrb[17].mxu1  ;;  %15681 = vmatmul.mubr.msk.f32.vlgmr.msra.gmra.mrb[16].mxu0 %vm332_vm2, %v1483_v57 }
 0xab7   :  { %17311 = vmatpush3.bf16.msra.mxu0 %v17310_v54  ;;  %15702 = vmatprep.mubr.msk.f32.mxu0 %vm18202_vm0, %v18203_v11  ;;  %v17331_v54 = vpack.c.bf16 %v14085_v51, %v14084_v50  ;;  %v14114_v50 = vld [vmem:[%s21487_s29 + $0x2a0] sm:$0xff]  ;;  %v14115_v51 = vld [vmem:[%s21487_s29 + $0x2a8] sm:$0xff] }
 0xab8   :  { %17312 = vmatprep.subr.bf16.mxu0 %v18201_v3 }
 0xabb   :  { %17314 = vmatpush3.bf16.msra.mxu0 %v17313_v59 }
 0xabc   :  { %15716 = vmatprep.subr.mxu0 %v18203_v11 }
 0xabd   :  { %v1642_v60 = vpop.f32.mrb[18].mxu1 }
 0xabe   :  { %15703 = vmatmul.mubr.msk.f32.vlgmr.msra.gmra.mrb[18].mxu0 %vm88_vm1, %v18368_v18  ;;  %v15693_v61 = vpop.f32.mrb[19].mxu1  ;;  %v1643_v2 = vadd.f32 %v14055_v1, %v1642_v60 }
 0xabf   :  { %15718 = vmatprep.mubr.msk.f32.mxu0 %vm18202_vm0, %v18203_v11  ;;  %v14080_v61 = vld [vmem:[%s21489_s4 + $0xc] sm:$0x1] }
 0xac0   :  { %v1646_v9 = vmul.f32 0.35355338, %v1643_v2 }
 0xb89   :  { %v1558_v62 = vpop.f32.mrb[16].mxu0 }
 0xb8a   :  { %v18626_v63 = vadd.f32 %v1558_v62, %v18546_v6  ;;  %v15682_v0 = vpop.f32.mrb[17].mxu0  ;;  %v14064_v6 = vld [vmem:[%s21487_s29 + $0x160] sm:$0xff] }
 0xb8b   :  { %v17316_v13 = vpack.c.bf16 %v14065_v10, %v14064_v6  ;;  %v14087_v0 = vld [vmem:[%s21489_s4 + $0x10] ss:$0 sm:$0xff]  ;;  %v14092_v6 = vld [vmem:[%s21487_s29 + $0x298] sm:$0xff] }
 0xb8d   :  { %17317 = vmatpush3.bf16.msra.mxu1 %v17316_v13 }
 0xb8e   :  { %17318 = vmatprep.subr.bf16.mxu1 %v18201_v3 }
 0xb91   :  { %v1726_v5 = vpop.f32.mrb[18].mxu0  ;;  %17320 = vmatpush3.bf16.msra.mxu1 %v17319_v15 }
 0xb92   :  { %v1727_v7 = vadd.f32 %v14062_v4, %v1726_v5  ;;  %v15704_v8 = vpop.f32.mrb[19].mxu0  ;;  %15726 = vmatprep.subr.mxu1 %v18203_v11 }
 0xb93   :  { %v14091_v8 = vld [vmem:[%s21487_s29 + $0x290] sm:$0xff] }
 0xb94   :  { %15717 = vmatpush3.xpose.msk.msra.mxu0 %vm332_vm2, %v1727_v7  ;;  %15714 = vmatmul.mubr.msk.f32.vlgmr.msra.gmra.mrb[20].mxu1 %vm88_vm1, %v18368_v18  ;;  %v14069_v18 = vld [vmem:[%s21489_s4 + $0xb] ss:$0 sm:$0xff]  ;;  %v17337_v10 = vpack.c.bf16 %v14092_v6, %v14091_v8 }
 0xb95   :  { %15721 = vmatprep.subr.mxu0 %v18203_v11  ;;  %15728 = vmatprep.mubr.msk.f32.mxu1 %vm18202_vm0, %v18203_v11  ;;  %v14090_v7 = vld [vmem:[%s21487_s29 + $0x288] sm:$0xff] }
 0xb96   :  { %15727 = vmatpush3.msra.mxu1 %v14074_v29  ;;  %v14104_v29 = vld [vmem:[%s21487_s29 + $0x1b8] sm:$0xff]  ;;  %v14125_v8 = vld [vmem:[%s21490_s0 + $0x28] sm:$0xff] }
 0xb97   :  { %15719 = vmatmul.mubr.msk.f32.vlgmr.msra.gmra.mrb[20].mxu0 %vm332_vm2, %v1646_v9  ;;  %17327 = vmatprep.subr.bf16.mxu1 %v18201_v3 }
 0xb98   :  { %15723 = vmatprep.mubr.msk.f32.mxu0 %vm18202_vm0, %v18203_v11 }
 0xc67   :  { %v1809_v26 = vpop.f32.mrb[20].mxu1 }
 0xc68   :  { %v1810_v27 = vadd.f32 %v14069_v18, %v1809_v26  ;;  %v15715_v28 = vpop.f32.mrb[21].mxu1  ;;  %v14101_v18 = vld [vmem:[%s21487_s29 + $0x1a0] sm:$0xff]  ;;  %v14102_v26 = vld [vmem:[%s21487_s29 + $0x1a8] sm:$0xff] }
 0xc69   :  { %v14103_v28 = vld [vmem:[%s21487_s29 + $0x1b0] sm:$0xff] }
 0xc6a   :  { %v1885_v17 = vpop.f32.mrb[20].mxu0  ;;  %15722 = vmatpush3.msra.mxu0 %v1810_v27  ;;  %v17340_v27 = vpack.c.bf16 %v14102_v26, %v14101_v18 }
 0xc6b   :  { %v15720_v19 = vpop.f32.mrb[21].mxu0  ;;  %v1889_v20 = vsel %vm332_vm2, %v1885_v17, -inf  ;;  %17321 = vmatprep.subr.bf16.mxu0 %v18201_v3 }
 0xc6c   :  { %1890 = vmax.xlane.f32.xlu0 %v1889_v20 }
 0xcf9   :  { %v1891_v21 = vpop.xlane.xlu0 %1890 }
 0xcfa   :  { %v1892_v22 = vsub.f32 %v1885_v17, %v1891_v21 }
 0xcfc   :  { %v1893_v23 = vmul.f32 1.442695, %v1892_v22 }
 0xcfe   :  { %18071 = vpow2.f32 %v1893_v23  ;;  %v14094_v23 = vld [vmem:[%s21489_s4 + $0x14] ss:$0 sm:$0xff] }
 0xd08   :  { %v18072_v24 = vpop.eup %18071 }
 0xd09   :  { %v1895_v25 = vsel %vm332_vm2, %v18072_v24, 0.0 }
 0xd0a   :  { %1896 = vadd.xlane.f32.xlu1 %v1895_v25 }
 0xd97   :  { %v1897_v30 = vpop.xlane.xlu1 %1896 }
 0xd98   :  { %18073 = vrcp.f32 %v1897_v30  ;;  %v17343_v30 = vpack.c.bf16 %v14104_v29, %v14103_v28 }
 0xda2   :  { %v18074_v31 = vpop.eup %18073 }
 0xda3   :  { %v1899_v32 = vmul.f32 %v18074_v31, %v18072_v24 }
 0xda5   :  { %v1900_v33 = vsel %vm332_vm2, %v1899_v32, 0.0  ;;  %v14107_v32 = vld [vmem:[%s21487_s29 + $0x220] sm:$0xff] }
 0xda6   :  { %v1901_v34 = vrot.slane %v1900_v33, 4 }
 0xda8   :  { %v1902_v35 = vadd.f32 %v1901_v34, %v1900_v33  ;;  %v14108_v33 = vld [vmem:[%s21487_s29 + $0x228] sm:$0xff] }
 0xdaa   :  { %v1903_v36 = vrot.slane %v1902_v35, 2 }
 0xdac   :  { %v1904_v37 = vadd.f32 %v1903_v36, %v1902_v35  ;;  %v17346_v35 = vpack.c.bf16 %v14108_v33, %v14107_v32 }
 0xdae   :  { %v1905_v38 = vrot.slane %v1904_v37, 1 }
 0xdb0   :  { %v1906_v39 = vadd.f32 %v1905_v38, %v1904_v37  ;;  %v14110_v37 = vld [vmem:[%s21487_s29 + $0x238] sm:$0xff] }
 0xdb2   :  { %v1907_v40 = vmul.f32 0.125, %v1906_v39 }
 0xdb4   :  { %15724 = vmatmul.mubr.msk.f32.vlgmr.msra.gmra.mrb[22].mxu0 %vm332_vm2, %v1907_v40 }
 0xdb5   :  { %15739 = vmatprep.mubr.msk.f32.mxu0 %vm18202_vm0, %v18203_v11  ;;  %17323 = vmatpush3.bf16.msra.mxu0 %v17322_v43  ;;  %v14105_v43 = vld [vmem:[%s21489_s4 + $0xd] sm:$0x1] }
 0xdb6   :  { %17324 = vmatprep.subr.bf16.mxu0 %v18201_v3 }
 0xdb9   :  { %17326 = vmatpush3.bf16.msra.mxu0 %v17325_v46 }
 0xdba   :  { %17333 = vmatprep.subr.bf16.mxu0 %v18201_v3 }
 0xdbc   :  { %15740 = vmatmul.mubr.msk.f32.vlgmr.msra.gmra.mrb[24].mxu0 %vm88_vm1, %v18363_v16 }
 0xdbd   :  { %15761 = vmatprep.mubr.msk.f32.mxu0 %vm18202_vm0, %v18203_v11 }
 0xe87   :  { %v1977_v52 = vpop.f32.mrb[22].mxu0 }
 0xe88   :  { %v15725_v53 = vpop.f32.mrb[23].mxu0  ;;  %15729 = vmatmul.mubr.msk.f32.vlgmr.msra.gmra.mrb[22].mxu1 %vm332_vm2, %v1977_v52  ;;  %v14116_v52 = vld [vmem:[%s21487_s29 + $0x2b0] sm:$0xff] }
 0xe89   :  { %17329 = vmatpush3.bf16.msra.mxu1 %v17328_v49  ;;  %15750 = vmatprep.mubr.msk.f32.mxu1 %vm18202_vm0, %v18203_v11  ;;  %v17352_v53 = vpack.c.bf16 %v14115_v51, %v14114_v50 }
 0xe8a   :  { %17330 = vmatprep.subr.bf16.mxu1 %v18201_v3 }
 0xe8d   :  { %17332 = vmatpush3.bf16.msra.mxu1 %v17331_v54  ;;  %v14117_v54 = vld [vmem:[%s21487_s29 + $0x2b8] sm:$0xff] }
 0xe8e   :  { %15764 = vmatprep.subr.mxu1 %v18203_v11 }
 0xe8f   :  { %v2132_v56 = vpop.f32.mrb[24].mxu0 }
 0xe90   :  { %15751 = vmatmul.mubr.msk.f32.vlgmr.msra.gmra.mrb[24].mxu1 %vm88_vm1, %v18708_v55  ;;  %v15741_v57 = vpop.f32.mrb[25].mxu0  ;;  %v2133_v62 = vadd.f32 %v14080_v61, %v2132_v56  ;;  %v17355_v56 = vpack.c.bf16 %v14117_v54, %v14116_v52 }
 0xe91   :  { %15766 = vmatprep.mubr.msk.f32.mxu1 %vm18202_vm0, %v18203_v11 }
 0xe92   :  { %v2136_v5 = vmul.f32 0.35355338, %v2133_v62 }
 0xf5b   :  { %v2052_v58 = vpop.f32.mrb[22].mxu1 }
 0xf5c   :  { %v18716_v59 = vadd.f32 %v2052_v58, %v18626_v63  ;;  %v15730_v60 = vpop.f32.mrb[23].mxu1  ;;  %v14089_v63 = vld [vmem:[%s21487_s29 + $0x280] sm:$0xff] }
 0xf5d   :  { %v17334_v9 = vpack.c.bf16 %v14090_v7, %v14089_v63 }
 0xf5f   :  { %17335 = vmatpush3.bf16.msra.mxu0 %v17334_v9 }
 0xf60   :  { %17336 = vmatprep.subr.bf16.mxu0 %v18201_v3 }
 0xf63   :  { %v2219_v1 = vpop.f32.mrb[24].mxu1  ;;  %17338 = vmatpush3.bf16.msra.mxu0 %v17337_v10 }
 0xf64   :  { %v2220_v2 = vadd.f32 %v14087_v0, %v2219_v1  ;;  %v15752_v4 = vpop.f32.mrb[25].mxu1  ;;  %17339 = vmatprep.subr.bf16.mxu0 %v18201_v3 }
 0xf66   :  { %15765 = vmatpush3.xpose.msk.msra.mxu1 %vm332_vm2, %v2220_v2  ;;  %15762 = vmatmul.mubr.msk.f32.vlgmr.msra.gmra.mrb[26].mxu0 %vm88_vm1, %v18708_v55 }
 0xf67   :  { %15769 = vmatprep.subr.mxu1 %v18203_v11  ;;  %15782 = vmatprep.mubr.msk.f32.mxu0 %vm18202_vm0, %v18203_v11 }
 0xf68   :  { %17341 = vmatpush3.bf16.msra.mxu0 %v17340_v27 }
 0xf69   :  { %15767 = vmatmul.mubr.msk.f32.vlgmr.msra.gmra.mrb[26].mxu1 %vm332_vm2, %v2136_v5  ;;  %17342 = vmatprep.subr.bf16.mxu0 %v18201_v3  ;;  %v14119_v5 = vld [vmem:[%s21489_s4 + $0x15] ss:$0 sm:$0xff] }
 0xf6a   :  { %15771 = vmatprep.mubr.msk.f32.mxu1 %vm18202_vm0, %v18203_v11 }
 0xf6c   :  { %17344 = vmatpush3.bf16.msra.mxu0 %v17343_v30  ;;  %v18881_v30 = vld [vmem:[%s21488_s24] sm:$0xff] }
 0xf6d   :  { %17351 = vmatprep.subr.bf16.mxu0 %v18201_v3 }
 0xf6f   :  { %15783 = vmatmul.mubr.msk.f32.vlgmr.msra.gmra.mrb[28].mxu0 %vm88_vm1, %v18363_v16  ;;  %v14109_v16 = vld [vmem:[%s21487_s29 + $0x230] sm:$0xff] }
 0xf70   :  { %15804 = vmatprep.mubr.msk.f32.mxu0 %vm18202_vm0, %v18203_v11  ;;  %v17349_v38 = vpack.c.bf16 %v14110_v37, %v14109_v16  ;;  %17353 = vmatpush3.bf16.msra.mxu0 %v17352_v53  ;;  %v14132_v37 = vld [vmem:[%s21489_s4 + $0xe] sm:$0x1] }
 0xf71   :  { %17354 = vmatprep.subr.bf16.mxu0 %v18201_v3 }
 0xf74   :  { %17356 = vmatpush3.bf16.msra.mxu0 %v17355_v56 }
 0xf75   :  { %15817 = vmatprep.subr.mxu0 %v18203_v11 }
 0xf77   :  { %15805 = vmatmul.mubr.msk.f32.vlgmr.msra.gmra.mrb[30].mxu0 %vm88_vm1, %v18708_v55 }
 0xf78   :  { %15819 = vmatprep.mubr.msk.f32.mxu0 %vm18202_vm0, %v18203_v11  ;;  %15818 = vmatpush3.msra.mxu0 %v14125_v8  ;;  %v14157_v8 = vld [vmem:[%s21487_s29 + $0x1f8] sm:$0xff] }
 0xf79   :  { %17357 = vmatprep.subr.bf16.mxu0 %v18201_v3 }
0x1039   :  { %v2302_v22 = vpop.f32.mrb[26].mxu0 }
0x103a   :  { %v15763_v24 = vpop.f32.mrb[27].mxu0  ;;  %v2303_v25 = vadd.f32 %v14094_v23, %v2302_v22  ;;  %v14129_v22 = vld [vmem:[%s21487_s29 + $0x1c8] sm:$0xff] }
0x103b   :  { %v14130_v24 = vld [vmem:[%s21487_s29 + $0x1d0] sm:$0xff] }
0x103c   :  { %v2378_v12 = vpop.f32.mrb[26].mxu1  ;;  %15770 = vmatpush3.msk.msra.mxu1 %vm2399_vm4, %v2303_v25  ;;  %v14131_v25 = vld [vmem:[%s21487_s29 + $0x1d8] sm:$0xff] }
0x103d   :  { %v15768_v13 = vpop.f32.mrb[27].mxu1  ;;  %v2383_v14 = vsel %vm2382_vm3, %v2378_v12, -inf  ;;  %17345 = vmatprep.subr.bf16.mxu1 %v18201_v3  ;;  %v17361_v27 = vpack.c.bf16 %v14131_v25, %v14130_v24  ;;  %v14158_v25 = vld [vmem:[%s21489_s4 + $0xf] sm:$0x1] }
0x103e   :  { %2384 = vmax.xlane.f32.xlu0 %v2383_v14  ;;  %v14134_v13 = vld [vmem:[%s21487_s29 + $0x240] sm:$0xff]  ;;  %v14135_v14 = vld [vmem:[%s21487_s29 + $0x248] sm:$0xff] }
0x1042   :  { %v2548_v39 = vpop.f32.mrb[28].mxu0 }
0x1043   :  { %v15784_v40 = vpop.f32.mrb[29].mxu0  ;;  %v2549_v44 = vadd.f32 %v14105_v43, %v2548_v39  ;;  %v14142_v43 = vld [vmem:[%s21487_s29 + $0x2c8] sm:$0xff] }
0x1045   :  { %v2552_v49 = vmul.f32 0.35355338, %v2549_v44  ;;  %v14143_v44 = vld [vmem:[%s21487_s29 + $0x2d0] sm:$0xff] }
0x104a   :  { %v2715_v4 = vpop.f32.mrb[30].mxu0 }
0x104b   :  { %v15806_v63 = vpop.f32.mrb[31].mxu0  ;;  %v2716_v7 = vadd.f32 %v14119_v5, %v2715_v4  ;;  %v14154_v4 = vld [vmem:[%s21487_s29 + $0x1e0] sm:$0xff]  ;;  %v14155_v5 = vld [vmem:[%s21487_s29 + $0x1e8] sm:$0xff] }
0x104c   :  { %v17376_v63 = vpack.c.bf16 %v14155_v5, %v14154_v4  ;;  %v14182_v4 = vld [vmem:[%s21491_s5 + $0x100] sm:$0xff]  ;;  %v14183_v5 = vld [vmem:[%s21491_s5 + $0x108] sm:$0xff] }
0x10cb   :  { %v2385_v15 = vpop.xlane.xlu0 %2384 }
0x10cc   :  { %v2386_v17 = vsub.f32 %v2378_v12, %v2385_v15  ;;  %v14100_v12 = vld [vmem:[%s21490_s0 + $0x20] sm:$0xff]  ;;  %v17364_v15 = vpack.c.bf16 %v14135_v14, %v14134_v13  ;;  %v14162_v13 = vld [vmem:[%s21487_s29 + $0x270] sm:$0xff]  ;;  %v14163_v14 = vld [vmem:[%s21487_s29 + $0x278] sm:$0xff] }
0x10ce   :  { %v2387_v19 = vmul.f32 1.442695, %v2386_v17  ;;  %v14136_v17 = vld [vmem:[%s21487_s29 + $0x250] sm:$0xff] }
0x10d0   :  { %18075 = vpow2.f32 %v2387_v19  ;;  %v14137_v19 = vld [vmem:[%s21487_s29 + $0x258] sm:$0xff] }
0x10da   :  { %v18076_v20 = vpop.eup %18075 }
0x10db   :  { %v2389_v21 = vsel %vm2382_vm3, %v18076_v20, 0.0 }
0x10dc   :  { %2390 = vadd.xlane.f32.xlu1 %v2389_v21  ;;  %v14128_v21 = vld [vmem:[%s21487_s29 + $0x1c0] sm:$0xff] }
0x10dd   :  { %v17358_v23 = vpack.c.bf16 %v14129_v22, %v14128_v21 }
0x1169   :  { %v2391_v31 = vpop.xlane.xlu1 %2390 }
0x116a   :  { %18077 = vrcp.f32 %v2391_v31  ;;  %v14139_v31 = vld [vmem:[%s21489_s4 + $0x12] ss:$0 sm:$0xff] }
0x1174   :  { %v18078_v34 = vpop.eup %18077 }
0x1175   :  { %v2393_v36 = vmul.f32 %v18078_v34, %v18076_v20  ;;  %v17367_v20 = vpack.c.bf16 %v14137_v19, %v14136_v17  ;;  %v17385_v19 = vpack.c.bf16 %v14163_v14, %v14162_v13  ;;  %v14187_v13 = vld [vmem:[%s21491_s5 + $0x128] sm:$0xff] }
0x1177   :  { %15772 = vmatmul.mubr.msk.f32.vlgmr.msra.gmra.mrb[28].mxu1 %vm2395_vm5, %v2393_v36 }
0x1178   :  { %17347 = vmatpush3.bf16.msra.mxu1 %v17346_v35  ;;  %15793 = vmatprep.mubr.msk.f32.mxu1 %vm18202_vm0, %v18203_v11 }
0x1179   :  { %17348 = vmatprep.subr.bf16.mxu1 %v18201_v3 }
0x117c   :  { %17350 = vmatpush3.bf16.msra.mxu1 %v17349_v38 }
0x117d   :  { %15807 = vmatprep.subr.mxu1 %v18203_v11 }
0x117f   :  { %15794 = vmatmul.mubr.msk.f32.vlgmr.msra.gmra.mrb[30].mxu1 %vm88_vm1, %v18708_v55 }
0x1180   :  { %15809 = vmatprep.mubr.msk.f32.mxu1 %vm18202_vm0, %v18203_v11 }
0x124a   :  { %v2469_v41 = vpop.f32.mrb[28].mxu1 }
0x124b   :  { %v15773_v42 = vpop.f32.mrb[29].mxu1 }
0x124c   :  { %v14141_v42 = vld [vmem:[%s21487_s29 + $0x2c0] sm:$0xff] }
0x1252   :  { %v2632_v46 = vpop.f32.mrb[30].mxu1 }
0x1253   :  { %v2633_v47 = vadd.f32 %v14112_v45, %v2632_v46  ;;  %v15795_v48 = vpop.f32.mrb[31].mxu1  ;;  %v17370_v45 = vpack.c.bf16 %v14142_v43, %v14141_v42  ;;  %v14144_v46 = vld [vmem:[%s21487_s29 + $0x2d8] sm:$0xff] }
0x1255   :  { %15808 = vmatpush3.xpose.msk.msra.mxu1 %vm332_vm2, %v2633_v47  ;;  %v17373_v47 = vpack.c.bf16 %v14144_v46, %v14143_v44 }
0x1256   :  { %15812 = vmatprep.subr.mxu1 %v18203_v11 }
0x1258   :  { %15810 = vmatmul.mubr.msk.f32.vlgmr.msra.gmra.mrb[32].mxu1 %vm332_vm2, %v2552_v49 }
0x1259   :  { %15814 = vmatprep.mubr.msk.f32.mxu1 %vm18202_vm0, %v18203_v11  ;;  %15813 = vmatpush3.msk.msra.mxu1 %vm2399_vm4, %v2716_v7  ;;  %v14156_v7 = vld [vmem:[%s21487_s29 + $0x1f0] sm:$0xff] }
0x125a   :  { %15822 = vmatprep.subr.mxu1 %v18203_v11 }
0x132b   :  { %v2791_v57 = vpop.f32.mrb[32].mxu1 }
0x132c   :  { %v15811_v58 = vpop.f32.mrb[33].mxu1  ;;  %v2795_v60 = vsel %vm2382_vm3, %v2791_v57, -inf }
0x132d   :  { %2796 = vmax.xlane.f32.xlu0 %v2795_v60  ;;  %v14146_v58 = vld [vmem:[%s21489_s4 + $0x16] ss:$0 sm:$0xff] }
0x13ba   :  { %v2797_v61 = vpop.xlane.xlu0 %2796 }
0x13bb   :  { %v2798_v62 = vsub.f32 %v2791_v57, %v2797_v61 }
0x13bd   :  { %v2799_v0 = vmul.f32 1.442695, %v2798_v62  ;;  %v14152_v62 = vld [vmem:[%s21490_s0 + $0x30] sm:$0xff] }
0x13bf   :  { %18079 = vpow2.f32 %v2799_v0 }
0x13c9   :  { %v18080_v1 = vpop.eup %18079 }
0x13ca   :  { %v2801_v2 = vsel %vm2382_vm3, %v18080_v1, 0.0 }
0x13cb   :  { %2802 = vadd.xlane.f32.xlu1 %v2801_v2 }
0x1458   :  { %v2803_v9 = vpop.xlane.xlu1 %2802 }
0x1459   :  { %18081 = vrcp.f32 %v2803_v9  ;;  %v17379_v9 = vpack.c.bf16 %v14157_v8, %v14156_v7  ;;  %v14184_v7 = vld [vmem:[%s21491_s5 + $0x110] sm:$0xff]  ;;  %v14185_v8 = vld [vmem:[%s21491_s5 + $0x118] sm:$0xff] }
0x1463   :  { %v18082_v6 = vpop.eup %18081 }
0x1464   :  { %v2805_v10 = vmul.f32 %v18082_v6, %v18080_v1  ;;  %v14160_v6 = vld [vmem:[%s21487_s29 + $0x260] sm:$0xff] }
0x1466   :  { %15815 = vmatmul.mubr.msk.f32.vlgmr.msra.gmra.mrb[34].mxu1 %vm2395_vm5, %v2805_v10  ;;  %v14161_v10 = vld [vmem:[%s21487_s29 + $0x268] sm:$0xff] }
0x1467   :  { %15823 = vmatpush3.msra.mxu1 %v14100_v12  ;;  %15824 = vmatprep.mubr.msk.f32.mxu1 %vm18202_vm0, %v18203_v11  ;;  %v17382_v12 = vpack.c.bf16 %v14161_v10, %v14160_v6  ;;  %v17409_v10 = vpack.c.bf16 %v14185_v8, %v14184_v7  ;;  %v14208_v8 = vld [vmem:[%s21491_s5 + $0x40] sm:$0xff] }
0x1468   :  { %17363 = vmatprep.subr.bf16.mxu1 %v18201_v3 }
0x146a   :  { %15825 = vmatmul.mubr.msk.f32.vlgmr.msra.gmra.mrb[36].mxu1 %vm332_vm2, %v2469_v41 }
0x146b   :  { %17365 = vmatpush3.bf16.msra.mxu1 %v17364_v15  ;;  %15846 = vmatprep.mubr.msk.f32.mxu1 %vm18202_vm0, %v18203_v11 }
0x146c   :  { %17366 = vmatprep.subr.bf16.mxu1 %v18201_v3 }
0x146f   :  { %17368 = vmatpush3.bf16.msra.mxu1 %v17367_v20 }
0x1470   :  { %15860 = vmatprep.subr.mxu1 %v18203_v11 }
0x1472   :  { %15847 = vmatmul.mubr.msk.f32.vlgmr.msra.gmra.mrb[38].mxu1 %vm88_vm1, %v18708_v55 }
0x1473   :  { %15862 = vmatprep.mubr.msk.f32.mxu1 %vm18202_vm0, %v18203_v11 }
0x1539   :  { %v2879_v18 = vpop.f32.mrb[34].mxu1 }
0x153a   :  { %v15816_v26 = vpop.f32.mrb[35].mxu1  ;;  %15820 = vmatmul.mubr.msk.f32.vlgmr.msra.gmra.mrb[32].mxu0 %vm332_vm2, %v2879_v18 }
0x153b   :  { %17359 = vmatpush3.bf16.msra.mxu0 %v17358_v23  ;;  %15835 = vmatprep.mubr.msk.f32.mxu0 %vm18202_vm0, %v18203_v11  ;;  %v14165_v26 = vld [vmem:[%s21489_s4 + $0x13] ss:$0 sm:$0xff] }
0x153c   :  { %17360 = vmatprep.subr.bf16.mxu0 %v18201_v3 }
0x153d   :  { %v3027_v28 = vpop.f32.mrb[36].mxu1 }
0x153e   :  { %v15826_v29 = vpop.f32.mrb[37].mxu1 }
0x153f   :  { %17362 = vmatpush3.bf16.msra.mxu0 %v17361_v27 }
0x1540   :  { %17369 = vmatprep.subr.bf16.mxu0 %v18201_v3 }
0x1542   :  { %15836 = vmatmul.mubr.msk.f32.vlgmr.msra.gmra.mrb[34].mxu0 %vm88_vm1, %v18881_v30 }
0x1543   :  { %15857 = vmatprep.mubr.msk.f32.mxu0 %vm18202_vm0, %v18203_v11  ;;  %17371 = vmatpush3.bf16.msra.mxu0 %v17370_v45 }
0x1544   :  { %17372 = vmatprep.subr.bf16.mxu0 %v18201_v3 }
0x1545   :  { %v3188_v32 = vpop.f32.mrb[38].mxu1 }
0x1546   :  { %v3189_v33 = vadd.f32 %v14139_v31, %v3188_v32  ;;  %v15848_v34 = vpop.f32.mrb[39].mxu1  ;;  %v14167_v31 = vld [vmem:[%s21487_s29 + $0x2e0] sm:$0xff]  ;;  %v14168_v32 = vld [vmem:[%s21487_s29 + $0x2e8] sm:$0xff] }
0x1547   :  { %17374 = vmatpush3.bf16.msra.mxu0 %v17373_v47  ;;  %v17388_v34 = vpack.c.bf16 %v14168_v32, %v14167_v31  ;;  %v14178_v47 = vld [vmem:[%s21490_s0 + $0x38] sm:$0xff] }
0x1548   :  { %15861 = vmatpush3.xpose.msk.msra.mxu1 %vm332_vm2, %v3189_v33  ;;  %15870 = vmatprep.subr.mxu0 %v18203_v11  ;;  %v14169_v33 = vld [vmem:[%s21487_s29 + $0x2f0] sm:$0xff] }
0x1549   :  { %15865 = vmatprep.subr.mxu1 %v18203_v11 }
0x154a   :  { %15858 = vmatmul.mubr.msk.f32.vlgmr.msra.gmra.mrb[36].mxu0 %vm88_vm1, %v18708_v55 }
0x154b   :  { %15872 = vmatprep.mubr.msk.f32.mxu0 %vm18202_vm0, %v18203_v11  ;;  %15871 = vmatpush3.msra.mxu0 %v14152_v62  ;;  %v4008_v62 = vld [vmem:[%s21491_s5 + $0x30] sm:$0xff] }
0x154c   :  { %17381 = vmatprep.subr.bf16.mxu0 %v18201_v3 }
0x160d   :  { %v2954_v35 = vpop.f32.mrb[32].mxu0 }
0x160e   :  { %v18892_v36 = vadd.f32 %v3027_v28, %v2954_v35  ;;  %v15821_v16 = vpop.f32.mrb[33].mxu0  ;;  %v14170_v35 = vld [vmem:[%s21487_s29 + $0x2f8] sm:$0xff] }
0x1615   :  { %v3104_v38 = vpop.f32.mrb[34].mxu0 }
0x1616   :  { %v3105_v39 = vadd.f32 %v14132_v37, %v3104_v38  ;;  %v15837_v40 = vpop.f32.mrb[35].mxu0 }
0x1618   :  { %v3108_v41 = vmul.f32 0.35355338, %v3105_v39 }
0x161a   :  { %15863 = vmatmul.mubr.msk.f32.vlgmr.msra.gmra.mrb[40].mxu1 %vm332_vm2, %v3108_v41 }
0x161b   :  { %15867 = vmatprep.mubr.msk.f32.mxu1 %vm18202_vm0, %v18203_v11 }
0x161d   :  { %v3271_v57 = vpop.f32.mrb[36].mxu0 }
0x161e   :  { %v15859_v60 = vpop.f32.mrb[37].mxu0  ;;  %v3272_v61 = vadd.f32 %v14146_v58, %v3271_v57  ;;  %v4006_v58 = vld [vmem:[%s21491_s5 + $0x20] sm:$0xff] }
0x161f   :  { %v4007_v60 = vld [vmem:[%s21491_s5 + $0x28] sm:$0xff] }
0x1620   :  { %15866 = vmatpush3.msk.msra.mxu1 %vm2399_vm4, %v3272_v61  ;;  %v17400_v61 = vpack.c.bf16 %v4007_v60, %v4006_v58  ;;  %v14220_v58 = vld [vmem:[%s21491_s5 + $0x150] sm:$0xff]  ;;  %v14221_v60 = vld [vmem:[%s21491_s5 + $0x158] sm:$0xff] }
0x1621   :  { %17375 = vmatprep.subr.bf16.mxu1 %v18201_v3 }
0x16ed   :  { %v3347_v48 = vpop.f32.mrb[40].mxu1 }
0x16ee   :  { %v15864_v49 = vpop.f32.mrb[41].mxu1  ;;  %v3351_v50 = vsel %vm2382_vm3, %v3347_v48, -inf }
0x16ef   :  { %3352 = vmax.xlane.f32.xlu0 %v3351_v50 }
0x177c   :  { %v3353_v51 = vpop.xlane.xlu0 %3352 }
0x177d   :  { %v3354_v52 = vsub.f32 %v3347_v48, %v3353_v51  ;;  %v4002_v51 = vld [vmem:[%s21491_s5] sm:$0xff] }
0x177f   :  { %v3355_v53 = vmul.f32 1.442695, %v3354_v52  ;;  %v4003_v52 = vld [vmem:[%s21491_s5 + $0x8] sm:$0xff] }
0x1781   :  { %18083 = vpow2.f32 %v3355_v53  ;;  %v17394_v53 = vpack.c.bf16 %v4003_v52, %v4002_v51  ;;  %v14202_v51 = vld [vmem:[%s21453_s7 + $0x8] ss:$0 sm:$0xff] }
0x178b   :  { %v18084_v54 = vpop.eup %18083 }
0x178c   :  { %v3357_v56 = vsel %vm2382_vm3, %v18084_v54, 0.0 }
0x178d   :  { %3358 = vadd.xlane.f32.xlu1 %v3357_v56  ;;  %v4005_v56 = vld [vmem:[%s21491_s5 + $0x18] sm:$0xff] }
0x181a   :  { %v3359_v0 = vpop.xlane.xlu1 %3358 }
0x181b   :  { %18085 = vrcp.f32 %v3359_v0  ;;  %v4009_v0 = vld [vmem:[%s21491_s5 + $0x38] sm:$0xff] }
0x1825   :  { %v18086_v1 = vpop.eup %18085 }
0x1826   :  { %v3361_v2 = vmul.f32 %v18086_v1, %v18084_v54  ;;  %v4004_v54 = vld [vmem:[%s21491_s5 + $0x10] sm:$0xff]  ;;  %v17403_v1 = vpack.c.bf16 %v4009_v0, %v4008_v62  ;;  %v14222_v62 = vld [vmem:[%s21491_s5 + $0x160] sm:$0xff]  ;;  %v14223_v0 = vld [vmem:[%s21491_s5 + $0x168] sm:$0xff] }
0x1827   :  { %v17397_v57 = vpack.c.bf16 %v4005_v56, %v4004_v54  ;;  %v14219_v54 = vld [vmem:[%s21491_s5 + $0x148] sm:$0xff] }
0x1828   :  { %15868 = vmatmul.mubr.msk.f32.vlgmr.msra.gmra.mrb[42].mxu1 %vm2395_vm5, %v3361_v2  ;;  %v19047_v2 = vld [vmem:[%s21492_s28] sm:$0xff] }
0x1829   :  { %15883 = vmatprep.mubr.msk.f32.mxu1 %vm18202_vm0, %v18203_v11  ;;  %17377 = vmatpush3.bf16.msra.mxu1 %v17376_v63  ;;  %v17406_v63 = vpack.c.bf16 %v14183_v5, %v14182_v4  ;;  %v14224_v4 = vld [vmem:[%s21491_s5 + $0x170] sm:$0xff]  ;;  %v14225_v5 = vld [vmem:[%s21491_s5 + $0x178] sm:$0xff] }
0x182a   :  { %17378 = vmatprep.subr.bf16.mxu1 %v18201_v3 }
0x182d   :  { %17380 = vmatpush3.bf16.msra.mxu1 %v17379_v9 }
0x182e   :  { %17387 = vmatprep.subr.bf16.mxu1 %v18201_v3 }
0x1830   :  { %15884 = vmatmul.mubr.msk.f32.vlgmr.msra.gmra.mrb[44].mxu1 %vm88_vm1, %v18881_v30 }
0x1831   :  { %15905 = vmatprep.mubr.msk.f32.mxu1 %vm18202_vm0, %v18203_v11  ;;  %17389 = vmatpush3.bf16.msra.mxu1 %v17388_v34  ;;  %v14195_v34 = vld [vmem:[%s21491_s5 + $0x210] sm:$0xff] }
0x1832   :  { %17390 = vmatprep.subr.bf16.mxu1 %v18201_v3 }
0x18fb   :  { %v3435_v15 = vpop.f32.mrb[42].mxu1 }
0x18fc   :  { %v15869_v17 = vpop.f32.mrb[43].mxu1  ;;  %15873 = vmatmul.mubr.msk.f32.vlgmr.msra.gmra.mrb[38].mxu0 %vm332_vm2, %v3435_v15  ;;  %v14188_v15 = vld [vmem:[%s21491_s5 + $0x130] sm:$0xff] }
0x18fd   :  { %17383 = vmatpush3.bf16.msra.mxu0 %v17382_v12  ;;  %15894 = vmatprep.mubr.msk.f32.mxu0 %vm18202_vm0, %v18203_v11  ;;  %v14186_v12 = vld [vmem:[%s21491_s5 + $0x120] sm:$0xff]  ;;  %v14189_v17 = vld [vmem:[%s21491_s5 + $0x138] sm:$0xff] }
0x18fe   :  { %17384 = vmatprep.subr.bf16.mxu0 %v18201_v3  ;;  %v17412_v14 = vpack.c.bf16 %v14187_v13, %v14186_v12  ;;  %v14210_v13 = vld [vmem:[%s21491_s5 + $0x50] sm:$0xff] }
0x1901   :  { %17386 = vmatpush3.bf16.msra.mxu0 %v17385_v19  ;;  %v17415_v19 = vpack.c.bf16 %v14189_v17, %v14188_v15  ;;  %v14212_v17 = vld [vmem:[%s21491_s5 + $0x60] sm:$0xff] }
0x1902   :  { %15908 = vmatprep.subr.mxu0 %v18203_v11 }
0x1903   :  { %v3588_v20 = vpop.f32.mrb[44].mxu1 }
0x1904   :  { %15895 = vmatmul.mubr.msk.f32.vlgmr.msra.gmra.mrb[40].mxu0 %vm88_vm1, %v18708_v55  ;;  %v15885_v21 = vpop.f32.mrb[45].mxu1  ;;  %v3589_v18 = vadd.f32 %v14158_v25, %v3588_v20  ;;  %v19087_v20 = vld [vmem:[%s21492_s28 + $0x8] sm:$0xf] }
0x1905   :  { %15910 = vmatprep.mubr.msk.f32.mxu0 %vm18202_vm0, %v18203_v11 }
0x1906   :  { %v3592_v30 = vmul.f32 0.35355338, %v3589_v18 }
0x19cf   :  { %v3510_v22 = vpop.f32.mrb[38].mxu0 }
0x19d0   :  { %v18972_v23 = vadd.f32 %v3510_v22, %v18892_v36  ;;  %v15874_v24 = vpop.f32.mrb[39].mxu0  ;;  %v17391_v36 = vpack.c.bf16 %v14170_v35, %v14169_v33  ;;  %v14194_v33 = vld [vmem:[%s21491_s5 + $0x208] sm:$0xff] }
0x19d2   :  { %17392 = vmatpush3.bf16.msra.mxu1 %v17391_v36  ;;  %v14196_v36 = vld [vmem:[%s21491_s5 + $0x218] sm:$0xff] }
0x19d3   :  { %15918 = vmatprep.subr.mxu1 %v18203_v11 }
0x19d5   :  { %15906 = vmatmul.mubr.msk.f32.vlgmr.msra.gmra.mrb[46].mxu1 %vm88_vm1, %v18708_v55  ;;  %v14172_v55 = vld [vmem:[%s21489_s4 + $0x17] ss:$0 sm:$0xff] }
0x19d6   :  { %15920 = vmatprep.mubr.msk.f32.mxu1 %vm18202_vm0, %v18203_v11  ;;  %15919 = vmatpush3.msra.mxu1 %v14178_v47 }
0x19d7   :  { %v3672_v27 = vpop.f32.mrb[40].mxu0  ;;  %17405 = vmatprep.subr.bf16.mxu1 %v18201_v3 }
0x19d8   :  { %v3673_v28 = vadd.f32 %v14165_v26, %v3672_v27  ;;  %v15896_v29 = vpop.f32.mrb[41].mxu0  ;;  %v4010_v26 = vld [vmem:[%s21453_s7] sm:$0x1] }
0x19da   :  { %15909 = vmatpush3.xpose.msk.msra.mxu0 %vm332_vm2, %v3673_v28  ;;  %v14191_v28 = vld [vmem:[%s21453_s7 + $0x4] ss:$0 sm:$0xff] }
0x19db   :  { %15913 = vmatprep.subr.mxu0 %v18203_v11 }
0x19dd   :  { %15911 = vmatmul.mubr.msk.f32.vlgmr.msra.gmra.mrb[42].mxu0 %vm332_vm2, %v3592_v30 }
0x19de   :  { %15915 = vmatprep.mubr.msk.f32.mxu0 %vm18202_vm0, %v18203_v11 }
0x1aa8   :  { %v3755_v44 = vpop.f32.mrb[46].mxu1 }
0x1aa9   :  { %v15907_v45 = vpop.f32.mrb[47].mxu1  ;;  %v3756_v46 = vadd.f32 %v14172_v55, %v3755_v44 }
0x1aab   :  { %15914 = vmatpush3.msk.msra.mxu0 %vm2399_vm4, %v3756_v46 }
0x1aac   :  { %17393 = vmatprep.subr.bf16.mxu0 %v18201_v3 }
0x1ab0   :  { %v3831_v16 = vpop.f32.mrb[42].mxu0 }
0x1ab1   :  { %v15912_v37 = vpop.f32.mrb[43].mxu0  ;;  %v3835_v38 = vsel %vm2382_vm3, %v3831_v16, -inf }
0x1ab2   :  { %3836 = vmax.xlane.f32.xlu0 %v3835_v38  ;;  %v14197_v37 = vld [vmem:[%s21491_s5 + $0x220] sm:$0xff]  ;;  %v14198_v38 = vld [vmem:[%s21491_s5 + $0x228] sm:$0xff] }
0x1b3f   :  { %v3837_v39 = vpop.xlane.xlu0 %3836 }
0x1b40   :  { %v3838_v40 = vsub.f32 %v3831_v16, %v3837_v39  ;;  %v17421_v16 = vpack.c.bf16 %v14196_v36, %v14195_v34  ;;  %v17424_v39 = vpack.c.bf16 %v14198_v38, %v14197_v37  ;;  %v14235_v34 = vld [vmem:[%s21491_s5 + $0x270] sm:$0xff]  ;;  %v4429_v37 = vld [vmem:[%s21454_s8 + $0x8] sm:$0xff] }
0x1b42   :  { %v3839_v41 = vmul.f32 1.442695, %v3838_v40  ;;  %v14199_v40 = vld [vmem:[%s21491_s5 + $0x230] sm:$0xff] }
0x1b44   :  { %18087 = vpow2.f32 %v3839_v41  ;;  %v14200_v41 = vld [vmem:[%s21491_s5 + $0x238] sm:$0xff] }
0x1b4e   :  { %v18088_v42 = vpop.eup %18087 }
0x1b4f   :  { %v3841_v43 = vsel %vm2382_vm3, %v18088_v42, 0.0 }
0x1b50   :  { %3842 = vadd.xlane.f32.xlu1 %v3841_v43 }
0x1bdd   :  { %v3843_v48 = vpop.xlane.xlu1 %3842 }
0x1bde   :  { %18089 = vrcp.f32 %v3843_v48 }
0x1be8   :  { %v18090_v49 = vpop.eup %18089 }
0x1be9   :  { %v3845_v50 = vmul.f32 %v18090_v49, %v18088_v42  ;;  %v17427_v42 = vpack.c.bf16 %v14200_v41, %v14199_v40 }
0x1beb   :  { %15916 = vmatmul.mubr.msk.f32.vlgmr.msra.gmra.mrb[44].mxu0 %vm2395_vm5, %v3845_v50 }
0x1bec   :  { %15939 = vmatprep.mubr.msk.f32.mxu0 %vm18202_vm0, %v18203_v11  ;;  %17395 = vmatpush3.bf16.msra.mxu0 %v17394_v53  ;;  %v14218_v53 = vld [vmem:[%s21491_s5 + $0x140] sm:$0xff] }
0x1bed   :  { %17396 = vmatprep.subr.bf16.mxu0 %v18201_v3 }
0x1bf0   :  { %17398 = vmatpush3.bf16.msra.mxu0 %v17397_v57  ;;  %v17442_v57 = vpack.c.bf16 %v14219_v54, %v14218_v53 }
0x1bf1   :  { %17399 = vmatprep.subr.bf16.mxu0 %v18201_v3 }
0x1bf4   :  { %17401 = vmatpush3.bf16.msra.mxu0 %v17400_v61  ;;  %v17445_v61 = vpack.c.bf16 %v14221_v60, %v14220_v58 }
0x1bf5   :  { %17402 = vmatprep.subr.bf16.mxu0 %v18201_v3 }
0x1bf8   :  { %17404 = vmatpush3.bf16.msra.mxu0 %v17403_v1  ;;  %v17448_v1 = vpack.c.bf16 %v14223_v0, %v14222_v62 }
0x1bf9   :  { %17417 = vmatprep.subr.bf16.mxu0 %v18201_v3 }
0x1bfb   :  { %15940 = vmatmul.mubr.msk.f32.vlgmr.msra.gmra.mrb[46].mxu0 %vm4011_vm6, %v19047_v2 }
0x1bfc   :  { %15977 = vmatprep.mubr.msk.f32.mxu0 %vm18202_vm0, %v18203_v11 }
0x1cbe   :  { %v3919_v9 = vpop.f32.mrb[44].mxu0 }
0x1cbf   :  { %v15917_v6 = vpop.f32.mrb[45].mxu0  ;;  %15921 = vmatmul.mubr.msk.f32.vlgmr.msra.gmra.mrb[48].mxu1 %vm332_vm2, %v3919_v9  ;;  %v14209_v9 = vld [vmem:[%s21491_s5 + $0x48] sm:$0xff] }
0x1cc0   :  { %17407 = vmatpush3.bf16.msra.mxu1 %v17406_v63  ;;  %15958 = vmatprep.mubr.msk.f32.mxu1 %vm18202_vm0, %v18203_v11  ;;  %v17451_v63 = vpack.c.bf16 %v14225_v5, %v14224_v4  ;;  %v14258_v4 = vld [vmem:[%s21491_s5 + $0x180] sm:$0xff]  ;;  %v14259_v5 = vld [vmem:[%s21491_s5 + $0x188] sm:$0xff] }
0x1cc1   :  { %17408 = vmatprep.subr.bf16.mxu1 %v18201_v3 }
0x1cc4   :  { %17410 = vmatpush3.bf16.msra.mxu1 %v17409_v10  ;;  %v17430_v10 = vpack.c.bf16 %v14209_v9, %v14208_v8  ;;  %v14244_v8 = vld [vmem:[%s21454_s8 + $0x10] sm:$0xff]  ;;  %v14245_v9 = vld [vmem:[%s21454_s8 + $0x18] sm:$0xff] }
0x1cc5   :  { %17411 = vmatprep.subr.bf16.mxu1 %v18201_v3 }
0x1cc8   :  { %17413 = vmatpush3.bf16.msra.mxu1 %v17412_v14  ;;  %v14211_v14 = vld [vmem:[%s21491_s5 + $0x58] sm:$0xff] }
0x1cc9   :  { %17414 = vmatprep.subr.bf16.mxu1 %v18201_v3  ;;  %v17433_v15 = vpack.c.bf16 %v14211_v14, %v14210_v13  ;;  %v14260_v13 = vld [vmem:[%s21491_s5 + $0x190] sm:$0xff]  ;;  %v14261_v14 = vld [vmem:[%s21491_s5 + $0x198] sm:$0xff] }
0x1ccc   :  { %17416 = vmatpush3.bf16.msra.mxu1 %v17415_v19  ;;  %v14213_v19 = vld [vmem:[%s21491_s5 + $0x68] sm:$0xff] }
0x1ccd   :  { %15980 = vmatprep.subr.mxu1 %v18203_v11 }
0x1cce   :  { %v4081_v21 = vpop.f32.mrb[46].mxu0 }
0x1ccf   :  { %15959 = vmatmul.mubr.msk.f32.vlgmr.msra.gmra.mrb[50].mxu1 %vm4011_vm6, %v19087_v20  ;;  %v15941_v22 = vpop.f32.mrb[47].mxu0  ;;  %v4082_v27 = vadd.f32 %v4081_v21, %v4010_v26  ;;  %v17436_v21 = vpack.c.bf16 %v14213_v19, %v14212_v17  ;;  %v14229_v26 = vld [vmem:[%s21491_s5 + $0x240] sm:$0xff]  ;;  %v14263_v19 = vld [vmem:[%s21491_s5 + $0x1a8] sm:$0xff] }
0x1cd0   :  { %15982 = vmatprep.mubr.msk.f32.mxu1 %vm18202_vm0, %v18203_v11  ;;  %v14214_v22 = vld [vmem:[%s21491_s5 + $0x70] sm:$0xff]  ;;  %v14262_v17 = vld [vmem:[%s21491_s5 + $0x1a0] sm:$0xff] }
0x1cd1   :  { %v4085_v32 = vmul.f32 0.25, %v4082_v27  ;;  %v14230_v27 = vld [vmem:[%s21491_s5 + $0x248] sm:$0xff] }
0x1d92   :  { %v3994_v24 = vpop.f32.mrb[48].mxu1 }
0x1d93   :  { %v19095_v25 = vadd.f32 %v3994_v24, %v18972_v23  ;;  %v15922_v18 = vpop.f32.mrb[49].mxu1  ;;  %v14193_v23 = vld [vmem:[%s21491_s5 + $0x200] sm:$0xff]  ;;  %v14215_v24 = vld [vmem:[%s21491_s5 + $0x78] sm:$0xff] }
0x1d94   :  { %v17418_v35 = vpack.c.bf16 %v14194_v33, %v14193_v23  ;;  %v17439_v18 = vpack.c.bf16 %v14215_v24, %v14214_v22  ;;  %v14234_v23 = vld [vmem:[%s21491_s5 + $0x268] sm:$0xff]  ;;  %v14264_v22 = vld [vmem:[%s21491_s5 + $0x1b0] sm:$0xff]  ;;  %v14265_v24 = vld [vmem:[%s21491_s5 + $0x1b8] sm:$0xff] }
0x1d96   :  { %17419 = vmatpush3.bf16.msra.mxu0 %v17418_v35  ;;  %v14236_v35 = vld [vmem:[%s21491_s5 + $0x278] sm:$0xff] }
0x1d97   :  { %17420 = vmatprep.subr.bf16.mxu0 %v18201_v3  ;;  %v17463_v36 = vpack.c.bf16 %v14236_v35, %v14235_v34  ;;  %v14253_v34 = vld [vmem:[%s21491_s5 + $0xa8] sm:$0xff] }
0x1d9a   :  { %17422 = vmatpush3.bf16.msra.mxu0 %v17421_v16  ;;  %v4428_v16 = vld [vmem:[%s21454_s8] sm:$0xff] }
0x1d9b   :  { %17423 = vmatprep.subr.bf16.mxu0 %v18201_v3  ;;  %v17469_v38 = vpack.c.bf16 %v4429_v37, %v4428_v16  ;;  %v14255_v16 = vld [vmem:[%s21491_s5 + $0xb8] sm:$0xff] }
0x1d9e   :  { %17425 = vmatpush3.bf16.msra.mxu0 %v17424_v39  ;;  %v14227_v39 = vld [vmem:[%s21453_s7 + $0x5] ss:$0 sm:$0xff] }
0x1d9f   :  { %17426 = vmatprep.subr.bf16.mxu0 %v18201_v3 }
0x1da2   :  { %v4172_v29 = vpop.f32.mrb[50].mxu1  ;;  %17428 = vmatpush3.bf16.msra.mxu0 %v17427_v42 }
0x1da3   :  { %v4173_v30 = vadd.f32 %v14191_v28, %v4172_v29  ;;  %v15960_v31 = vpop.f32.mrb[51].mxu1  ;;  %17441 = vmatprep.subr.bf16.mxu0 %v18201_v3  ;;  %v17454_v28 = vpack.c.bf16 %v14230_v27, %v14229_v26  ;;  %v14231_v29 = vld [vmem:[%s21491_s5 + $0x250] sm:$0xff]  ;;  %v14248_v26 = vld [vmem:[%s21491_s5 + $0x80] sm:$0xff]  ;;  %v14249_v27 = vld [vmem:[%s21491_s5 + $0x88] sm:$0xff] }
0x1da5   :  { %15981 = vmatpush3.xpose.msk.msra.mxu1 %vm4263_vm7, %v4173_v30  ;;  %15978 = vmatmul.mubr.msk.f32.vlgmr.msra.gmra.mrb[48].mxu0 %vm4011_vm6, %v19087_v20  ;;  %v14232_v30 = vld [vmem:[%s21491_s5 + $0x258] sm:$0xff] }
0x1da6   :  { %15985 = vmatprep.subr.mxu1 %v18203_v11  ;;  %16025 = vmatprep.mubr.msk.f32.mxu0 %vm18202_vm0, %v18203_v11  ;;  %v17457_v31 = vpack.c.bf16 %v14232_v30, %v14231_v29  ;;  %v14250_v29 = vld [vmem:[%s21491_s5 + $0x90] sm:$0xff]  ;;  %v14251_v30 = vld [vmem:[%s21491_s5 + $0x98] sm:$0xff] }
0x1da7   :  { %17443 = vmatpush3.bf16.msra.mxu0 %v17442_v57 }
0x1da8   :  { %15983 = vmatmul.mubr.msk.f32.vlgmr.msra.gmra.mrb[52].mxu1 %vm4263_vm7, %v4085_v32  ;;  %17444 = vmatprep.subr.bf16.mxu0 %v18201_v3  ;;  %v14233_v32 = vld [vmem:[%s21491_s5 + $0x260] sm:$0xff] }
0x1da9   :  { %15987 = vmatprep.mubr.msk.f32.mxu1 %vm18202_vm0, %v18203_v11  ;;  %v17460_v33 = vpack.c.bf16 %v14234_v23, %v14233_v32  ;;  %v17475_v23 = vpack.c.bf16 %v14251_v30, %v14250_v29  ;;  %v14301_v30 = vld [vmem:[%s21491_s5 + $0x1e0] sm:$0xff] }
0x1dab   :  { %17446 = vmatpush3.bf16.msra.mxu0 %v17445_v61 }
0x1dac   :  { %17447 = vmatprep.subr.bf16.mxu0 %v18201_v3 }
0x1daf   :  { %17449 = vmatpush3.bf16.msra.mxu0 %v17448_v1 }
0x1db0   :  { %17450 = vmatprep.subr.bf16.mxu0 %v18201_v3 }
0x1db3   :  { %17452 = vmatpush3.bf16.msra.mxu0 %v17451_v63  ;;  %v17484_v63 = vpack.c.bf16 %v14259_v5, %v14258_v4 }
0x1db4   :  { %16047 = vmatprep.subr.mxu0 %v18203_v11 }
0x1db6   :  { %16026 = vmatmul.mubr.msk.f32.vlgmr.msra.gmra.mrb[50].mxu0 %vm4011_vm6, %v19087_v20 }
0x1db7   :  { %16049 = vmatprep.mubr.msk.f32.mxu0 %vm18202_vm0, %v18203_v11 }
0x1e78   :  { %v4259_v50 = vpop.f32.mrb[48].mxu0 }
0x1e79   :  { %v15979_v52 = vpop.f32.mrb[49].mxu0  ;;  %v4260_v56 = vadd.f32 %v14202_v51, %v4259_v50 }
0x1e7b   :  { %v4336_v43 = vpop.f32.mrb[52].mxu1  ;;  %15986 = vmatpush3.msk.msra.mxu1 %vm2399_vm4, %v4260_v56 }
0x1e7c   :  { %v15984_v44 = vpop.f32.mrb[53].mxu1  ;;  %v4340_v55 = vsel %vm2382_vm3, %v4336_v43, -inf  ;;  %17429 = vmatprep.subr.bf16.mxu1 %v18201_v3 }
0x1e7d   :  { %4341 = vmax.xlane.f32.xlu0 %v4340_v55  ;;  %v14216_v55 = vld [vmem:[%s21453_s7 + $0x1] sm:$0x1] }
0x1e89   :  { %v4595_v40 = vpop.f32.mrb[50].mxu0 }
0x1e8a   :  { %v4596_v41 = vadd.f32 %v14227_v39, %v4595_v40  ;;  %v16027_v42 = vpop.f32.mrb[51].mxu0 }
0x1e8c   :  { %16048 = vmatpush3.xpose.msk.msra.mxu0 %vm4263_vm7, %v4596_v41 }
0x1e8d   :  { %16052 = vmatprep.subr.mxu0 %v18203_v11 }
0x1f0a   :  { %v4342_v45 = vpop.xlane.xlu0 %4341 }
0x1f0b   :  { %v4343_v46 = vsub.f32 %v4336_v43, %v4342_v45 }
0x1f0d   :  { %v4344_v47 = vmul.f32 1.442695, %v4343_v46 }
0x1f0f   :  { %18091 = vpow2.f32 %v4344_v47 }
0x1f19   :  { %v18092_v48 = vpop.eup %18091 }
0x1f1a   :  { %v4346_v49 = vsel %vm2382_vm3, %v18092_v48, 0.0 }
0x1f1b   :  { %4347 = vadd.xlane.f32.xlu1 %v4346_v49  ;;  %v14238_v49 = vld [vmem:[%s21453_s7 + $0x9] ss:$0 sm:$0xff] }
0x1fa8   :  { %v4348_v7 = vpop.xlane.xlu1 %4347 }
0x1fa9   :  { %18093 = vrcp.f32 %v4348_v7 }
0x1fb3   :  { %v18094_v6 = vpop.eup %18093 }
0x1fb4   :  { %v4350_v12 = vmul.f32 %v18094_v6, %v18092_v48 }
0x1fb6   :  { %15988 = vmatmul.mubr.msk.f32.vlgmr.msra.gmra.mrb[54].mxu1 %vm2395_vm5, %v4350_v12 }
0x1fb7   :  { %17431 = vmatpush3.bf16.msra.mxu1 %v17430_v10  ;;  %16006 = vmatprep.mubr.msk.f32.mxu1 %vm18202_vm0, %v18203_v11  ;;  %v17466_v10 = vpack.c.bf16 %v14245_v9, %v14244_v8 }
0x1fb8   :  { %17432 = vmatprep.subr.bf16.mxu1 %v18201_v3 }
0x1fbb   :  { %17434 = vmatpush3.bf16.msra.mxu1 %v17433_v15  ;;  %v17487_v15 = vpack.c.bf16 %v14261_v14, %v14260_v13  ;;  %v14297_v14 = vld [vmem:[%s21491_s5 + $0x1c0] sm:$0xff] }
0x1fbc   :  { %17435 = vmatprep.subr.bf16.mxu1 %v18201_v3 }
0x1fbf   :  { %17437 = vmatpush3.bf16.msra.mxu1 %v17436_v21  ;;  %v17490_v21 = vpack.c.bf16 %v14263_v19, %v14262_v17 }
0x1fc0   :  { %17438 = vmatprep.subr.bf16.mxu1 %v18201_v3 }
0x1fc3   :  { %17440 = vmatpush3.bf16.msra.mxu1 %v17439_v18  ;;  %v17493_v18 = vpack.c.bf16 %v14265_v24, %v14264_v22  ;;  %v14285_v22 = vld [vmem:[%s21454_s8 + $0x28] sm:$0xff] }
0x1fc4   :  { %17453 = vmatprep.subr.bf16.mxu1 %v18201_v3 }
0x1fc6   :  { %16007 = vmatmul.mubr.msk.f32.vlgmr.msra.gmra.mrb[56].mxu1 %vm4011_vm6, %v19047_v2 }
0x1fc7   :  { %17455 = vmatpush3.bf16.msra.mxu1 %v17454_v28  ;;  %16044 = vmatprep.mubr.msk.f32.mxu1 %vm18202_vm0, %v18203_v11  ;;  %v17472_v28 = vpack.c.bf16 %v14249_v27, %v14248_v26  ;;  %v14299_v27 = vld [vmem:[%s21491_s5 + $0x1d0] sm:$0xff] }
0x1fc8   :  { %17456 = vmatprep.subr.bf16.mxu1 %v18201_v3 }
0x1fcb   :  { %17458 = vmatpush3.bf16.msra.mxu1 %v17457_v31 }
0x1fcc   :  { %17459 = vmatprep.subr.bf16.mxu1 %v18201_v3 }
0x1fcf   :  { %17461 = vmatpush3.bf16.msra.mxu1 %v17460_v33  ;;  %v14252_v33 = vld [vmem:[%s21491_s5 + $0xa0] sm:$0xff] }
0x1fd0   :  { %17462 = vmatprep.subr.bf16.mxu1 %v18201_v3  ;;  %v17478_v35 = vpack.c.bf16 %v14253_v34, %v14252_v33  ;;  %v14304_v33 = vld [vmem:[%s21491_s5 + $0x1f8] sm:$0xff] }
0x1fd3   :  { %17464 = vmatpush3.bf16.msra.mxu1 %v17463_v36  ;;  %v14254_v36 = vld [vmem:[%s21491_s5 + $0xb0] sm:$0xff] }
0x1fd4   :  { %17468 = vmatprep.subr.bf16.mxu1 %v18201_v3  ;;  %v17481_v37 = vpack.c.bf16 %v14255_v16, %v14254_v36  ;;  %v14288_v36 = vld [vmem:[%s21491_s5 + $0xc8] sm:$0xff] }
0x1fd6   :  { %16045 = vmatmul.mubr.msk.f32.vlgmr.msra.gmra.mrb[58].mxu1 %vm4011_vm6, %v19087_v20 }
0x1fd7   :  { %17470 = vmatpush3.bf16.msra.mxu1 %v17469_v38  ;;  %16068 = vmatprep.mubr.msk.f32.mxu1 %vm18202_vm0, %v18203_v11  ;;  %v14267_v38 = vld [vmem:[%s21453_s7 + $0x6] ss:$0 sm:$0xff] }
0x1fd8   :  { %17483 = vmatprep.subr.bf16.mxu1 %v18201_v3 }
0x2089   :  { %v4424_v43 = vpop.f32.mrb[54].mxu1 }
0x208a   :  { %v15989_v44 = vpop.f32.mrb[55].mxu1  ;;  %16069 = vmatmul.mubr.msk.f32.vlgmr.msra.gmra.mrb[60].mxu1 %vm4263_vm7, %v4424_v43 }
0x208b   :  { %16106 = vmatprep.mubr.msk.f32.mxu1 %vm18202_vm0, %v18203_v11  ;;  %17485 = vmatpush3.bf16.msra.mxu1 %v17484_v63 }
0x208c   :  { %17486 = vmatprep.subr.bf16.mxu1 %v18201_v3 }
0x208f   :  { %17488 = vmatpush3.bf16.msra.mxu1 %v17487_v15  ;;  %v14298_v15 = vld [vmem:[%s21491_s5 + $0x1c8] sm:$0xff] }
0x2090   :  { %17489 = vmatprep.subr.bf16.mxu1 %v18201_v3  ;;  %v17523_v17 = vpack.c.bf16 %v14298_v15, %v14297_v14 }
0x2093   :  { %17491 = vmatpush3.bf16.msra.mxu1 %v17490_v21  ;;  %v14284_v21 = vld [vmem:[%s21454_s8 + $0x20] sm:$0xff] }
0x2094   :  { %17492 = vmatprep.subr.bf16.mxu1 %v18201_v3 }
0x2097   :  { %17494 = vmatpush3.bf16.msra.mxu1 %v17493_v18  ;;  %v17508_v18 = vpack.c.bf16 %v14285_v22, %v14284_v21 }
0x2098   :  { %16128 = vmatprep.subr.mxu1 %v18203_v11 }
0x2099   :  { %v4507_v45 = vpop.f32.mrb[56].mxu1 }
0x209a   :  { %v4508_v46 = vadd.f32 %v14216_v55, %v4507_v45  ;;  %v16008_v47 = vpop.f32.mrb[57].mxu1  ;;  %16107 = vmatmul.mubr.msk.f32.vlgmr.msra.gmra.mrb[62].mxu1 %vm4011_vm6, %v19087_v20  ;;  %v14256_v55 = vld [vmem:[%s21453_s7 + $0x2] sm:$0x1] }
0x209b   :  { %16130 = vmatprep.mubr.msk.f32.mxu1 %vm18202_vm0, %v18203_v11 }
0x209c   :  { %v4511_v48 = vmul.f32 0.25, %v4508_v46 }
0x209e   :  { %16050 = vmatmul.mubr.msk.f32.vlgmr.msra.gmra.mrb[52].mxu0 %vm4263_vm7, %v4511_v48 }
0x209f   :  { %16054 = vmatprep.mubr.msk.f32.mxu0 %vm18202_vm0, %v18203_v11 }
0x20a9   :  { %v4682_v50 = vpop.f32.mrb[58].mxu1 }
0x20aa   :  { %v4683_v51 = vadd.f32 %v14238_v49, %v4682_v50  ;;  %v16046_v52 = vpop.f32.mrb[59].mxu1  ;;  %v14269_v49 = vld [vmem:[%s21491_s5 + $0x280] sm:$0xff]  ;;  %v14270_v50 = vld [vmem:[%s21491_s5 + $0x288] sm:$0xff] }
0x20ab   :  { %v17496_v52 = vpack.c.bf16 %v14270_v50, %v14269_v49 }
0x20ac   :  { %16053 = vmatpush3.msk.msra.mxu0 %vm2399_vm4, %v4683_v51  ;;  %v14271_v51 = vld [vmem:[%s21491_s5 + $0x290] sm:$0xff] }
0x20ad   :  { %17465 = vmatprep.subr.bf16.mxu0 %v18201_v3 }
0x215d   :  { %v19272_v53 = vpop.f32.mrb[60].mxu1 }
0x215e   :  { %v16070_v54 = vpop.f32.mrb[61].mxu1 }
0x216d   :  { %v5164_v39 = vpop.f32.mrb[62].mxu1 }
0x216e   :  { %v5165_v40 = vadd.f32 %v14267_v38, %v5164_v39  ;;  %v16108_v41 = vpop.f32.mrb[63].mxu1  ;;  %v14290_v38 = vld [vmem:[%s21491_s5 + $0xd8] sm:$0xff] }
0x2170   :  { %16129 = vmatpush3.xpose.msk.msra.mxu1 %vm4263_vm7, %v5165_v40 }
0x2171   :  { %v4758_v56 = vpop.f32.mrb[52].mxu0  ;;  %16133 = vmatprep.subr.mxu1 %v18203_v11 }
0x2172   :  { %v16051_v57 = vpop.f32.mrb[53].mxu0  ;;  %v4762_v58 = vsel %vm2382_vm3, %v4758_v56, -inf }
0x2173   :  { %4763 = vmax.xlane.f32.xlu0 %v4762_v58  ;;  %v14274_v57 = vld [vmem:[%s21491_s5 + $0x2a8] sm:$0xff] }
0x2200   :  { %v4764_v60 = vpop.xlane.xlu0 %4763 }
0x2201   :  { %v4765_v61 = vsub.f32 %v4758_v56, %v4764_v60  ;;  %v14273_v56 = vld [vmem:[%s21491_s5 + $0x2a0] sm:$0xff]  ;;  %v14275_v60 = vld [vmem:[%s21491_s5 + $0x2b0] sm:$0xff] }
0x2202   :  { %v17502_v58 = vpack.c.bf16 %v14274_v57, %v14273_v56  ;;  %v14295_v56 = vld [vmem:[%s21453_s7 + $0x3] sm:$0x1] }
0x2203   :  { %v4766_v62 = vmul.f32 1.442695, %v4765_v61  ;;  %v14276_v61 = vld [vmem:[%s21491_s5 + $0x2b8] sm:$0xff] }
0x2205   :  { %18095 = vpow2.f32 %v4766_v62  ;;  %v17505_v62 = vpack.c.bf16 %v14276_v61, %v14275_v60 }
0x220f   :  { %v18096_v0 = vpop.eup %18095 }
0x2210   :  { %v4768_v1 = vsel %vm2382_vm3, %v18096_v0, 0.0 }
0x2211   :  { %4769 = vadd.xlane.f32.xlu1 %v4768_v1 }
0x229e   :  { %v4770_v7 = vpop.xlane.xlu1 %4769 }
0x229f   :  { %18097 = vrcp.f32 %v4770_v7 }
0x22a9   :  { %v18098_v6 = vpop.eup %18097 }
0x22aa   :  { %v4772_v12 = vmul.f32 %v18098_v6, %v18096_v0 }
0x22ac   :  { %16055 = vmatmul.mubr.msk.f32.vlgmr.msra.gmra.mrb[54].mxu0 %vm2395_vm5, %v4772_v12 }
0x22ad   :  { %17467 = vmatpush3.bf16.msra.mxu0 %v17466_v10  ;;  %16061 = vmatprep.mubr.msk.f32.mxu0 %vm18202_vm0, %v18203_v11  ;;  %v14278_v10 = vld [vmem:[%s21453_s7 + $0xa] ss:$0 sm:$0xff] }
0x22ae   :  { %17471 = vmatprep.subr.bf16.mxu0 %v18201_v3 }
0x237f   :  { %v4846_v31 = vpop.f32.mrb[54].mxu0 }
0x2380   :  { %v16056_v32 = vpop.f32.mrb[55].mxu0  ;;  %16062 = vmatmul.mubr.msk.f32.vlgmr.msra.gmra.mrb[56].mxu0 %vm4263_vm7, %v4846_v31  ;;  %v14302_v31 = vld [vmem:[%s21491_s5 + $0x1e8] sm:$0xff] }
0x2381   :  { %17473 = vmatpush3.bf16.msra.mxu0 %v17472_v28  ;;  %16087 = vmatprep.mubr.msk.f32.mxu0 %vm18202_vm0, %v18203_v11  ;;  %v14300_v28 = vld [vmem:[%s21491_s5 + $0x1d8] sm:$0xff]  ;;  %v17529_v32 = vpack.c.bf16 %v14302_v31, %v14301_v30 }
0x2382   :  { %17474 = vmatprep.subr.bf16.mxu0 %v18201_v3  ;;  %v17526_v29 = vpack.c.bf16 %v14300_v28, %v14299_v27  ;;  %v14323_v28 = vld [vmem:[%s21454_s8 + $0x30] sm:$0xff] }
0x2385   :  { %17476 = vmatpush3.bf16.msra.mxu0 %v17475_v23  ;;  %v14303_v23 = vld [vmem:[%s21491_s5 + $0x1f0] sm:$0xff] }
0x2386   :  { %17477 = vmatprep.subr.bf16.mxu0 %v18201_v3  ;;  %v17532_v34 = vpack.c.bf16 %v14304_v33, %v14303_v23  ;;  %v5995_v23 = vld [vmem:[%s21456_s10] sm:$0xff]  ;;  %v5996_v33 = vld [vmem:[%s21456_s10 + $0x8] sm:$0xff] }
0x2389   :  { %17479 = vmatpush3.bf16.msra.mxu0 %v17478_v35  ;;  %v14287_v35 = vld [vmem:[%s21491_s5 + $0xc0] sm:$0xff] }
0x238a   :  { %17480 = vmatprep.subr.bf16.mxu0 %v18201_v3  ;;  %v17511_v16 = vpack.c.bf16 %v14288_v36, %v14287_v35  ;;  %v5997_v35 = vld [vmem:[%s21456_s10 + $0x10] sm:$0xff]  ;;  %v5998_v36 = vld [vmem:[%s21456_s10 + $0x18] sm:$0xff] }
0x238d   :  { %17482 = vmatpush3.bf16.msra.mxu0 %v17481_v37  ;;  %v14289_v37 = vld [vmem:[%s21491_s5 + $0xd0] sm:$0xff] }
0x238e   :  { %17495 = vmatprep.subr.bf16.mxu0 %v18201_v3  ;;  %v17514_v41 = vpack.c.bf16 %v14290_v38, %v14289_v37  ;;  %v6157_v37 = vld [vmem:[%s21459_s13] sm:$0xff]  ;;  %v6158_v38 = vld [vmem:[%s21459_s13 + $0x8] sm:$0xff] }
0x2390   :  { %16088 = vmatmul.mubr.msk.f32.vlgmr.msra.gmra.mrb[58].mxu0 %vm4011_vm6, %v19047_v2 }
0x2391   :  { %16125 = vmatprep.mubr.msk.f32.mxu0 %vm18202_vm0, %v18203_v11  ;;  %17497 = vmatpush3.bf16.msra.mxu0 %v17496_v52 }
0x2392   :  { %17498 = vmatprep.subr.bf16.mxu0 %v18201_v3 }
0x2453   :  { %v4922_v42 = vpop.f32.mrb[56].mxu0 }
0x2454   :  { %v19359_v43 = vadd.f32 %v19272_v53, %v4922_v42  ;;  %v16063_v44 = vpop.f32.mrb[57].mxu0  ;;  %v14272_v53 = vld [vmem:[%s21491_s5 + $0x298] sm:$0xff]  ;;  %v14291_v42 = vld [vmem:[%s21491_s5 + $0xe0] sm:$0xff] }
0x2455   :  { %v17499_v54 = vpack.c.bf16 %v14272_v53, %v14271_v51  ;;  %v14292_v44 = vld [vmem:[%s21491_s5 + $0xe8] sm:$0xff] }
0x2457   :  { %17500 = vmatpush3.bf16.msra.mxu0 %v17499_v54 }
0x2458   :  { %17501 = vmatprep.subr.bf16.mxu0 %v18201_v3 }
0x245b   :  { %17503 = vmatpush3.bf16.msra.mxu0 %v17502_v58 }
0x245c   :  { %17504 = vmatprep.subr.bf16.mxu0 %v18201_v3 }
0x245f   :  { %17506 = vmatpush3.bf16.msra.mxu0 %v17505_v62  ;;  %v14308_v62 = vld [vmem:[%s21491_s5 + $0x2c0] sm:$0xff] }
0x2460   :  { %17522 = vmatprep.subr.bf16.mxu0 %v18201_v3 }
0x2462   :  { %16126 = vmatmul.mubr.msk.f32.vlgmr.msra.gmra.mrb[60].mxu0 %vm4011_vm6, %v19087_v20 }
0x2463   :  { %v5076_v45 = vpop.f32.mrb[58].mxu0  ;;  %16180 = vmatprep.mubr.msk.f32.mxu0 %vm18202_vm0, %v18203_v11  ;;  %17524 = vmatpush3.bf16.msra.mxu0 %v17523_v17 }
0x2464   :  { %v5077_v46 = vadd.f32 %v14256_v55, %v5076_v45  ;;  %v16089_v47 = vpop.f32.mrb[59].mxu0  ;;  %17525 = vmatprep.subr.bf16.mxu0 %v18201_v3  ;;  %v17517_v55 = vpack.c.bf16 %v14292_v44, %v14291_v42  ;;  %v14293_v45 = vld [vmem:[%s21491_s5 + $0xf0] sm:$0xff]  ;;  %v6160_v42 = vld [vmem:[%s21459_s13 + $0x18] sm:$0xff] }
0x2466   :  { %v5080_v48 = vmul.f32 0.25, %v5077_v46  ;;  %v14294_v46 = vld [vmem:[%s21491_s5 + $0xf8] sm:$0xff] }
0x2467   :  { %17527 = vmatpush3.bf16.msra.mxu0 %v17526_v29  ;;  %v17520_v47 = vpack.c.bf16 %v14294_v46, %v14293_v45  ;;  %v14324_v29 = vld [vmem:[%s21454_s8 + $0x38] sm:$0xff]  ;;  %v6162_v45 = vld [vmem:[%s21459_s13 + $0x28] sm:$0xff] }
0x2468   :  { %16131 = vmatmul.mubr.msk.f32.vlgmr.msra.gmra.mrb[64].mxu1 %vm4263_vm7, %v5080_v48  ;;  %17528 = vmatprep.subr.bf16.mxu0 %v18201_v3  ;;  %v14306_v48 = vld [vmem:[%s21453_s7 + $0x7] ss:$0 sm:$0xff]  ;;  %v17547_v31 = vpack.c.bf16 %v14324_v29, %v14323_v28 }
0x2469   :  { %16135 = vmatprep.mubr.msk.f32.mxu1 %vm18202_vm0, %v18203_v11 }
0x246b   :  { %17530 = vmatpush3.bf16.msra.mxu0 %v17529_v32 }
0x246c   :  { %17531 = vmatprep.subr.bf16.mxu0 %v18201_v3 }
0x246f   :  { %17533 = vmatpush3.bf16.msra.mxu0 %v17532_v34  ;;  %v17556_v34 = vpack.c.bf16 %v5996_v33, %v5995_v23 }
0x2470   :  { %16202 = vmatprep.subr.mxu0 %v18203_v11 }
0x2472   :  { %16181 = vmatmul.mubr.msk.f32.vlgmr.msra.gmra.mrb[62].mxu0 %vm4011_vm6, %v19087_v20 }
0x2473   :  { %16204 = vmatprep.mubr.msk.f32.mxu0 %vm18202_vm0, %v18203_v11 }
0x2535   :  { %v5251_v6 = vpop.f32.mrb[60].mxu0 }
0x2536   :  { %v16127_v12 = vpop.f32.mrb[61].mxu0  ;;  %v5252_v13 = vadd.f32 %v14278_v10, %v5251_v6  ;;  %v14315_v6 = vld [vmem:[%s21491_s5 + $0x2f8] sm:$0xff] }
0x2538   :  { %16134 = vmatpush3.msk.msra.mxu1 %vm2399_vm4, %v5252_v13 }
0x2539   :  { %17507 = vmatprep.subr.bf16.mxu1 %v18201_v3 }
0x253b   :  { %v5327_v0 = vpop.f32.mrb[64].mxu1 }
0x253c   :  { %v16132_v1 = vpop.f32.mrb[65].mxu1  ;;  %v5331_v4 = vsel %vm2382_vm3, %v5327_v0, -inf }
0x253d   :  { %5332 = vmax.xlane.f32.xlu0 %v5331_v4  ;;  %v14311_v4 = vld [vmem:[%s21491_s5 + $0x2d8] sm:$0xff] }
0x2545   :  { %v5661_v49 = vpop.f32.mrb[62].mxu0 }
0x2546   :  { %v5662_v50 = vadd.f32 %v14306_v48, %v5661_v49  ;;  %v16182_v51 = vpop.f32.mrb[63].mxu0  ;;  %v14327_v48 = vld [vmem:[%s21456_s10 + $0x28] sm:$0xff] }
0x2547   :  { %v14329_v51 = vld [vmem:[%s21456_s10 + $0x38] sm:$0xff] }
0x2548   :  { %16203 = vmatpush3.xpose.msk.msra.mxu0 %vm4263_vm7, %v5662_v50  ;;  %v14328_v50 = vld [vmem:[%s21456_s10 + $0x30] sm:$0xff] }
0x2549   :  { %16207 = vmatprep.subr.mxu0 %v18203_v11 }
0x25ca   :  { %v5333_v5 = vpop.xlane.xlu0 %5332 }
0x25cb   :  { %v5334_v63 = vsub.f32 %v5327_v0, %v5333_v5  ;;  %v14310_v0 = vld [vmem:[%s21491_s5 + $0x2d0] sm:$0xff] }
0x25cc   :  { %v17538_v5 = vpack.c.bf16 %v14311_v4, %v14310_v0  ;;  %v14335_v0 = vld [vmem:[%s21459_s13 + $0x58] sm:$0xff]  ;;  %v14337_v4 = vld [vmem:[%s21459_s13 + $0x68] sm:$0xff] }
0x25cd   :  { %v5335_v7 = vmul.f32 1.442695, %v5334_v63  ;;  %v14312_v63 = vld [vmem:[%s21491_s5 + $0x2e0] sm:$0xff] }
0x25cf   :  { %18099 = vpow2.f32 %v5335_v7  ;;  %v14313_v7 = vld [vmem:[%s21491_s5 + $0x2e8] sm:$0xff] }
0x25d9   :  { %v18100_v8 = vpop.eup %18099 }
0x25da   :  { %v5337_v9 = vsel %vm2382_vm3, %v18100_v8, 0.0 }
0x25db   :  { %5338 = vadd.xlane.f32.xlu1 %v5337_v9  ;;  %v14314_v9 = vld [vmem:[%s21491_s5 + $0x2f0] sm:$0xff] }
0x25dc   :  { %v17544_v10 = vpack.c.bf16 %v14315_v6, %v14314_v9  ;;  %v14338_v9 = vld [vmem:[%s21459_s13 + $0x70] sm:$0xff]  ;;  %v14339_v6 = vld [vmem:[%s21459_s13 + $0x78] sm:$0xff] }
0x2668   :  { %v5339_v19 = vpop.xlane.xlu1 %5338 }
0x2669   :  { %18101 = vrcp.f32 %v5339_v19 }
0x2673   :  { %v18102_v24 = vpop.eup %18101 }
0x2674   :  { %v5341_v26 = vmul.f32 %v18102_v24, %v18100_v8  ;;  %v17541_v8 = vpack.c.bf16 %v14313_v7, %v14312_v63  ;;  %v6163_v63 = vld [vmem:[%s21459_s13 + $0x30] sm:$0xff]  ;;  %v6164_v7 = vld [vmem:[%s21459_s13 + $0x38] sm:$0xff] }
0x2676   :  { %16136 = vmatmul.mubr.msk.f32.vlgmr.msra.gmra.mrb[66].mxu1 %vm2395_vm5, %v5341_v26 }
0x2677   :  { %17509 = vmatpush3.bf16.msra.mxu1 %v17508_v18  ;;  %16142 = vmatprep.mubr.msk.f32.mxu1 %vm18202_vm0, %v18203_v11 }
0x2678   :  { %17510 = vmatprep.subr.bf16.mxu1 %v18201_v3 }
0x2749   :  { %v5415_v39 = vpop.f32.mrb[66].mxu1 }
0x274a   :  { %v16137_v40 = vpop.f32.mrb[67].mxu1  ;;  %16143 = vmatmul.mubr.msk.f32.vlgmr.msra.gmra.mrb[68].mxu1 %vm4263_vm7, %v5415_v39  ;;  %v19569_v39 = vld [vmem:[%s21488_s24] sm:$0xff] }
0x274b   :  { %17512 = vmatpush3.bf16.msra.mxu1 %v17511_v16  ;;  %16161 = vmatprep.mubr.msk.f32.mxu1 %vm18202_vm0, %v18203_v11  ;;  %v17559_v16 = vpack.c.bf16 %v5998_v36, %v5997_v35  ;;  %v17574_v40 = vpack.c.bf16 %v6158_v38, %v6157_v37 }
0x274c   :  { %17513 = vmatprep.subr.bf16.mxu1 %v18201_v3 }
0x274f   :  { %17515 = vmatpush3.bf16.msra.mxu1 %v17514_v41  ;;  %v6159_v41 = vld [vmem:[%s21459_s13 + $0x10] sm:$0xff] }
0x2750   :  { %17516 = vmatprep.subr.bf16.mxu1 %v18201_v3  ;;  %v17577_v44 = vpack.c.bf16 %v6160_v42, %v6159_v41  ;;  %v6406_v41 = vld [vmem:[%s21460_s14 + $0x8] sm:$0xff] }
0x2753   :  { %17518 = vmatpush3.bf16.msra.mxu1 %v17517_v55  ;;  %v6161_v55 = vld [vmem:[%s21459_s13 + $0x20] sm:$0xff] }
0x2754   :  { %17519 = vmatprep.subr.bf16.mxu1 %v18201_v3  ;;  %v17580_v46 = vpack.c.bf16 %v6162_v45, %v6161_v55  ;;  %v6409_v45 = vld [vmem:[%s21460_s14 + $0x20] sm:$0xff] }
0x2757   :  { %17521 = vmatpush3.bf16.msra.mxu1 %v17520_v47  ;;  %v14326_v47 = vld [vmem:[%s21456_s10 + $0x20] sm:$0xff] }
0x2758   :  { %17534 = vmatprep.subr.bf16.mxu1 %v18201_v3  ;;  %v17550_v49 = vpack.c.bf16 %v14327_v48, %v14326_v47  ;;  %v6411_v48 = vld [vmem:[%s21460_s14 + $0x30] sm:$0xff] }
0x275a   :  { %16162 = vmatmul.mubr.msk.f32.vlgmr.msra.gmra.mrb[70].mxu1 %vm4011_vm6, %v19047_v2 }
0x275b   :  { %16199 = vmatprep.mubr.msk.f32.mxu1 %vm18202_vm0, %v18203_v11 }
0x281d   :  { %v5491_v52 = vpop.f32.mrb[68].mxu1 }
0x281e   :  { %v19489_v53 = vadd.f32 %v5491_v52, %v19359_v43  ;;  %v16144_v54 = vpop.f32.mrb[69].mxu1  ;;  %v14309_v43 = vld [vmem:[%s21491_s5 + $0x2c8] sm:$0xff] }
0x281f   :  { %v17535_v1 = vpack.c.bf16 %v14309_v43, %v14308_v62  ;;  %v14334_v43 = vld [vmem:[%s21459_s13 + $0x50] sm:$0xff] }
0x2821   :  { %17536 = vmatpush3.bf16.msra.mxu1 %v17535_v1  ;;  %v17565_v1 = vpack.c.bf16 %v14335_v0, %v14334_v43 }
0x2822   :  { %17537 = vmatprep.subr.bf16.mxu1 %v18201_v3 }
0x2825   :  { %17539 = vmatpush3.bf16.msra.mxu1 %v17538_v5 }
0x2826   :  { %17540 = vmatprep.subr.bf16.mxu1 %v18201_v3 }
0x2829   :  { %17542 = vmatpush3.bf16.msra.mxu1 %v17541_v8  ;;  %v17583_v8 = vpack.c.bf16 %v6164_v7, %v6163_v63  ;;  %v14352_v7 = vld [vmem:[%s21457_s11 + $0x20] sm:$0xff] }
0x282a   :  { %17543 = vmatprep.subr.bf16.mxu1 %v18201_v3 }
0x282d   :  { %v5573_v57 = vpop.f32.mrb[70].mxu1  ;;  %17545 = vmatpush3.bf16.msra.mxu1 %v17544_v10  ;;  %v17571_v10 = vpack.c.bf16 %v14339_v6, %v14338_v9  ;;  %v18173_v9 = vld [vmem:[%s21492_s28] sm:$0xff] }
0x282e   :  { %v5574_v58 = vadd.f32 %v14295_v56, %v5573_v57  ;;  %v16163_v60 = vpop.f32.mrb[71].mxu1  ;;  %17555 = vmatprep.subr.bf16.mxu1 %v18201_v3  ;;  %v17553_v56 = vpack.c.bf16 %v14329_v51, %v14328_v50  ;;  %v14332_v57 = vld [vmem:[%s21459_s13 + $0x40] sm:$0xff] }
0x282f   :  { %v14180_v60 = vld [vmem:[%s21493_s3 + $0x1] sm:$0x1] }
0x2830   :  { %v5577_v61 = vmul.f32 0.25, %v5574_v58  ;;  %16200 = vmatmul.mubr.msk.f32.vlgmr.msra.gmra.mrb[72].mxu1 %vm4011_vm6, %v19087_v20  ;;  %v14317_v20 = vld [vmem:[%s21453_s7 + $0xb] ss:$0 sm:$0xff]  ;;  %v4001_v62 = vadd.f32 %v14180_v60, %v19095_v25  ;;  %v14336_v25 = vld [vmem:[%s21459_s13 + $0x60] sm:$0xff] }
0x2831   :  { %16238 = vmatprep.mubr.msk.f32.mxu1 %vm18202_vm0, %v18203_v11  ;;  %17557 = vmatpush3.bf16.msra.mxu1 %v17556_v34  ;;  %v14333_v58 = vld [vmem:[%s21459_s13 + $0x48] sm:$0xff]  ;;  %v17568_v5 = vpack.c.bf16 %v14337_v4, %v14336_v25  ;;  %v14345_v51 = vld [vmem:[%s21458_s12 + $0x20] sm:$0xff] }
0x2832   :  { %16205 = vmatmul.mubr.msk.f32.vlgmr.msra.gmra.mrb[64].mxu0 %vm4263_vm7, %v5577_v61  ;;  %17558 = vmatprep.subr.bf16.mxu1 %v18201_v3  ;;  %v17562_v61 = vpack.c.bf16 %v14333_v58, %v14332_v57  ;;  %v14348_v57 = vld [vmem:[%s21458_s12 + $0x38] sm:$0xff] }
0x2833   :  { %16209 = vmatprep.mubr.msk.f32.mxu0 %vm18202_vm0, %v18203_v11 }
0x2835   :  { %17560 = vmatpush3.bf16.msra.mxu1 %v17559_v16 }
0x2836   :  { %17573 = vmatprep.subr.bf16.mxu1 %v18201_v3 }
0x2838   :  { %16239 = vmatmul.mubr.msk.f32.vlgmr.msra.gmra.mrb[74].mxu1 %vm88_vm1, %v19569_v39 }
0x2839   :  { %16276 = vmatprep.mubr.msk.f32.mxu1 %vm18202_vm0, %v18203_v11  ;;  %17575 = vmatpush3.bf16.msra.mxu1 %v17574_v40  ;;  %v6405_v40 = vld [vmem:[%s21460_s14] sm:$0xff] }
0x283a   :  { %17576 = vmatprep.subr.bf16.mxu1 %v18201_v3  ;;  %v17592_v42 = vpack.c.bf16 %v6406_v41, %v6405_v40  ;;  %v14356_v40 = vld [vmem:[%s21464_s18 + $0x3] sm:$0x1] }
0x283d   :  { %17578 = vmatpush3.bf16.msra.mxu1 %v17577_v44  ;;  %v6408_v44 = vld [vmem:[%s21460_s14 + $0x18] sm:$0xff] }
0x283e   :  { %17579 = vmatprep.subr.bf16.mxu1 %v18201_v3 }
0x2841   :  { %17581 = vmatpush3.bf16.msra.mxu1 %v17580_v46  ;;  %v6410_v46 = vld [vmem:[%s21460_s14 + $0x28] sm:$0xff] }
0x2842   :  { %17582 = vmatprep.subr.bf16.mxu1 %v18201_v3  ;;  %v17598_v47 = vpack.c.bf16 %v6410_v46, %v6409_v45  ;;  %v14361_v45 = vld [vmem:[%s21458_s12 + $0x58] sm:$0xff] }
0x2845   :  { %17584 = vmatpush3.bf16.msra.mxu1 %v17583_v8  ;;  %v14353_v8 = vld [vmem:[%s21457_s11 + $0x28] sm:$0xff] }
0x2846   :  { %17591 = vmatprep.subr.bf16.mxu1 %v18201_v3 }
0x2848   :  { %16277 = vmatmul.mubr.msk.f32.vlgmr.msra.gmra.mrb[76].mxu1 %vm4011_vm6, %v19047_v2 }
0x2849   :  { %16306 = vmatprep.mubr.msk.f32.mxu1 %vm18202_vm0, %v18203_v11  ;;  %17593 = vmatpush3.bf16.msra.mxu1 %v17592_v42  ;;  %v14358_v42 = vld [vmem:[%s21458_s12 + $0x40] sm:$0xff] }
0x284a   :  { %17594 = vmatprep.subr.bf16.mxu1 %v18201_v3 }
0x2903   :  { %v5748_v24 = vpop.f32.mrb[72].mxu1 }
0x2904   :  { %v16201_v18 = vpop.f32.mrb[73].mxu1  ;;  %v5749_v26 = vadd.f32 %v14317_v20, %v5748_v24  ;;  %v6329_v20 = vld [vmem:[%s21457_s11 + $0x10] sm:$0xff] }
0x2905   :  { %v5824_v12 = vpop.f32.mrb[64].mxu0  ;;  %v6330_v18 = vld [vmem:[%s21457_s11 + $0x18] sm:$0xff] }
0x2906   :  { %v16206_v13 = vpop.f32.mrb[65].mxu0  ;;  %v5828_v14 = vsel %vm2382_vm3, %v5824_v12, -inf  ;;  %16208 = vmatpush3.msk.msra.mxu0 %vm2399_vm4, %v5749_v26  ;;  %v17589_v26 = vpack.c.bf16 %v6330_v18, %v6329_v20  ;;  %v6489_v20 = vld [vmem:[%s21458_s12 + $0x8] sm:$0xff]  ;;  %v14343_v18 = vld [vmem:[%s21464_s18 + $0x1] sm:$0x1] }
0x2907   :  { %5829 = vmax.xlane.f32.xlu0 %v5828_v14  ;;  %17546 = vmatprep.subr.bf16.mxu0 %v18201_v3  ;;  %v6327_v14 = vld [vmem:[%s21457_s11] sm:$0xff] }
0x2994   :  { %v5830_v15 = vpop.xlane.xlu0 %5829 }
0x2995   :  { %v5831_v17 = vsub.f32 %v5824_v12, %v5830_v15  ;;  %v6143_v12 = vpop.f32.mrb[74].mxu1  ;;  %v6328_v15 = vld [vmem:[%s21457_s11 + $0x8] sm:$0xff] }
0x2996   :  { %v16240_v13 = vpop.f32.mrb[75].mxu1 }
0x2997   :  { %v5832_v19 = vmul.f32 1.442695, %v5831_v17  ;;  %v6313_v37 = vpop.f32.mrb[76].mxu1 }
0x2998   :  { %v16278_v38 = vpop.f32.mrb[77].mxu1 }
0x2999   :  { %18103 = vpow2.f32 %v5832_v19  ;;  %v5993_v19 = vld [vmem:[%s21455_s9] sm:$0x1] }
0x29a3   :  { %v18104_v21 = vpop.eup %18103 }
0x29a4   :  { %v5834_v22 = vsel %vm2382_vm3, %v18104_v21, 0.0 }
0x29a5   :  { %5835 = vadd.xlane.f32.xlu1 %v5834_v22  ;;  %v17586_v22 = vpack.c.bf16 %v6328_v15, %v6327_v14  ;;  %v14354_v14 = vld [vmem:[%s21457_s11 + $0x30] sm:$0xff]  ;;  %v14355_v15 = vld [vmem:[%s21457_s11 + $0x38] sm:$0xff] }
0x2a32   :  { %v5836_v27 = vpop.xlane.xlu1 %5835 }
0x2a33   :  { %18105 = vrcp.f32 %v5836_v27  ;;  %v6147_v27 = vld [vmem:[%s21463_s17] sm:$0x1] }
0x2a3d   :  { %v18106_v30 = vpop.eup %18105 }
0x2a3e   :  { %v5838_v32 = vmul.f32 %v18106_v30, %v18104_v21 }
0x2a40   :  { %16210 = vmatmul.mubr.msk.f32.vlgmr.msra.gmra.mrb[66].mxu0 %vm2395_vm5, %v5838_v32 }
0x2a41   :  { %17548 = vmatpush3.bf16.msra.mxu0 %v17547_v31  ;;  %16216 = vmatprep.mubr.msk.f32.mxu0 %vm18202_vm0, %v18203_v11 }
0x2a42   :  { %17549 = vmatprep.subr.bf16.mxu0 %v18201_v3 }
0x2b13   :  { %v5912_v52 = vpop.f32.mrb[66].mxu0 }
0x2b14   :  { %v16211_v54 = vpop.f32.mrb[67].mxu0  ;;  %16217 = vmatmul.mubr.msk.f32.vlgmr.msra.gmra.mrb[68].mxu0 %vm4263_vm7, %v5912_v52  ;;  %v14346_v52 = vld [vmem:[%s21458_s12 + $0x28] sm:$0xff] }
0x2b15   :  { %17551 = vmatpush3.bf16.msra.mxu0 %v17550_v49  ;;  %16227 = vmatprep.mubr.msk.f32.mxu0 %vm18202_vm0, %v18203_v11  ;;  %v6412_v49 = vld [vmem:[%s21460_s14 + $0x38] sm:$0xff]  ;;  %v14347_v54 = vld [vmem:[%s21458_s12 + $0x30] sm:$0xff] }
0x2b16   :  { %17552 = vmatprep.subr.bf16.mxu0 %v18201_v3  ;;  %v17601_v50 = vpack.c.bf16 %v6412_v49, %v6411_v48  ;;  %v17607_v58 = vpack.c.bf16 %v14348_v57, %v14347_v54 }
0x2b19   :  { %17554 = vmatpush3.bf16.msra.mxu0 %v17553_v56  ;;  %v17604_v56 = vpack.c.bf16 %v14346_v52, %v14345_v51 }
0x2b1a   :  { %17561 = vmatprep.subr.bf16.mxu0 %v18201_v3 }
0x2b1c   :  { %16228 = vmatmul.mubr.msk.f32.vlgmr.msra.gmra.mrb[70].mxu0 %vm88_vm1, %v4001_v62 }
0x2b1d   :  { %17563 = vmatpush3.bf16.msra.mxu0 %v17562_v61  ;;  %16257 = vmatprep.mubr.msk.f32.mxu0 %vm18202_vm0, %v18203_v11  ;;  %v6317_v61 = vld [vmem:[%s21465_s19] sm:$0x1] }
0x2b1e   :  { %17564 = vmatprep.subr.bf16.mxu0 %v18201_v3 }
0x2b21   :  { %17566 = vmatpush3.bf16.msra.mxu0 %v17565_v1 }
0x2b22   :  { %17567 = vmatprep.subr.bf16.mxu0 %v18201_v3 }
0x2b25   :  { %17569 = vmatpush3.bf16.msra.mxu0 %v17568_v5 }
0x2b26   :  { %17570 = vmatprep.subr.bf16.mxu0 %v18201_v3 }
0x2b29   :  { %17572 = vmatpush3.bf16.msra.mxu0 %v17571_v10 }
0x2b2a   :  { %17585 = vmatprep.subr.bf16.mxu0 %v18201_v3 }
0x2be7   :  { %v5988_v17 = vpop.f32.mrb[68].mxu0 }
0x2be8   :  { %v5992_v2 = vadd.f32 %v5988_v17, %v19489_v53  ;;  %v16218_v21 = vpop.f32.mrb[69].mxu0  ;;  %v17619_v17 = vpack.c.bf16 %v14355_v15, %v14354_v14  ;;  %v6984_v14 = vld [vmem:[%s21462_s16 + $0x18] sm:$0xff] }
0x2bea   :  { %v19663_v24 = vadd.f32 %v5993_v19, %v5992_v2  ;;  %v2057_v19 = vld [vmem:[%s21493_s3] sm:$0x1] }
0x2bec   :  { %16258 = vmatmul.mubr.msk.f32.vlgmr.msra.gmra.mrb[72].mxu0 %vm4011_vm6, %v19663_v24 }
0x2bed   :  { %17587 = vmatpush3.bf16.msra.mxu0 %v17586_v22  ;;  %16287 = vmatprep.mubr.msk.f32.mxu0 %vm18202_vm0, %v18203_v11  ;;  %v2058_v22 = vadd.f32 %v2057_v19, %v18716_v59  ;;  %v6986_v19 = vld [vmem:[%s21462_s16 + $0x28] sm:$0xff] }
0x2bee   :  { %17588 = vmatprep.subr.bf16.mxu0 %v18201_v3 }
0x2bef   :  { %v6073_v53 = vpop.f32.mrb[70].mxu0 }
0x2bf0   :  { %v6144_v28 = vadd.f32 %v6143_v12, %v6073_v53  ;;  %v16229_v29 = vpop.f32.mrb[71].mxu0  ;;  %v17616_v12 = vpack.c.bf16 %v14353_v8, %v14352_v7  ;;  %v6902_v7 = vld [vmem:[%s21461_s15 + $0x10] sm:$0xff]  ;;  %v6903_v8 = vld [vmem:[%s21461_s15 + $0x18] sm:$0xff] }
0x2bf1   :  { %17590 = vmatpush3.bf16.msra.mxu0 %v17589_v26  ;;  %v6491_v29 = vld [vmem:[%s21458_s12 + $0x18] sm:$0xff] }
0x2bf2   :  { %v6148_v30 = vadd.f32 %v6147_v27, %v6144_v28  ;;  %17603 = vmatprep.subr.bf16.mxu0 %v18201_v3  ;;  %v6490_v28 = vld [vmem:[%s21458_s12 + $0x10] sm:$0xff] }
0x2bf4   :  { %v6149_v31 = vmul.f32 0.5, %v6148_v30  ;;  %v17613_v30 = vpack.c.bf16 %v6491_v29, %v6490_v28  ;;  %v7071_v29 = vld [vmem:[%s21487_s29] sm:$0xff] }
0x2bf6   :  { %18107 = vtanh.f32 %v6149_v31  ;;  %v14362_v31 = vld [vmem:[%s21458_s12 + $0x60] sm:$0xff] }
0x2c00   :  { %v18108_v32 = vpop.eup %18107 }
0x2c01   :  { %v6151_v23 = vadd.f32 1.0, %v18108_v32  ;;  %v14363_v32 = vld [vmem:[%s21458_s12 + $0x68] sm:$0xff] }
0x2c03   :  { %v6152_v33 = vmul.f32 0.5, %v6151_v23  ;;  %v6331_v23 = vld [vmem:[%s21464_s18] sm:$0x1] }
0x2c05   :  { %v6154_v34 = vsub.f32 1.0, %v6152_v33  ;;  %v6153_v35 = vmul.f32 %v19569_v39, %v6152_v33  ;;  %v6407_v39 = vld [vmem:[%s21460_s14 + $0x10] sm:$0xff] }
0x2c06   :  { %v17595_v55 = vpack.c.bf16 %v6408_v44, %v6407_v39  ;;  %v14359_v39 = vld [vmem:[%s21458_s12 + $0x48] sm:$0xff] }
0x2c07   :  { %v6155_v36 = vmul.f32 %v6154_v34, %v4001_v62  ;;  %v17622_v34 = vpack.c.bf16 %v14363_v32, %v14362_v31  ;;  %v17628_v44 = vpack.c.bf16 %v14359_v39, %v14358_v42  ;;  %v19907_v39 = vld [vmem:[%s21488_s24 + $0x20] sm:$0xff] }
0x2c08   :  { %17596 = vmatpush3.bf16.msra.mxu1 %v17595_v55  ;;  %v14360_v55 = vld [vmem:[%s21458_s12 + $0x50] sm:$0xff] }
0x2c09   :  { %v6156_v16 = vadd.f32 %v6155_v36, %v6153_v35  ;;  %17597 = vmatprep.subr.bf16.mxu1 %v18201_v3  ;;  %v17631_v46 = vpack.c.bf16 %v14361_v45, %v14360_v55  ;;  %v6988_v55 = vld [vmem:[%s21462_s16 + $0x38] sm:$0xff] }
0x2c0b   :  { %16288 = vmatmul.mubr.msk.f32.vlgmr.msra.gmra.mrb[74].mxu0 %vm88_vm1, %v6156_v16  ;;  %v14364_v16 = vld [vmem:[%s21458_s12 + $0x70] sm:$0xff] }
0x2c0c   :  { %16317 = vmatprep.mubr.msk.f32.mxu0 %vm18202_vm0, %v18203_v11  ;;  %17599 = vmatpush3.bf16.msra.mxu1 %v17598_v47 }
0x2c0d   :  { %17600 = vmatprep.subr.bf16.mxu1 %v18201_v3  ;;  %17605 = vmatpush3.bf16.msra.mxu0 %v17604_v56 }
0x2c0e   :  { %17606 = vmatprep.subr.bf16.mxu0 %v18201_v3 }
0x2c10   :  { %17602 = vmatpush3.bf16.msra.mxu1 %v17601_v50  ;;  %v14351_v50 = vld [vmem:[%s21464_s18 + $0x2] sm:$0x1] }
0x2c11   :  { %17615 = vmatprep.subr.bf16.mxu1 %v18201_v3  ;;  %17608 = vmatpush3.bf16.msra.mxu0 %v17607_v58 }
0x2c12   :  { %17609 = vmatprep.subr.bf16.mxu0 %v18201_v3 }
0x2cbf   :  { %v6243_v60 = vpop.f32.mrb[72].mxu0 }
0x2cc0   :  { %v6314_v62 = vadd.f32 %v6313_v37, %v6243_v60  ;;  %v16259_v43 = vpop.f32.mrb[73].mxu0  ;;  %v14365_v37 = vld [vmem:[%s21458_s12 + $0x78] sm:$0xff] }
0x2cc1   :  { %v17625_v38 = vpack.c.bf16 %v14365_v37, %v14364_v16  ;;  %v14379_v16 = vld [vmem:[%s21487_s29 + $0x88] sm:$0xff]  ;;  %v19890_v37 = vld [vmem:[%s21488_s24 + $0x18] sm:$0xff] }
0x2cc2   :  { %v6318_v0 = vadd.f32 %v6317_v61, %v6314_v62 }
0x2cc4   :  { %v6319_v1 = vmul.f32 0.5, %v6318_v0 }
0x2cc6   :  { %18109 = vtanh.f32 %v6319_v1 }
0x2cd0   :  { %v18110_v25 = vpop.eup %18109 }
0x2cd1   :  { %v6321_v4 = vadd.f32 1.0, %v18110_v25 }
0x2cd3   :  { %v6322_v5 = vmul.f32 0.5, %v6321_v4  ;;  %v6900_v4 = vld [vmem:[%s21461_s15] sm:$0xff] }
0x2cd5   :  { %v6324_v63 = vsub.f32 1.0, %v6322_v5  ;;  %v6323_v6 = vmul.f32 %v18173_v9, %v6322_v5  ;;  %v6901_v5 = vld [vmem:[%s21461_s15 + $0x8] sm:$0xff]  ;;  %v17637_v9 = vpack.c.bf16 %v6903_v8, %v6902_v7  ;;  %v6989_v7 = vld [vmem:[%s21467_s21] sm:$0x1] }
0x2cd7   :  { %v6325_v10 = vmul.f32 %v6324_v63, %v19663_v24  ;;  %v6488_v24 = vld [vmem:[%s21458_s12] sm:$0xff]  ;;  %v17634_v63 = vpack.c.bf16 %v6901_v5, %v6900_v4  ;;  %v14388_v5 = vld [vmem:[%s21487_s29 + $0x118] sm:$0xff] }
0x2cd8   :  { %v17610_v26 = vpack.c.bf16 %v6489_v20, %v6488_v24 }
0x2cd9   :  { %v6326_v13 = vadd.f32 %v6325_v10, %v6323_v6  ;;  %v6981_v6 = vld [vmem:[%s21462_s16] sm:$0xff]  ;;  %v6982_v10 = vld [vmem:[%s21462_s16 + $0x8] sm:$0xff] }
0x2cdb   :  { %16307 = vmatmul.mubr.msk.f32.vlgmr.msra.gmra.mrb[78].mxu1 %vm4011_vm6, %v6326_v13  ;;  %v17640_v13 = vpack.c.bf16 %v6982_v10, %v6981_v6 }
0x2cdc   :  { %17617 = vmatpush3.bf16.msra.mxu1 %v17616_v12  ;;  %16339 = vmatprep.mubr.msk.f32.mxu1 %vm18202_vm0, %v18203_v11  ;;  %v6983_v12 = vld [vmem:[%s21462_s16 + $0x10] sm:$0xff] }
0x2cdd   :  { %17618 = vmatprep.subr.bf16.mxu1 %v18201_v3  ;;  %v17643_v15 = vpack.c.bf16 %v6984_v14, %v6983_v12 }
0x2cde   :  { %v6401_v2 = vpop.f32.mrb[74].mxu0 }
0x2cdf   :  { %v16289_v21 = vpop.f32.mrb[75].mxu0  ;;  %v6402_v35 = vadd.f32 %v6401_v2, %v6331_v23 }
0x2ce0   :  { %17620 = vmatpush3.bf16.msra.mxu1 %v17619_v17  ;;  %v6985_v17 = vld [vmem:[%s21462_s16 + $0x20] sm:$0xff] }
0x2ce1   :  { %17627 = vmatprep.subr.bf16.mxu1 %v18201_v3  ;;  %v17646_v2 = vpack.c.bf16 %v6986_v19, %v6985_v17 }
0x2ce3   :  { %16340 = vmatmul.mubr.msk.f32.vlgmr.msra.gmra.mrb[80].mxu1 %vm88_vm1, %v2058_v22  ;;  %v14368_v22 = vld [vmem:[%s21464_s18 + $0x4] sm:$0x1] }
0x2ce4   :  { %16361 = vmatprep.mubr.msk.f32.mxu1 %vm18202_vm0, %v18203_v11  ;;  %17629 = vmatpush3.bf16.msra.mxu1 %v17628_v44  ;;  %v6987_v44 = vld [vmem:[%s21462_s16 + $0x30] sm:$0xff] }
0x2ce5   :  { %17630 = vmatprep.subr.bf16.mxu1 %v18201_v3  ;;  %v17649_v45 = vpack.c.bf16 %v6988_v55, %v6987_v44  ;;  %v14404_v44 = vld [vmem:[%s21487_s29 + $0xb0] sm:$0xff]  ;;  %v14405_v55 = vld [vmem:[%s21487_s29 + $0xb8] sm:$0xff] }
0x2ce8   :  { %17632 = vmatpush3.bf16.msra.mxu1 %v17631_v46  ;;  %v6904_v46 = vld [vmem:[%s21466_s20] sm:$0x1] }
0x2ce9   :  { %17639 = vmatprep.subr.bf16.mxu1 %v18201_v3 }
0x2dae   :  { %v6484_v59 = vpop.f32.mrb[78].mxu1 }
0x2daf   :  { %v6485_v53 = vadd.f32 %v14343_v18, %v6484_v59  ;;  %v16308_v27 = vpop.f32.mrb[79].mxu1 }
0x2db1   :  { %16318 = vmatmul.mubr.msk.f32.vlgmr.msra.gmra.mrb[76].mxu0 %vm88_vm1, %v6485_v53 }
0x2db2   :  { %17611 = vmatpush3.bf16.msra.mxu0 %v17610_v26  ;;  %16328 = vmatprep.mubr.msk.f32.mxu0 %vm18202_vm0, %v18203_v11 }
0x2db3   :  { %17612 = vmatprep.subr.bf16.mxu0 %v18201_v3 }
0x2db6   :  { %17614 = vmatpush3.bf16.msra.mxu0 %v17613_v30  ;;  %v6730_v33 = vpop.f32.mrb[80].mxu1  ;;  %v7072_v30 = vld [vmem:[%s21487_s29 + $0x8] sm:$0xff] }
0x2db7   :  { %v16341_v36 = vpop.f32.mrb[81].mxu1  ;;  %17621 = vmatprep.subr.bf16.mxu0 %v18201_v3  ;;  %v19799_v41 = vadd.f32 %v14356_v40, %v6730_v33  ;;  %v17652_v32 = vpack.c.bf16 %v7072_v30, %v7071_v29  ;;  %v7073_v33 = vld [vmem:[%s21487_s29 + $0x10] sm:$0xff] }
0x2db8   :  { %v14378_v36 = vld [vmem:[%s21487_s29 + $0x80] sm:$0xff]  ;;  %v14380_v40 = vld [vmem:[%s21487_s29 + $0x90] sm:$0xff] }
0x2db9   :  { %16329 = vmatmul.mubr.msk.f32.vlgmr.msra.gmra.mrb[78].mxu0 %vm88_vm1, %v6402_v35 }
0x2dba   :  { %17623 = vmatpush3.bf16.msra.mxu0 %v17622_v34  ;;  %16350 = vmatprep.mubr.msk.f32.mxu0 %vm18202_vm0, %v18203_v11  ;;  %v7074_v34 = vld [vmem:[%s21487_s29 + $0x18] sm:$0xff] }
0x2dbb   :  { %17624 = vmatprep.subr.bf16.mxu0 %v18201_v3 }
0x2dbe   :  { %17626 = vmatpush3.bf16.msra.mxu0 %v17625_v38  ;;  %v17658_v38 = vpack.c.bf16 %v14379_v16, %v14378_v36  ;;  %v14402_v16 = vld [vmem:[%s21487_s29 + $0xa0] sm:$0xff] }
0x2dbf   :  { %17633 = vmatprep.subr.bf16.mxu0 %v18201_v3 }
0x2dc1   :  { %16351 = vmatmul.mubr.msk.f32.vlgmr.msra.gmra.mrb[80].mxu0 %vm88_vm1, %v19799_v41 }
0x2dc2   :  { %16372 = vmatprep.mubr.msk.f32.mxu0 %vm18202_vm0, %v18203_v11  ;;  %17635 = vmatpush3.bf16.msra.mxu0 %v17634_v63 }
0x2dc3   :  { %17636 = vmatprep.subr.bf16.mxu0 %v18201_v3 }
0x2dc6   :  { %17638 = vmatpush3.bf16.msra.mxu0 %v17637_v9 }
0x2dc7   :  { %17651 = vmatprep.subr.bf16.mxu0 %v18201_v3 }
0x2e84   :  { %v6566_v47 = vpop.f32.mrb[76].mxu0 }
0x2e85   :  { %v16319_v48 = vpop.f32.mrb[77].mxu0 }
0x2e8c   :  { %v6639_v49 = vpop.f32.mrb[78].mxu0 }
0x2e8d   :  { %v6640_v51 = vadd.f32 %v6639_v49, %v6566_v47  ;;  %v16330_v52 = vpop.f32.mrb[79].mxu0 }
0x2e8f   :  { %v6645_v54 = vadd.f32 %v14351_v50, %v6640_v51 }
0x2e91   :  { %v6646_v56 = vmul.f32 0.5, %v6645_v54 }
0x2e93   :  { %18111 = vtanh.f32 %v6646_v56  ;;  %v14376_v56 = vld [vmem:[%s21489_s4] ss:$0 sm:$0xff] }
0x2e94   :  { %v6813_v57 = vpop.f32.mrb[80].mxu0 }
0x2e95   :  { %v16352_v58 = vpop.f32.mrb[81].mxu0 }
0x2e9d   :  { %v18112_v60 = vpop.eup %18111 }
0x2e9e   :  { %v6648_v61 = vadd.f32 1.0, %v18112_v60 }
0x2ea0   :  { %v6649_v62 = vmul.f32 0.5, %v6648_v61 }
0x2ea2   :  { %v6651_v43 = vsub.f32 1.0, %v6649_v62  ;;  %v6650_v0 = vmul.f32 %v6649_v62, %v6402_v35  ;;  %v17655_v35 = vpack.c.bf16 %v7074_v34, %v7073_v33 }
0x2ea4   :  { %v6652_v1 = vmul.f32 %v6651_v43, %v6485_v53 }
0x2ea6   :  { %v6653_v25 = vadd.f32 %v6652_v1, %v6650_v0  ;;  %v14385_v0 = vld [vmem:[%s21487_s29 + $0x100] sm:$0xff]  ;;  %v14386_v1 = vld [vmem:[%s21487_s29 + $0x108] sm:$0xff] }
0x2ea7   :  { %v17664_v4 = vpack.c.bf16 %v14386_v1, %v14385_v0  ;;  %v14412_v0 = vld [vmem:[%s21487_s29 + $0x138] sm:$0xff] }
0x2ea8   :  { %16362 = vmatmul.mubr.msk.f32.vlgmr.msra.gmra.mrb[82].mxu1 %vm88_vm1, %v6653_v25 }
0x2ea9   :  { %16391 = vmatprep.mubr.msk.f32.mxu1 %vm18202_vm0, %v18203_v11  ;;  %17641 = vmatpush3.bf16.msra.mxu1 %v17640_v13 }
0x2eaa   :  { %17642 = vmatprep.subr.bf16.mxu1 %v18201_v3 }
0x2ead   :  { %17644 = vmatpush3.bf16.msra.mxu1 %v17643_v15 }
0x2eae   :  { %17645 = vmatprep.subr.bf16.mxu1 %v18201_v3 }
0x2eb1   :  { %17647 = vmatpush3.bf16.msra.mxu1 %v17646_v2 }
0x2eb2   :  { %17648 = vmatprep.subr.bf16.mxu1 %v18201_v3 }
0x2eb5   :  { %17650 = vmatpush3.bf16.msra.mxu1 %v17649_v45  ;;  %v17679_v45 = vpack.c.bf16 %v14405_v55, %v14404_v44  ;;  %v14434_v55 = vld [vmem:[%s21489_s4 + $0x6] ss:$0 sm:$0xff] }
0x2eb6   :  { %17663 = vmatprep.subr.bf16.mxu1 %v18201_v3 }
0x2f7b   :  { %v6886_v21 = vpop.f32.mrb[82].mxu1 }
0x2f7c   :  { %v6887_v24 = vadd.f32 %v6886_v21, %v6813_v57  ;;  %v16363_v20 = vpop.f32.mrb[83].mxu1  ;;  %v14383_v57 = vld [vmem:[%s21489_s4 + $0x4] ss:$0 sm:$0xff]  ;;  %v14390_v21 = vld [vmem:[%s21489_s4 + $0x8] ss:$0 sm:$0xff] }
0x2f7e   :  { %v6892_v18 = vadd.f32 %v14368_v22, %v6887_v24 }
0x2f80   :  { %v6893_v59 = vmul.f32 0.5, %v6892_v18  ;;  %v14395_v18 = vld [vmem:[%s21487_s29 + $0x20] sm:$0xff] }
0x2f82   :  { %18113 = vtanh.f32 %v6893_v59  ;;  %v14396_v59 = vld [vmem:[%s21487_s29 + $0x28] sm:$0xff] }
0x2f8c   :  { %v18114_v26 = vpop.eup %18113 }
0x2f8d   :  { %v6895_v53 = vadd.f32 1.0, %v18114_v26  ;;  %v17670_v26 = vpack.c.bf16 %v14396_v59, %v14395_v18 }
0x2f8f   :  { %v6896_v27 = vmul.f32 0.5, %v6895_v53  ;;  %v14397_v53 = vld [vmem:[%s21487_s29 + $0x30] sm:$0xff] }
0x2f91   :  { %v6897_v28 = vsub.f32 1.0, %v6896_v27  ;;  %v14398_v27 = vld [vmem:[%s21487_s29 + $0x38] sm:$0xff] }
0x2f93   :  { %v6898_v31 = vmul.f32 %v6897_v28, %v19799_v41  ;;  %v14381_v41 = vld [vmem:[%s21487_s29 + $0x98] sm:$0xff]  ;;  %v17673_v28 = vpack.c.bf16 %v14398_v27, %v14397_v53  ;;  %v7489_v27 = vld [vmem:[%s21490_s0] sm:$0xff] }
0x2f94   :  { %v17661_v42 = vpack.c.bf16 %v14381_v41, %v14380_v40 }
0x2f95   :  { %v6899_v23 = vadd.f32 %v6898_v31, %v6653_v25  ;;  %v14387_v25 = vld [vmem:[%s21487_s29 + $0x110] sm:$0xff] }
0x2f96   :  { %v17667_v63 = vpack.c.bf16 %v14388_v5, %v14387_v25 }
0x2f97   :  { %16373 = vmatmul.mubr.msk.f32.vlgmr.msra.gmra.mrb[82].mxu0 %vm88_vm1, %v6899_v23 }
0x2f98   :  { %17653 = vmatpush3.bf16.msra.mxu0 %v17652_v32  ;;  %16402 = vmatprep.mubr.msk.f32.mxu0 %vm18202_vm0, %v18203_v11 }
0x2f99   :  { %17654 = vmatprep.subr.bf16.mxu0 %v18201_v3 }
0x2f9c   :  { %17656 = vmatpush3.bf16.msra.mxu0 %v17655_v35 }
0x2f9d   :  { %17657 = vmatprep.subr.bf16.mxu0 %v18201_v3 }
0x2f9f   :  { %16403 = vmatmul.mubr.msk.f32.vlgmr.msra.gmra.mrb[84].mxu0 %vm88_vm1, %v19890_v37 }
0x2fa0   :  { %17659 = vmatpush3.bf16.msra.mxu0 %v17658_v38  ;;  %16413 = vmatprep.mubr.msk.f32.mxu0 %vm18202_vm0, %v18203_v11  ;;  %v14403_v38 = vld [vmem:[%s21487_s29 + $0xa8] sm:$0xff] }
0x2fa1   :  { %17660 = vmatprep.subr.bf16.mxu0 %v18201_v3  ;;  %v17676_v41 = vpack.c.bf16 %v14403_v38, %v14402_v16  ;;  %v14425_v16 = vld [vmem:[%s21487_s29 + $0x58] sm:$0xff] }
0x2fa4   :  { %17662 = vmatpush3.bf16.msra.mxu0 %v17661_v42 }
0x2fa5   :  { %16427 = vmatprep.subr.mxu0 %v18203_v11 }
0x2fa7   :  { %16414 = vmatmul.mubr.msk.f32.vlgmr.msra.gmra.mrb[86].mxu0 %vm88_vm1, %v19907_v39 }
0x2fa8   :  { %16429 = vmatprep.mubr.msk.f32.mxu0 %vm18202_vm0, %v18203_v11 }
0x306a   :  { %v6974_v47 = vpop.f32.mrb[82].mxu0 }
0x306b   :  { %v6975_v48 = vadd.f32 %v6974_v47, %v6904_v46  ;;  %v16374_v49 = vpop.f32.mrb[83].mxu0 }
0x306d   :  { %vm6978_vm8 = vcmp.gt.f32.partialorder %v6975_v48, 0.0  ;;  %v6979_v50 = vmul.f32 0.01, %v6975_v48 }
0x306f   :  { %v6980_v51 = vsel %vm6978_vm8, %v6975_v48, %v6979_v50  ;;  %v14400_v50 = vld [vmem:[%s21489_s4 + $0x1] ss:$0 sm:$0xff] }
0x3070   :  { %16392 = vmatmul.mubr.msk.f32.vlgmr.msra.gmra.mrb[84].mxu1 %vm4011_vm6, %v6980_v51 }
0x3071   :  { %16424 = vmatprep.mubr.msk.f32.mxu1 %vm18202_vm0, %v18203_v11  ;;  %17665 = vmatpush3.bf16.msra.mxu1 %v17664_v4 }
0x3072   :  { %v7151_v52 = vpop.f32.mrb[84].mxu0  ;;  %17666 = vmatprep.subr.bf16.mxu1 %v18201_v3 }
0x3073   :  { %v16404_v54 = vpop.f32.mrb[85].mxu0  ;;  %v7152_v58 = vadd.f32 %v14376_v56, %v7151_v52  ;;  %v14407_v52 = vld [vmem:[%s21489_s4 + $0x5] ss:$0 sm:$0xff] }
0x3075   :  { %v7155_v43 = vmul.f32 0.35355338, %v7152_v58  ;;  %17668 = vmatpush3.bf16.msra.mxu1 %v17667_v63 }
0x3076   :  { %16432 = vmatprep.subr.mxu1 %v18203_v11 }
0x3078   :  { %16425 = vmatmul.mubr.msk.f32.vlgmr.msra.gmra.mrb[86].mxu1 %vm88_vm1, %v19907_v39 }
0x3079   :  { %16434 = vmatprep.mubr.msk.f32.mxu1 %vm18202_vm0, %v18203_v11 }
0x307a   :  { %v7236_v60 = vpop.f32.mrb[86].mxu0 }
0x307b   :  { %v7237_v61 = vadd.f32 %v14383_v57, %v7236_v60  ;;  %v16415_v62 = vpop.f32.mrb[87].mxu0  ;;  %v14409_v60 = vld [vmem:[%s21487_s29 + $0x120] sm:$0xff] }
0x307c   :  { %v14411_v62 = vld [vmem:[%s21487_s29 + $0x130] sm:$0xff] }
0x307d   :  { %16428 = vmatpush3.xpose.msk.msra.mxu0 %vm332_vm2, %v7237_v61  ;;  %v14410_v61 = vld [vmem:[%s21487_s29 + $0x128] sm:$0xff]  ;;  %v17685_v1 = vpack.c.bf16 %v14412_v0, %v14411_v62 }
0x307e   :  { %17669 = vmatprep.subr.bf16.mxu0 %v18201_v3 }
0x3080   :  { %16430 = vmatmul.mubr.msk.f32.vlgmr.msra.gmra.mrb[88].mxu0 %vm332_vm2, %v7155_v43  ;;  %v17682_v43 = vpack.c.bf16 %v14410_v61, %v14409_v60  ;;  %v14437_v60 = vld [vmem:[%s21487_s29 + $0x148] sm:$0xff]  ;;  %v14438_v61 = vld [vmem:[%s21487_s29 + $0x150] sm:$0xff] }
0x3081   :  { %16445 = vmatprep.mubr.msk.f32.mxu0 %vm18202_vm0, %v18203_v11  ;;  %17671 = vmatpush3.bf16.msra.mxu0 %v17670_v26 }
0x3082   :  { %17672 = vmatprep.subr.bf16.mxu0 %v18201_v3 }
0x3085   :  { %17674 = vmatpush3.bf16.msra.mxu0 %v17673_v28  ;;  %v14429_v28 = vld [vmem:[%s21487_s29 + $0xc0] sm:$0xff] }
0x3086   :  { %17681 = vmatprep.subr.bf16.mxu0 %v18201_v3 }
0x3088   :  { %16446 = vmatmul.mubr.msk.f32.vlgmr.msra.gmra.mrb[90].mxu0 %vm88_vm1, %v19890_v37 }
0x3089   :  { %16467 = vmatprep.mubr.msk.f32.mxu0 %vm18202_vm0, %v18203_v11  ;;  %17683 = vmatpush3.bf16.msra.mxu0 %v17682_v43  ;;  %v14439_v43 = vld [vmem:[%s21487_s29 + $0x158] sm:$0xff] }
0x308a   :  { %17684 = vmatprep.subr.bf16.mxu0 %v18201_v3  ;;  %v17703_v0 = vpack.c.bf16 %v14439_v43, %v14438_v61 }
0x308d   :  { %17686 = vmatpush3.bf16.msra.mxu0 %v17685_v1 }
0x308e   :  { %16480 = vmatprep.subr.mxu0 %v18203_v11 }
0x3090   :  { %16468 = vmatmul.mubr.msk.f32.vlgmr.msra.gmra.mrb[92].mxu0 %vm88_vm1, %v19907_v39 }
0x3091   :  { %16482 = vmatprep.mubr.msk.f32.mxu0 %vm18202_vm0, %v18203_v11 }
0x3143   :  { %v7059_v8 = vpop.f32.mrb[84].mxu1 }
0x3144   :  { %v7060_v9 = vadd.f32 %v7059_v8, %v6989_v7  ;;  %v16393_v6 = vpop.f32.mrb[85].mxu1 }
0x3146   :  { %7063 = vst [vmem:[#allocation2] sm:$0x1] %v7060_v9 }
0x314b   :  { %v7317_v22 = vpop.f32.mrb[86].mxu1 }
0x314c   :  { %v7318_v24 = vadd.f32 %v14390_v21, %v7317_v22  ;;  %v16426_v20 = vpop.f32.mrb[87].mxu1 }
0x314e   :  { %16433 = vmatpush3.msra.mxu1 %v7318_v24 }
0x314f   :  { %17675 = vmatprep.subr.bf16.mxu1 %v18201_v3 }
0x3153   :  { %v7393_v10 = vpop.f32.mrb[88].mxu0 }
0x3154   :  { %v16431_v12 = vpop.f32.mrb[89].mxu0  ;;  %v7397_v13 = vsel %vm332_vm2, %v7393_v10, -inf }
0x3155   :  { %7398 = vmax.xlane.f32.xlu0 %v7397_v13 }
0x315b   :  { %v7567_v46 = vpop.f32.mrb[90].mxu0 }
0x315c   :  { %v16447_v47 = vpop.f32.mrb[91].mxu0  ;;  %v7568_v51 = vadd.f32 %v14400_v50, %v7567_v46 }
0x315e   :  { %v7571_v58 = vmul.f32 0.35355338, %v7568_v51  ;;  %v14427_v51 = vld [vmem:[%s21489_s4 + $0x2] ss:$0 sm:$0xff] }
0x3163   :  { %v7730_v12 = vpop.f32.mrb[92].mxu0 }
0x31e2   :  { %v7399_v14 = vpop.xlane.xlu0 %7398 }
0x31e3   :  { %v7400_v15 = vsub.f32 %v7393_v10, %v7399_v14  ;;  %v14414_v10 = vld [vmem:[%s21489_s4 + $0x9] ss:$0 sm:$0xff]  ;;  %v16469_v14 = vpop.f32.mrb[93].mxu0 }
0x31e4   :  { %v7731_v13 = vadd.f32 %v14414_v10, %v7730_v12  ;;  %v14446_v14 = vld [vmem:[%s21490_s0 + $0x10] sm:$0xff] }
0x31e5   :  { %v7401_v17 = vmul.f32 1.442695, %v7400_v15  ;;  %v14419_v15 = vld [vmem:[%s21490_s0 + $0x8] sm:$0xff] }
0x31e6   :  { %16481 = vmatpush3.msra.mxu0 %v14419_v15 }
0x31e7   :  { %18115 = vpow2.f32 %v7401_v17  ;;  %17687 = vmatprep.subr.bf16.mxu0 %v18201_v3 }
0x31f1   :  { %v18116_v19 = vpop.eup %18115 }
0x31f2   :  { %v7403_v2 = vsel %vm332_vm2, %v18116_v19, 0.0 }
0x31f3   :  { %7404 = vadd.xlane.f32.xlu1 %v7403_v2 }
0x3280   :  { %v7405_v29 = vpop.xlane.xlu1 %7404 }
0x3281   :  { %18117 = vrcp.f32 %v7405_v29  ;;  %v14430_v29 = vld [vmem:[%s21487_s29 + $0xc8] sm:$0xff] }
0x328b   :  { %v18118_v30 = vpop.eup %18117 }
0x328c   :  { %v7407_v31 = vmul.f32 %v18118_v30, %v18116_v19  ;;  %v17694_v30 = vpack.c.bf16 %v14430_v29, %v14429_v28  ;;  %v14450_v29 = vld [vmem:[%s21487_s29 + $0x70] sm:$0xff] }
0x328e   :  { %v7408_v32 = vsel %vm332_vm2, %v7407_v31, 0.0  ;;  %v14431_v31 = vld [vmem:[%s21487_s29 + $0xd0] sm:$0xff] }
0x328f   :  { %v7409_v23 = vrot.slane %v7408_v32, 4 }
0x3291   :  { %v7410_v33 = vadd.f32 %v7409_v23, %v7408_v32  ;;  %v14432_v32 = vld [vmem:[%s21487_s29 + $0xd8] sm:$0xff] }
0x3292   :  { %v17697_v23 = vpack.c.bf16 %v14432_v32, %v14431_v31  ;;  %v14455_v32 = vld [vmem:[%s21487_s29 + $0xe0] sm:$0xff] }
0x3293   :  { %v7411_v34 = vrot.slane %v7410_v33, 2 }
0x3295   :  { %v7412_v35 = vadd.f32 %v7411_v34, %v7410_v33  ;;  %v14422_v33 = vld [vmem:[%s21487_s29 + $0x40] sm:$0xff]  ;;  %v14423_v34 = vld [vmem:[%s21487_s29 + $0x48] sm:$0xff] }
0x3297   :  { %v7413_v36 = vrot.slane %v7412_v35, 1 }
0x3299   :  { %v7414_v40 = vadd.f32 %v7413_v36, %v7412_v35  ;;  %v17688_v35 = vpack.c.bf16 %v14423_v34, %v14422_v33  ;;  %v14424_v36 = vld [vmem:[%s21487_s29 + $0x50] sm:$0xff] }
0x329a   :  { %v14457_v34 = vld [vmem:[%s21487_s29 + $0xf0] sm:$0xff] }
0x329b   :  { %v7415_v42 = vmul.f32 0.125, %v7414_v40 }
0x329d   :  { %16435 = vmatmul.mubr.msk.f32.vlgmr.msra.gmra.mrb[88].mxu1 %vm332_vm2, %v7415_v42 }
0x329e   :  { %17677 = vmatpush3.bf16.msra.mxu1 %v17676_v41  ;;  %16456 = vmatprep.mubr.msk.f32.mxu1 %vm18202_vm0, %v18203_v11  ;;  %v17691_v41 = vpack.c.bf16 %v14425_v16, %v14424_v36 }
0x329f   :  { %17678 = vmatprep.subr.bf16.mxu1 %v18201_v3 }
0x32a2   :  { %17680 = vmatpush3.bf16.msra.mxu1 %v17679_v45 }
0x32a3   :  { %16470 = vmatprep.subr.mxu1 %v18203_v11 }
0x32a5   :  { %16457 = vmatmul.mubr.msk.f32.vlgmr.msra.gmra.mrb[90].mxu1 %vm88_vm1, %v19907_v39 }
0x32a6   :  { %16472 = vmatprep.mubr.msk.f32.mxu1 %vm18202_vm0, %v18203_v11 }
0x3370   :  { %v20005_v48 = vpop.f32.mrb[88].mxu1 }
0x3371   :  { %v16436_v49 = vpop.f32.mrb[89].mxu1 }
0x3378   :  { %v7649_v54 = vpop.f32.mrb[90].mxu1 }
0x3379   :  { %v7650_v56 = vadd.f32 %v14407_v52, %v7649_v54  ;;  %v16458_v57 = vpop.f32.mrb[91].mxu1 }
0x337b   :  { %16471 = vmatpush3.xpose.msk.msra.mxu1 %vm332_vm2, %v7650_v56 }
0x337c   :  { %16475 = vmatprep.subr.mxu1 %v18203_v11 }
0x337e   :  { %16473 = vmatmul.mubr.msk.f32.vlgmr.msra.gmra.mrb[92].mxu1 %vm332_vm2, %v7571_v58  ;;  %v14436_v58 = vld [vmem:[%s21487_s29 + $0x140] sm:$0xff] }
0x337f   :  { %16477 = vmatprep.mubr.msk.f32.mxu1 %vm18202_vm0, %v18203_v11  ;;  %16476 = vmatpush3.msra.mxu1 %v7731_v13  ;;  %v17700_v62 = vpack.c.bf16 %v14437_v60, %v14436_v58  ;;  %v14465_v58 = vld [vmem:[%s21487_s29 + $0x178] sm:$0xff] }
0x3380   :  { %16485 = vmatprep.subr.mxu1 %v18203_v11 }
0x3451   :  { %v7806_v25 = vpop.f32.mrb[92].mxu1 }
0x3452   :  { %v16474_v4 = vpop.f32.mrb[93].mxu1  ;;  %v7810_v5 = vsel %vm332_vm2, %v7806_v25, -inf }
0x3453   :  { %7811 = vmax.xlane.f32.xlu0 %v7810_v5 }
0x34e0   :  { %v7812_v63 = vpop.xlane.xlu0 %7811 }
0x34e1   :  { %v7813_v7 = vsub.f32 %v7806_v25, %v7812_v63 }
0x34e3   :  { %v7814_v8 = vmul.f32 1.442695, %v7813_v7 }
0x34e5   :  { %18119 = vpow2.f32 %v7814_v8 }
0x34ef   :  { %v18120_v9 = vpop.eup %18119 }
0x34f0   :  { %v7816_v6 = vsel %vm332_vm2, %v18120_v9, 0.0 }
0x34f1   :  { %7817 = vadd.xlane.f32.xlu1 %v7816_v6  ;;  %v14441_v6 = vld [vmem:[%s21489_s4 + $0xa] ss:$0 sm:$0xff] }
0x357e   :  { %v7818_v17 = vpop.xlane.xlu1 %7817 }
0x357f   :  { %18121 = vrcp.f32 %v7818_v17 }
0x3589   :  { %v18122_v19 = vpop.eup %18121 }
0x358a   :  { %v7820_v2 = vmul.f32 %v18122_v19, %v18120_v9 }
0x358c   :  { %v7821_v21 = vsel %vm332_vm2, %v7820_v2, 0.0 }
0x358d   :  { %v7822_v22 = vrot.slane %v7821_v21, 4 }
0x358f   :  { %v7823_v24 = vadd.f32 %v7822_v22, %v7821_v21 }
0x3591   :  { %v7824_v20 = vrot.slane %v7823_v24, 2 }
0x3593   :  { %v7825_v18 = vadd.f32 %v7824_v20, %v7823_v24 }
0x3595   :  { %v7826_v59 = vrot.slane %v7825_v18, 1 }
0x3597   :  { %v7827_v26 = vadd.f32 %v7826_v59, %v7825_v18 }
0x3599   :  { %v7828_v53 = vmul.f32 0.125, %v7827_v26 }
0x359b   :  { %16478 = vmatmul.mubr.msk.f32.vlgmr.msra.gmra.mrb[94].mxu1 %vm332_vm2, %v7828_v53  ;;  %v14448_v53 = vld [vmem:[%s21487_s29 + $0x60] sm:$0xff] }
0x359c   :  { %16486 = vmatpush3.msra.mxu1 %v7489_v27  ;;  %16487 = vmatprep.mubr.msk.f32.mxu1 %vm18202_vm0, %v18203_v11  ;;  %v14449_v27 = vld [vmem:[%s21487_s29 + $0x68] sm:$0xff] }
0x359d   :  { %17693 = vmatprep.subr.bf16.mxu1 %v18201_v3  ;;  %v17706_v28 = vpack.c.bf16 %v14449_v27, %v14448_v53  ;;  %v14480_v27 = vld [vmem:[%s21487_s29 + $0x200] sm:$0xff] }
0x359f   :  { %16488 = vmatmul.mubr.msk.f32.vlgmr.msra.gmra.mrb[96].mxu1 %vm332_vm2, %v20005_v48 }
0x35a0   :  { %17695 = vmatpush3.bf16.msra.mxu1 %v17694_v30  ;;  %16509 = vmatprep.mubr.msk.f32.mxu1 %vm18202_vm0, %v18203_v11  ;;  %v14451_v30 = vld [vmem:[%s21487_s29 + $0x78] sm:$0xff] }
0x35a1   :  { %17696 = vmatprep.subr.bf16.mxu1 %v18201_v3  ;;  %v17709_v31 = vpack.c.bf16 %v14451_v30, %v14450_v29  ;;  %v14482_v30 = vld [vmem:[%s21487_s29 + $0x210] sm:$0xff] }
0x35a4   :  { %17698 = vmatpush3.bf16.msra.mxu1 %v17697_v23  ;;  %v14456_v23 = vld [vmem:[%s21487_s29 + $0xe8] sm:$0xff] }
0x35a5   :  { %16523 = vmatprep.subr.mxu1 %v18203_v11  ;;  %v17712_v33 = vpack.c.bf16 %v14456_v23, %v14455_v32 }
0x35a7   :  { %16510 = vmatmul.mubr.msk.f32.vlgmr.msra.gmra.mrb[98].mxu1 %vm88_vm1, %v19907_v39 }
0x35a8   :  { %16525 = vmatprep.mubr.msk.f32.mxu1 %vm18202_vm0, %v18203_v11 }
0x366e   :  { %v7898_v38 = vpop.f32.mrb[94].mxu1 }
0x366f   :  { %v16479_v40 = vpop.f32.mrb[95].mxu1  ;;  %16483 = vmatmul.mubr.msk.f32.vlgmr.msra.gmra.mrb[94].mxu0 %vm332_vm2, %v7898_v38 }
0x3670   :  { %17689 = vmatpush3.bf16.msra.mxu0 %v17688_v35  ;;  %16498 = vmatprep.mubr.msk.f32.mxu0 %vm18202_vm0, %v18203_v11  ;;  %v14458_v35 = vld [vmem:[%s21487_s29 + $0xf8] sm:$0xff] }
0x3671   :  { %17690 = vmatprep.subr.bf16.mxu0 %v18201_v3  ;;  %v17715_v38 = vpack.c.bf16 %v14458_v35, %v14457_v34  ;;  %v20264_v34 = vld [vmem:[%s21488_s24 + $0x28] sm:$0xf] }
0x3672   :  { %v8045_v42 = vpop.f32.mrb[96].mxu1 }
0x3673   :  { %v16489_v44 = vpop.f32.mrb[97].mxu1 }
0x3674   :  { %17692 = vmatpush3.bf16.msra.mxu0 %v17691_v41 }
0x3675   :  { %17699 = vmatprep.subr.bf16.mxu0 %v18201_v3 }
0x3677   :  { %16499 = vmatmul.mubr.msk.f32.vlgmr.msra.gmra.mrb[96].mxu0 %vm88_vm1, %v19890_v37 }
0x3678   :  { %16520 = vmatprep.mubr.msk.f32.mxu0 %vm18202_vm0, %v18203_v11  ;;  %17701 = vmatpush3.bf16.msra.mxu0 %v17700_v62 }
0x3679   :  { %17702 = vmatprep.subr.bf16.mxu0 %v18201_v3 }
0x367a   :  { %v8208_v45 = vpop.f32.mrb[98].mxu1 }
0x367b   :  { %v8209_v46 = vadd.f32 %v14434_v55, %v8208_v45  ;;  %v16511_v47 = vpop.f32.mrb[99].mxu1  ;;  %v14453_v45 = vld [vmem:[%s21489_s4 + $0x3] ss:$0 sm:$0xff] }
0x367c   :  { %17704 = vmatpush3.bf16.msra.mxu0 %v17703_v0  ;;  %v14460_v47 = vld [vmem:[%s21489_s4 + $0x7] ss:$0 sm:$0xff] }
0x367d   :  { %16524 = vmatpush3.xpose.msk.msra.mxu1 %vm332_vm2, %v8209_v46  ;;  %16533 = vmatprep.subr.mxu0 %v18203_v11 }
0x367e   :  { %16528 = vmatprep.subr.mxu1 %v18203_v11 }
0x367f   :  { %16521 = vmatmul.mubr.msk.f32.vlgmr.msra.gmra.mrb[98].mxu0 %vm88_vm1, %v19907_v39 }
0x3680   :  { %16535 = vmatprep.mubr.msk.f32.mxu0 %vm18202_vm0, %v18203_v11  ;;  %16534 = vmatpush3.msra.mxu0 %v14446_v14 }
0x3681   :  { %17711 = vmatprep.subr.bf16.mxu0 %v18201_v3 }
0x3742   :  { %v7972_v48 = vpop.f32.mrb[94].mxu0 }
0x3743   :  { %v20102_v49 = vadd.f32 %v8045_v42, %v7972_v48  ;;  %v16484_v50 = vpop.f32.mrb[95].mxu0 }
0x374a   :  { %v8126_v52 = vpop.f32.mrb[96].mxu0 }
0x374b   :  { %v8127_v54 = vadd.f32 %v14427_v51, %v8126_v52  ;;  %v16500_v56 = vpop.f32.mrb[97].mxu0 }
0x374c   :  { %v14464_v56 = vld [vmem:[%s21487_s29 + $0x170] sm:$0xff] }
0x374d   :  { %v8130_v57 = vmul.f32 0.35355338, %v8127_v54  ;;  %v14463_v54 = vld [vmem:[%s21487_s29 + $0x168] sm:$0xff]  ;;  %v17721_v60 = vpack.c.bf16 %v14465_v58, %v14464_v56 }
0x374f   :  { %16526 = vmatmul.mubr.msk.f32.vlgmr.msra.gmra.mrb[100].mxu1 %vm332_vm2, %v8130_v57 }
0x3750   :  { %16530 = vmatprep.mubr.msk.f32.mxu1 %vm18202_vm0, %v18203_v11 }
0x3752   :  { %v8289_v10 = vpop.f32.mrb[98].mxu0 }
0x3753   :  { %v8290_v12 = vadd.f32 %v14441_v6, %v8289_v10  ;;  %v16522_v13 = vpop.f32.mrb[99].mxu0 }
0x3755   :  { %16529 = vmatpush3.msra.mxu1 %v8290_v12 }
0x3756   :  { %17705 = vmatprep.subr.bf16.mxu1 %v18201_v3 }
0x3822   :  { %v8365_v1 = vpop.f32.mrb[100].mxu1 }
0x3823   :  { %v16527_v25 = vpop.f32.mrb[101].mxu1  ;;  %v8369_v4 = vsel %vm332_vm2, %v8365_v1, -inf }
0x3824   :  { %8370 = vmax.xlane.f32.xlu0 %v8369_v4 }
0x38b1   :  { %v8371_v5 = vpop.xlane.xlu0 %8370 }
0x38b2   :  { %v8372_v63 = vsub.f32 %v8365_v1, %v8371_v5 }
0x38b4   :  { %v8373_v7 = vmul.f32 1.442695, %v8372_v63 }
0x38b6   :  { %18123 = vpow2.f32 %v8373_v7 }
0x38c0   :  { %v18124_v8 = vpop.eup %18123 }
0x38c1   :  { %v8375_v9 = vsel %vm332_vm2, %v18124_v8, 0.0 }
0x38c2   :  { %8376 = vadd.xlane.f32.xlu1 %v8375_v9  ;;  %v14472_v9 = vld [vmem:[%s21490_s0 + $0x18] sm:$0xff] }
0x394f   :  { %v8377_v15 = vpop.xlane.xlu1 %8376 }
0x3950   :  { %18125 = vrcp.f32 %v8377_v15 }
0x395a   :  { %v18126_v17 = vpop.eup %18125 }
0x395b   :  { %v8379_v19 = vmul.f32 %v18126_v17, %v18124_v8 }
0x395d   :  { %v8380_v2 = vsel %vm332_vm2, %v8379_v19, 0.0 }
0x395e   :  { %v8381_v21 = vrot.slane %v8380_v2, 4 }
0x3960   :  { %v8382_v22 = vadd.f32 %v8381_v21, %v8380_v2 }
0x3962   :  { %v8383_v24 = vrot.slane %v8382_v22, 2 }
0x3964   :  { %v8384_v20 = vadd.f32 %v8383_v24, %v8382_v22  ;;  %v14474_v24 = vld [vmem:[%s21487_s29 + $0x180] sm:$0xff] }
0x3966   :  { %v8385_v18 = vrot.slane %v8384_v20, 1 }
0x3968   :  { %v8386_v59 = vadd.f32 %v8385_v18, %v8384_v20  ;;  %v14475_v20 = vld [vmem:[%s21487_s29 + $0x188] sm:$0xff] }
0x3969   :  { %v17724_v18 = vpack.c.bf16 %v14475_v20, %v14474_v24 }
0x396a   :  { %v8387_v26 = vmul.f32 0.125, %v8386_v59  ;;  %v14476_v59 = vld [vmem:[%s21487_s29 + $0x190] sm:$0xff] }
0x396c   :  { %16531 = vmatmul.mubr.msk.f32.vlgmr.msra.gmra.mrb[102].mxu1 %vm332_vm2, %v8387_v26  ;;  %v14477_v26 = vld [vmem:[%s21487_s29 + $0x198] sm:$0xff] }
0x396d   :  { %16546 = vmatprep.mubr.msk.f32.mxu1 %vm18202_vm0, %v18203_v11  ;;  %17707 = vmatpush3.bf16.msra.mxu1 %v17706_v28  ;;  %v17727_v53 = vpack.c.bf16 %v14477_v26, %v14476_v59  ;;  %v14481_v28 = vld [vmem:[%s21487_s29 + $0x208] sm:$0xff]  ;;  %v14510_v26 = vld [vmem:[%s21489_s4 + $0x11] ss:$0 sm:$0xff] }
0x396e   :  { %17708 = vmatprep.subr.bf16.mxu1 %v18201_v3  ;;  %v17730_v29 = vpack.c.bf16 %v14481_v28, %v14480_v27 }
0x3971   :  { %17710 = vmatpush3.bf16.msra.mxu1 %v17709_v31  ;;  %v14483_v31 = vld [vmem:[%s21487_s29 + $0x218] sm:$0xff] }
0x3972   :  { %17717 = vmatprep.subr.bf16.mxu1 %v18201_v3 }
0x3974   :  { %16547 = vmatmul.mubr.msk.f32.vlgmr.msra.gmra.mrb[104].mxu1 %vm88_vm1, %v19890_v37 }
0x3975   :  { %16568 = vmatprep.mubr.msk.f32.mxu1 %vm18202_vm0, %v18203_v11 }
0x3a3f   :  { %v8457_v36 = vpop.f32.mrb[102].mxu1 }
0x3a40   :  { %v16532_v16 = vpop.f32.mrb[103].mxu1  ;;  %16536 = vmatmul.mubr.msk.f32.vlgmr.msra.gmra.mrb[100].mxu0 %vm332_vm2, %v8457_v36 }
0x3a41   :  { %17713 = vmatpush3.bf16.msra.mxu0 %v17712_v33  ;;  %16557 = vmatprep.mubr.msk.f32.mxu0 %vm18202_vm0, %v18203_v11  ;;  %v17733_v33 = vpack.c.bf16 %v14483_v31, %v14482_v30  ;;  %v14512_v30 = vld [vmem:[%s21487_s29 + $0x2a0] sm:$0xff]  ;;  %v14513_v31 = vld [vmem:[%s21487_s29 + $0x2a8] sm:$0xff] }
0x3a42   :  { %17714 = vmatprep.subr.bf16.mxu0 %v18201_v3 }
0x3a45   :  { %17716 = vmatpush3.bf16.msra.mxu0 %v17715_v38 }
0x3a46   :  { %16571 = vmatprep.subr.mxu0 %v18203_v11 }
0x3a47   :  { %v8613_v40 = vpop.f32.mrb[104].mxu1 }
0x3a48   :  { %16558 = vmatmul.mubr.msk.f32.vlgmr.msra.gmra.mrb[102].mxu0 %vm88_vm1, %v19907_v39  ;;  %v16548_v41 = vpop.f32.mrb[105].mxu1  ;;  %v8614_v46 = vadd.f32 %v14453_v45, %v8613_v40 }
0x3a49   :  { %16573 = vmatprep.mubr.msk.f32.mxu0 %vm18202_vm0, %v18203_v11  ;;  %v14478_v41 = vld [vmem:[%s21489_s4 + $0xc] sm:$0x1] }
0x3a4a   :  { %v8617_v52 = vmul.f32 0.35355338, %v8614_v46 }
0x3b13   :  { %v8531_v42 = vpop.f32.mrb[100].mxu0 }
0x3b14   :  { %v20182_v44 = vadd.f32 %v8531_v42, %v20102_v49  ;;  %v16537_v55 = vpop.f32.mrb[101].mxu0  ;;  %v14462_v49 = vld [vmem:[%s21487_s29 + $0x160] sm:$0xff] }
0x3b15   :  { %v17718_v57 = vpack.c.bf16 %v14463_v54, %v14462_v49  ;;  %v14485_v55 = vld [vmem:[%s21489_s4 + $0x10] ss:$0 sm:$0xff]  ;;  %v14490_v49 = vld [vmem:[%s21487_s29 + $0x298] sm:$0xff] }
0x3b17   :  { %17719 = vmatpush3.bf16.msra.mxu1 %v17718_v57 }
0x3b18   :  { %17720 = vmatprep.subr.bf16.mxu1 %v18201_v3 }
0x3b1b   :  { %v8695_v48 = vpop.f32.mrb[102].mxu0  ;;  %17722 = vmatpush3.bf16.msra.mxu1 %v17721_v60 }
0x3b1c   :  { %v8696_v50 = vadd.f32 %v14460_v47, %v8695_v48  ;;  %v16559_v51 = vpop.f32.mrb[103].mxu0  ;;  %16581 = vmatprep.subr.mxu1 %v18203_v11 }
0x3b1d   :  { %v14489_v51 = vld [vmem:[%s21487_s29 + $0x290] sm:$0xff] }
0x3b1e   :  { %16572 = vmatpush3.xpose.msk.msra.mxu0 %vm332_vm2, %v8696_v50  ;;  %16569 = vmatmul.mubr.msk.f32.vlgmr.msra.gmra.mrb[106].mxu1 %vm88_vm1, %v19907_v39  ;;  %v14467_v39 = vld [vmem:[%s21489_s4 + $0xb] ss:$0 sm:$0xff]  ;;  %v17739_v54 = vpack.c.bf16 %v14490_v49, %v14489_v51 }
0x3b1f   :  { %16576 = vmatprep.subr.mxu0 %v18203_v11  ;;  %16583 = vmatprep.mubr.msk.f32.mxu1 %vm18202_vm0, %v18203_v11  ;;  %v14488_v50 = vld [vmem:[%s21487_s29 + $0x288] sm:$0xff] }
0x3b20   :  { %16582 = vmatpush3.msra.mxu1 %v14472_v9  ;;  %v14502_v9 = vld [vmem:[%s21487_s29 + $0x1b8] sm:$0xff]  ;;  %v14523_v51 = vld [vmem:[%s21490_s0 + $0x28] sm:$0xff] }
0x3b21   :  { %16574 = vmatmul.mubr.msk.f32.vlgmr.msra.gmra.mrb[104].mxu0 %vm332_vm2, %v8617_v52  ;;  %17729 = vmatprep.subr.bf16.mxu1 %v18201_v3 }
0x3b22   :  { %16578 = vmatprep.mubr.msk.f32.mxu0 %vm18202_vm0, %v18203_v11 }
0x3bf1   :  { %v8776_v63 = vpop.f32.mrb[106].mxu1 }
0x3bf2   :  { %v8777_v7 = vadd.f32 %v14467_v39, %v8776_v63  ;;  %v16570_v8 = vpop.f32.mrb[107].mxu1  ;;  %v14499_v39 = vld [vmem:[%s21487_s29 + $0x1a0] sm:$0xff]  ;;  %v14500_v63 = vld [vmem:[%s21487_s29 + $0x1a8] sm:$0xff] }
0x3bf3   :  { %v14501_v8 = vld [vmem:[%s21487_s29 + $0x1b0] sm:$0xff] }
0x3bf4   :  { %v8852_v61 = vpop.f32.mrb[104].mxu0  ;;  %16577 = vmatpush3.msra.mxu0 %v8777_v7  ;;  %v17742_v7 = vpack.c.bf16 %v14500_v63, %v14499_v39 }
0x3bf5   :  { %v16575_v62 = vpop.f32.mrb[105].mxu0  ;;  %v8856_v43 = vsel %vm332_vm2, %v8852_v61, -inf  ;;  %17723 = vmatprep.subr.bf16.mxu0 %v18201_v3 }
0x3bf6   :  { %8857 = vmax.xlane.f32.xlu0 %v8856_v43 }
0x3c83   :  { %v8858_v0 = vpop.xlane.xlu0 %8857 }
0x3c84   :  { %v8859_v1 = vsub.f32 %v8852_v61, %v8858_v0 }
0x3c86   :  { %v8860_v25 = vmul.f32 1.442695, %v8859_v1 }
0x3c88   :  { %18127 = vpow2.f32 %v8860_v25  ;;  %v14492_v25 = vld [vmem:[%s21489_s4 + $0x14] ss:$0 sm:$0xff] }
0x3c92   :  { %v18128_v4 = vpop.eup %18127 }
0x3c93   :  { %v8862_v5 = vsel %vm332_vm2, %v18128_v4, 0.0 }
0x3c94   :  { %8863 = vadd.xlane.f32.xlu1 %v8862_v5 }
0x3d21   :  { %v8864_v6 = vpop.xlane.xlu1 %8863 }
0x3d22   :  { %18129 = vrcp.f32 %v8864_v6  ;;  %v17745_v6 = vpack.c.bf16 %v14502_v9, %v14501_v8 }
0x3d2c   :  { %v18130_v10 = vpop.eup %18129 }
0x3d2d   :  { %v8866_v12 = vmul.f32 %v18130_v10, %v18128_v4 }
0x3d2f   :  { %v8867_v13 = vsel %vm332_vm2, %v8866_v12, 0.0  ;;  %v14505_v12 = vld [vmem:[%s21487_s29 + $0x220] sm:$0xff] }
0x3d30   :  { %v8868_v14 = vrot.slane %v8867_v13, 4 }
0x3d32   :  { %v8869_v15 = vadd.f32 %v8868_v14, %v8867_v13  ;;  %v14506_v13 = vld [vmem:[%s21487_s29 + $0x228] sm:$0xff] }
0x3d34   :  { %v8870_v17 = vrot.slane %v8869_v15, 2 }
0x3d36   :  { %v8871_v19 = vadd.f32 %v8870_v17, %v8869_v15  ;;  %v17748_v15 = vpack.c.bf16 %v14506_v13, %v14505_v12 }
0x3d38   :  { %v8872_v2 = vrot.slane %v8871_v19, 1 }
0x3d3a   :  { %v8873_v21 = vadd.f32 %v8872_v2, %v8871_v19  ;;  %v14508_v19 = vld [vmem:[%s21487_s29 + $0x238] sm:$0xff] }
0x3d3c   :  { %v8874_v22 = vmul.f32 0.125, %v8873_v21 }
0x3d3e   :  { %16579 = vmatmul.mubr.msk.f32.vlgmr.msra.gmra.mrb[106].mxu0 %vm332_vm2, %v8874_v22 }
0x3d3f   :  { %16594 = vmatprep.mubr.msk.f32.mxu0 %vm18202_vm0, %v18203_v11  ;;  %17725 = vmatpush3.bf16.msra.mxu0 %v17724_v18  ;;  %v14503_v18 = vld [vmem:[%s21489_s4 + $0xd] sm:$0x1] }
0x3d40   :  { %17726 = vmatprep.subr.bf16.mxu0 %v18201_v3 }
0x3d43   :  { %17728 = vmatpush3.bf16.msra.mxu0 %v17727_v53 }
0x3d44   :  { %17735 = vmatprep.subr.bf16.mxu0 %v18201_v3 }
0x3d46   :  { %16595 = vmatmul.mubr.msk.f32.vlgmr.msra.gmra.mrb[108].mxu0 %vm88_vm1, %v19890_v37 }
0x3d47   :  { %16616 = vmatprep.mubr.msk.f32.mxu0 %vm18202_vm0, %v18203_v11 }
0x3e11   :  { %v8944_v32 = vpop.f32.mrb[106].mxu0 }
0x3e12   :  { %v16580_v23 = vpop.f32.mrb[107].mxu0  ;;  %16584 = vmatmul.mubr.msk.f32.vlgmr.msra.gmra.mrb[108].mxu1 %vm332_vm2, %v8944_v32  ;;  %v14514_v32 = vld [vmem:[%s21487_s29 + $0x2b0] sm:$0xff] }
0x3e13   :  { %17731 = vmatpush3.bf16.msra.mxu1 %v17730_v29  ;;  %16605 = vmatprep.mubr.msk.f32.mxu1 %vm18202_vm0, %v18203_v11  ;;  %v17754_v23 = vpack.c.bf16 %v14513_v31, %v14512_v30 }
0x3e14   :  { %17732 = vmatprep.subr.bf16.mxu1 %v18201_v3 }
0x3e17   :  { %17734 = vmatpush3.bf16.msra.mxu1 %v17733_v33  ;;  %v14515_v33 = vld [vmem:[%s21487_s29 + $0x2b8] sm:$0xff] }
0x3e18   :  { %16619 = vmatprep.subr.mxu1 %v18203_v11 }
0x3e19   :  { %v9096_v35 = vpop.f32.mrb[108].mxu0 }
0x3e1a   :  { %16606 = vmatmul.mubr.msk.f32.vlgmr.msra.gmra.mrb[110].mxu1 %vm88_vm1, %v20264_v34  ;;  %v16596_v36 = vpop.f32.mrb[109].mxu0  ;;  %v9097_v42 = vadd.f32 %v14478_v41, %v9096_v35  ;;  %v17757_v35 = vpack.c.bf16 %v14515_v33, %v14514_v32 }
0x3e1b   :  { %16621 = vmatprep.mubr.msk.f32.mxu1 %vm18202_vm0, %v18203_v11 }
0x3e1c   :  { %v9100_v48 = vmul.f32 0.35355338, %v9097_v42 }
0x3ee5   :  { %v9018_v16 = vpop.f32.mrb[108].mxu1 }
0x3ee6   :  { %v20272_v38 = vadd.f32 %v9018_v16, %v20182_v44  ;;  %v16585_v40 = vpop.f32.mrb[109].mxu1  ;;  %v14487_v44 = vld [vmem:[%s21487_s29 + $0x280] sm:$0xff] }
0x3ee7   :  { %v17736_v52 = vpack.c.bf16 %v14488_v50, %v14487_v44 }
0x3ee9   :  { %17737 = vmatpush3.bf16.msra.mxu0 %v17736_v52 }
0x3eea   :  { %17738 = vmatprep.subr.bf16.mxu0 %v18201_v3 }
0x3eed   :  { %v9181_v45 = vpop.f32.mrb[110].mxu1  ;;  %17740 = vmatpush3.bf16.msra.mxu0 %v17739_v54 }
0x3eee   :  { %v9182_v46 = vadd.f32 %v14485_v55, %v9181_v45  ;;  %v16607_v47 = vpop.f32.mrb[111].mxu1  ;;  %17741 = vmatprep.subr.bf16.mxu0 %v18201_v3 }
0x3ef0   :  { %16620 = vmatpush3.xpose.msk.msra.mxu1 %vm332_vm2, %v9182_v46  ;;  %16617 = vmatmul.mubr.msk.f32.vlgmr.msra.gmra.mrb[110].mxu0 %vm88_vm1, %v20264_v34 }
0x3ef1   :  { %16624 = vmatprep.subr.mxu1 %v18203_v11  ;;  %16637 = vmatprep.mubr.msk.f32.mxu0 %vm18202_vm0, %v18203_v11 }
0x3ef2   :  { %17743 = vmatpush3.bf16.msra.mxu0 %v17742_v7 }
0x3ef3   :  { %16622 = vmatmul.mubr.msk.f32.vlgmr.msra.gmra.mrb[112].mxu1 %vm332_vm2, %v9100_v48  ;;  %17744 = vmatprep.subr.bf16.mxu0 %v18201_v3  ;;  %v14517_v48 = vld [vmem:[%s21489_s4 + $0x15] ss:$0 sm:$0xff] }
0x3ef4   :  { %16626 = vmatprep.mubr.msk.f32.mxu1 %vm18202_vm0, %v18203_v11 }
0x3ef6   :  { %17746 = vmatpush3.bf16.msra.mxu0 %v17745_v6  ;;  %v20437_v6 = vld [vmem:[%s21488_s24 + $0x18] sm:$0xff] }
0x3ef7   :  { %17753 = vmatprep.subr.bf16.mxu0 %v18201_v3 }
0x3ef9   :  { %16638 = vmatmul.mubr.msk.f32.vlgmr.msra.gmra.mrb[112].mxu0 %vm88_vm1, %v19890_v37  ;;  %v14507_v37 = vld [vmem:[%s21487_s29 + $0x230] sm:$0xff] }
0x3efa   :  { %16659 = vmatprep.mubr.msk.f32.mxu0 %vm18202_vm0, %v18203_v11  ;;  %v17751_v2 = vpack.c.bf16 %v14508_v19, %v14507_v37  ;;  %17755 = vmatpush3.bf16.msra.mxu0 %v17754_v23  ;;  %v14530_v19 = vld [vmem:[%s21489_s4 + $0xe] sm:$0x1] }
0x3efb   :  { %17756 = vmatprep.subr.bf16.mxu0 %v18201_v3 }
0x3efe   :  { %17758 = vmatpush3.bf16.msra.mxu0 %v17757_v35 }
0x3eff   :  { %16672 = vmatprep.subr.mxu0 %v18203_v11 }
0x3f01   :  { %16660 = vmatmul.mubr.msk.f32.vlgmr.msra.gmra.mrb[114].mxu0 %vm88_vm1, %v20264_v34 }
0x3f02   :  { %16674 = vmatprep.mubr.msk.f32.mxu0 %vm18202_vm0, %v18203_v11  ;;  %16673 = vmatpush3.msra.mxu0 %v14523_v51  ;;  %v14555_v51 = vld [vmem:[%s21487_s29 + $0x1f8] sm:$0xff] }
0x3f03   :  { %17759 = vmatprep.subr.bf16.mxu0 %v18201_v3 }
0x3fc3   :  { %v9262_v1 = vpop.f32.mrb[110].mxu0 }
0x3fc4   :  { %v16618_v4 = vpop.f32.mrb[111].mxu0  ;;  %v9263_v5 = vadd.f32 %v14492_v25, %v9262_v1  ;;  %v14527_v1 = vld [vmem:[%s21487_s29 + $0x1c8] sm:$0xff] }
0x3fc5   :  { %v14528_v4 = vld [vmem:[%s21487_s29 + $0x1d0] sm:$0xff] }
0x3fc6   :  { %v9338_v56 = vpop.f32.mrb[112].mxu1  ;;  %16625 = vmatpush3.msk.msra.mxu1 %vm2399_vm4, %v9263_v5  ;;  %v14529_v5 = vld [vmem:[%s21487_s29 + $0x1d8] sm:$0xff] }
0x3fc7   :  { %v16623_v57 = vpop.f32.mrb[113].mxu1  ;;  %v9342_v58 = vsel %vm2382_vm3, %v9338_v56, -inf  ;;  %17747 = vmatprep.subr.bf16.mxu1 %v18201_v3  ;;  %v17763_v7 = vpack.c.bf16 %v14529_v5, %v14528_v4  ;;  %v14556_v5 = vld [vmem:[%s21489_s4 + $0xf] sm:$0x1] }
0x3fc8   :  { %9343 = vmax.xlane.f32.xlu0 %v9342_v58  ;;  %v14532_v57 = vld [vmem:[%s21487_s29 + $0x240] sm:$0xff]  ;;  %v14533_v58 = vld [vmem:[%s21487_s29 + $0x248] sm:$0xff] }
0x3fcc   :  { %v9502_v21 = vpop.f32.mrb[112].mxu0 }
0x3fcd   :  { %v16639_v22 = vpop.f32.mrb[113].mxu0  ;;  %v9503_v59 = vadd.f32 %v14503_v18, %v9502_v21  ;;  %v14540_v18 = vld [vmem:[%s21487_s29 + $0x2c8] sm:$0xff] }
0x3fcf   :  { %v9506_v29 = vmul.f32 0.35355338, %v9503_v59  ;;  %v14541_v59 = vld [vmem:[%s21487_s29 + $0x2d0] sm:$0xff] }
0x3fd4   :  { %v9665_v47 = vpop.f32.mrb[114].mxu0 }
0x3fd5   :  { %v16661_v44 = vpop.f32.mrb[115].mxu0  ;;  %v9666_v50 = vadd.f32 %v14517_v48, %v9665_v47  ;;  %v14552_v47 = vld [vmem:[%s21487_s29 + $0x1e0] sm:$0xff]  ;;  %v14553_v48 = vld [vmem:[%s21487_s29 + $0x1e8] sm:$0xff] }
0x3fd6   :  { %v17778_v44 = vpack.c.bf16 %v14553_v48, %v14552_v47  ;;  %v14580_v47 = vld [vmem:[%s21491_s5 + $0x100] sm:$0xff]  ;;  %v14581_v48 = vld [vmem:[%s21491_s5 + $0x108] sm:$0xff] }
0x4055   :  { %v9344_v60 = vpop.xlane.xlu0 %9343 }
0x4056   :  { %v9345_v61 = vsub.f32 %v9338_v56, %v9344_v60  ;;  %v14498_v56 = vld [vmem:[%s21490_s0 + $0x20] sm:$0xff]  ;;  %v17766_v60 = vpack.c.bf16 %v14533_v58, %v14532_v57  ;;  %v14560_v57 = vld [vmem:[%s21487_s29 + $0x270] sm:$0xff]  ;;  %v14561_v58 = vld [vmem:[%s21487_s29 + $0x278] sm:$0xff] }
0x4058   :  { %v9346_v62 = vmul.f32 1.442695, %v9345_v61  ;;  %v14534_v61 = vld [vmem:[%s21487_s29 + $0x250] sm:$0xff] }
0x405a   :  { %18131 = vpow2.f32 %v9346_v62  ;;  %v14535_v62 = vld [vmem:[%s21487_s29 + $0x258] sm:$0xff] }
0x4064   :  { %v18132_v43 = vpop.eup %18131 }
0x4065   :  { %v9348_v0 = vsel %vm2382_vm3, %v18132_v43, 0.0 }
0x4066   :  { %9349 = vadd.xlane.f32.xlu1 %v9348_v0  ;;  %v14526_v0 = vld [vmem:[%s21487_s29 + $0x1c0] sm:$0xff] }
0x4067   :  { %v17760_v25 = vpack.c.bf16 %v14527_v1, %v14526_v0 }
0x40f3   :  { %v9350_v10 = vpop.xlane.xlu1 %9349 }
0x40f4   :  { %18133 = vrcp.f32 %v9350_v10  ;;  %v14537_v10 = vld [vmem:[%s21489_s4 + $0x12] ss:$0 sm:$0xff] }
0x40fe   :  { %v18134_v14 = vpop.eup %18133 }
0x40ff   :  { %v9352_v17 = vmul.f32 %v18134_v14, %v18132_v43  ;;  %v17769_v43 = vpack.c.bf16 %v14535_v62, %v14534_v61  ;;  %v17787_v62 = vpack.c.bf16 %v14561_v58, %v14560_v57  ;;  %v14585_v57 = vld [vmem:[%s21491_s5 + $0x128] sm:$0xff] }
0x4101   :  { %16627 = vmatmul.mubr.msk.f32.vlgmr.msra.gmra.mrb[114].mxu1 %vm2395_vm5, %v9352_v17 }
0x4102   :  { %17749 = vmatpush3.bf16.msra.mxu1 %v17748_v15  ;;  %16648 = vmatprep.mubr.msk.f32.mxu1 %vm18202_vm0, %v18203_v11 }
0x4103   :  { %17750 = vmatprep.subr.bf16.mxu1 %v18201_v3 }
0x4106   :  { %17752 = vmatpush3.bf16.msra.mxu1 %v17751_v2 }
0x4107   :  { %16662 = vmatprep.subr.mxu1 %v18203_v11 }
0x4109   :  { %16649 = vmatmul.mubr.msk.f32.vlgmr.msra.gmra.mrb[116].mxu1 %vm88_vm1, %v20264_v34 }
0x410a   :  { %16664 = vmatprep.mubr.msk.f32.mxu1 %vm18202_vm0, %v18203_v11 }
0x41d4   :  { %v9426_v24 = vpop.f32.mrb[114].mxu1 }
0x41d5   :  { %v16628_v20 = vpop.f32.mrb[115].mxu1 }
0x41d6   :  { %v14539_v20 = vld [vmem:[%s21487_s29 + $0x2c0] sm:$0xff] }
0x41dc   :  { %v9584_v53 = vpop.f32.mrb[116].mxu1 }
0x41dd   :  { %v9585_v27 = vadd.f32 %v14510_v26, %v9584_v53  ;;  %v16650_v28 = vpop.f32.mrb[117].mxu1  ;;  %v17772_v26 = vpack.c.bf16 %v14540_v18, %v14539_v20  ;;  %v14542_v53 = vld [vmem:[%s21487_s29 + $0x2d8] sm:$0xff] }
0x41df   :  { %16663 = vmatpush3.xpose.msk.msra.mxu1 %vm332_vm2, %v9585_v27  ;;  %v17775_v27 = vpack.c.bf16 %v14542_v53, %v14541_v59 }
0x41e0   :  { %16667 = vmatprep.subr.mxu1 %v18203_v11 }
0x41e2   :  { %16665 = vmatmul.mubr.msk.f32.vlgmr.msra.gmra.mrb[118].mxu1 %vm332_vm2, %v9506_v29 }
0x41e3   :  { %16669 = vmatprep.mubr.msk.f32.mxu1 %vm18202_vm0, %v18203_v11  ;;  %16668 = vmatpush3.msk.msra.mxu1 %vm2399_vm4, %v9666_v50  ;;  %v14554_v50 = vld [vmem:[%s21487_s29 + $0x1f0] sm:$0xff] }
0x41e4   :  { %16677 = vmatprep.subr.mxu1 %v18203_v11 }
0x42b5   :  { %v9741_v36 = vpop.f32.mrb[118].mxu1 }
0x42b6   :  { %v16666_v16 = vpop.f32.mrb[119].mxu1  ;;  %v9745_v40 = vsel %vm2382_vm3, %v9741_v36, -inf }
0x42b7   :  { %9746 = vmax.xlane.f32.xlu0 %v9745_v40  ;;  %v14544_v16 = vld [vmem:[%s21489_s4 + $0x16] ss:$0 sm:$0xff] }
0x4344   :  { %v9747_v41 = vpop.xlane.xlu0 %9746 }
0x4345   :  { %v9748_v42 = vsub.f32 %v9741_v36, %v9747_v41 }
0x4347   :  { %v9749_v55 = vmul.f32 1.442695, %v9748_v42  ;;  %v14550_v42 = vld [vmem:[%s21490_s0 + $0x30] sm:$0xff] }
0x4349   :  { %18135 = vpow2.f32 %v9749_v55 }
0x4353   :  { %v18136_v45 = vpop.eup %18135 }
0x4354   :  { %v9751_v46 = vsel %vm2382_vm3, %v18136_v45, 0.0 }
0x4355   :  { %9752 = vadd.xlane.f32.xlu1 %v9751_v46 }
0x43e2   :  { %v9753_v52 = vpop.xlane.xlu1 %9752 }
0x43e3   :  { %18137 = vrcp.f32 %v9753_v52  ;;  %v17781_v52 = vpack.c.bf16 %v14555_v51, %v14554_v50  ;;  %v14582_v50 = vld [vmem:[%s21491_s5 + $0x110] sm:$0xff]  ;;  %v14583_v51 = vld [vmem:[%s21491_s5 + $0x118] sm:$0xff] }
0x43ed   :  { %v18138_v49 = vpop.eup %18137 }
0x43ee   :  { %v9755_v54 = vmul.f32 %v18138_v49, %v18136_v45  ;;  %v14558_v49 = vld [vmem:[%s21487_s29 + $0x260] sm:$0xff] }
0x43f0   :  { %16670 = vmatmul.mubr.msk.f32.vlgmr.msra.gmra.mrb[120].mxu1 %vm2395_vm5, %v9755_v54  ;;  %v14559_v54 = vld [vmem:[%s21487_s29 + $0x268] sm:$0xff] }
0x43f1   :  { %16678 = vmatpush3.msra.mxu1 %v14498_v56  ;;  %16679 = vmatprep.mubr.msk.f32.mxu1 %vm18202_vm0, %v18203_v11  ;;  %v17784_v56 = vpack.c.bf16 %v14559_v54, %v14558_v49  ;;  %v17811_v54 = vpack.c.bf16 %v14583_v51, %v14582_v50  ;;  %v14606_v51 = vld [vmem:[%s21491_s5 + $0x40] sm:$0xff] }
0x43f2   :  { %17765 = vmatprep.subr.bf16.mxu1 %v18201_v3 }
0x43f4   :  { %16680 = vmatmul.mubr.msk.f32.vlgmr.msra.gmra.mrb[122].mxu1 %vm332_vm2, %v9426_v24 }
0x43f5   :  { %17767 = vmatpush3.bf16.msra.mxu1 %v17766_v60  ;;  %16701 = vmatprep.mubr.msk.f32.mxu1 %vm18202_vm0, %v18203_v11 }
0x43f6   :  { %17768 = vmatprep.subr.bf16.mxu1 %v18201_v3 }
0x43f9   :  { %17770 = vmatpush3.bf16.msra.mxu1 %v17769_v43 }
0x43fa   :  { %16715 = vmatprep.subr.mxu1 %v18203_v11 }
0x43fc   :  { %16702 = vmatmul.mubr.msk.f32.vlgmr.msra.gmra.mrb[124].mxu1 %vm88_vm1, %v20264_v34 }
0x43fd   :  { %16717 = vmatprep.mubr.msk.f32.mxu1 %vm18202_vm0, %v18203_v11 }
0x44c3   :  { %v9829_v39 = vpop.f32.mrb[120].mxu1 }
0x44c4   :  { %v16671_v63 = vpop.f32.mrb[121].mxu1  ;;  %16675 = vmatmul.mubr.msk.f32.vlgmr.msra.gmra.mrb[116].mxu0 %vm332_vm2, %v9829_v39 }
0x44c5   :  { %17761 = vmatpush3.bf16.msra.mxu0 %v17760_v25  ;;  %16690 = vmatprep.mubr.msk.f32.mxu0 %vm18202_vm0, %v18203_v11  ;;  %v14563_v63 = vld [vmem:[%s21489_s4 + $0x13] ss:$0 sm:$0xff] }
0x44c6   :  { %17762 = vmatprep.subr.bf16.mxu0 %v18201_v3 }
0x44c7   :  { %v9976_v8 = vpop.f32.mrb[122].mxu1 }
0x44c8   :  { %v16681_v9 = vpop.f32.mrb[123].mxu1 }
0x44c9   :  { %17764 = vmatpush3.bf16.msra.mxu0 %v17763_v7 }
0x44ca   :  { %17771 = vmatprep.subr.bf16.mxu0 %v18201_v3 }
0x44cc   :  { %16691 = vmatmul.mubr.msk.f32.vlgmr.msra.gmra.mrb[118].mxu0 %vm88_vm1, %v20437_v6 }
0x44cd   :  { %16712 = vmatprep.mubr.msk.f32.mxu0 %vm18202_vm0, %v18203_v11  ;;  %17773 = vmatpush3.bf16.msra.mxu0 %v17772_v26 }
0x44ce   :  { %17774 = vmatprep.subr.bf16.mxu0 %v18201_v3 }
0x44cf   :  { %v10133_v12 = vpop.f32.mrb[124].mxu1 }
0x44d0   :  { %v10134_v13 = vadd.f32 %v14537_v10, %v10133_v12  ;;  %v16703_v14 = vpop.f32.mrb[125].mxu1  ;;  %v14565_v10 = vld [vmem:[%s21487_s29 + $0x2e0] sm:$0xff]  ;;  %v14566_v12 = vld [vmem:[%s21487_s29 + $0x2e8] sm:$0xff] }
0x44d1   :  { %17776 = vmatpush3.bf16.msra.mxu0 %v17775_v27  ;;  %v17790_v14 = vpack.c.bf16 %v14566_v12, %v14565_v10  ;;  %v14576_v27 = vld [vmem:[%s21490_s0 + $0x38] sm:$0xff] }
0x44d2   :  { %16716 = vmatpush3.xpose.msk.msra.mxu1 %vm332_vm2, %v10134_v13  ;;  %16725 = vmatprep.subr.mxu0 %v18203_v11  ;;  %v14567_v13 = vld [vmem:[%s21487_s29 + $0x2f0] sm:$0xff] }
0x44d3   :  { %16720 = vmatprep.subr.mxu1 %v18203_v11 }
0x44d4   :  { %16713 = vmatmul.mubr.msk.f32.vlgmr.msra.gmra.mrb[120].mxu0 %vm88_vm1, %v20264_v34 }
0x44d5   :  { %16727 = vmatprep.mubr.msk.f32.mxu0 %vm18202_vm0, %v18203_v11  ;;  %16726 = vmatpush3.msra.mxu0 %v14550_v42  ;;  %v10942_v42 = vld [vmem:[%s21491_s5 + $0x30] sm:$0xff] }
0x44d6   :  { %17783 = vmatprep.subr.bf16.mxu0 %v18201_v3 }
0x4597   :  { %v9903_v15 = vpop.f32.mrb[116].mxu0 }
0x4598   :  { %v20448_v17 = vadd.f32 %v9976_v8, %v9903_v15  ;;  %v16676_v37 = vpop.f32.mrb[117].mxu0  ;;  %v14568_v15 = vld [vmem:[%s21487_s29 + $0x2f8] sm:$0xff] }
0x459f   :  { %v10051_v2 = vpop.f32.mrb[118].mxu0 }
0x45a0   :  { %v10052_v21 = vadd.f32 %v14530_v19, %v10051_v2  ;;  %v16692_v22 = vpop.f32.mrb[119].mxu0 }
0x45a2   :  { %v10055_v24 = vmul.f32 0.35355338, %v10052_v21 }
0x45a4   :  { %16718 = vmatmul.mubr.msk.f32.vlgmr.msra.gmra.mrb[126].mxu1 %vm332_vm2, %v10055_v24 }
0x45a5   :  { %16722 = vmatprep.mubr.msk.f32.mxu1 %vm18202_vm0, %v18203_v11 }
0x45a7   :  { %v10214_v36 = vpop.f32.mrb[120].mxu0 }
0x45a8   :  { %v16714_v40 = vpop.f32.mrb[121].mxu0  ;;  %v10215_v41 = vadd.f32 %v14544_v16, %v10214_v36  ;;  %v10940_v16 = vld [vmem:[%s21491_s5 + $0x20] sm:$0xff] }
0x45a9   :  { %v10941_v40 = vld [vmem:[%s21491_s5 + $0x28] sm:$0xff] }
0x45aa   :  { %16721 = vmatpush3.msk.msra.mxu1 %vm2399_vm4, %v10215_v41  ;;  %v17802_v41 = vpack.c.bf16 %v10941_v40, %v10940_v16  ;;  %v14618_v16 = vld [vmem:[%s21491_s5 + $0x150] sm:$0xff]  ;;  %v14619_v40 = vld [vmem:[%s21491_s5 + $0x158] sm:$0xff] }
0x45ab   :  { %17777 = vmatprep.subr.bf16.mxu1 %v18201_v3 }
0x4677   :  { %v10290_v28 = vpop.f32.mrb[126].mxu1 }
0x4678   :  { %v16719_v29 = vpop.f32.mrb[127].mxu1  ;;  %v10294_v30 = vsel %vm2382_vm3, %v10290_v28, -inf }
0x4679   :  { %10295 = vmax.xlane.f32.xlu0 %v10294_v30 }
0x4706   :  { %v10296_v31 = vpop.xlane.xlu0 %10295 }
0x4707   :  { %v10297_v32 = vsub.f32 %v10290_v28, %v10296_v31  ;;  %v10936_v31 = vld [vmem:[%s21491_s5] sm:$0xff] }
0x4709   :  { %v10298_v23 = vmul.f32 1.442695, %v10297_v32  ;;  %v10937_v32 = vld [vmem:[%s21491_s5 + $0x8] sm:$0xff] }
0x470b   :  { %18139 = vpow2.f32 %v10298_v23  ;;  %v17796_v23 = vpack.c.bf16 %v10937_v32, %v10936_v31  ;;  %v14600_v31 = vld [vmem:[%s21453_s7 + $0x8] ss:$0 sm:$0xff] }
0x4715   :  { %v18140_v33 = vpop.eup %18139 }
0x4716   :  { %v10300_v35 = vsel %vm2382_vm3, %v18140_v33, 0.0 }
0x4717   :  { %10301 = vadd.xlane.f32.xlu1 %v10300_v35  ;;  %v10939_v35 = vld [vmem:[%s21491_s5 + $0x18] sm:$0xff] }
0x47a4   :  { %v10302_v55 = vpop.xlane.xlu1 %10301 }
0x47a5   :  { %18141 = vrcp.f32 %v10302_v55  ;;  %v10943_v55 = vld [vmem:[%s21491_s5 + $0x38] sm:$0xff] }
0x47af   :  { %v18142_v45 = vpop.eup %18141 }
0x47b0   :  { %v10304_v46 = vmul.f32 %v18142_v45, %v18140_v33  ;;  %v10938_v33 = vld [vmem:[%s21491_s5 + $0x10] sm:$0xff]  ;;  %v17805_v45 = vpack.c.bf16 %v10943_v55, %v10942_v42  ;;  %v14620_v42 = vld [vmem:[%s21491_s5 + $0x160] sm:$0xff]  ;;  %v14621_v55 = vld [vmem:[%s21491_s5 + $0x168] sm:$0xff] }
0x47b1   :  { %v17799_v36 = vpack.c.bf16 %v10939_v35, %v10938_v33  ;;  %v14617_v33 = vld [vmem:[%s21491_s5 + $0x148] sm:$0xff] }
0x47b2   :  { %16723 = vmatmul.mubr.msk.f32.vlgmr.msra.gmra.mrb[128].mxu1 %vm2395_vm5, %v10304_v46  ;;  %v20603_v46 = vld [vmem:[%s21492_s28 + $0x10] sm:$0xff] }
0x47b3   :  { %16738 = vmatprep.mubr.msk.f32.mxu1 %vm18202_vm0, %v18203_v11  ;;  %17779 = vmatpush3.bf16.msra.mxu1 %v17778_v44  ;;  %v17808_v44 = vpack.c.bf16 %v14581_v48, %v14580_v47  ;;  %v14622_v47 = vld [vmem:[%s21491_s5 + $0x170] sm:$0xff]  ;;  %v14623_v48 = vld [vmem:[%s21491_s5 + $0x178] sm:$0xff] }
0x47b4   :  { %17780 = vmatprep.subr.bf16.mxu1 %v18201_v3 }
0x47b7   :  { %17782 = vmatpush3.bf16.msra.mxu1 %v17781_v52 }
0x47b8   :  { %17789 = vmatprep.subr.bf16.mxu1 %v18201_v3 }
0x47ba   :  { %16739 = vmatmul.mubr.msk.f32.vlgmr.msra.gmra.mrb[130].mxu1 %vm88_vm1, %v20437_v6 }
0x47bb   :  { %16760 = vmatprep.mubr.msk.f32.mxu1 %vm18202_vm0, %v18203_v11  ;;  %17791 = vmatpush3.bf16.msra.mxu1 %v17790_v14  ;;  %v14593_v14 = vld [vmem:[%s21491_s5 + $0x210] sm:$0xff] }
0x47bc   :  { %17792 = vmatprep.subr.bf16.mxu1 %v18201_v3 }
0x4885   :  { %v10378_v60 = vpop.f32.mrb[128].mxu1 }
0x4886   :  { %v16724_v61 = vpop.f32.mrb[129].mxu1  ;;  %16728 = vmatmul.mubr.msk.f32.vlgmr.msra.gmra.mrb[122].mxu0 %vm332_vm2, %v10378_v60  ;;  %v14586_v60 = vld [vmem:[%s21491_s5 + $0x130] sm:$0xff] }
0x4887   :  { %17785 = vmatpush3.bf16.msra.mxu0 %v17784_v56  ;;  %16749 = vmatprep.mubr.msk.f32.mxu0 %vm18202_vm0, %v18203_v11  ;;  %v14584_v56 = vld [vmem:[%s21491_s5 + $0x120] sm:$0xff]  ;;  %v14587_v61 = vld [vmem:[%s21491_s5 + $0x138] sm:$0xff] }
0x4888   :  { %17786 = vmatprep.subr.bf16.mxu0 %v18201_v3  ;;  %v17814_v58 = vpack.c.bf16 %v14585_v57, %v14584_v56  ;;  %v14608_v57 = vld [vmem:[%s21491_s5 + $0x50] sm:$0xff] }
0x488b   :  { %17788 = vmatpush3.bf16.msra.mxu0 %v17787_v62  ;;  %v17817_v62 = vpack.c.bf16 %v14587_v61, %v14586_v60  ;;  %v14610_v61 = vld [vmem:[%s21491_s5 + $0x60] sm:$0xff] }
0x488c   :  { %16763 = vmatprep.subr.mxu0 %v18203_v11 }
0x488d   :  { %v10528_v43 = vpop.f32.mrb[130].mxu1 }
0x488e   :  { %16750 = vmatmul.mubr.msk.f32.vlgmr.msra.gmra.mrb[124].mxu0 %vm88_vm1, %v20264_v34  ;;  %v16740_v0 = vpop.f32.mrb[131].mxu1  ;;  %v10529_v39 = vadd.f32 %v14556_v5, %v10528_v43  ;;  %v20643_v43 = vld [vmem:[%s21492_s28 + $0x18] sm:$0xf] }
0x488f   :  { %16765 = vmatprep.mubr.msk.f32.mxu0 %vm18202_vm0, %v18203_v11 }
0x4890   :  { %v10532_v6 = vmul.f32 0.35355338, %v10529_v39 }
0x4959   :  { %v10452_v1 = vpop.f32.mrb[122].mxu0 }
0x495a   :  { %v20528_v25 = vadd.f32 %v10452_v1, %v20448_v17  ;;  %v16729_v4 = vpop.f32.mrb[123].mxu0  ;;  %v17793_v17 = vpack.c.bf16 %v14568_v15, %v14567_v13  ;;  %v14592_v13 = vld [vmem:[%s21491_s5 + $0x208] sm:$0xff] }
0x495c   :  { %17794 = vmatpush3.bf16.msra.mxu1 %v17793_v17  ;;  %v14594_v17 = vld [vmem:[%s21491_s5 + $0x218] sm:$0xff] }
0x495d   :  { %16773 = vmatprep.subr.mxu1 %v18203_v11 }
0x495f   :  { %16761 = vmatmul.mubr.msk.f32.vlgmr.msra.gmra.mrb[132].mxu1 %vm88_vm1, %v20264_v34  ;;  %v14570_v34 = vld [vmem:[%s21489_s4 + $0x17] ss:$0 sm:$0xff] }
0x4960   :  { %16775 = vmatprep.mubr.msk.f32.mxu1 %vm18202_vm0, %v18203_v11  ;;  %16774 = vmatpush3.msra.mxu1 %v14576_v27 }
0x4961   :  { %v10610_v7 = vpop.f32.mrb[124].mxu0  ;;  %17807 = vmatprep.subr.bf16.mxu1 %v18201_v3 }
0x4962   :  { %v10611_v8 = vadd.f32 %v14563_v63, %v10610_v7  ;;  %v16751_v9 = vpop.f32.mrb[125].mxu0  ;;  %v10944_v63 = vld [vmem:[%s21453_s7] sm:$0x1]  ;;  %v14589_v7 = vld [vmem:[%s21453_s7 + $0x4] ss:$0 sm:$0xff] }
0x4964   :  { %16764 = vmatpush3.xpose.msk.msra.mxu0 %vm332_vm2, %v10611_v8 }
0x4965   :  { %16768 = vmatprep.subr.mxu0 %v18203_v11 }
0x4967   :  { %16766 = vmatmul.mubr.msk.f32.vlgmr.msra.gmra.mrb[126].mxu0 %vm332_vm2, %v10532_v6 }
0x4968   :  { %16770 = vmatprep.mubr.msk.f32.mxu0 %vm18202_vm0, %v18203_v11 }
0x4a32   :  { %v10691_v59 = vpop.f32.mrb[132].mxu1 }
0x4a33   :  { %v16762_v26 = vpop.f32.mrb[133].mxu1  ;;  %v10692_v53 = vadd.f32 %v14570_v34, %v10691_v59 }
0x4a35   :  { %16769 = vmatpush3.msk.msra.mxu0 %vm2399_vm4, %v10692_v53 }
0x4a36   :  { %17795 = vmatprep.subr.bf16.mxu0 %v18201_v3 }
0x4a3a   :  { %v10767_v37 = vpop.f32.mrb[126].mxu0 }
0x4a3b   :  { %v16767_v19 = vpop.f32.mrb[127].mxu0  ;;  %v10771_v2 = vsel %vm2382_vm3, %v10767_v37, -inf }
0x4a3c   :  { %10772 = vmax.xlane.f32.xlu0 %v10771_v2  ;;  %v14595_v19 = vld [vmem:[%s21491_s5 + $0x220] sm:$0xff]  ;;  %v14596_v2 = vld [vmem:[%s21491_s5 + $0x228] sm:$0xff] }
0x4ac9   :  { %v10773_v21 = vpop.xlane.xlu0 %10772 }
0x4aca   :  { %v10774_v22 = vsub.f32 %v10767_v37, %v10773_v21  ;;  %v17823_v37 = vpack.c.bf16 %v14594_v17, %v14593_v14  ;;  %v17826_v21 = vpack.c.bf16 %v14596_v2, %v14595_v19  ;;  %v14633_v14 = vld [vmem:[%s21491_s5 + $0x270] sm:$0xff]  ;;  %v11357_v19 = vld [vmem:[%s21454_s8 + $0x8] sm:$0xff] }
0x4acc   :  { %v10775_v24 = vmul.f32 1.442695, %v10774_v22  ;;  %v14597_v22 = vld [vmem:[%s21491_s5 + $0x230] sm:$0xff] }
0x4ace   :  { %18143 = vpow2.f32 %v10775_v24  ;;  %v14598_v24 = vld [vmem:[%s21491_s5 + $0x238] sm:$0xff] }
0x4ad8   :  { %v18144_v20 = vpop.eup %18143 }
0x4ad9   :  { %v10777_v18 = vsel %vm2382_vm3, %v18144_v20, 0.0 }
0x4ada   :  { %10778 = vadd.xlane.f32.xlu1 %v10777_v18 }
0x4b67   :  { %v10779_v28 = vpop.xlane.xlu1 %10778 }
0x4b68   :  { %18145 = vrcp.f32 %v10779_v28 }
0x4b72   :  { %v18146_v29 = vpop.eup %18145 }
0x4b73   :  { %v10781_v30 = vmul.f32 %v18146_v29, %v18144_v20  ;;  %v17829_v20 = vpack.c.bf16 %v14598_v24, %v14597_v22 }
0x4b75   :  { %16771 = vmatmul.mubr.msk.f32.vlgmr.msra.gmra.mrb[128].mxu0 %vm2395_vm5, %v10781_v30 }
0x4b76   :  { %16794 = vmatprep.mubr.msk.f32.mxu0 %vm18202_vm0, %v18203_v11  ;;  %17797 = vmatpush3.bf16.msra.mxu0 %v17796_v23  ;;  %v14616_v23 = vld [vmem:[%s21491_s5 + $0x140] sm:$0xff] }
0x4b77   :  { %17798 = vmatprep.subr.bf16.mxu0 %v18201_v3 }
0x4b7a   :  { %17800 = vmatpush3.bf16.msra.mxu0 %v17799_v36  ;;  %v17844_v36 = vpack.c.bf16 %v14617_v33, %v14616_v23 }
0x4b7b   :  { %17801 = vmatprep.subr.bf16.mxu0 %v18201_v3 }
0x4b7e   :  { %17803 = vmatpush3.bf16.msra.mxu0 %v17802_v41  ;;  %v17847_v41 = vpack.c.bf16 %v14619_v40, %v14618_v16 }
0x4b7f   :  { %17804 = vmatprep.subr.bf16.mxu0 %v18201_v3 }
0x4b82   :  { %17806 = vmatpush3.bf16.msra.mxu0 %v17805_v45  ;;  %v17850_v45 = vpack.c.bf16 %v14621_v55, %v14620_v42 }
0x4b83   :  { %17819 = vmatprep.subr.bf16.mxu0 %v18201_v3 }
0x4b85   :  { %16795 = vmatmul.mubr.msk.f32.vlgmr.msra.gmra.mrb[130].mxu0 %vm4011_vm6, %v20603_v46 }
0x4b86   :  { %16832 = vmatprep.mubr.msk.f32.mxu0 %vm18202_vm0, %v18203_v11 }
0x4c48   :  { %v10855_v52 = vpop.f32.mrb[128].mxu0 }
0x4c49   :  { %v16772_v49 = vpop.f32.mrb[129].mxu0  ;;  %16776 = vmatmul.mubr.msk.f32.vlgmr.msra.gmra.mrb[134].mxu1 %vm332_vm2, %v10855_v52  ;;  %v14607_v52 = vld [vmem:[%s21491_s5 + $0x48] sm:$0xff] }
0x4c4a   :  { %17809 = vmatpush3.bf16.msra.mxu1 %v17808_v44  ;;  %16813 = vmatprep.mubr.msk.f32.mxu1 %vm18202_vm0, %v18203_v11  ;;  %v17853_v44 = vpack.c.bf16 %v14623_v48, %v14622_v47  ;;  %v14656_v47 = vld [vmem:[%s21491_s5 + $0x180] sm:$0xff]  ;;  %v14657_v48 = vld [vmem:[%s21491_s5 + $0x188] sm:$0xff] }
0x4c4b   :  { %17810 = vmatprep.subr.bf16.mxu1 %v18201_v3 }
0x4c4e   :  { %17812 = vmatpush3.bf16.msra.mxu1 %v17811_v54  ;;  %v17832_v54 = vpack.c.bf16 %v14607_v52, %v14606_v51  ;;  %v14642_v51 = vld [vmem:[%s21454_s8 + $0x10] sm:$0xff]  ;;  %v14643_v52 = vld [vmem:[%s21454_s8 + $0x18] sm:$0xff] }
0x4c4f   :  { %17813 = vmatprep.subr.bf16.mxu1 %v18201_v3 }
0x4c52   :  { %17815 = vmatpush3.bf16.msra.mxu1 %v17814_v58  ;;  %v14609_v58 = vld [vmem:[%s21491_s5 + $0x58] sm:$0xff] }
0x4c53   :  { %17816 = vmatprep.subr.bf16.mxu1 %v18201_v3  ;;  %v17835_v60 = vpack.c.bf16 %v14609_v58, %v14608_v57  ;;  %v14658_v57 = vld [vmem:[%s21491_s5 + $0x190] sm:$0xff]  ;;  %v14659_v58 = vld [vmem:[%s21491_s5 + $0x198] sm:$0xff] }
0x4c56   :  { %17818 = vmatpush3.bf16.msra.mxu1 %v17817_v62  ;;  %v14611_v62 = vld [vmem:[%s21491_s5 + $0x68] sm:$0xff] }
0x4c57   :  { %16835 = vmatprep.subr.mxu1 %v18203_v11 }
0x4c58   :  { %v11014_v0 = vpop.f32.mrb[130].mxu0 }
0x4c59   :  { %16814 = vmatmul.mubr.msk.f32.vlgmr.msra.gmra.mrb[136].mxu1 %vm4011_vm6, %v20643_v43  ;;  %v16796_v1 = vpop.f32.mrb[131].mxu0  ;;  %v11015_v8 = vadd.f32 %v11014_v0, %v10944_v63  ;;  %v17838_v0 = vpack.c.bf16 %v14611_v62, %v14610_v61  ;;  %v14627_v63 = vld [vmem:[%s21491_s5 + $0x240] sm:$0xff]  ;;  %v14661_v62 = vld [vmem:[%s21491_s5 + $0x1a8] sm:$0xff] }
0x4c5a   :  { %16837 = vmatprep.mubr.msk.f32.mxu1 %vm18202_vm0, %v18203_v11  ;;  %v14612_v1 = vld [vmem:[%s21491_s5 + $0x70] sm:$0xff]  ;;  %v14660_v61 = vld [vmem:[%s21491_s5 + $0x1a0] sm:$0xff] }
0x4c5b   :  { %v11018_v12 = vmul.f32 0.25, %v11015_v8 }
0x4d1c   :  { %v10929_v4 = vpop.f32.mrb[134].mxu1 }
0x4d1d   :  { %v20651_v5 = vadd.f32 %v10929_v4, %v20528_v25  ;;  %v16777_v39 = vpop.f32.mrb[135].mxu1  ;;  %v14591_v25 = vld [vmem:[%s21491_s5 + $0x200] sm:$0xff]  ;;  %v14613_v4 = vld [vmem:[%s21491_s5 + $0x78] sm:$0xff] }
0x4d1e   :  { %v17820_v15 = vpack.c.bf16 %v14592_v13, %v14591_v25  ;;  %v17841_v39 = vpack.c.bf16 %v14613_v4, %v14612_v1  ;;  %v14632_v25 = vld [vmem:[%s21491_s5 + $0x268] sm:$0xff]  ;;  %v14662_v1 = vld [vmem:[%s21491_s5 + $0x1b0] sm:$0xff]  ;;  %v14663_v4 = vld [vmem:[%s21491_s5 + $0x1b8] sm:$0xff] }
0x4d20   :  { %17821 = vmatpush3.bf16.msra.mxu0 %v17820_v15  ;;  %v14634_v15 = vld [vmem:[%s21491_s5 + $0x278] sm:$0xff] }
0x4d21   :  { %17822 = vmatprep.subr.bf16.mxu0 %v18201_v3  ;;  %v17865_v17 = vpack.c.bf16 %v14634_v15, %v14633_v14  ;;  %v14651_v14 = vld [vmem:[%s21491_s5 + $0xa8] sm:$0xff] }
0x4d24   :  { %17824 = vmatpush3.bf16.msra.mxu0 %v17823_v37  ;;  %v11356_v37 = vld [vmem:[%s21454_s8] sm:$0xff] }
0x4d25   :  { %17825 = vmatprep.subr.bf16.mxu0 %v18201_v3  ;;  %v17871_v2 = vpack.c.bf16 %v11357_v19, %v11356_v37  ;;  %v14653_v37 = vld [vmem:[%s21491_s5 + $0xb8] sm:$0xff] }
0x4d28   :  { %17827 = vmatpush3.bf16.msra.mxu0 %v17826_v21  ;;  %v14625_v21 = vld [vmem:[%s21453_s7 + $0x5] ss:$0 sm:$0xff] }
0x4d29   :  { %17828 = vmatprep.subr.bf16.mxu0 %v18201_v3 }
0x4d2c   :  { %v11103_v9 = vpop.f32.mrb[136].mxu1  ;;  %17830 = vmatpush3.bf16.msra.mxu0 %v17829_v20 }
0x4d2d   :  { %v11104_v6 = vadd.f32 %v14589_v7, %v11103_v9  ;;  %v16815_v10 = vpop.f32.mrb[137].mxu1  ;;  %17843 = vmatprep.subr.bf16.mxu0 %v18201_v3  ;;  %v14628_v7 = vld [vmem:[%s21491_s5 + $0x248] sm:$0xff]  ;;  %v14629_v9 = vld [vmem:[%s21491_s5 + $0x250] sm:$0xff] }
0x4d2e   :  { %v17856_v8 = vpack.c.bf16 %v14628_v7, %v14627_v63  ;;  %v14646_v63 = vld [vmem:[%s21491_s5 + $0x80] sm:$0xff]  ;;  %v14647_v7 = vld [vmem:[%s21491_s5 + $0x88] sm:$0xff] }
0x4d2f   :  { %16836 = vmatpush3.xpose.msk.msra.mxu1 %vm4263_vm7, %v11104_v6  ;;  %16833 = vmatmul.mubr.msk.f32.vlgmr.msra.gmra.mrb[132].mxu0 %vm4011_vm6, %v20643_v43  ;;  %v14630_v6 = vld [vmem:[%s21491_s5 + $0x258] sm:$0xff] }
0x4d30   :  { %16840 = vmatprep.subr.mxu1 %v18203_v11  ;;  %16880 = vmatprep.mubr.msk.f32.mxu0 %vm18202_vm0, %v18203_v11  ;;  %v17859_v10 = vpack.c.bf16 %v14630_v6, %v14629_v9  ;;  %v14648_v9 = vld [vmem:[%s21491_s5 + $0x90] sm:$0xff]  ;;  %v14649_v6 = vld [vmem:[%s21491_s5 + $0x98] sm:$0xff] }
0x4d31   :  { %17845 = vmatpush3.bf16.msra.mxu0 %v17844_v36 }
0x4d32   :  { %16838 = vmatmul.mubr.msk.f32.vlgmr.msra.gmra.mrb[138].mxu1 %vm4263_vm7, %v11018_v12  ;;  %17846 = vmatprep.subr.bf16.mxu0 %v18201_v3  ;;  %v14631_v12 = vld [vmem:[%s21491_s5 + $0x260] sm:$0xff] }
0x4d33   :  { %16842 = vmatprep.mubr.msk.f32.mxu1 %vm18202_vm0, %v18203_v11  ;;  %v17862_v13 = vpack.c.bf16 %v14632_v25, %v14631_v12  ;;  %v17877_v25 = vpack.c.bf16 %v14649_v6, %v14648_v9  ;;  %v14699_v6 = vld [vmem:[%s21491_s5 + $0x1e0] sm:$0xff] }
0x4d35   :  { %17848 = vmatpush3.bf16.msra.mxu0 %v17847_v41 }
0x4d36   :  { %17849 = vmatprep.subr.bf16.mxu0 %v18201_v3 }
0x4d39   :  { %17851 = vmatpush3.bf16.msra.mxu0 %v17850_v45 }
0x4d3a   :  { %17852 = vmatprep.subr.bf16.mxu0 %v18201_v3 }
0x4d3d   :  { %17854 = vmatpush3.bf16.msra.mxu0 %v17853_v44  ;;  %v17886_v44 = vpack.c.bf16 %v14657_v48, %v14656_v47 }
0x4d3e   :  { %16902 = vmatprep.subr.mxu0 %v18203_v11 }
0x4d40   :  { %16881 = vmatmul.mubr.msk.f32.vlgmr.msra.gmra.mrb[134].mxu0 %vm4011_vm6, %v20643_v43 }
0x4d41   :  { %16904 = vmatprep.mubr.msk.f32.mxu0 %vm18202_vm0, %v18203_v11 }
0x4e02   :  { %v11188_v30 = vpop.f32.mrb[132].mxu0 }
0x4e03   :  { %v16834_v32 = vpop.f32.mrb[133].mxu0  ;;  %v11189_v35 = vadd.f32 %v14600_v31, %v11188_v30 }
0x4e05   :  { %v11264_v18 = vpop.f32.mrb[138].mxu1  ;;  %16841 = vmatpush3.msk.msra.mxu1 %vm2399_vm4, %v11189_v35 }
0x4e06   :  { %v16839_v59 = vpop.f32.mrb[139].mxu1  ;;  %v11268_v34 = vsel %vm2382_vm3, %v11264_v18, -inf  ;;  %17831 = vmatprep.subr.bf16.mxu1 %v18201_v3 }
0x4e07   :  { %11269 = vmax.xlane.f32.xlu0 %v11268_v34  ;;  %v14614_v34 = vld [vmem:[%s21453_s7 + $0x1] sm:$0x1] }
0x4e13   :  { %v11519_v22 = vpop.f32.mrb[134].mxu0 }
0x4e14   :  { %v11520_v24 = vadd.f32 %v14625_v21, %v11519_v22  ;;  %v16882_v20 = vpop.f32.mrb[135].mxu0 }
0x4e16   :  { %16903 = vmatpush3.xpose.msk.msra.mxu0 %vm4263_vm7, %v11520_v24 }
0x4e17   :  { %16907 = vmatprep.subr.mxu0 %v18203_v11 }
0x4e94   :  { %v11270_v26 = vpop.xlane.xlu0 %11269 }
0x4e95   :  { %v11271_v53 = vsub.f32 %v11264_v18, %v11270_v26 }
0x4e97   :  { %v11272_v27 = vmul.f32 1.442695, %v11271_v53 }
0x4e99   :  { %18147 = vpow2.f32 %v11272_v27 }
0x4ea3   :  { %v18148_v28 = vpop.eup %18147 }
0x4ea4   :  { %v11274_v29 = vsel %vm2382_vm3, %v18148_v28, 0.0 }
0x4ea5   :  { %11275 = vadd.xlane.f32.xlu1 %v11274_v29  ;;  %v14636_v29 = vld [vmem:[%s21453_s7 + $0x9] ss:$0 sm:$0xff] }
0x4f32   :  { %v11276_v50 = vpop.xlane.xlu1 %11275 }
0x4f33   :  { %18149 = vrcp.f32 %v11276_v50 }
0x4f3d   :  { %v18150_v49 = vpop.eup %18149 }
0x4f3e   :  { %v11278_v56 = vmul.f32 %v18150_v49, %v18148_v28 }
0x4f40   :  { %16843 = vmatmul.mubr.msk.f32.vlgmr.msra.gmra.mrb[140].mxu1 %vm2395_vm5, %v11278_v56 }
0x4f41   :  { %17833 = vmatpush3.bf16.msra.mxu1 %v17832_v54  ;;  %16861 = vmatprep.mubr.msk.f32.mxu1 %vm18202_vm0, %v18203_v11  ;;  %v17868_v54 = vpack.c.bf16 %v14643_v52, %v14642_v51 }
0x4f42   :  { %17834 = vmatprep.subr.bf16.mxu1 %v18201_v3 }
0x4f45   :  { %17836 = vmatpush3.bf16.msra.mxu1 %v17835_v60  ;;  %v17889_v60 = vpack.c.bf16 %v14659_v58, %v14658_v57  ;;  %v14695_v58 = vld [vmem:[%s21491_s5 + $0x1c0] sm:$0xff] }
0x4f46   :  { %17837 = vmatprep.subr.bf16.mxu1 %v18201_v3 }
0x4f49   :  { %17839 = vmatpush3.bf16.msra.mxu1 %v17838_v0  ;;  %v17892_v0 = vpack.c.bf16 %v14661_v62, %v14660_v61 }
0x4f4a   :  { %17840 = vmatprep.subr.bf16.mxu1 %v18201_v3 }
0x4f4d   :  { %17842 = vmatpush3.bf16.msra.mxu1 %v17841_v39  ;;  %v17895_v39 = vpack.c.bf16 %v14663_v4, %v14662_v1  ;;  %v14683_v1 = vld [vmem:[%s21454_s8 + $0x28] sm:$0xff] }
0x4f4e   :  { %17855 = vmatprep.subr.bf16.mxu1 %v18201_v3 }
0x4f50   :  { %16862 = vmatmul.mubr.msk.f32.vlgmr.msra.gmra.mrb[142].mxu1 %vm4011_vm6, %v20603_v46 }
0x4f51   :  { %17857 = vmatpush3.bf16.msra.mxu1 %v17856_v8  ;;  %16899 = vmatprep.mubr.msk.f32.mxu1 %vm18202_vm0, %v18203_v11  ;;  %v17874_v8 = vpack.c.bf16 %v14647_v7, %v14646_v63  ;;  %v14697_v7 = vld [vmem:[%s21491_s5 + $0x1d0] sm:$0xff] }
0x4f52   :  { %17858 = vmatprep.subr.bf16.mxu1 %v18201_v3 }
0x4f55   :  { %17860 = vmatpush3.bf16.msra.mxu1 %v17859_v10 }
0x4f56   :  { %17861 = vmatprep.subr.bf16.mxu1 %v18201_v3 }
0x4f59   :  { %17863 = vmatpush3.bf16.msra.mxu1 %v17862_v13  ;;  %v14650_v13 = vld [vmem:[%s21491_s5 + $0xa0] sm:$0xff] }
0x4f5a   :  { %17864 = vmatprep.subr.bf16.mxu1 %v18201_v3  ;;  %v17880_v15 = vpack.c.bf16 %v14651_v14, %v14650_v13  ;;  %v14702_v13 = vld [vmem:[%s21491_s5 + $0x1f8] sm:$0xff] }
0x4f5d   :  { %17866 = vmatpush3.bf16.msra.mxu1 %v17865_v17  ;;  %v14652_v17 = vld [vmem:[%s21491_s5 + $0xb0] sm:$0xff] }
0x4f5e   :  { %17870 = vmatprep.subr.bf16.mxu1 %v18201_v3  ;;  %v17883_v19 = vpack.c.bf16 %v14653_v37, %v14652_v17  ;;  %v14686_v17 = vld [vmem:[%s21491_s5 + $0xc8] sm:$0xff] }
0x4f60   :  { %16900 = vmatmul.mubr.msk.f32.vlgmr.msra.gmra.mrb[144].mxu1 %vm4011_vm6, %v20643_v43 }
0x4f61   :  { %17872 = vmatpush3.bf16.msra.mxu1 %v17871_v2  ;;  %16923 = vmatprep.mubr.msk.f32.mxu1 %vm18202_vm0, %v18203_v11  ;;  %v14665_v2 = vld [vmem:[%s21453_s7 + $0x6] ss:$0 sm:$0xff] }
0x4f62   :  { %17885 = vmatprep.subr.bf16.mxu1 %v18201_v3 }
0x5013   :  { %v11352_v18 = vpop.f32.mrb[140].mxu1 }
0x5014   :  { %v16844_v59 = vpop.f32.mrb[141].mxu1  ;;  %16924 = vmatmul.mubr.msk.f32.vlgmr.msra.gmra.mrb[146].mxu1 %vm4263_vm7, %v11352_v18 }
0x5015   :  { %16961 = vmatprep.mubr.msk.f32.mxu1 %vm18202_vm0, %v18203_v11  ;;  %17887 = vmatpush3.bf16.msra.mxu1 %v17886_v44 }
0x5016   :  { %17888 = vmatprep.subr.bf16.mxu1 %v18201_v3 }
0x5019   :  { %17890 = vmatpush3.bf16.msra.mxu1 %v17889_v60  ;;  %v14696_v60 = vld [vmem:[%s21491_s5 + $0x1c8] sm:$0xff] }
0x501a   :  { %17891 = vmatprep.subr.bf16.mxu1 %v18201_v3  ;;  %v17925_v61 = vpack.c.bf16 %v14696_v60, %v14695_v58 }
0x501d   :  { %17893 = vmatpush3.bf16.msra.mxu1 %v17892_v0  ;;  %v14682_v0 = vld [vmem:[%s21454_s8 + $0x20] sm:$0xff] }
0x501e   :  { %17894 = vmatprep.subr.bf16.mxu1 %v18201_v3 }
0x5021   :  { %17896 = vmatpush3.bf16.msra.mxu1 %v17895_v39  ;;  %v17910_v39 = vpack.c.bf16 %v14683_v1, %v14682_v0 }
0x5022   :  { %16983 = vmatprep.subr.mxu1 %v18203_v11 }
0x5023   :  { %v11433_v26 = vpop.f32.mrb[142].mxu1 }
0x5024   :  { %v11434_v53 = vadd.f32 %v14614_v34, %v11433_v26  ;;  %v16863_v27 = vpop.f32.mrb[143].mxu1  ;;  %16962 = vmatmul.mubr.msk.f32.vlgmr.msra.gmra.mrb[148].mxu1 %vm4011_vm6, %v20643_v43  ;;  %v14654_v34 = vld [vmem:[%s21453_s7 + $0x2] sm:$0x1] }
0x5025   :  { %16985 = vmatprep.mubr.msk.f32.mxu1 %vm18202_vm0, %v18203_v11 }
0x5026   :  { %v11437_v28 = vmul.f32 0.25, %v11434_v53 }
0x5028   :  { %16905 = vmatmul.mubr.msk.f32.vlgmr.msra.gmra.mrb[136].mxu0 %vm4263_vm7, %v11437_v28 }
0x5029   :  { %16909 = vmatprep.mubr.msk.f32.mxu0 %vm18202_vm0, %v18203_v11 }
0x5033   :  { %v11604_v30 = vpop.f32.mrb[144].mxu1 }
0x5034   :  { %v11605_v31 = vadd.f32 %v14636_v29, %v11604_v30  ;;  %v16901_v32 = vpop.f32.mrb[145].mxu1  ;;  %v14667_v29 = vld [vmem:[%s21491_s5 + $0x280] sm:$0xff]  ;;  %v14668_v30 = vld [vmem:[%s21491_s5 + $0x288] sm:$0xff] }
0x5035   :  { %v17898_v32 = vpack.c.bf16 %v14668_v30, %v14667_v29 }
0x5036   :  { %16908 = vmatpush3.msk.msra.mxu0 %vm2399_vm4, %v11605_v31  ;;  %v14669_v31 = vld [vmem:[%s21491_s5 + $0x290] sm:$0xff] }
0x5037   :  { %17867 = vmatprep.subr.bf16.mxu0 %v18201_v3 }
0x50e7   :  { %v20828_v23 = vpop.f32.mrb[146].mxu1 }
0x50e8   :  { %v16925_v33 = vpop.f32.mrb[147].mxu1 }
0x50f7   :  { %v12081_v21 = vpop.f32.mrb[148].mxu1 }
0x50f8   :  { %v12082_v22 = vadd.f32 %v14665_v2, %v12081_v21  ;;  %v16963_v24 = vpop.f32.mrb[149].mxu1  ;;  %v14688_v2 = vld [vmem:[%s21491_s5 + $0xd8] sm:$0xff] }
0x50fa   :  { %16984 = vmatpush3.xpose.msk.msra.mxu1 %vm4263_vm7, %v12082_v22 }
0x50fb   :  { %v11680_v35 = vpop.f32.mrb[136].mxu0  ;;  %16988 = vmatprep.subr.mxu1 %v18203_v11 }
0x50fc   :  { %v16906_v36 = vpop.f32.mrb[137].mxu0  ;;  %v11684_v16 = vsel %vm2382_vm3, %v11680_v35, -inf }
0x50fd   :  { %11685 = vmax.xlane.f32.xlu0 %v11684_v16  ;;  %v14672_v36 = vld [vmem:[%s21491_s5 + $0x2a8] sm:$0xff] }
0x518a   :  { %v11686_v40 = vpop.xlane.xlu0 %11685 }
0x518b   :  { %v11687_v41 = vsub.f32 %v11680_v35, %v11686_v40  ;;  %v14671_v35 = vld [vmem:[%s21491_s5 + $0x2a0] sm:$0xff]  ;;  %v14673_v40 = vld [vmem:[%s21491_s5 + $0x2b0] sm:$0xff] }
0x518c   :  { %v17904_v16 = vpack.c.bf16 %v14672_v36, %v14671_v35  ;;  %v14693_v35 = vld [vmem:[%s21453_s7 + $0x3] sm:$0x1] }
0x518d   :  { %v11688_v42 = vmul.f32 1.442695, %v11687_v41  ;;  %v14674_v41 = vld [vmem:[%s21491_s5 + $0x2b8] sm:$0xff] }
0x518f   :  { %18151 = vpow2.f32 %v11688_v42  ;;  %v17907_v42 = vpack.c.bf16 %v14674_v41, %v14673_v40 }
0x5199   :  { %v18152_v55 = vpop.eup %18151 }
0x519a   :  { %v11690_v45 = vsel %vm2382_vm3, %v18152_v55, 0.0 }
0x519b   :  { %11691 = vadd.xlane.f32.xlu1 %v11690_v45 }
0x5228   :  { %v11692_v50 = vpop.xlane.xlu1 %11691 }
0x5229   :  { %18153 = vrcp.f32 %v11692_v50 }
0x5233   :  { %v18154_v49 = vpop.eup %18153 }
0x5234   :  { %v11694_v56 = vmul.f32 %v18154_v49, %v18152_v55 }
0x5236   :  { %16910 = vmatmul.mubr.msk.f32.vlgmr.msra.gmra.mrb[138].mxu0 %vm2395_vm5, %v11694_v56 }
0x5237   :  { %17869 = vmatpush3.bf16.msra.mxu0 %v17868_v54  ;;  %16916 = vmatprep.mubr.msk.f32.mxu0 %vm18202_vm0, %v18203_v11  ;;  %v14676_v54 = vld [vmem:[%s21453_s7 + $0xa] ss:$0 sm:$0xff] }
0x5238   :  { %17873 = vmatprep.subr.bf16.mxu0 %v18201_v3 }
0x5309   :  { %v11768_v10 = vpop.f32.mrb[138].mxu0 }
0x530a   :  { %v16911_v12 = vpop.f32.mrb[139].mxu0  ;;  %16917 = vmatmul.mubr.msk.f32.vlgmr.msra.gmra.mrb[140].mxu0 %vm4263_vm7, %v11768_v10  ;;  %v14700_v10 = vld [vmem:[%s21491_s5 + $0x1e8] sm:$0xff] }
0x530b   :  { %17875 = vmatpush3.bf16.msra.mxu0 %v17874_v8  ;;  %16942 = vmatprep.mubr.msk.f32.mxu0 %vm18202_vm0, %v18203_v11  ;;  %v14698_v8 = vld [vmem:[%s21491_s5 + $0x1d8] sm:$0xff]  ;;  %v17931_v12 = vpack.c.bf16 %v14700_v10, %v14699_v6 }
0x530c   :  { %17876 = vmatprep.subr.bf16.mxu0 %v18201_v3  ;;  %v17928_v9 = vpack.c.bf16 %v14698_v8, %v14697_v7  ;;  %v14721_v8 = vld [vmem:[%s21454_s8 + $0x30] sm:$0xff] }
0x530f   :  { %17878 = vmatpush3.bf16.msra.mxu0 %v17877_v25  ;;  %v14701_v25 = vld [vmem:[%s21491_s5 + $0x1f0] sm:$0xff] }
0x5310   :  { %17879 = vmatprep.subr.bf16.mxu0 %v18201_v3  ;;  %v17934_v14 = vpack.c.bf16 %v14702_v13, %v14701_v25  ;;  %v12902_v25 = vld [vmem:[%s21456_s10] sm:$0xff]  ;;  %v12903_v13 = vld [vmem:[%s21456_s10 + $0x8] sm:$0xff] }
0x5313   :  { %17881 = vmatpush3.bf16.msra.mxu0 %v17880_v15  ;;  %v14685_v15 = vld [vmem:[%s21491_s5 + $0xc0] sm:$0xff] }
0x5314   :  { %17882 = vmatprep.subr.bf16.mxu0 %v18201_v3  ;;  %v17913_v37 = vpack.c.bf16 %v14686_v17, %v14685_v15  ;;  %v12904_v15 = vld [vmem:[%s21456_s10 + $0x10] sm:$0xff]  ;;  %v12905_v17 = vld [vmem:[%s21456_s10 + $0x18] sm:$0xff] }
0x5317   :  { %17884 = vmatpush3.bf16.msra.mxu0 %v17883_v19  ;;  %v14687_v19 = vld [vmem:[%s21491_s5 + $0xd0] sm:$0xff] }
0x5318   :  { %17897 = vmatprep.subr.bf16.mxu0 %v18201_v3  ;;  %v17916_v24 = vpack.c.bf16 %v14688_v2, %v14687_v19  ;;  %v21119_v19 = vld [vmem:[%s21488_s24 + $0x18] sm:$0xff]  ;;  %v13063_v2 = vld [vmem:[%s21459_s13] sm:$0xff] }
0x531a   :  { %16943 = vmatmul.mubr.msk.f32.vlgmr.msra.gmra.mrb[142].mxu0 %vm4011_vm6, %v20603_v46 }
0x531b   :  { %16980 = vmatprep.mubr.msk.f32.mxu0 %vm18202_vm0, %v18203_v11  ;;  %17899 = vmatpush3.bf16.msra.mxu0 %v17898_v32 }
0x531c   :  { %17900 = vmatprep.subr.bf16.mxu0 %v18201_v3 }
0x53dd   :  { %v11843_v20 = vpop.f32.mrb[140].mxu0 }
0x53de   :  { %v20915_v18 = vadd.f32 %v20828_v23, %v11843_v20  ;;  %v16918_v59 = vpop.f32.mrb[141].mxu0  ;;  %v14670_v23 = vld [vmem:[%s21491_s5 + $0x298] sm:$0xff]  ;;  %v14689_v20 = vld [vmem:[%s21491_s5 + $0xe0] sm:$0xff] }
0x53df   :  { %v17901_v33 = vpack.c.bf16 %v14670_v23, %v14669_v31  ;;  %v14690_v59 = vld [vmem:[%s21491_s5 + $0xe8] sm:$0xff] }
0x53e1   :  { %17902 = vmatpush3.bf16.msra.mxu0 %v17901_v33 }
0x53e2   :  { %17903 = vmatprep.subr.bf16.mxu0 %v18201_v3 }
0x53e5   :  { %17905 = vmatpush3.bf16.msra.mxu0 %v17904_v16 }
0x53e6   :  { %17906 = vmatprep.subr.bf16.mxu0 %v18201_v3 }
0x53e9   :  { %17908 = vmatpush3.bf16.msra.mxu0 %v17907_v42  ;;  %v14706_v42 = vld [vmem:[%s21491_s5 + $0x2c0] sm:$0xff] }
0x53ea   :  { %17924 = vmatprep.subr.bf16.mxu0 %v18201_v3 }
0x53ec   :  { %16981 = vmatmul.mubr.msk.f32.vlgmr.msra.gmra.mrb[144].mxu0 %vm4011_vm6, %v20643_v43 }
0x53ed   :  { %v11995_v26 = vpop.f32.mrb[142].mxu0  ;;  %17035 = vmatprep.mubr.msk.f32.mxu0 %vm18202_vm0, %v18203_v11  ;;  %17926 = vmatpush3.bf16.msra.mxu0 %v17925_v61 }
0x53ee   :  { %v11996_v53 = vadd.f32 %v14654_v34, %v11995_v26  ;;  %v16944_v27 = vpop.f32.mrb[143].mxu0  ;;  %17927 = vmatprep.subr.bf16.mxu0 %v18201_v3  ;;  %v17919_v34 = vpack.c.bf16 %v14690_v59, %v14689_v20  ;;  %v14691_v26 = vld [vmem:[%s21491_s5 + $0xf0] sm:$0xff]  ;;  %v13066_v20 = vld [vmem:[%s21459_s13 + $0x18] sm:$0xff] }
0x53f0   :  { %v11999_v28 = vmul.f32 0.25, %v11996_v53  ;;  %v14692_v53 = vld [vmem:[%s21491_s5 + $0xf8] sm:$0xff] }
0x53f1   :  { %17929 = vmatpush3.bf16.msra.mxu0 %v17928_v9  ;;  %v17922_v27 = vpack.c.bf16 %v14692_v53, %v14691_v26  ;;  %v14722_v9 = vld [vmem:[%s21454_s8 + $0x38] sm:$0xff]  ;;  %v13068_v26 = vld [vmem:[%s21459_s13 + $0x28] sm:$0xff] }
0x53f2   :  { %16986 = vmatmul.mubr.msk.f32.vlgmr.msra.gmra.mrb[150].mxu1 %vm4263_vm7, %v11999_v28  ;;  %17930 = vmatprep.subr.bf16.mxu0 %v18201_v3  ;;  %v14704_v28 = vld [vmem:[%s21453_s7 + $0x7] ss:$0 sm:$0xff]  ;;  %v17949_v10 = vpack.c.bf16 %v14722_v9, %v14721_v8 }
0x53f3   :  { %16990 = vmatprep.mubr.msk.f32.mxu1 %vm18202_vm0, %v18203_v11 }
0x53f5   :  { %17932 = vmatpush3.bf16.msra.mxu0 %v17931_v12 }
0x53f6   :  { %17933 = vmatprep.subr.bf16.mxu0 %v18201_v3 }
0x53f9   :  { %17935 = vmatpush3.bf16.msra.mxu0 %v17934_v14  ;;  %v17958_v14 = vpack.c.bf16 %v12903_v13, %v12902_v25 }
0x53fa   :  { %17057 = vmatprep.subr.mxu0 %v18203_v11 }
0x53fc   :  { %17036 = vmatmul.mubr.msk.f32.vlgmr.msra.gmra.mrb[146].mxu0 %vm4011_vm6, %v20643_v43 }
0x53fd   :  { %17059 = vmatprep.mubr.msk.f32.mxu0 %vm18202_vm0, %v18203_v11 }
0x54bf   :  { %v12166_v49 = vpop.f32.mrb[144].mxu0 }
0x54c0   :  { %v16982_v56 = vpop.f32.mrb[145].mxu0  ;;  %v12167_v57 = vadd.f32 %v14676_v54, %v12166_v49  ;;  %v14713_v49 = vld [vmem:[%s21491_s5 + $0x2f8] sm:$0xff] }
0x54c2   :  { %16989 = vmatpush3.msk.msra.mxu1 %vm2399_vm4, %v12167_v57 }
0x54c3   :  { %17909 = vmatprep.subr.bf16.mxu1 %v18201_v3 }
0x54c5   :  { %v12242_v55 = vpop.f32.mrb[150].mxu1 }
0x54c6   :  { %v16987_v45 = vpop.f32.mrb[151].mxu1  ;;  %v12246_v47 = vsel %vm2382_vm3, %v12242_v55, -inf }
0x54c7   :  { %12247 = vmax.xlane.f32.xlu0 %v12246_v47  ;;  %v14709_v47 = vld [vmem:[%s21491_s5 + $0x2d8] sm:$0xff] }
0x54cf   :  { %v12571_v29 = vpop.f32.mrb[146].mxu0 }
0x54d0   :  { %v12572_v30 = vadd.f32 %v14704_v28, %v12571_v29  ;;  %v17037_v31 = vpop.f32.mrb[147].mxu0  ;;  %v14725_v28 = vld [vmem:[%s21456_s10 + $0x28] sm:$0xff] }
0x54d1   :  { %v14727_v31 = vld [vmem:[%s21456_s10 + $0x38] sm:$0xff] }
0x54d2   :  { %17058 = vmatpush3.xpose.msk.msra.mxu0 %vm4263_vm7, %v12572_v30  ;;  %v14726_v30 = vld [vmem:[%s21456_s10 + $0x30] sm:$0xff] }
0x54d3   :  { %17062 = vmatprep.subr.mxu0 %v18203_v11 }
0x5554   :  { %v12248_v48 = vpop.xlane.xlu0 %12247 }
0x5555   :  { %v12249_v44 = vsub.f32 %v12242_v55, %v12248_v48  ;;  %v14708_v55 = vld [vmem:[%s21491_s5 + $0x2d0] sm:$0xff] }
0x5556   :  { %v17940_v48 = vpack.c.bf16 %v14709_v47, %v14708_v55  ;;  %v14733_v55 = vld [vmem:[%s21459_s13 + $0x58] sm:$0xff]  ;;  %v14735_v47 = vld [vmem:[%s21459_s13 + $0x68] sm:$0xff] }
0x5557   :  { %v12250_v50 = vmul.f32 1.442695, %v12249_v44  ;;  %v14710_v44 = vld [vmem:[%s21491_s5 + $0x2e0] sm:$0xff] }
0x5559   :  { %18155 = vpow2.f32 %v12250_v50  ;;  %v14711_v50 = vld [vmem:[%s21491_s5 + $0x2e8] sm:$0xff] }
0x5563   :  { %v18156_v51 = vpop.eup %18155 }
0x5564   :  { %v12252_v52 = vsel %vm2382_vm3, %v18156_v51, 0.0 }
0x5565   :  { %12253 = vadd.xlane.f32.xlu1 %v12252_v52  ;;  %v14712_v52 = vld [vmem:[%s21491_s5 + $0x2f0] sm:$0xff] }
0x5566   :  { %v17946_v54 = vpack.c.bf16 %v14713_v49, %v14712_v52  ;;  %v14737_v52 = vld [vmem:[%s21459_s13 + $0x78] sm:$0xff] }
0x55f2   :  { %v12254_v62 = vpop.xlane.xlu1 %12253 }
0x55f3   :  { %18157 = vrcp.f32 %v12254_v62 }
0x55fd   :  { %v18158_v4 = vpop.eup %18157 }
0x55fe   :  { %v12256_v63 = vmul.f32 %v18158_v4, %v18156_v51  ;;  %v17943_v51 = vpack.c.bf16 %v14711_v50, %v14710_v44  ;;  %v13069_v44 = vld [vmem:[%s21459_s13 + $0x30] sm:$0xff]  ;;  %v13070_v50 = vld [vmem:[%s21459_s13 + $0x38] sm:$0xff] }
0x55ff   :  { %v17985_v49 = vpack.c.bf16 %v13070_v50, %v13069_v44  ;;  %v14750_v50 = vld [vmem:[%s21457_s11 + $0x20] sm:$0xff] }
0x5600   :  { %16991 = vmatmul.mubr.msk.f32.vlgmr.msra.gmra.mrb[152].mxu1 %vm2395_vm5, %v12256_v63 }
0x5601   :  { %17911 = vmatpush3.bf16.msra.mxu1 %v17910_v39  ;;  %16997 = vmatprep.mubr.msk.f32.mxu1 %vm18202_vm0, %v18203_v11 }
0x5602   :  { %17912 = vmatprep.subr.bf16.mxu1 %v18201_v3 }
0x56d3   :  { %v12330_v21 = vpop.f32.mrb[152].mxu1 }
0x56d4   :  { %v16992_v22 = vpop.f32.mrb[153].mxu1  ;;  %16998 = vmatmul.mubr.msk.f32.vlgmr.msra.gmra.mrb[154].mxu1 %vm4263_vm7, %v12330_v21  ;;  %v13064_v21 = vld [vmem:[%s21459_s13 + $0x8] sm:$0xff] }
0x56d5   :  { %17914 = vmatpush3.bf16.msra.mxu1 %v17913_v37  ;;  %17016 = vmatprep.mubr.msk.f32.mxu1 %vm18202_vm0, %v18203_v11  ;;  %v17961_v37 = vpack.c.bf16 %v12905_v17, %v12904_v15  ;;  %v17976_v22 = vpack.c.bf16 %v13064_v21, %v13063_v2 }
0x56d6   :  { %17915 = vmatprep.subr.bf16.mxu1 %v18201_v3 }
0x56d9   :  { %17917 = vmatpush3.bf16.msra.mxu1 %v17916_v24  ;;  %v13065_v24 = vld [vmem:[%s21459_s13 + $0x10] sm:$0xff] }
0x56da   :  { %17918 = vmatprep.subr.bf16.mxu1 %v18201_v3  ;;  %v17979_v59 = vpack.c.bf16 %v13066_v20, %v13065_v24  ;;  %v13311_v24 = vld [vmem:[%s21460_s14 + $0x8] sm:$0xff] }
0x56dd   :  { %17920 = vmatpush3.bf16.msra.mxu1 %v17919_v34  ;;  %v13067_v34 = vld [vmem:[%s21459_s13 + $0x20] sm:$0xff] }
0x56de   :  { %17921 = vmatprep.subr.bf16.mxu1 %v18201_v3  ;;  %v17982_v53 = vpack.c.bf16 %v13068_v26, %v13067_v34  ;;  %v13314_v26 = vld [vmem:[%s21460_s14 + $0x20] sm:$0xff] }
0x56e1   :  { %17923 = vmatpush3.bf16.msra.mxu1 %v17922_v27  ;;  %v14724_v27 = vld [vmem:[%s21456_s10 + $0x20] sm:$0xff] }
0x56e2   :  { %17936 = vmatprep.subr.bf16.mxu1 %v18201_v3  ;;  %v17952_v29 = vpack.c.bf16 %v14725_v28, %v14724_v27  ;;  %v13316_v28 = vld [vmem:[%s21460_s14 + $0x30] sm:$0xff] }
0x56e4   :  { %17017 = vmatmul.mubr.msk.f32.vlgmr.msra.gmra.mrb[156].mxu1 %vm4011_vm6, %v20603_v46 }
0x56e5   :  { %17054 = vmatprep.mubr.msk.f32.mxu1 %vm18202_vm0, %v18203_v11 }
0x57a7   :  { %v12405_v32 = vpop.f32.mrb[154].mxu1 }
0x57a8   :  { %v21045_v23 = vadd.f32 %v12405_v32, %v20915_v18  ;;  %v16999_v33 = vpop.f32.mrb[155].mxu1  ;;  %v14707_v18 = vld [vmem:[%s21491_s5 + $0x2c8] sm:$0xff] }
0x57a9   :  { %v17937_v45 = vpack.c.bf16 %v14707_v18, %v14706_v42  ;;  %v14732_v18 = vld [vmem:[%s21459_s13 + $0x50] sm:$0xff] }
0x57ab   :  { %17938 = vmatpush3.bf16.msra.mxu1 %v17937_v45  ;;  %v17967_v45 = vpack.c.bf16 %v14733_v55, %v14732_v18 }
0x57ac   :  { %17939 = vmatprep.subr.bf16.mxu1 %v18201_v3 }
0x57af   :  { %17941 = vmatpush3.bf16.msra.mxu1 %v17940_v48 }
0x57b0   :  { %17942 = vmatprep.subr.bf16.mxu1 %v18201_v3 }
0x57b3   :  { %17944 = vmatpush3.bf16.msra.mxu1 %v17943_v51  ;;  %v14736_v51 = vld [vmem:[%s21459_s13 + $0x70] sm:$0xff] }
0x57b4   :  { %17945 = vmatprep.subr.bf16.mxu1 %v18201_v3 }
0x57b7   :  { %v12485_v36 = vpop.f32.mrb[156].mxu1  ;;  %17947 = vmatpush3.bf16.msra.mxu1 %v17946_v54  ;;  %v17973_v54 = vpack.c.bf16 %v14737_v52, %v14736_v51  ;;  %v14751_v51 = vld [vmem:[%s21457_s11 + $0x28] sm:$0xff]  ;;  %v18176_v52 = vld [vmem:[%s21492_s28 + $0x10] sm:$0xff] }
0x57b8   :  { %v12486_v16 = vadd.f32 %v14693_v35, %v12485_v36  ;;  %v17018_v40 = vpop.f32.mrb[157].mxu1  ;;  %17957 = vmatprep.subr.bf16.mxu1 %v18201_v3  ;;  %v17955_v35 = vpack.c.bf16 %v14727_v31, %v14726_v30  ;;  %v14730_v36 = vld [vmem:[%s21459_s13 + $0x40] sm:$0xff] }
0x57b9   :  { %v14578_v40 = vld [vmem:[%s21493_s3 + $0x1] sm:$0x1] }
0x57ba   :  { %v12489_v41 = vmul.f32 0.25, %v12486_v16  ;;  %17055 = vmatmul.mubr.msk.f32.vlgmr.msra.gmra.mrb[158].mxu1 %vm4011_vm6, %v20643_v43  ;;  %v14715_v43 = vld [vmem:[%s21453_s7 + $0xb] ss:$0 sm:$0xff]  ;;  %v10935_v42 = vadd.f32 %v14578_v40, %v20651_v5  ;;  %v14734_v5 = vld [vmem:[%s21459_s13 + $0x60] sm:$0xff] }
0x57bb   :  { %17093 = vmatprep.mubr.msk.f32.mxu1 %vm18202_vm0, %v18203_v11  ;;  %17959 = vmatpush3.bf16.msra.mxu1 %v17958_v14  ;;  %v14731_v16 = vld [vmem:[%s21459_s13 + $0x48] sm:$0xff]  ;;  %v17970_v48 = vpack.c.bf16 %v14735_v47, %v14734_v5  ;;  %v14743_v31 = vld [vmem:[%s21458_s12 + $0x20] sm:$0xff] }
0x57bc   :  { %17060 = vmatmul.mubr.msk.f32.vlgmr.msra.gmra.mrb[148].mxu0 %vm4263_vm7, %v12489_v41  ;;  %17960 = vmatprep.subr.bf16.mxu1 %v18201_v3  ;;  %v17964_v41 = vpack.c.bf16 %v14731_v16, %v14730_v36  ;;  %v14746_v36 = vld [vmem:[%s21458_s12 + $0x38] sm:$0xff] }
0x57bd   :  { %17064 = vmatprep.mubr.msk.f32.mxu0 %vm18202_vm0, %v18203_v11 }
0x57bf   :  { %17962 = vmatpush3.bf16.msra.mxu1 %v17961_v37 }
0x57c0   :  { %17975 = vmatprep.subr.bf16.mxu1 %v18201_v3 }
0x57c2   :  { %17094 = vmatmul.mubr.msk.f32.vlgmr.msra.gmra.mrb[160].mxu1 %vm88_vm1, %v21119_v19 }
0x57c3   :  { %17131 = vmatprep.mubr.msk.f32.mxu1 %vm18202_vm0, %v18203_v11  ;;  %17977 = vmatpush3.bf16.msra.mxu1 %v17976_v22  ;;  %v13310_v22 = vld [vmem:[%s21460_s14] sm:$0xff] }
0x57c4   :  { %17978 = vmatprep.subr.bf16.mxu1 %v18201_v3  ;;  %v17994_v20 = vpack.c.bf16 %v13311_v24, %v13310_v22  ;;  %v14754_v22 = vld [vmem:[%s21464_s18 + $0x3] sm:$0x1] }
0x57c7   :  { %17980 = vmatpush3.bf16.msra.mxu1 %v17979_v59  ;;  %v13313_v59 = vld [vmem:[%s21460_s14 + $0x18] sm:$0xff] }
0x57c8   :  { %17981 = vmatprep.subr.bf16.mxu1 %v18201_v3 }
0x57cb   :  { %17983 = vmatpush3.bf16.msra.mxu1 %v17982_v53  ;;  %v13315_v53 = vld [vmem:[%s21460_s14 + $0x28] sm:$0xff] }
0x57cc   :  { %17984 = vmatprep.subr.bf16.mxu1 %v18201_v3  ;;  %v18000_v27 = vpack.c.bf16 %v13315_v53, %v13314_v26  ;;  %v14759_v26 = vld [vmem:[%s21458_s12 + $0x58] sm:$0xff] }
0x57cf   :  { %17986 = vmatpush3.bf16.msra.mxu1 %v17985_v49 }
0x57d0   :  { %17993 = vmatprep.subr.bf16.mxu1 %v18201_v3 }
0x57d2   :  { %17132 = vmatmul.mubr.msk.f32.vlgmr.msra.gmra.mrb[162].mxu1 %vm4011_vm6, %v20603_v46 }
0x57d3   :  { %17161 = vmatprep.mubr.msk.f32.mxu1 %vm18202_vm0, %v18203_v11  ;;  %17995 = vmatpush3.bf16.msra.mxu1 %v17994_v20  ;;  %v14756_v20 = vld [vmem:[%s21458_s12 + $0x40] sm:$0xff] }
0x57d4   :  { %17996 = vmatprep.subr.bf16.mxu1 %v18201_v3 }
0x588d   :  { %v12656_v4 = vpop.f32.mrb[158].mxu1 }
0x588e   :  { %v17056_v39 = vpop.f32.mrb[159].mxu1  ;;  %v12657_v63 = vadd.f32 %v14715_v43, %v12656_v4  ;;  %v13234_v43 = vld [vmem:[%s21457_s11 + $0x10] sm:$0xff] }
0x588f   :  { %v12732_v56 = vpop.f32.mrb[148].mxu0  ;;  %v13235_v39 = vld [vmem:[%s21457_s11 + $0x18] sm:$0xff] }
0x5890   :  { %v17061_v57 = vpop.f32.mrb[149].mxu0  ;;  %v12736_v58 = vsel %vm2382_vm3, %v12732_v56, -inf  ;;  %17063 = vmatpush3.msk.msra.mxu0 %vm2399_vm4, %v12657_v63  ;;  %v17991_v63 = vpack.c.bf16 %v13235_v39, %v13234_v43  ;;  %v13393_v43 = vld [vmem:[%s21458_s12 + $0x8] sm:$0xff]  ;;  %v14741_v39 = vld [vmem:[%s21464_s18 + $0x1] sm:$0x1] }
0x5891   :  { %12737 = vmax.xlane.f32.xlu0 %v12736_v58  ;;  %17948 = vmatprep.subr.bf16.mxu0 %v18201_v3  ;;  %v13232_v58 = vld [vmem:[%s21457_s11] sm:$0xff] }
0x591e   :  { %v12738_v60 = vpop.xlane.xlu0 %12737 }
0x591f   :  { %v12739_v61 = vsub.f32 %v12732_v56, %v12738_v60  ;;  %v13049_v56 = vpop.f32.mrb[160].mxu1  ;;  %v13233_v60 = vld [vmem:[%s21457_s11 + $0x8] sm:$0xff] }
0x5920   :  { %v17095_v57 = vpop.f32.mrb[161].mxu1 }
0x5921   :  { %v12740_v62 = vmul.f32 1.442695, %v12739_v61  ;;  %v13218_v2 = vpop.f32.mrb[162].mxu1 }
0x5922   :  { %v17133_v21 = vpop.f32.mrb[163].mxu1 }
0x5923   :  { %18159 = vpow2.f32 %v12740_v62  ;;  %v12900_v62 = vld [vmem:[%s21455_s9] sm:$0x1] }
0x592d   :  { %v18160_v0 = vpop.eup %18159 }
0x592e   :  { %v12742_v1 = vsel %vm2382_vm3, %v18160_v0, 0.0 }
0x592f   :  { %12743 = vadd.xlane.f32.xlu1 %v12742_v1  ;;  %v17988_v1 = vpack.c.bf16 %v13233_v60, %v13232_v58  ;;  %v14752_v58 = vld [vmem:[%s21457_s11 + $0x30] sm:$0xff]  ;;  %v14753_v60 = vld [vmem:[%s21457_s11 + $0x38] sm:$0xff] }
0x59bc   :  { %v12744_v7 = vpop.xlane.xlu1 %12743 }
0x59bd   :  { %18161 = vrcp.f32 %v12744_v7  ;;  %v13053_v7 = vld [vmem:[%s21494_s22] sm:$0x1] }
0x59c7   :  { %v18162_v6 = vpop.eup %18161 }
0x59c8   :  { %v12746_v12 = vmul.f32 %v18162_v6, %v18160_v0 }
0x59ca   :  { %17065 = vmatmul.mubr.msk.f32.vlgmr.msra.gmra.mrb[150].mxu0 %vm2395_vm5, %v12746_v12 }
0x59cb   :  { %17950 = vmatpush3.bf16.msra.mxu0 %v17949_v10  ;;  %17071 = vmatprep.mubr.msk.f32.mxu0 %vm18202_vm0, %v18203_v11 }
0x59cc   :  { %17951 = vmatprep.subr.bf16.mxu0 %v18201_v3 }
0x5a9d   :  { %v12820_v32 = vpop.f32.mrb[150].mxu0 }
0x5a9e   :  { %v17066_v33 = vpop.f32.mrb[151].mxu0  ;;  %17072 = vmatmul.mubr.msk.f32.vlgmr.msra.gmra.mrb[152].mxu0 %vm4263_vm7, %v12820_v32  ;;  %v14744_v32 = vld [vmem:[%s21458_s12 + $0x28] sm:$0xff] }
0x5a9f   :  { %17953 = vmatpush3.bf16.msra.mxu0 %v17952_v29  ;;  %17082 = vmatprep.mubr.msk.f32.mxu0 %vm18202_vm0, %v18203_v11  ;;  %v13317_v29 = vld [vmem:[%s21460_s14 + $0x38] sm:$0xff]  ;;  %v14745_v33 = vld [vmem:[%s21458_s12 + $0x30] sm:$0xff] }
0x5aa0   :  { %17954 = vmatprep.subr.bf16.mxu0 %v18201_v3  ;;  %v18003_v30 = vpack.c.bf16 %v13317_v29, %v13316_v28  ;;  %v18009_v16 = vpack.c.bf16 %v14746_v36, %v14745_v33 }
0x5aa3   :  { %17956 = vmatpush3.bf16.msra.mxu0 %v17955_v35  ;;  %v18006_v35 = vpack.c.bf16 %v14744_v32, %v14743_v31 }
0x5aa4   :  { %17963 = vmatprep.subr.bf16.mxu0 %v18201_v3 }
0x5aa6   :  { %17083 = vmatmul.mubr.msk.f32.vlgmr.msra.gmra.mrb[154].mxu0 %vm88_vm1, %v10935_v42 }
0x5aa7   :  { %17965 = vmatpush3.bf16.msra.mxu0 %v17964_v41  ;;  %17112 = vmatprep.mubr.msk.f32.mxu0 %vm18202_vm0, %v18203_v11  ;;  %v13222_v41 = vld [vmem:[%s21465_s19] sm:$0x1] }
0x5aa8   :  { %17966 = vmatprep.subr.bf16.mxu0 %v18201_v3 }
0x5aab   :  { %17968 = vmatpush3.bf16.msra.mxu0 %v17967_v45 }
0x5aac   :  { %17969 = vmatprep.subr.bf16.mxu0 %v18201_v3 }
0x5aaf   :  { %17971 = vmatpush3.bf16.msra.mxu0 %v17970_v48 }
0x5ab0   :  { %17972 = vmatprep.subr.bf16.mxu0 %v18201_v3 }
0x5ab3   :  { %17974 = vmatpush3.bf16.msra.mxu0 %v17973_v54 }
0x5ab4   :  { %17987 = vmatprep.subr.bf16.mxu0 %v18201_v3 }
0x5b71   :  { %v12895_v61 = vpop.f32.mrb[152].mxu0 }
0x5b72   :  { %v12899_v46 = vadd.f32 %v12895_v61, %v21045_v23  ;;  %v17073_v0 = vpop.f32.mrb[153].mxu0  ;;  %v18021_v61 = vpack.c.bf16 %v14753_v60, %v14752_v58  ;;  %v13882_v60 = vld [vmem:[%s21462_s16 + $0x20] sm:$0xff] }
0x5b74   :  { %v21219_v4 = vadd.f32 %v12900_v62, %v12899_v46  ;;  %v9023_v62 = vld [vmem:[%s21493_s3] sm:$0x1] }
0x5b76   :  { %17113 = vmatmul.mubr.msk.f32.vlgmr.msra.gmra.mrb[156].mxu0 %vm4011_vm6, %v21219_v4 }
0x5b77   :  { %17989 = vmatpush3.bf16.msra.mxu0 %v17988_v1  ;;  %17142 = vmatprep.mubr.msk.f32.mxu0 %vm18202_vm0, %v18203_v11  ;;  %v9024_v1 = vadd.f32 %v9023_v62, %v20272_v38 }
0x5b78   :  { %17990 = vmatprep.subr.bf16.mxu0 %v18201_v3 }
0x5b79   :  { %v12979_v23 = vpop.f32.mrb[154].mxu0 }
0x5b7a   :  { %v13050_v8 = vadd.f32 %v13049_v56, %v12979_v23  ;;  %v17084_v9 = vpop.f32.mrb[155].mxu0  ;;  %v18018_v56 = vpack.c.bf16 %v14751_v51, %v14750_v50  ;;  %v13799_v50 = vld [vmem:[%s21461_s15 + $0x10] sm:$0xff] }
0x5b7b   :  { %17992 = vmatpush3.bf16.msra.mxu0 %v17991_v63  ;;  %v13395_v9 = vld [vmem:[%s21458_s12 + $0x18] sm:$0xff] }
0x5b7c   :  { %v13054_v6 = vadd.f32 %v13053_v7, %v13050_v8  ;;  %18005 = vmatprep.subr.bf16.mxu0 %v18201_v3  ;;  %v13394_v8 = vld [vmem:[%s21458_s12 + $0x10] sm:$0xff] }
0x5b7e   :  { %v13055_v10 = vmul.f32 0.5, %v13054_v6  ;;  %v18015_v6 = vpack.c.bf16 %v13395_v9, %v13394_v8 }
0x5b80   :  { %18163 = vtanh.f32 %v13055_v10  ;;  %v14760_v10 = vld [vmem:[%s21458_s12 + $0x60] sm:$0xff] }
0x5b8a   :  { %v18164_v12 = vpop.eup %18163 }
0x5b8b   :  { %v13057_v25 = vadd.f32 1.0, %v18164_v12  ;;  %v14761_v12 = vld [vmem:[%s21458_s12 + $0x68] sm:$0xff] }
0x5b8d   :  { %v13058_v13 = vmul.f32 0.5, %v13057_v25  ;;  %v13236_v25 = vld [vmem:[%s21464_s18] sm:$0x1] }
0x5b8f   :  { %v13060_v14 = vsub.f32 1.0, %v13058_v13  ;;  %v13059_v15 = vmul.f32 %v21119_v19, %v13058_v13  ;;  %v13312_v19 = vld [vmem:[%s21460_s14 + $0x10] sm:$0xff] }
0x5b90   :  { %v17997_v34 = vpack.c.bf16 %v13313_v59, %v13312_v19  ;;  %v14757_v19 = vld [vmem:[%s21458_s12 + $0x48] sm:$0xff] }
0x5b91   :  { %v13061_v17 = vmul.f32 %v13060_v14, %v10935_v42  ;;  %v18024_v14 = vpack.c.bf16 %v14761_v12, %v14760_v10  ;;  %v18030_v59 = vpack.c.bf16 %v14757_v19, %v14756_v20  ;;  %v13801_v12 = vld [vmem:[%s21466_s20] sm:$0x1] }
0x5b92   :  { %17998 = vmatpush3.bf16.msra.mxu1 %v17997_v34  ;;  %v14758_v34 = vld [vmem:[%s21458_s12 + $0x50] sm:$0xff] }
0x5b93   :  { %v13062_v37 = vadd.f32 %v13061_v17, %v13059_v15  ;;  %17999 = vmatprep.subr.bf16.mxu1 %v18201_v3  ;;  %v18033_v53 = vpack.c.bf16 %v14759_v26, %v14758_v34 }
0x5b95   :  { %17143 = vmatmul.mubr.msk.f32.vlgmr.msra.gmra.mrb[158].mxu0 %vm88_vm1, %v13062_v37  ;;  %v14762_v37 = vld [vmem:[%s21458_s12 + $0x70] sm:$0xff] }
0x5b96   :  { %17172 = vmatprep.mubr.msk.f32.mxu0 %vm18202_vm0, %v18203_v11  ;;  %18001 = vmatpush3.bf16.msra.mxu1 %v18000_v27 }
0x5b97   :  { %18002 = vmatprep.subr.bf16.mxu1 %v18201_v3  ;;  %18007 = vmatpush3.bf16.msra.mxu0 %v18006_v35 }
0x5b98   :  { %18008 = vmatprep.subr.bf16.mxu0 %v18201_v3 }
0x5b9a   :  { %18004 = vmatpush3.bf16.msra.mxu1 %v18003_v30  ;;  %v14749_v30 = vld [vmem:[%s21464_s18 + $0x2] sm:$0x1] }
0x5b9b   :  { %18017 = vmatprep.subr.bf16.mxu1 %v18201_v3  ;;  %18010 = vmatpush3.bf16.msra.mxu0 %v18009_v16 }
0x5b9c   :  { %18011 = vmatprep.subr.bf16.mxu0 %v18201_v3 }
0x5c49   :  { %v13148_v40 = vpop.f32.mrb[156].mxu0 }
0x5c4a   :  { %v13219_v42 = vadd.f32 %v13218_v2, %v13148_v40  ;;  %v17114_v18 = vpop.f32.mrb[157].mxu0  ;;  %v14763_v2 = vld [vmem:[%s21458_s12 + $0x78] sm:$0xff] }
0x5c4b   :  { %v18027_v21 = vpack.c.bf16 %v14763_v2, %v14762_v37  ;;  %v13886_v37 = vld [vmem:[%s21467_s21] sm:$0x1] }
0x5c4c   :  { %v13223_v55 = vadd.f32 %v13222_v41, %v13219_v42 }
0x5c4e   :  { %v13224_v45 = vmul.f32 0.5, %v13223_v55 }
0x5c50   :  { %18165 = vtanh.f32 %v13224_v45 }
0x5c5a   :  { %v18166_v5 = vpop.eup %18165 }
0x5c5b   :  { %v13226_v47 = vadd.f32 1.0, %v18166_v5 }
0x5c5d   :  { %v13227_v48 = vmul.f32 0.5, %v13226_v47  ;;  %v13797_v47 = vld [vmem:[%s21461_s15] sm:$0xff] }
0x5c5f   :  { %v13229_v44 = vsub.f32 1.0, %v13227_v48  ;;  %v13228_v49 = vmul.f32 %v18176_v52, %v13227_v48  ;;  %v13798_v48 = vld [vmem:[%s21461_s15 + $0x8] sm:$0xff]  ;;  %v13878_v52 = vld [vmem:[%s21462_s16] sm:$0xff] }
0x5c61   :  { %v13230_v54 = vmul.f32 %v13229_v44, %v21219_v4  ;;  %v13392_v4 = vld [vmem:[%s21458_s12] sm:$0xff]  ;;  %v18036_v44 = vpack.c.bf16 %v13798_v48, %v13797_v47  ;;  %s18204_s12 = smov [#allocation2]  }
0x5c62   :  { %v18012_v63 = vpack.c.bf16 %v13393_v43, %v13392_v4  ;;  %s13967_s5 = sshll.u32 %s18204_s12, 4  ;;  %s13968_s5 = int_to_ptr.vmem [resolvable:$true] %s13967_s5 }
0x5c63   :  { %v13231_v57 = vadd.f32 %v13230_v54, %v13228_v49  ;;  %v13879_v49 = vld [vmem:[%s21462_s16 + $0x8] sm:$0xff]  ;;  %v13880_v54 = vld [vmem:[%s21462_s16 + $0x10] sm:$0xff]  ;;  %p18182_p1 = scmp.lt.s32.totalorder %s13968_s5, %s13968_s5 }
0x5c65   :  { %17162 = vmatmul.mubr.msk.f32.vlgmr.msra.gmra.mrb[164].mxu1 %vm4011_vm6, %v13231_v57  ;;  %v13881_v57 = vld [vmem:[%s21462_s16 + $0x18] sm:$0xff] }
0x5c66   :  { %18019 = vmatpush3.bf16.msra.mxu1 %v18018_v56  ;;  %17194 = vmatprep.mubr.msk.f32.mxu1 %vm18202_vm0, %v18203_v11  ;;  %v18042_v56 = vpack.c.bf16 %v13879_v49, %v13878_v52  ;;  %v18045_v58 = vpack.c.bf16 %v13881_v57, %v13880_v54 }
0x5c67   :  { %18020 = vmatprep.subr.bf16.mxu1 %v18201_v3 }
0x5c68   :  { %v13306_v46 = vpop.f32.mrb[158].mxu0 }
0x5c69   :  { %v17144_v0 = vpop.f32.mrb[159].mxu0  ;;  %v13307_v15 = vadd.f32 %v13306_v46, %v13236_v25 }
0x5c6a   :  { %18022 = vmatpush3.bf16.msra.mxu1 %v18021_v61  ;;  %v13883_v61 = vld [vmem:[%s21462_s16 + $0x28] sm:$0xff]  ;;  %v14766_v0 = vld [vmem:[%s21464_s18 + $0x4] sm:$0x1] }
0x5c6b   :  { %18029 = vmatprep.subr.bf16.mxu1 %v18201_v3  ;;  %v18048_v62 = vpack.c.bf16 %v13883_v61, %v13882_v60 }
0x5c6d   :  { %17195 = vmatmul.mubr.msk.f32.vlgmr.msra.gmra.mrb[166].mxu1 %vm88_vm1, %v9024_v1 }
0x5c6e   :  { %17216 = vmatprep.mubr.msk.f32.mxu1 %vm18202_vm0, %v18203_v11  ;;  %18031 = vmatpush3.bf16.msra.mxu1 %v18030_v59 }
0x5c6f   :  { %18032 = vmatprep.subr.bf16.mxu1 %v18201_v3 }
0x5c72   :  { %18034 = vmatpush3.bf16.msra.mxu1 %v18033_v53 }
0x5c73   :  { %18041 = vmatprep.subr.bf16.mxu1 %v18201_v3 }
0x5d38   :  { %v13388_v38 = vpop.f32.mrb[164].mxu1 }
0x5d39   :  { %v13389_v23 = vadd.f32 %v14741_v39, %v13388_v38  ;;  %v17163_v7 = vpop.f32.mrb[165].mxu1 }
0x5d3b   :  { %17173 = vmatmul.mubr.msk.f32.vlgmr.msra.gmra.mrb[160].mxu0 %vm88_vm1, %v13389_v23 }
0x5d3c   :  { %18013 = vmatpush3.bf16.msra.mxu0 %v18012_v63  ;;  %17183 = vmatprep.mubr.msk.f32.mxu0 %vm18202_vm0, %v18203_v11 }
0x5d3d   :  { %18014 = vmatprep.subr.bf16.mxu0 %v18201_v3 }
0x5d40   :  { %18016 = vmatpush3.bf16.msra.mxu0 %v18015_v6  ;;  %v13630_v13 = vpop.f32.mrb[166].mxu1  ;;  %v13885_v6 = vld [vmem:[%s21462_s16 + $0x38] sm:$0xff] }
0x5d41   :  { %v17196_v17 = vpop.f32.mrb[167].mxu1  ;;  %18023 = vmatprep.subr.bf16.mxu0 %v18201_v3  ;;  %v21355_v24 = vadd.f32 %v14754_v22, %v13630_v13 }
0x5d43   :  { %17184 = vmatmul.mubr.msk.f32.vlgmr.msra.gmra.mrb[162].mxu0 %vm88_vm1, %v13307_v15 }
0x5d44   :  { %18025 = vmatpush3.bf16.msra.mxu0 %v18024_v14  ;;  %17205 = vmatprep.mubr.msk.f32.mxu0 %vm18202_vm0, %v18203_v11 }
0x5d45   :  { %18026 = vmatprep.subr.bf16.mxu0 %v18201_v3 }
0x5d48   :  { %18028 = vmatpush3.bf16.msra.mxu0 %v18027_v21 }
0x5d49   :  { %18035 = vmatprep.subr.bf16.mxu0 %v18201_v3 }
0x5d4b   :  { %17206 = vmatmul.mubr.msk.f32.vlgmr.msra.gmra.mrb[164].mxu0 %vm88_vm1, %v21355_v24 }
0x5d4c   :  { %17227 = vmatprep.mubr.msk.f32.mxu0 %vm18202_vm0, %v18203_v11  ;;  %18037 = vmatpush3.bf16.msra.mxu0 %v18036_v44 }
0x5d4d   :  { %18038 = vmatprep.subr.bf16.mxu0 %v18201_v3 }
0x5e0e   :  { %v13469_v27 = vpop.f32.mrb[160].mxu0 }
0x5e0f   :  { %v17174_v28 = vpop.f32.mrb[161].mxu0 }
0x5e16   :  { %v13542_v29 = vpop.f32.mrb[162].mxu0 }
0x5e17   :  { %v13543_v31 = vadd.f32 %v13542_v29, %v13469_v27  ;;  %v17185_v32 = vpop.f32.mrb[163].mxu0 }
0x5e19   :  { %v13547_v33 = vadd.f32 %v14749_v30, %v13543_v31 }
0x5e1b   :  { %v13548_v35 = vmul.f32 0.5, %v13547_v33 }
0x5e1d   :  { %18167 = vtanh.f32 %v13548_v35 }
0x5e1e   :  { %v13711_v36 = vpop.f32.mrb[164].mxu0 }
0x5e1f   :  { %v17207_v16 = vpop.f32.mrb[165].mxu0 }
0x5e27   :  { %v18168_v40 = vpop.eup %18167 }
0x5e28   :  { %v13550_v41 = vadd.f32 1.0, %v18168_v40 }
0x5e2a   :  { %v13551_v42 = vmul.f32 0.5, %v13550_v41 }
0x5e2c   :  { %v13553_v18 = vsub.f32 1.0, %v13551_v42  ;;  %v13552_v55 = vmul.f32 %v13551_v42, %v13307_v15 }
0x5e2e   :  { %v13554_v45 = vmul.f32 %v13553_v18, %v13389_v23 }
0x5e30   :  { %v13555_v5 = vadd.f32 %v13554_v45, %v13552_v55 }
0x5e32   :  { %17217 = vmatmul.mubr.msk.f32.vlgmr.msra.gmra.mrb[168].mxu1 %vm88_vm1, %v13555_v5 }
0x5e33   :  { %17246 = vmatprep.mubr.msk.f32.mxu1 %vm18202_vm0, %v18203_v11  ;;  %v13800_v11 = vld [vmem:[%s21461_s15 + $0x18] sm:$0xff]  ;;  %18043 = vmatpush3.bf16.msra.mxu1 %v18042_v56 }
0x5e34   :  { %v18039_v51 = vpack.c.bf16 %v13800_v11, %v13799_v50  ;;  %18044 = vmatprep.subr.bf16.mxu1 %v18201_v3 }
0x5e36   :  { %18040 = vmatpush3.bf16.msra.mxu0 %v18039_v51 }
0x5e37   :  { %18046 = vmatpush3.bf16.msra.mxu1 %v18045_v58 }
0x5e38   :  { %18047 = vmatprep.subr.bf16.mxu1 %v18201_v3 }
0x5e3b   :  { %18049 = vmatpush3.bf16.msra.mxu1 %v18048_v62 }
0x5e3c   :  { %18050 = vmatprep.subr.bf16.mxu1 %v18201_v3  ;;  %v13884_v3 = vld [vmem:[%s21462_s16 + $0x30] sm:$0xff]  ;;  %s18177_s16 = scalar_lea.vmem %s13968_s5, 32 }
0x5e3d   :  { %v18051_v10 = vpack.c.bf16 %v13885_v6, %v13884_v3  ;;  %p18178_p0 = scmp.ne.s32.totalorder %s13968_s5, %s18177_s16  ;;  %p18183_p2 = scmp.lt.s32.totalorder %s18177_s16, %s18177_s16 }
0x5e3f   :  { %18052 = vmatpush3.bf16.msra.mxu1 %v18051_v10  ;;  %p18184_p3 = por %p18183_p2, %p18182_p1 }
0x5e41   :  { %p18185_p4 = pnand %p18184_p3, %p18178_p0 }
0x5f05   :  { %v13784_v46 = vpop.f32.mrb[168].mxu1 }
0x5f06   :  { %v13785_v1 = vadd.f32 %v13784_v46, %v13711_v36  ;;  %v17218_v4 = vpop.f32.mrb[169].mxu1 }
0x5f08   :  { %v13789_v43 = vadd.f32 %v14766_v0, %v13785_v1 }
0x5f0a   :  { %v13790_v39 = vmul.f32 0.5, %v13789_v43 }
0x5f0c   :  { %18169 = vtanh.f32 %v13790_v39 }
0x5f16   :  { %v18170_v38 = vpop.eup %18169 }
0x5f17   :  { %v13792_v63 = vadd.f32 1.0, %v18170_v38 }
0x5f19   :  { %v13793_v23 = vmul.f32 0.5, %v13792_v63 }
0x5f1b   :  { %v13794_v7 = vsub.f32 1.0, %v13793_v23 }
0x5f1d   :  { %v13795_v8 = vmul.f32 %v13794_v7, %v21355_v24 }
0x5f1f   :  { %v13796_v9 = vadd.f32 %v13795_v8, %v13555_v5 }
0x5f21   :  { %17228 = vmatmul.mubr.msk.f32.vlgmr.msra.gmra.mrb[166].mxu0 %vm88_vm1, %v13796_v9 }
0x5ff4   :  { %v13871_v25 = vpop.f32.mrb[166].mxu0 }
0x5ff5   :  { %v13872_v13 = vadd.f32 %v13871_v25, %v13801_v12  ;;  %v17229_v14 = vpop.f32.mrb[167].mxu0 }
0x5ff7   :  { %vm13875_vm9 = vcmp.gt.f32.partialorder %v13872_v13, 0.0  ;;  %v13876_v15 = vmul.f32 0.01, %v13872_v13 }
0x5ff9   :  { %v13877_v17 = vsel %vm13875_vm9, %v13872_v13, %v13876_v15 }
0x5ffa   :  { %17247 = vmatmul.mubr.msk.f32.vlgmr.msra.gmra.mrb[170].mxu1 %vm4011_vm6, %v13877_v17 }
0x60cd   :  { %v13956_v2 = vpop.f32.mrb[170].mxu1 }
0x60ce   :  { %v13957_v21 = vadd.f32 %v13956_v2, %v13886_v37  ;;  %v17248_v22 = vpop.f32.mrb[171].mxu1 }
0x60d0   :  { %13961 = vst [vmem:[#allocation2 + $0x1] sm:$0x1] %v13957_v21 }
0x60d1   :  { %18188 = shalt.err (!%p18185_p4)
}
0x60d2   :  { %s21495_s14 = sld [smem:[#allocation13_spill]] }
0x60d8   :  { %s18189_s24 = scalar_lea.hbm %s21495_s14, 32 }
0x60d9   :  { %p18190_p5 = scmp.ne.s32.totalorder %s21495_s14, %s18189_s24  ;;  %p18193_p6 = scmp.lt.u32.totalorder %s18189_s24, %s21495_s14 }
0x60db   :  { %p18195_p7 = pnand %p18193_p6, %p18190_p5 }
0x60dd   :  { %18198 = shalt.err (!%p18195_p7)
}
0x60de   :  { %s18205_s7 = smov 16   ;;  %s18206_s13 = smov 1  }
0x60df   :  { %13973 = dma.vmem_to_hbm [thread:$0]  %s13968_s5, 32, %s21495_s14, [#allocation3], %s18205_s7, %s18205_s7, %s18206_s13  }
0x60e0   :  { %18199 = dma.done.wait [#allocation3], 32  }
0x60e1   :  { %18200 = vsyncadd [#allocation3], 4294967264 }
0x60e2   :  { %13977 = vsyncpa [#allocation3], 1 }

</bundles_post_ra>
